<compile_context>
chip_gen: v6e
topology: v6e:2x2x1
jax: 0.10.0
libtpu: 0.0.40
codegen_flags: <defaults>
</compile_context>

<pallas_src>
import functools

import jax
import jax.numpy as jnp
from jax.experimental import pallas as pl
from jax.experimental.pallas import tpu as pltpu


# ------------------------------ Pallas kernel --------------------------------
def _resblock_kernel(x_ref, w1_ref, b1_ref, wf_ref, bf_ref, out_ref, *,
                     stride, Ho, Wo):
    """Fused ResBlock forward for one batch block.

    x_ref   : (Nb, H, W, Cin)       UNPADDED input block (NHWC, mm_dtype)
    w1_ref  : (9*Cin, Cout)         conv1 weight with bn1 scale folded in
    b1_ref  : (1, Cout)             bn1 bias (f32)
    wf_ref  : (9*Cout+Cin, Cpad)    fused [conv2*bn2 | skip] weight, lane-padded
    bf_ref  : (1, Cpad)             bn2 (+ skip-bn) bias (f32), lane-padded
    out_ref : (Nb*Ho*Wo, Cpad)      lane-dense output block (f32)
    """
    f32 = jnp.float32
    Nb, H, W, Cin = x_ref.shape
    Cout = w1_ref.shape[-1]
    Cpad = out_ref.shape[-1]
    Mb = Nb * Ho * Wo
    Hs = (Ho - 1) * stride + 1
    Ws = (Wo - 1) * stride + 1

    # ---- circular (wrap) pad of width 1, built in-VMEM (no extra HBM pass).
    x = x_ref[...]
    xp = jnp.concatenate([x[:, -1:], x, x[:, :1]], axis=1)
    xp = jnp.concatenate([xp[:, :, -1:], xp, xp[:, :, :1]], axis=2)

    def tap1(dy, dx):
        return xp[:, dy:dy + Hs:stride, dx:dx + Ws:stride, :].reshape(Mb, Cin)

    skip_tap = tap1(1, 1)            # == x[:, ::stride, ::stride, :]

    # ---- conv1 (+ folded bn1) + relu -----------------------------------------
    if Cin >= 128:
        # Per-tap K already fills the MXU: 9 accumulating dots, no col1 slab.
        r1 = jnp.zeros((Mb, Cout), f32)
        for t in range(9):
            dy, dx = divmod(t, 3)
            a = skip_tap if t == 4 else tap1(dy, dx)
            r1 = r1 + jnp.dot(a, w1_ref[pl.ds(t * Cin, Cin), :],
                              preferred_element_type=f32)
    else:
        # TODO(synk): for tiny channel counts a channel-major layout with
        #   pltpu.roll taps would avoid these sub-128 lane-shift concats.
        taps = [skip_tap if t == 4 else tap1(*divmod(t, 3)) for t in range(9)]
        col1 = jnp.concatenate(taps, axis=-1)                # (Mb, 9*Cin)
        r1 = jnp.dot(col1, w1_ref[...], preferred_element_type=f32)
    r1 = jnp.maximum(r1 + b1_ref[...], 0.0)                  # f32 bias + relu
    r1 = r1.astype(x.dtype).reshape(Nb, Ho, Wo, Cout)        # back to mm_dtype

    # ---- circular pad of the intermediate, then conv2 + bn2 + skip (+relu) ---
    r1p = jnp.concatenate([r1[:, -1:], r1, r1[:, :1]], axis=1)
    r1p = jnp.concatenate([r1p[:, :, -1:], r1p, r1p[:, :, :1]], axis=2)

    def tap2(dy, dx):
        return r1p[:, dy:dy + Ho, dx:dx + Wo, :].reshape(Mb, Cout)

    if Cout >= 128:
        out = jnp.zeros((Mb, Cpad), f32)
        for t in range(9):
            dy, dx = divmod(t, 3)
            out = out + jnp.dot(tap2(dy, dx), wf_ref[pl.ds(t * Cout, Cout), :],
                                preferred_element_type=f32)
        out = out + jnp.dot(skip_tap, wf_ref[pl.ds(9 * Cout, Cin), :],
                            preferred_element_type=f32)
    else:
        col2 = jnp.concatenate(
            [tap2(dy, dx) for dy in range(3) for dx in range(3)] + [skip_tap],
            axis=-1)                                         # (Mb, 9*Cout+Cin)
        out = jnp.dot(col2, wf_ref[...], preferred_element_type=f32)

    out = jnp.maximum(out + bf_ref[...], 0.0)                # f32 bias + relu
    out_ref[...] = out.astype(out_ref.dtype)


# --------------------------------- wrapper -----------------------------------
def _fold_bn(gamma, beta, mean, var, eps=1e-5):
    scale = gamma / jnp.sqrt(var + eps)
    bias = beta - mean * scale
    return scale[None, :].astype(jnp.float32), bias[None, :].astype(jnp.float32)


def _tpu_target():
    """Returns (#tensorcores worth splitting the batch over, vmem limit bytes)."""
    try:
        kind = jax.devices()[0].device_kind.lower()
    except Exception:
        kind = ""
    is_v7 = "7" in kind                      # e.g. "tpu7x"
    num_tc = 2 if is_v7 else 1               # v5e/v6e: single TC -> no split
    vmem_limit = (48 if is_v7 else 64) * 1024 * 1024
    return num_tc, vmem_limit


def resblock_forward(x_nchw, params, stride=1, mm_dtype=jnp.bfloat16):
    """ResBlock forward. x_nchw: (N, Cin, H, W) f32 -> (N, Cout, Ho, Wo) f32.

    mm_dtype feeds the MXU and the im2col slabs (bf16 default on every TPU
    generation — the MXU is natively bf16); accumulation and all element-wise
    math stay float32.
    """
    # NOTE: when chaining ResBlocks keep the model NHWC end-to-end and drop
    # these boundary transposes (each is a full-tensor HBM relayout by XLA).
    x = jnp.transpose(x_nchw, (0, 2, 3, 1)).astype(mm_dtype)   # NHWC, mm_dtype
    N, H, W, Cin = x.shape
    w1 = params["w1"]                                          # (3,3,Cin,Cout)
    w2 = params["w2"]                                          # (3,3,Cout,Cout)
    Cout = w1.shape[-1]
    Ho = (H - 1) // stride + 1
    Wo = (W - 1) // stride + 1
    Cpad = ((Cout + 127) // 128) * 128       # lane-dense, unmasked output store

    # Fold eval-mode BatchNorms into the conv weights / per-channel biases.
    s1, b1 = _fold_bn(params["g1"], params["be1"], params["m1"], params["v1"])
    s2, b2 = _fold_bn(params["g2"], params["be2"], params["m2"], params["v2"])
    w1_eff = (w1.reshape(9 * Cin, Cout) * s1).astype(mm_dtype)
    w2_eff = w2.reshape(9 * Cout, Cout) * s2

    if stride > 1 or Cin != Cout:            # projection skip (1x1 conv + bn)
        ssk, bsk = _fold_bn(params["gsk"], params["besk"],
                            params["msk"], params["vsk"])
        wsk_eff = params["wsk"] * ssk
        bias_f = b2 + bsk
    else:                                    # identity skip folded as eye block
        wsk_eff = jnp.eye(Cin, dtype=jnp.float32)
        bias_f = b2
    wf = jnp.concatenate([w2_eff, wsk_eff], axis=0)            # (9*Cout+Cin, Cout)
    wf = jnp.pad(wf, ((0, 0), (0, Cpad - Cout))).astype(mm_dtype)
    bf = jnp.pad(bias_f, ((0, 0), (0, Cpad - Cout)))           # (1, Cpad) f32

    # Batch split only on 2-TC chips (v7x); single-TC chips keep one long
    # MXU M stream.  Guard the (8,128) constraint on the output block.
    num_tc, vmem_limit = _tpu_target()
    NB = 1
    if num_tc >= 2 and N % num_tc == 0 and ((N // num_tc) * Ho * Wo) % 8 == 0:
        NB = num_tc
    Nb = N // NB
    Mb = Nb * Ho * Wo
    # TODO(synk): for production-sized H*W*C add a spatial (row-tile + halo)
    #   grid axis so per-block slabs stay within v7x's 64 MiB VMEM.

    kernel = functools.partial(_resblock_kernel, stride=stride, Ho=Ho, Wo=Wo)
    out2d = pl.pallas_call(
        kernel,
        out_shape=jax.ShapeDtypeStruct((N * Ho * Wo, Cpad), jnp.float32),
        grid=(NB,),
        in_specs=[
            pl.BlockSpec((Nb, H, W, Cin), lambda n: (n, 0, 0, 0)),
            pl.BlockSpec((9 * Cin, Cout), lambda n: (0, 0)),
            pl.BlockSpec((1, Cout), lambda n: (0, 0)),
            pl.BlockSpec((9 * Cout + Cin, Cpad), lambda n: (0, 0)),
            pl.BlockSpec((1, Cpad), lambda n: (0, 0)),
        ],
        out_specs=pl.BlockSpec((Mb, Cpad), lambda n: (n, 0)),
        compiler_params=pltpu.CompilerParams(
            dimension_semantics=("parallel",),
            vmem_limit_bytes=vmem_limit),
    )(x, w1_eff, b1, wf, bf)

    out = out2d[:, :Cout].reshape(N, Ho, Wo, Cout)
    return jnp.transpose(out, (0, 3, 1, 2))                    # NCHW


# ---------------- pure-JAX reference (for correctness check) -----------------
def _conv(x_nhwc, w_hwio, stride):
    return jax.lax.conv_general_dilated(
        x_nhwc, w_hwio, (stride, stride), "VALID",
        dimension_numbers=("NHWC", "HWIO", "NHWC"))


def resblock_reference(x_nchw, params, stride=1):
    x = jnp.transpose(x_nchw, (0, 2, 3, 1))
    Cin = x.shape[-1]
    Cout = params["w1"].shape[-1]
    s1, b1 = _fold_bn(params["g1"], params["be1"], params["m1"], params["v1"])
    s2, b2 = _fold_bn(params["g2"], params["be2"], params["m2"], params["v2"])

    xpad = jnp.pad(x, ((0, 0), (1, 1), (1, 1), (0, 0)), mode="wrap")
    r = _conv(xpad, params["w1"], stride)
    r = jnp.maximum(r * s1[None, None] + b1[None, None], 0.0)
    rpad = jnp.pad(r, ((0, 0), (1, 1), (1, 1), (0, 0)), mode="wrap")
    r = _conv(rpad, params["w2"], 1)
    r = r * s2[None, None] + b2[None, None]

    if stride > 1 or Cin != Cout:
        ssk, bsk = _fold_bn(params["gsk"], params["besk"],
                            params["msk"], params["vsk"])
        sk = _conv(x, params["wsk"][None, None], stride)
        sk = sk * ssk[None, None] + bsk[None, None]
    else:
        sk = x
    out = jnp.maximum(r + sk, 0.0)
    return jnp.transpose(out, (0, 3, 1, 2))


def make_params(key, cin, cout):
    ks = jax.random.split(key, 16)
    return {
        "w1": 0.1 * jax.random.normal(ks[0], (3, 3, cin, cout), jnp.float32),
        "g1": 1.0 + 0.1 * jax.random.normal(ks[1], (cout,), jnp.float32),
        "be1": 0.1 * jax.random.normal(ks[2], (cout,), jnp.float32),
        "m1": 0.1 * jax.random.normal(ks[3], (cout,), jnp.float32),
        "v1": 0.5 + jnp.abs(jax.random.normal(ks[4], (cout,), jnp.float32)) * 0.5,
        "w2": 0.1 * jax.random.normal(ks[5], (3, 3, cout, cout), jnp.float32),
        "g2": 1.0 + 0.1 * jax.random.normal(ks[6], (cout,), jnp.float32),
        "be2": 0.1 * jax.random.normal(ks[7], (cout,), jnp.float32),
        "m2": 0.1 * jax.random.normal(ks[8], (cout,), jnp.float32),
        "v2": 0.5 + jnp.abs(jax.random.normal(ks[9], (cout,), jnp.float32)) * 0.5,
        "wsk": 0.1 * jax.random.normal(ks[10], (cin, cout), jnp.float32),
        "gsk": 1.0 + 0.1 * jax.random.normal(ks[11], (cout,), jnp.float32),
        "besk": 0.1 * jax.random.normal(ks[12], (cout,), jnp.float32),
        "msk": 0.1 * jax.random.normal(ks[13], (cout,), jnp.float32),
        "vsk": 0.5 + jnp.abs(jax.random.normal(ks[14], (cout,), jnp.float32)) * 0.5,
    }


if __name__ == "__main__":
    key = jax.random.PRNGKey(0)
    kx, kp, kx2, kp2, kx3, kp3 = jax.random.split(key, 6)

    # Case 1: projection skip (Cin != Cout), bf16 MXU operands (the default).
    N, Cin, H, W, Cout = 2, 4, 16, 16, 8
    x = jax.random.normal(kx, (N, Cin, H, W), jnp.float32)
    params = make_params(kp, Cin, Cout)
    ref = jax.block_until_ready(resblock_reference(x, params, stride=1))
    out = jax.block_until_ready(resblock_forward(x, params, stride=1))
    assert out.shape == ref.shape, (out.shape, ref.shape)
    assert jnp.allclose(out, ref, atol=5e-2, rtol=5e-2), \
        float(jnp.max(jnp.abs(out - ref)))

    # Case 2: same block with f32 MXU operands (tight tolerance).
    out_f32 = jax.block_until_ready(
        resblock_forward(x, params, stride=1, mm_dtype=jnp.float32))
    assert jnp.allclose(out_f32, ref, atol=5e-4, rtol=5e-4), \
        float(jnp.max(jnp.abs(out_f32 - ref)))

    # Case 3: identity skip (Cin == Cout), bf16 default — identity block folded
    # into the fused conv2 weight.
    x2 = jax.random.normal(kx2, (N, Cout, H, W), jnp.float32)
    params2 = make_params(kp2, Cout, Cout)
    ref2 = jax.block_until_ready(resblock_reference(x2, params2, stride=1))
    out2 = jax.block_until_ready(resblock_forward(x2, params2, stride=1))
    assert jnp.allclose(out2, ref2, atol=5e-2, rtol=5e-2), \
        float(jnp.max(jnp.abs(out2 - ref2)))

    # Case 4: Cin = Cout = 128 exercises the accumulate-dot (K >= 128) path,
    # f32 operands so the comparison stays tight.
    N3, C3, H3 = 2, 128, 8
    x3 = jax.random.normal(kx3, (N3, C3, H3, H3), jnp.float32)
    params3 = make_params(kp3, C3, C3)
    ref3 = jax.block_until_ready(resblock_reference(x3, params3, stride=1))
    out3 = jax.block_until_ready(
        resblock_forward(x3, params3, stride=1, mm_dtype=jnp.float32))
    assert jnp.allclose(out3, ref3, atol=1e-2, rtol=1e-2), \
        float(jnp.max(jnp.abs(out3 - ref3)))

    print("KERNEL_OK")
</pallas_src>

<mosaic_0001>
module attributes {stable_mosaic.version = 11 : i64} {
  func.func @_resblock_kernel(%arg0: i32, %arg1: memref<2x16x16x4xbf16, #tpu.memory_space<vmem>>, %arg2: memref<36x8xbf16, #tpu.memory_space<vmem>>, %arg3: memref<1x8xf32, #tpu.memory_space<vmem>>, %arg4: memref<76x128xbf16, #tpu.memory_space<vmem>>, %arg5: memref<1x128xf32, #tpu.memory_space<vmem>>, %arg6: memref<512x128xf32, #tpu.memory_space<vmem>>) attributes {dimension_semantics = [#tpu.dimension_semantics<parallel>], iteration_bounds = array<i64: 1>, scalar_prefetch = 0 : i64, scratch_operands = 0 : i64, tpu.core_type = #tpu.core_type<tc>, window_params = [{transform_indices = @transform_0, window_bounds = array<i64: 2, 16, 16, 4>}, {pipeline_mode = #tpu.pipeline_mode<synchronous>, transform_indices = @transform_1, window_bounds = array<i64: 36, 8>}, {pipeline_mode = #tpu.pipeline_mode<synchronous>, transform_indices = @transform_2, window_bounds = array<i64: 1, 8>}, {pipeline_mode = #tpu.pipeline_mode<synchronous>, transform_indices = @transform_3, window_bounds = array<i64: 76, 128>}, {pipeline_mode = #tpu.pipeline_mode<synchronous>, transform_indices = @transform_4, window_bounds = array<i64: 1, 128>}, {transform_indices = @transform_5, window_bounds = array<i64: 512, 128>}]} {
    %c0 = arith.constant 0 : index
    %c0_0 = arith.constant 0 : index
    %c0_1 = arith.constant 0 : index
    %c0_2 = arith.constant 0 : index
    %0 = vector.load %arg1[%c0, %c0_0, %c0_1, %c0_2] : memref<2x16x16x4xbf16, #tpu.memory_space<vmem>>, vector<2x16x16x4xbf16>
    %1 = vector.extract_strided_slice %0 {offsets = [0, 15, 0, 0], sizes = [2, 1, 16, 4], strides = [1, 1, 1, 1]} : vector<2x16x16x4xbf16> to vector<2x1x16x4xbf16>
    %2 = vector.extract_strided_slice %0 {offsets = [0, 0, 0, 0], sizes = [2, 1, 16, 4], strides = [1, 1, 1, 1]} : vector<2x16x16x4xbf16> to vector<2x1x16x4xbf16>
    %3 = tpu.concatenate %1, %0, %2 in 1 : vector<2x1x16x4xbf16>, vector<2x16x16x4xbf16>, vector<2x1x16x4xbf16> -> vector<2x18x16x4xbf16>
    %4 = vector.extract_strided_slice %3 {offsets = [0, 0, 15, 0], sizes = [2, 18, 1, 4], strides = [1, 1, 1, 1]} : vector<2x18x16x4xbf16> to vector<2x18x1x4xbf16>
    %5 = vector.extract_strided_slice %3 {offsets = [0, 0, 0, 0], sizes = [2, 18, 1, 4], strides = [1, 1, 1, 1]} : vector<2x18x16x4xbf16> to vector<2x18x1x4xbf16>
    %6 = tpu.concatenate %4, %3, %5 in 2 : vector<2x18x1x4xbf16>, vector<2x18x16x4xbf16>, vector<2x18x1x4xbf16> -> vector<2x18x18x4xbf16>
    %7 = vector.extract_strided_slice %6 {offsets = [0, 1, 1, 0], sizes = [2, 16, 16, 4], strides = [1, 1, 1, 1]} : vector<2x18x18x4xbf16> to vector<2x16x16x4xbf16>
    %8 = vector.shape_cast %7 : vector<2x16x16x4xbf16> to vector<512x4xbf16>
    %9 = vector.extract_strided_slice %6 {offsets = [0, 0, 0, 0], sizes = [2, 16, 16, 4], strides = [1, 1, 1, 1]} : vector<2x18x18x4xbf16> to vector<2x16x16x4xbf16>
    %10 = vector.shape_cast %9 : vector<2x16x16x4xbf16> to vector<512x4xbf16>
    %11 = vector.extract_strided_slice %6 {offsets = [0, 0, 1, 0], sizes = [2, 16, 16, 4], strides = [1, 1, 1, 1]} : vector<2x18x18x4xbf16> to vector<2x16x16x4xbf16>
    %12 = vector.shape_cast %11 : vector<2x16x16x4xbf16> to vector<512x4xbf16>
    %13 = vector.extract_strided_slice %6 {offsets = [0, 0, 2, 0], sizes = [2, 16, 16, 4], strides = [1, 1, 1, 1]} : vector<2x18x18x4xbf16> to vector<2x16x16x4xbf16>
    %14 = vector.shape_cast %13 : vector<2x16x16x4xbf16> to vector<512x4xbf16>
    %15 = vector.extract_strided_slice %6 {offsets = [0, 1, 0, 0], sizes = [2, 16, 16, 4], strides = [1, 1, 1, 1]} : vector<2x18x18x4xbf16> to vector<2x16x16x4xbf16>
    %16 = vector.shape_cast %15 : vector<2x16x16x4xbf16> to vector<512x4xbf16>
    %17 = vector.extract_strided_slice %6 {offsets = [0, 1, 2, 0], sizes = [2, 16, 16, 4], strides = [1, 1, 1, 1]} : vector<2x18x18x4xbf16> to vector<2x16x16x4xbf16>
    %18 = vector.shape_cast %17 : vector<2x16x16x4xbf16> to vector<512x4xbf16>
    %19 = vector.extract_strided_slice %6 {offsets = [0, 2, 0, 0], sizes = [2, 16, 16, 4], strides = [1, 1, 1, 1]} : vector<2x18x18x4xbf16> to vector<2x16x16x4xbf16>
    %20 = vector.shape_cast %19 : vector<2x16x16x4xbf16> to vector<512x4xbf16>
    %21 = vector.extract_strided_slice %6 {offsets = [0, 2, 1, 0], sizes = [2, 16, 16, 4], strides = [1, 1, 1, 1]} : vector<2x18x18x4xbf16> to vector<2x16x16x4xbf16>
    %22 = vector.shape_cast %21 : vector<2x16x16x4xbf16> to vector<512x4xbf16>
    %23 = vector.extract_strided_slice %6 {offsets = [0, 2, 2, 0], sizes = [2, 16, 16, 4], strides = [1, 1, 1, 1]} : vector<2x18x18x4xbf16> to vector<2x16x16x4xbf16>
    %24 = vector.shape_cast %23 : vector<2x16x16x4xbf16> to vector<512x4xbf16>
    %25 = tpu.concatenate %10, %12, %14, %16, %8, %18, %20, %22, %24 in 1 : vector<512x4xbf16>, vector<512x4xbf16>, vector<512x4xbf16>, vector<512x4xbf16>, vector<512x4xbf16>, vector<512x4xbf16>, vector<512x4xbf16>, vector<512x4xbf16>, vector<512x4xbf16> -> vector<512x36xbf16>
    %c0_3 = arith.constant 0 : index
    %c0_4 = arith.constant 0 : index
    %26 = vector.load %arg2[%c0_3, %c0_4] : memref<36x8xbf16, #tpu.memory_space<vmem>>, vector<36x8xbf16>
    %cst = arith.constant dense<0.000000e+00> : vector<512x8xf32>
    %27 = tpu.matmul %25, %26, %cst {dimension_numbers = #tpu.dot_dimension_numbers<[1], [0], [0], [1], [0, 0, 1, 1], [], []>} : vector<512x36xbf16>, vector<36x8xbf16>, vector<512x8xf32> -> vector<512x8xf32>
    %c0_5 = arith.constant 0 : index
    %c0_6 = arith.constant 0 : index
    %28 = vector.load %arg3[%c0_5, %c0_6] : memref<1x8xf32, #tpu.memory_space<vmem>>, vector<1x8xf32>
    %29 = vector.broadcast %28 : vector<1x8xf32> to vector<512x8xf32>
    %30 = arith.addf %27, %29 : vector<512x8xf32>
    %cst_7 = arith.constant 0.000000e+00 : f32
    %31 = vector.broadcast %cst_7 : f32 to vector<512x8xf32>
    %32 = arith.maximumf %30, %31 : vector<512x8xf32>
    %33 = arith.truncf %32 : vector<512x8xf32> to vector<512x8xbf16>
    %34 = vector.shape_cast %33 : vector<512x8xbf16> to vector<2x16x16x8xbf16>
    %35 = vector.extract_strided_slice %34 {offsets = [0, 15, 0, 0], sizes = [2, 1, 16, 8], strides = [1, 1, 1, 1]} : vector<2x16x16x8xbf16> to vector<2x1x16x8xbf16>
    %36 = vector.extract_strided_slice %34 {offsets = [0, 0, 0, 0], sizes = [2, 1, 16, 8], strides = [1, 1, 1, 1]} : vector<2x16x16x8xbf16> to vector<2x1x16x8xbf16>
    %37 = tpu.concatenate %35, %34, %36 in 1 : vector<2x1x16x8xbf16>, vector<2x16x16x8xbf16>, vector<2x1x16x8xbf16> -> vector<2x18x16x8xbf16>
    %38 = vector.extract_strided_slice %37 {offsets = [0, 0, 15, 0], sizes = [2, 18, 1, 8], strides = [1, 1, 1, 1]} : vector<2x18x16x8xbf16> to vector<2x18x1x8xbf16>
    %39 = vector.extract_strided_slice %37 {offsets = [0, 0, 0, 0], sizes = [2, 18, 1, 8], strides = [1, 1, 1, 1]} : vector<2x18x16x8xbf16> to vector<2x18x1x8xbf16>
    %40 = tpu.concatenate %38, %37, %39 in 2 : vector<2x18x1x8xbf16>, vector<2x18x16x8xbf16>, vector<2x18x1x8xbf16> -> vector<2x18x18x8xbf16>
    %41 = vector.extract_strided_slice %40 {offsets = [0, 0, 0, 0], sizes = [2, 16, 16, 8], strides = [1, 1, 1, 1]} : vector<2x18x18x8xbf16> to vector<2x16x16x8xbf16>
    %42 = vector.shape_cast %41 : vector<2x16x16x8xbf16> to vector<512x8xbf16>
    %43 = vector.extract_strided_slice %40 {offsets = [0, 0, 1, 0], sizes = [2, 16, 16, 8], strides = [1, 1, 1, 1]} : vector<2x18x18x8xbf16> to vector<2x16x16x8xbf16>
    %44 = vector.shape_cast %43 : vector<2x16x16x8xbf16> to vector<512x8xbf16>
    %45 = vector.extract_strided_slice %40 {offsets = [0, 0, 2, 0], sizes = [2, 16, 16, 8], strides = [1, 1, 1, 1]} : vector<2x18x18x8xbf16> to vector<2x16x16x8xbf16>
    %46 = vector.shape_cast %45 : vector<2x16x16x8xbf16> to vector<512x8xbf16>
    %47 = vector.extract_strided_slice %40 {offsets = [0, 1, 0, 0], sizes = [2, 16, 16, 8], strides = [1, 1, 1, 1]} : vector<2x18x18x8xbf16> to vector<2x16x16x8xbf16>
    %48 = vector.shape_cast %47 : vector<2x16x16x8xbf16> to vector<512x8xbf16>
    %49 = vector.extract_strided_slice %40 {offsets = [0, 1, 1, 0], sizes = [2, 16, 16, 8], strides = [1, 1, 1, 1]} : vector<2x18x18x8xbf16> to vector<2x16x16x8xbf16>
    %50 = vector.shape_cast %49 : vector<2x16x16x8xbf16> to vector<512x8xbf16>
    %51 = vector.extract_strided_slice %40 {offsets = [0, 1, 2, 0], sizes = [2, 16, 16, 8], strides = [1, 1, 1, 1]} : vector<2x18x18x8xbf16> to vector<2x16x16x8xbf16>
    %52 = vector.shape_cast %51 : vector<2x16x16x8xbf16> to vector<512x8xbf16>
    %53 = vector.extract_strided_slice %40 {offsets = [0, 2, 0, 0], sizes = [2, 16, 16, 8], strides = [1, 1, 1, 1]} : vector<2x18x18x8xbf16> to vector<2x16x16x8xbf16>
    %54 = vector.shape_cast %53 : vector<2x16x16x8xbf16> to vector<512x8xbf16>
    %55 = vector.extract_strided_slice %40 {offsets = [0, 2, 1, 0], sizes = [2, 16, 16, 8], strides = [1, 1, 1, 1]} : vector<2x18x18x8xbf16> to vector<2x16x16x8xbf16>
    %56 = vector.shape_cast %55 : vector<2x16x16x8xbf16> to vector<512x8xbf16>
    %57 = vector.extract_strided_slice %40 {offsets = [0, 2, 2, 0], sizes = [2, 16, 16, 8], strides = [1, 1, 1, 1]} : vector<2x18x18x8xbf16> to vector<2x16x16x8xbf16>
    %58 = vector.shape_cast %57 : vector<2x16x16x8xbf16> to vector<512x8xbf16>
    %59 = tpu.concatenate %42, %44, %46, %48, %50, %52, %54, %56, %58, %8 in 1 : vector<512x8xbf16>, vector<512x8xbf16>, vector<512x8xbf16>, vector<512x8xbf16>, vector<512x8xbf16>, vector<512x8xbf16>, vector<512x8xbf16>, vector<512x8xbf16>, vector<512x8xbf16>, vector<512x4xbf16> -> vector<512x76xbf16>
    %c0_8 = arith.constant 0 : index
    %c0_9 = arith.constant 0 : index
    %60 = vector.load %arg4[%c0_8, %c0_9] : memref<76x128xbf16, #tpu.memory_space<vmem>>, vector<76x128xbf16>
    %cst_10 = arith.constant dense<0.000000e+00> : vector<512x128xf32>
    %61 = tpu.matmul %59, %60, %cst_10 {dimension_numbers = #tpu.dot_dimension_numbers<[1], [0], [0], [1], [0, 0, 1, 1], [], []>} : vector<512x76xbf16>, vector<76x128xbf16>, vector<512x128xf32> -> vector<512x128xf32>
    %c0_11 = arith.constant 0 : index
    %c0_12 = arith.constant 0 : index
    %62 = vector.load %arg5[%c0_11, %c0_12] : memref<1x128xf32, #tpu.memory_space<vmem>>, vector<1x128xf32>
    %63 = vector.broadcast %62 : vector<1x128xf32> to vector<512x128xf32>
    %64 = arith.addf %61, %63 : vector<512x128xf32>
    %cst_13 = arith.constant 0.000000e+00 : f32
    %65 = vector.broadcast %cst_13 : f32 to vector<512x128xf32>
    %66 = arith.maximumf %64, %65 : vector<512x128xf32>
    %c0_14 = arith.constant 0 : index
    %c0_15 = arith.constant 0 : index
    %67 = vector.load %arg6[%c0_14, %c0_15] : memref<512x128xf32, #tpu.memory_space<vmem>>, vector<512x128xf32>
    tpu.vector_store %arg6[%c0_14, %c0_15], %66 {strides = array<i32>} : memref<512x128xf32, #tpu.memory_space<vmem>>, vector<512x128xf32>,
    return
  }
  func.func @transform_0(%arg0: i32) -> (i32, i32, i32, i32) {
    %c0_i32 = arith.constant 0 : i32
    %c0_i32_0 = arith.constant 0 : i32
    %c0_i32_1 = arith.constant 0 : i32
    %c0_i32_2 = arith.constant 0 : i32
    return %arg0, %c0_i32, %c0_i32_0, %c0_i32_1 : i32, i32, i32, i32
  }
  func.func @transform_1(%arg0: i32) -> (i32, i32) {
    %c0_i32 = arith.constant 0 : i32
    %c0_i32_0 = arith.constant 0 : i32
    %c0_i32_1 = arith.constant 0 : i32
    return %c0_i32, %c0_i32_0 : i32, i32
  }
  func.func @transform_2(%arg0: i32) -> (i32, i32) {
    %c0_i32 = arith.constant 0 : i32
    %c0_i32_0 = arith.constant 0 : i32
    %c0_i32_1 = arith.constant 0 : i32
    return %c0_i32, %c0_i32_0 : i32, i32
  }
  func.func @transform_3(%arg0: i32) -> (i32, i32) {
    %c0_i32 = arith.constant 0 : i32
    %c0_i32_0 = arith.constant 0 : i32
    %c0_i32_1 = arith.constant 0 : i32
    return %c0_i32, %c0_i32_0 : i32, i32
  }
  func.func @transform_4(%arg0: i32) -> (i32, i32) {
    %c0_i32 = arith.constant 0 : i32
    %c0_i32_0 = arith.constant 0 : i32
    %c0_i32_1 = arith.constant 0 : i32
    return %c0_i32, %c0_i32_0 : i32, i32
  }
  func.func @transform_5(%arg0: i32) -> (i32, i32) {
    %c0_i32 = arith.constant 0 : i32
    %c0_i32_0 = arith.constant 0 : i32
    return %arg0, %c0_i32 : i32, i32
  }
}

</mosaic_0001>

<bundles_post_ra>
// kernel: tpu_custom_call.1
= control target key start
LH: loop header
LB: loop body
LE: loop exit
PB: predicated region body
PF: predicated region fallthrough
CT: control target
= control target key end

     0   :  { %vm886_vm0 = vcmask 1040384   ;;  %vm887_vm1 = vsmask.f32 256  ;;  %vm953_vm2 = vsmask.f32 7424  ;;  %v11075_v25 = vmov 0  ;;  %s10744_s0 = inlined_call_operand.vmem [shape: bf16[2,16,16,4], index: 0, kind: input, shape index: {}]   ;;  %s10745_s1 = inlined_call_operand.vmem [shape: bf16[36,8], index: 1, kind: input, shape index: {}]   ;;  %s10746_s2 = inlined_call_operand.vmem [shape: f32[1,8], index: 2, kind: input, shape index: {}]   ;;  %s10747_s3 = inlined_call_operand.vmem [shape: bf16[76,128], index: 3, kind: input, shape index: {}]   ;;  %s10748_s4 = inlined_call_operand.vmem [shape: f32[1,128], index: 4, kind: input, shape index: {}]   ;;  %s10749_s5 = inlined_call_operand.hbm [shape: f32[512,128], index: 5, kind: output, shape index: {}]  }
   0x1   :  { %v52_v0 = vld [vmem:[%s10744_s0 + $0x78] sm:$0xf]  ;;  %v53_v1 = vld [vmem:[%s10744_s0 + $0x7c] sm:$0xf]  ;;  %v24_v5 = vld [vmem:[%s10744_s0 + $0x8] sm:$0xf] }
   0x2   :  { %v5645_v2 = vcombine.low %v53_v1, %v53_v1  ;;  %v5677_v3 = vcombine.low %v52_v0, %v53_v1  ;;  %v5709_v4 = vcombine.low %v52_v0, %v52_v0  ;;  %v25_v6 = vld [vmem:[%s10744_s0 + $0xc] sm:$0xf]  ;;  %v5711_v9 = vcombine.low %v24_v5, %v24_v5  ;;  %v26_v10 = vld [vmem:[%s10744_s0 + $0x10] sm:$0xf]  ;;  %v27_v11 = vld [vmem:[%s10744_s0 + $0x14] sm:$0xf] }
   0x3   :  { %v5647_v7 = vcombine.low %v25_v6, %v25_v6  ;;  %v5679_v8 = vcombine.low %v24_v5, %v25_v6  ;;  %v5648_v22 = vcombine.low %v27_v11, %v27_v11  ;;  %v5680_v23 = vcombine.low %v26_v10, %v27_v11  ;;  %v23_v24 = vld [vmem:[%s10744_s0 + $0x4] sm:$0xf]  ;;  %vm6243_vm3 = vmand %vm886_vm0, %vm887_vm1  ;;  %v22_v42 = vld [vmem:[%s10744_s0] sm:$0xf]  ;;  %s6175_s17 = smov 4  }
   0x4   :  { %v183_v12 = vshrl.u32 %v5645_v2, 16  ;;  %v439_v13 = vshrl.u32 %v5677_v3, 16  ;;  %v442_v14 = vshll.u32 %v5677_v3, 16  ;;  %v759_v15 = vshll.u32 %v5709_v4, 16  ;;  %v31_v55 = vld [vmem:[%s10744_s0 + $0x24] sm:$0xf] }
   0x5   :  { %v191_v16 = vshrl.u32 %v5647_v7, 16  ;;  %v453_v17 = vshrl.u32 %v5679_v8, 16  ;;  %v456_v18 = vshll.u32 %v5679_v8, 16  ;;  %v765_v19 = vshll.u32 %v5711_v9, 16  ;;  %v30_v0 = vld [vmem:[%s10744_s0 + $0x20] sm:$0xf] }
   0x6   :  { %v185_v20 = vrot.slane %v183_v12, 3  ;;  %v441_v21 = vrot.slane %v439_v13, 7  ;;  %v11076_v25 = vsel %vm6243_vm3, 4294967295, %v11075_v25  ;;  %v5712_v28 = vcombine.low %v26_v10, %v26_v10  ;;  %v28_v5 = vld [vmem:[%s10744_s0 + $0x18] sm:$0xf] }
   0x7   :  { %11077 = vst [vmem:[#allocation5_spill] sm:$0xff] %v11076_v25  ;;  %v193_v26 = vrot.slane %v191_v16, 3  ;;  %v455_v27 = vrot.slane %v453_v17, 7  ;;  %v5646_v29 = vcombine.low %v23_v24, %v23_v24  ;;  %v195_v32 = vshrl.u32 %v5648_v22, 16  ;;  %v29_v10 = vld [vmem:[%s10744_s0 + $0x1c] sm:$0xf] }
   0x8   :  { %v444_v30 = vor.u32 %v442_v14, %v441_v21  ;;  %v6249_v31 = vsel %vm6243_vm3, %v441_v21, %v759_v15  ;;  %v460_v33 = vshrl.u32 %v5680_v23, 16  ;;  %v463_v37 = vshll.u32 %v5680_v23, 16 }
   0x9   :  { %v1142_v34 = vshll.u32 %v6249_v31, 16  ;;  %v458_v35 = vor.u32 %v456_v18, %v455_v27  ;;  %v6254_v36 = vsel %vm6243_vm3, %v455_v27, %v765_v19  ;;  %v197_v40 = vrot.slane %v195_v32, 3 }
   0xa   :  { %v6258_v38 = vsel %vm6243_vm3, %v185_v20, %v444_v30  ;;  %v974_v39 = vshll.u32 %v6254_v36, 16  ;;  %v462_v41 = vrot.slane %v460_v33, 7  ;;  %v768_v52 = vshll.u32 %v5712_v28, 16  ;;  %v34_v33 = vld [vmem:[%s10744_s0 + $0x30] sm:$0xf] }
   0xb   :  { %v1135_v43 = vshrl.u32 %v6258_v38, 16  ;;  %v1137_v44 = vshll.u32 %v6258_v38, 16  ;;  %v1144_v45 = vrot.slane %v1142_v34, 1  ;;  %v6268_v46 = vsel %vm6243_vm3, %v193_v26, %v458_v35 }
   0xc   :  { %v967_v47 = vshrl.u32 %v6268_v46, 16  ;;  %v969_v48 = vshll.u32 %v6268_v46, 16  ;;  %v976_v49 = vrot.slane %v974_v39, 1  ;;  %v465_v50 = vor.u32 %v463_v37, %v462_v41 }
   0xd   :  { %v1139_v51 = vrot.slane %v1137_v44, 1  ;;  %v187_v53 = vshrl.u32 %v5646_v29, 16  ;;  %v5678_v54 = vcombine.low %v22_v42, %v23_v24  ;;  %v5710_v58 = vcombine.low %v22_v42, %v22_v42 }
   0xe   :  { %v971_v56 = vrot.slane %v969_v48, 1  ;;  %v6277_v57 = vsel %vm6243_vm3, %v197_v40, %v465_v50  ;;  %v5650_v59 = vcombine.low %v31_v55, %v31_v55  ;;  %v6281_v61 = vsel %vm6243_vm3, %v462_v41, %v768_v52  ;;  %v35_v40 = vld [vmem:[%s10744_s0 + $0x34] sm:$0xf] }
   0xf   :  { %v1140_v60 = vor.u32 %v1139_v51, %v1135_v43  ;;  %v979_v62 = vshrl.u32 %v6277_v57, 16  ;;  %v981_v63 = vshll.u32 %v6277_v57, 16  ;;  %v986_v2 = vshll.u32 %v6281_v61, 16 }
  0x10   :  { %v972_v1 = vor.u32 %v971_v56, %v967_v47  ;;  %v189_v3 = vrot.slane %v187_v53, 3  ;;  %v446_v4 = vshrl.u32 %v5678_v54, 16  ;;  %v449_v8 = vshll.u32 %v5678_v54, 16 }
  0x11   :  { %v6293_v6 = vsel %vm953_vm2, %v1140_v60, %v1144_v45  ;;  %v983_v7 = vrot.slane %v981_v63, 1  ;;  %v762_v9 = vshll.u32 %v5710_v58, 16  ;;  %v988_v12 = vrot.slane %v986_v2, 1 }
  0x12   :  { %11078 = vst [vmem:[#allocation6_spill] sm:$0xff] %v6293_v6  ;;  %1499 = vrot.lane.b32.xlu0 %v6293_v6, %s6175_s17  ;;  %v6301_v11 = vsel %vm953_vm2, %v972_v1, %v976_v49  ;;  %v448_v13 = vrot.slane %v446_v4, 7  ;;  %v203_v14 = vshrl.u32 %v5650_v59, 16  ;;  %v5682_v16 = vcombine.low %v30_v0, %v31_v55  ;;  %v32_v4 = vld [vmem:[%s10744_s0 + $0x28] sm:$0xf] }
  0x13   :  { %11079 = vst [vmem:[#allocation7_spill] sm:$0xff] %v6301_v11  ;;  %1503 = vrot.lane.b32.xlu1 %v6301_v11, %s6175_s17  ;;  %v984_v15 = vor.u32 %v983_v7, %v979_v62  ;;  %v5714_v17 = vcombine.low %v30_v0, %v30_v0  ;;  %v5649_v18 = vcombine.low %v29_v10, %v29_v10 }
  0x14   :  { %v451_v19 = vor.u32 %v449_v8, %v448_v13  ;;  %v6307_v20 = vsel %vm6243_vm3, %v448_v13, %v762_v9  ;;  %v205_v21 = vrot.slane %v203_v14, 3  ;;  %v5681_v22 = vcombine.low %v28_v5, %v29_v10 }
  0x15   :  { %v6310_v23 = vsel %vm953_vm2, %v984_v15, %v988_v12  ;;  %v962_v24 = vshll.u32 %v6307_v20, 16  ;;  %v474_v26 = vshrl.u32 %v5682_v16, 16  ;;  %v477_v27 = vshll.u32 %v5682_v16, 16 }
  0x16   :  { %11080 = vst [vmem:[#allocation8_spill] sm:$0xff] %v6310_v23  ;;  %v6315_v28 = vsel %vm6243_vm3, %v189_v3, %v451_v19  ;;  %v774_v29 = vshll.u32 %v5714_v17, 16  ;;  %v199_v30 = vshrl.u32 %v5649_v18, 16  ;;  %v467_v32 = vshrl.u32 %v5681_v22, 16 }
  0x17   :  { %1505 = vrot.lane.b32.xlu1 %v6310_v23, %s6175_s17  ;;  %v955_v34 = vshrl.u32 %v6315_v28, 16  ;;  %v957_v35 = vshll.u32 %v6315_v28, 16  ;;  %v964_v37 = vrot.slane %v962_v24, 1  ;;  %v476_v39 = vrot.slane %v474_v26, 7 }
  0x18   :  { %v201_v41 = vrot.slane %v199_v30, 3  ;;  %v469_v42 = vrot.slane %v467_v32, 7  ;;  %v470_v43 = vshll.u32 %v5681_v22, 16  ;;  %v5713_v44 = vcombine.low %v28_v5, %v28_v5  ;;  %v33_v5 = vld [vmem:[%s10744_s0 + $0x2c] sm:$0xf] }
  0x19   :  { %v959_v45 = vrot.slane %v957_v35, 1  ;;  %v479_v47 = vor.u32 %v477_v27, %v476_v39  ;;  %v6329_v48 = vsel %vm6243_vm3, %v476_v39, %v774_v29  ;;  %v5652_v49 = vcombine.low %v35_v40, %v35_v40 }
  0x1a   :  { %v1010_v50 = vshll.u32 %v6329_v48, 16  ;;  %v472_v51 = vor.u32 %v470_v43, %v469_v42  ;;  %v771_v52 = vshll.u32 %v5713_v44, 16  ;;  %v5684_v53 = vcombine.low %v34_v33, %v35_v40 }
  0x1b   :  { %v960_v54 = vor.u32 %v959_v45, %v955_v34  ;;  %v6334_v55 = vsel %vm6243_vm3, %v205_v21, %v479_v47  ;;  %v211_v56 = vshrl.u32 %v5652_v49, 16  ;;  %v5716_v58 = vcombine.low %v34_v33, %v34_v33  ;;  %v39_v21 = vld [vmem:[%s10744_s0 + $0x44] sm:$0xf]  ;;  %v38_v34 = vld [vmem:[%s10744_s0 + $0x40] sm:$0xf] }
  0x1c   :  { %v1003_v59 = vshrl.u32 %v6334_v55, 16  ;;  %v1005_v60 = vshll.u32 %v6334_v55, 16  ;;  %v1012_v62 = vrot.slane %v1010_v50, 1  ;;  %v6340_v63 = vsel %vm6243_vm3, %v201_v41, %v472_v51  ;;  %v36_v45 = vld [vmem:[%s10744_s0 + $0x38] sm:$0xf] }
  0x1d   :  { %v6343_v0 = vsel %vm953_vm2, %v960_v54, %v964_v37  ;;  %v6347_v1 = vsel %vm6243_vm3, %v469_v42, %v771_v52  ;;  %v991_v2 = vshrl.u32 %v6340_v63, 16  ;;  %v993_v3 = vshll.u32 %v6340_v63, 16  ;;  %v37_v52 = vld [vmem:[%s10744_s0 + $0x3c] sm:$0xf] }
  0x1e   :  { %11081 = vst [vmem:[#allocation9_spill] sm:$0xff] %v6343_v0  ;;  %1501 = vrot.lane.b32.xlu0 %v6343_v0, %s6175_s17  ;;  %v1007_v7 = vrot.slane %v1005_v60, 1  ;;  %v998_v8 = vshll.u32 %v6347_v1, 16  ;;  %v213_v9 = vrot.slane %v211_v56, 3  ;;  %v488_v10 = vshrl.u32 %v5684_v53, 16 }
  0x1f   :  { %v995_v12 = vrot.slane %v993_v3, 1  ;;  %v491_v13 = vshll.u32 %v5684_v53, 16  ;;  %v780_v14 = vshll.u32 %v5716_v58, 16  ;;  %v5651_v15 = vcombine.low %v33_v5, %v33_v5 }
  0x20   :  { %v1008_v16 = vor.u32 %v1007_v7, %v1003_v59  ;;  %v1000_v17 = vrot.slane %v998_v8, 1  ;;  %v490_v18 = vrot.slane %v488_v10, 7  ;;  %v5683_v19 = vcombine.low %v32_v4, %v33_v5 }
  0x21   :  { %v996_v22 = vor.u32 %v995_v12, %v991_v2  ;;  %v207_v24 = vshrl.u32 %v5651_v15, 16  ;;  %v5715_v26 = vcombine.low %v32_v4, %v32_v4  ;;  %v5654_v27 = vcombine.low %v39_v21, %v39_v21 }
  0x22   :  { %v6364_v29 = vsel %vm953_vm2, %v1008_v16, %v1012_v62  ;;  %v493_v30 = vor.u32 %v491_v13, %v490_v18  ;;  %v6368_v32 = vsel %vm6243_vm3, %v490_v18, %v780_v14  ;;  %v481_v33 = vshrl.u32 %v5683_v19, 16 }
  0x23   :  { %11082 = vst [vmem:[#allocation10_spill] sm:$0xff] %v6364_v29  ;;  %1509 = vrot.lane.b32.xlu1 %v6364_v29, %s6175_s17  ;;  %v6376_v35 = vsel %vm953_vm2, %v996_v22, %v1000_v17  ;;  %v1034_v37 = vshll.u32 %v6368_v32, 16  ;;  %v209_v39 = vrot.slane %v207_v24, 3  ;;  %v484_v40 = vshll.u32 %v5683_v19, 16  ;;  %v43_v17 = vld [vmem:[%s10744_s0 + $0x54] sm:$0xf] }
  0x24   :  { %11083 = vst [vmem:[#allocation11_spill] sm:$0xff] %v6376_v35  ;;  %1507 = vrot.lane.b32.xlu0 %v6376_v35, %s6175_s17  ;;  %v6383_v41 = vsel %vm6243_vm3, %v213_v9, %v493_v30  ;;  %v483_v42 = vrot.slane %v481_v33, 7  ;;  %v777_v43 = vshll.u32 %v5715_v26, 16  ;;  %v219_v44 = vshrl.u32 %v5654_v27, 16  ;;  %v42_v22 = vld [vmem:[%s10744_s0 + $0x50] sm:$0xf] }
  0x25   :  { %v1027_v47 = vshrl.u32 %v6383_v41, 16  ;;  %v1029_v49 = vshll.u32 %v6383_v41, 16  ;;  %v1036_v50 = vrot.slane %v1034_v37, 1  ;;  %v5686_v51 = vcombine.low %v38_v34, %v39_v21 }
  0x26   :  { %v486_v53 = vor.u32 %v484_v40, %v483_v42  ;;  %v6395_v54 = vsel %vm6243_vm3, %v483_v42, %v777_v43  ;;  %v221_v56 = vrot.slane %v219_v44, 3  ;;  %v5718_v58 = vcombine.low %v38_v34, %v38_v34 }
  0x27   :  { %v1031_v59 = vrot.slane %v1029_v49, 1  ;;  %v1022_v60 = vshll.u32 %v6395_v54, 16  ;;  %v502_v62 = vshrl.u32 %v5686_v51, 16  ;;  %v505_v2 = vshll.u32 %v5686_v51, 16  ;;  %v41_v49 = vld [vmem:[%s10744_s0 + $0x4c] sm:$0xf] }
  0x28   :  { %v6400_v3 = vsel %vm6243_vm3, %v209_v39, %v486_v53  ;;  %v786_v4 = vshll.u32 %v5718_v58, 16  ;;  %v5653_v5 = vcombine.low %v37_v52, %v37_v52  ;;  %v5685_v7 = vcombine.low %v36_v45, %v37_v52 }
  0x29   :  { %v1032_v8 = vor.u32 %v1031_v59, %v1027_v47  ;;  %v1015_v9 = vshrl.u32 %v6400_v3, 16  ;;  %v1017_v10 = vshll.u32 %v6400_v3, 16  ;;  %v1024_v12 = vrot.slane %v1022_v60, 1  ;;  %v40_v47 = vld [vmem:[%s10744_s0 + $0x48] sm:$0xf] }
  0x2a   :  { %v504_v13 = vrot.slane %v502_v62, 7  ;;  %v215_v14 = vshrl.u32 %v5653_v5, 16  ;;  %v495_v15 = vshrl.u32 %v5685_v7, 16  ;;  %v498_v16 = vshll.u32 %v5685_v7, 16 }
  0x2b   :  { %v6408_v18 = vsel %vm953_vm2, %v1032_v8, %v1036_v50  ;;  %v1019_v19 = vrot.slane %v1017_v10, 1  ;;  %v5717_v21 = vcombine.low %v36_v45, %v36_v45  ;;  %v5656_v24 = vcombine.low %v43_v17, %v43_v17 }
  0x2c   :  { %11084 = vst [vmem:[#allocation12_spill] sm:$0xff] %v6408_v18  ;;  %1513 = vrot.lane.b32.xlu1 %v6408_v18, %s6175_s17  ;;  %v507_v26 = vor.u32 %v505_v2, %v504_v13  ;;  %v6417_v27 = vsel %vm6243_vm3, %v504_v13, %v786_v4  ;;  %v217_v30 = vrot.slane %v215_v14, 3  ;;  %v497_v33 = vrot.slane %v495_v15, 7 }
  0x2d   :  { %v1020_v34 = vor.u32 %v1019_v19, %v1015_v9  ;;  %v1058_v37 = vshll.u32 %v6417_v27, 16  ;;  %v783_v39 = vshll.u32 %v5717_v21, 16  ;;  %v227_v40 = vshrl.u32 %v5656_v24, 16 }
  0x2e   :  { %v6422_v42 = vsel %vm6243_vm3, %v221_v56, %v507_v26  ;;  %v500_v43 = vor.u32 %v498_v16, %v497_v33  ;;  %v5688_v44 = vcombine.low %v42_v22, %v43_v17  ;;  %v5720_v45 = vcombine.low %v42_v22, %v42_v22  ;;  %v46_v16 = vld [vmem:[%s10744_s0 + $0x60] sm:$0xf] }
  0x2f   :  { %v6431_v50 = vsel %vm953_vm2, %v1020_v34, %v1024_v12  ;;  %v1051_v51 = vshrl.u32 %v6422_v42, 16  ;;  %v1053_v52 = vshll.u32 %v6422_v42, 16  ;;  %v1060_v53 = vrot.slane %v1058_v37, 1 }
  0x30   :  { %11085 = vst [vmem:[#allocation13_spill] sm:$0xff] %v6431_v50  ;;  %1511 = vrot.lane.b32.xlu0 %v6431_v50, %s6175_s17  ;;  %v6439_v56 = vsel %vm6243_vm3, %v217_v30, %v500_v43  ;;  %v6443_v58 = vsel %vm6243_vm3, %v497_v33, %v783_v39  ;;  %v229_v59 = vrot.slane %v227_v40, 3  ;;  %v516_v60 = vshrl.u32 %v5688_v44, 16 }
  0x31   :  { %v1055_v62 = vrot.slane %v1053_v52, 1  ;;  %v1039_v2 = vshrl.u32 %v6439_v56, 16  ;;  %v1041_v4 = vshll.u32 %v6439_v56, 16  ;;  %v1046_v5 = vshll.u32 %v6443_v58, 16 }
  0x32   :  { %v518_v7 = vrot.slane %v516_v60, 7  ;;  %v519_v8 = vshll.u32 %v5688_v44, 16  ;;  %v792_v9 = vshll.u32 %v5720_v45, 16  ;;  %v5655_v10 = vcombine.low %v41_v49, %v41_v49 }
  0x33   :  { %v1056_v12 = vor.u32 %v1055_v62, %v1051_v51  ;;  %v1043_v13 = vrot.slane %v1041_v4, 1  ;;  %v1048_v14 = vrot.slane %v1046_v5, 1  ;;  %v5687_v15 = vcombine.low %v40_v47, %v41_v49 }
  0x34   :  { %v521_v17 = vor.u32 %v519_v8, %v518_v7  ;;  %v6453_v19 = vsel %vm6243_vm3, %v518_v7, %v792_v9  ;;  %v223_v21 = vshrl.u32 %v5655_v10, 16  ;;  %v5719_v22 = vcombine.low %v40_v47, %v40_v47 }
  0x35   :  { %10 = vsyncpa [#allocation3], 0  ;;  %v6456_v24 = vsel %vm953_vm2, %v1056_v12, %v1060_v53  ;;  %v1044_v26 = vor.u32 %v1043_v13, %v1039_v2  ;;  %v1082_v30 = vshll.u32 %v6453_v19, 16  ;;  %v509_v33 = vshrl.u32 %v5687_v15, 16  ;;  %v47_v34 = vld [vmem:[%s10744_s0 + $0x64] sm:$0xf] }
  0x36   :  { %11086 = vst [vmem:[#allocation14_spill] sm:$0xff] %v6456_v24  ;;  %v44_v37 = vld [vmem:[%s10744_s0 + $0x58] sm:$0xf]  ;;  %1517 = vrot.lane.b32.xlu1 %v6456_v24, %s6175_s17  ;;  %v6469_v39 = vsel %vm6243_vm3, %v229_v59, %v521_v17  ;;  %v225_v40 = vrot.slane %v223_v21, 3  ;;  %v512_v43 = vshll.u32 %v5687_v15, 16  ;;  %v789_v44 = vshll.u32 %v5719_v22, 16 }
  0x37   :  { %v45_v45 = vld [vmem:[%s10744_s0 + $0x5c] sm:$0xf]  ;;  %v6475_v47 = vsel %vm953_vm2, %v1044_v26, %v1048_v14  ;;  %v1075_v49 = vshrl.u32 %v6469_v39, 16  ;;  %v1077_v51 = vshll.u32 %v6469_v39, 16  ;;  %v1084_v52 = vrot.slane %v1082_v30, 1  ;;  %s6178_s26 = smov 16  }
  0x38   :  { %11087 = vst [vmem:[#allocation15_spill] sm:$0xff] %v6475_v47  ;;  %1515 = vrot.lane.b32.xlu0 %v6475_v47, %s6175_s17  ;;  %v511_v53 = vrot.slane %v509_v33, 7  ;;  %v5658_v59 = vcombine.low %v47_v34, %v47_v34  ;;  %v5690_v60 = vcombine.low %v46_v16, %v47_v34  ;;  %v5722_v62 = vcombine.low %v46_v16, %v46_v16  ;;  %v50_v30 = vld [vmem:[%s10744_s0 + $0x70] sm:$0xf]  ;;  %v55_v6 = vld [vmem:[%s10744_s0 + $0x84] sm:$0xf] }
  0x39   :  { %v1079_v2 = vrot.slane %v1077_v51, 1  ;;  %v5657_v4 = vcombine.low %v45_v45, %v45_v45  ;;  %v5689_v5 = vcombine.low %v44_v37, %v45_v45  ;;  %v5721_v7 = vcombine.low %v44_v37, %v44_v37  ;;  %v67_v11 = vld [vmem:[%s10744_s0 + $0xb4] sm:$0xf]  ;;  %s6179_s27 = smov 20   ;;  %s6180_s28 = smov 24  }
  0x3a   :  { %v514_v8 = vor.u32 %v512_v43, %v511_v53  ;;  %v6483_v9 = vsel %vm6243_vm3, %v511_v53, %v789_v44  ;;  %v235_v10 = vshrl.u32 %v5658_v59, 16  ;;  %v530_v12 = vshrl.u32 %v5690_v60, 16  ;;  %s6181_s10 = smov 28   ;;  %s6184_s15 = smov 48  }
  0x3b   :  { %v1080_v13 = vor.u32 %v1079_v2, %v1075_v49  ;;  %v1070_v14 = vshll.u32 %v6483_v9, 16  ;;  %v533_v15 = vshll.u32 %v5690_v60, 16  ;;  %v798_v17 = vshll.u32 %v5722_v62, 16  ;;  %s6185_s16 = smov 56   ;;  %s6186_s20 = smov 64  }
  0x3c   :  { %v6488_v21 = vsel %vm6243_vm3, %v225_v40, %v514_v8  ;;  %v237_v16 = vrot.slane %v235_v10, 3  ;;  %v532_v22 = vrot.slane %v530_v12, 7  ;;  %v231_v26 = vshrl.u32 %v5657_v4, 16  ;;  %v51_v40 = vld [vmem:[%s10744_s0 + $0x74] sm:$0xf]  ;;  %s6187_s23 = smov 72  }
  0x3d   :  { %v6494_v33 = vsel %vm953_vm2, %v1080_v13, %v1084_v52  ;;  %v1063_v34 = vshrl.u32 %v6488_v21, 16  ;;  %v1065_v37 = vshll.u32 %v6488_v21, 16  ;;  %v1072_v43 = vrot.slane %v1070_v14, 1 }
  0x3e   :  { %11088 = vst [vmem:[#allocation16_spill] sm:$0xff] %v6494_v33  ;;  %1521 = vrot.lane.b32.xlu1 %v6494_v33, %s6175_s17  ;;  %v535_v44 = vor.u32 %v533_v15, %v532_v22  ;;  %v6505_v45 = vsel %vm6243_vm3, %v532_v22, %v798_v17  ;;  %v233_v49 = vrot.slane %v231_v26, 3  ;;  %v523_v51 = vshrl.u32 %v5689_v5, 16 }
  0x3f   :  { %v1067_v52 = vrot.slane %v1065_v37, 1  ;;  %v1106_v53 = vshll.u32 %v6505_v45, 16  ;;  %v526_v59 = vshll.u32 %v5689_v5, 16  ;;  %v795_v60 = vshll.u32 %v5721_v7, 16 }
  0x40   :  { %v6510_v62 = vsel %vm6243_vm3, %v237_v16, %v535_v44  ;;  %v525_v2 = vrot.slane %v523_v51, 7  ;;  %v5660_v4 = vcombine.low %v51_v40, %v51_v40  ;;  %v5692_v8 = vcombine.low %v50_v30, %v51_v40  ;;  %v48_v16 = vld [vmem:[%s10744_s0 + $0x68] sm:$0xf]  ;;  %v49_v40 = vld [vmem:[%s10744_s0 + $0x6c] sm:$0xf] }
  0x41   :  { %v1068_v10 = vor.u32 %v1067_v52, %v1063_v34  ;;  %v1099_v12 = vshrl.u32 %v6510_v62, 16  ;;  %v1101_v13 = vshll.u32 %v6510_v62, 16  ;;  %v1108_v14 = vrot.slane %v1106_v53, 1 }
  0x42   :  { %v528_v15 = vor.u32 %v526_v59, %v525_v2  ;;  %v6516_v17 = vsel %vm6243_vm3, %v525_v2, %v795_v60  ;;  %v243_v5 = vshrl.u32 %v5660_v4, 16  ;;  %v544_v7 = vshrl.u32 %v5692_v8, 16 }
  0x43   :  { %v6522_v22 = vsel %vm953_vm2, %v1068_v10, %v1072_v43  ;;  %v1103_v26 = vrot.slane %v1101_v13, 1  ;;  %v1094_v34 = vshll.u32 %v6516_v17, 16  ;;  %v547_v37 = vshll.u32 %v5692_v8, 16 }
  0x44   :  { %11089 = vst [vmem:[#allocation17_spill] sm:$0xff] %v6522_v22  ;;  %1519 = vrot.lane.b32.xlu0 %v6522_v22, %s6175_s17  ;;  %v6532_v44 = vsel %vm6243_vm3, %v233_v49, %v528_v15  ;;  %v245_v51 = vrot.slane %v243_v5, 3  ;;  %v546_v52 = vrot.slane %v544_v7, 7  ;;  %v5724_v53 = vcombine.low %v50_v30, %v50_v30 }
  0x45   :  { %v1104_v43 = vor.u32 %v1103_v26, %v1099_v12  ;;  %v1087_v59 = vshrl.u32 %v6532_v44, 16  ;;  %v1089_v60 = vshll.u32 %v6532_v44, 16  ;;  %v1096_v2 = vrot.slane %v1094_v34, 1 }
  0x46   :  { %v549_v4 = vor.u32 %v547_v37, %v546_v52  ;;  %v804_v8 = vshll.u32 %v5724_v53, 16  ;;  %v5659_v10 = vcombine.low %v49_v40, %v49_v40  ;;  %v5691_v13 = vcombine.low %v48_v16, %v49_v40  ;;  %v54_v53 = vld [vmem:[%s10744_s0 + $0x80] sm:$0xf] }
  0x47   :  { %v6540_v49 = vsel %vm953_vm2, %v1104_v43, %v1108_v14  ;;  %v1091_v15 = vrot.slane %v1089_v60, 1  ;;  %v5723_v5 = vcombine.low %v48_v16, %v48_v16  ;;  %v5662_v30 = vcombine.low %v55_v6, %v55_v6 }
  0x48   :  { %11090 = vst [vmem:[#allocation18_spill] sm:$0xff] %v6540_v49  ;;  %1525 = vrot.lane.b32.xlu1 %v6540_v49, %s6175_s17  ;;  %v6546_v12 = vsel %vm6243_vm3, %v245_v51, %v549_v4  ;;  %v6550_v7 = vsel %vm6243_vm3, %v546_v52, %v804_v8  ;;  %v239_v26 = vshrl.u32 %v5659_v10, 16  ;;  %v537_v34 = vshrl.u32 %v5691_v13, 16 }
  0x49   :  { %11091 = vst [vmem:[#allocation19_spill] sm:$0xff] %v6546_v12  ;;  %v1092_v37 = vor.u32 %v1091_v15, %v1087_v59  ;;  %v1123_v14 = vshrl.u32 %v6546_v12, 16  ;;  %v1125_v40 = vshll.u32 %v6546_v12, 16  ;;  %v1130_v16 = vshll.u32 %v6550_v7, 16 }
  0x4a   :  { %v241_v43 = vrot.slane %v239_v26, 3  ;;  %v539_v51 = vrot.slane %v537_v34, 7  ;;  %v540_v60 = vshll.u32 %v5691_v13, 16  ;;  %v801_v4 = vshll.u32 %v5723_v5, 16  ;;  %v85_v13 = vld [vmem:[%s10744_s0 + $0xfc] sm:$0xf] }
  0x4b   :  { %v6559_v52 = vsel %vm953_vm2, %v1092_v37, %v1096_v2  ;;  %v1127_v8 = vrot.slane %v1125_v40, 1  ;;  %v1132_v10 = vrot.slane %v1130_v16, 1  ;;  %v251_v59 = vshrl.u32 %v5662_v30, 16  ;;  %v84_v30 = vld [vmem:[%s10744_s0 + $0xf8] sm:$0xf] }
  0x4c   :  { %11092 = vst [vmem:[#allocation20_spill] sm:$0xff] %v6559_v52  ;;  %1523 = vrot.lane.b32.xlu0 %v6559_v52, %s6175_s17  ;;  %v542_v15 = vor.u32 %v540_v60, %v539_v51  ;;  %v6565_v49 = vsel %vm6243_vm3, %v539_v51, %v801_v4  ;;  %v5694_v33 = vcombine.low %v54_v53, %v55_v6  ;;  %v58_v37 = vld [vmem:[%s10744_s0 + $0x90] sm:$0xf]  ;;  %vm1402_vm4 = vcmask 1046528  }
  0x4d   :  { %v5726_v24 = vcombine.low %v54_v53, %v54_v53  ;;  %v1128_v5 = vor.u32 %v1127_v8, %v1123_v14  ;;  %v1118_v2 = vshll.u32 %v6565_v49, 16  ;;  %v253_v26 = vrot.slane %v251_v59, 3  ;;  %v59_v14 = vld [vmem:[%s10744_s0 + $0x94] sm:$0xf] }
  0x4e   :  { %v5661_v34 = vcombine.low %v85_v13, %v85_v13  ;;  %v6579_v6 = vsel %vm6243_vm3, %v241_v43, %v542_v15  ;;  %v558_v40 = vshrl.u32 %v5694_v33, 16  ;;  %v561_v16 = vshll.u32 %v5694_v33, 16 }
  0x4f   :  { %v810_v53 = vshll.u32 %v5726_v24, 16  ;;  %v6585_v51 = vsel %vm953_vm2, %v1128_v5, %v1132_v10  ;;  %v1111_v60 = vshrl.u32 %v6579_v6, 16  ;;  %v1113_v4 = vshll.u32 %v6579_v6, 16 }
  0x50   :  { %11093 = vst [vmem:[#allocation21_spill] sm:$0xff] %v6585_v51  ;;  %v1120_v8 = vrot.slane %v1118_v2, 1  ;;  %1529 = vrot.lane.b32.xlu1 %v6585_v51, %s6175_s17  ;;  %v560_v43 = vrot.slane %v558_v40, 7  ;;  %v247_v59 = vshrl.u32 %v5661_v34, 16  ;;  %v5693_v15 = vcombine.low %v84_v30, %v85_v13 }
  0x51   :  { %v5725_v33 = vcombine.low %v84_v30, %v84_v30  ;;  %v1115_v24 = vrot.slane %v1113_v4, 1  ;;  %v5664_v52 = vcombine.low %v59_v14, %v59_v14  ;;  %v5696_v18 = vcombine.low %v58_v37, %v59_v14 }
  0x52   :  { %v5728_v22 = vcombine.low %v58_v37, %v58_v37  ;;  %v563_v29 = vor.u32 %v561_v16, %v560_v43  ;;  %v6593_v10 = vsel %vm6243_vm3, %v560_v43, %v810_v53  ;;  %v249_v5 = vrot.slane %v247_v59, 3  ;;  %v56_v37 = vld [vmem:[%s10744_s0 + $0x88] sm:$0xf] }
  0x53   :  { %v551_v47 = vshrl.u32 %v5693_v15, 16  ;;  %v1116_v23 = vor.u32 %v1115_v24, %v1111_v60  ;;  %v1154_v2 = vshll.u32 %v6593_v10, 16  ;;  %v554_v50 = vshll.u32 %v5693_v15, 16 }
  0x54   :  { %v807_v51 = vshll.u32 %v5725_v33, 16  ;;  %v6598_v13 = vsel %vm6243_vm3, %v253_v26, %v563_v29  ;;  %v259_v34 = vshrl.u32 %v5664_v52, 16  ;;  %v572_v40 = vshrl.u32 %v5696_v18, 16  ;;  %v57_v29 = vld [vmem:[%s10744_s0 + $0x8c] sm:$0xf] }
  0x55   :  { %11094 = vst [vmem:[#allocation22_spill] sm:$0xff] %v6598_v13  ;;  %v553_v30 = vrot.slane %v551_v47, 7  ;;  %v6604_v16 = vsel %vm953_vm2, %v1116_v23, %v1120_v8  ;;  %v1147_v53 = vshrl.u32 %v6598_v13, 16  ;;  %v1149_v14 = vshll.u32 %v6598_v13, 16 }
  0x56   :  { %11095 = vst [vmem:[#allocation23_spill] sm:$0xff] %v6604_v16  ;;  %v1156_v60 = vrot.slane %v1154_v2, 1  ;;  %1527 = vrot.lane.b32.xlu0 %v6604_v16, %s6175_s17  ;;  %v261_v26 = vrot.slane %v259_v34, 3  ;;  %v574_v23 = vrot.slane %v572_v40, 7  ;;  %v575_v43 = vshll.u32 %v5696_v18, 16 }
  0x57   :  { %v556_v47 = vor.u32 %v554_v50, %v553_v30  ;;  %v6615_v52 = vsel %vm6243_vm3, %v553_v30, %v807_v51  ;;  %v1151_v4 = vrot.slane %v1149_v14, 1  ;;  %v816_v59 = vshll.u32 %v5728_v22, 16 }
  0x58   :  { %11096 = vst [vmem:[#allocation24_spill] sm:$0xff] %v6615_v52  ;;  %v1334_v8 = vshll.u32 %v6615_v52, 16  ;;  %v5663_v33 = vcombine.low %v57_v29, %v57_v29  ;;  %v5695_v24 = vcombine.low %v56_v37, %v57_v29  ;;  %v5727_v2 = vcombine.low %v56_v37, %v56_v37 }
  0x59   :  { %v6620_v15 = vsel %vm6243_vm3, %v249_v5, %v556_v47  ;;  %v1152_v16 = vor.u32 %v1151_v4, %v1147_v53  ;;  %v577_v34 = vor.u32 %v575_v43, %v574_v23  ;;  %v6626_v40 = vsel %vm6243_vm3, %v574_v23, %v816_v59  ;;  %v62_v5 = vld [vmem:[%s10744_s0 + $0xa0] sm:$0xf]  ;;  %v63_v47 = vld [vmem:[%s10744_s0 + $0xa4] sm:$0xf] }
  0x5a   :  { %11097 = vst [vmem:[#allocation25_spill] sm:$0xff] %v6620_v15  ;;  %v1327_v50 = vshrl.u32 %v6620_v15, 16  ;;  %v1329_v51 = vshll.u32 %v6620_v15, 16  ;;  %v1336_v30 = vrot.slane %v1334_v8, 1  ;;  %11098 = vst [vmem:[#allocation26_spill] sm:$0xff] %v6626_v40  ;;  %v255_v18 = vshrl.u32 %v5663_v33, 16 }
  0x5b   :  { %v565_v22 = vshrl.u32 %v5695_v24, 16  ;;  %v6632_v14 = vsel %vm953_vm2, %v1152_v16, %v1156_v60  ;;  %v1178_v53 = vshll.u32 %v6626_v40, 16  ;;  %v568_v29 = vshll.u32 %v5695_v24, 16 }
  0x5c   :  { %11099 = vst [vmem:[#allocation27_spill] sm:$0xff] %v6632_v14  ;;  %v1331_v37 = vrot.slane %v1329_v51, 1  ;;  %1533 = vrot.lane.b32.xlu1 %v6632_v14, %s6175_s17  ;;  %v6642_v23 = vsel %vm6243_vm3, %v261_v26, %v577_v34  ;;  %v257_v4 = vrot.slane %v255_v18, 3  ;;  %v813_v43 = vshll.u32 %v5727_v2, 16 }
  0x5d   :  { %11100 = vst [vmem:[#allocation28_spill] sm:$0xff] %v6642_v23  ;;  %v567_v8 = vrot.slane %v565_v22, 7  ;;  %v1171_v60 = vshrl.u32 %v6642_v23, 16  ;;  %v1173_v59 = vshll.u32 %v6642_v23, 16  ;;  %v1180_v33 = vrot.slane %v1178_v53, 1 }
  0x5e   :  { %v1332_v16 = vor.u32 %v1331_v37, %v1327_v50  ;;  %v5666_v0 = vcombine.low %v63_v47, %v63_v47  ;;  %v5698_v14 = vcombine.low %v62_v5, %v63_v47  ;;  %v5730_v2 = vcombine.low %v62_v5, %v62_v5  ;;  %v60_v50 = vld [vmem:[%s10744_s0 + $0x98] sm:$0xf] }
  0x5f   :  { %v570_v24 = vor.u32 %v568_v29, %v567_v8  ;;  %v6648_v51 = vsel %vm6243_vm3, %v567_v8, %v813_v43  ;;  %v1175_v26 = vrot.slane %v1173_v59, 1  ;;  %vm2623_vm5 = vcmask 1041408  }
  0x60   :  { %11101 = vst [vmem:[#allocation29_spill] sm:$0xff] %v6648_v51  ;;  %v6651_v35 = vsel %vm953_vm2, %v1332_v16, %v1336_v30  ;;  %v1166_v34 = vshll.u32 %v6648_v51, 16  ;;  %v267_v22 = vshrl.u32 %v5666_v0, 16  ;;  %v586_v37 = vshrl.u32 %v5698_v14, 16  ;;  %v61_v30 = vld [vmem:[%s10744_s0 + $0x9c] sm:$0xf] }
  0x61   :  { %11102 = vst [vmem:[#allocation30_spill] sm:$0xff] %v6651_v35  ;;  %1531 = vrot.lane.b32.xlu0 %v6651_v35, %s6175_s17  ;;  %v6661_v18 = vsel %vm6243_vm3, %v257_v4, %v570_v24  ;;  %v589_v53 = vshll.u32 %v5698_v14, 16  ;;  %v1176_v29 = vor.u32 %v1175_v26, %v1171_v60  ;;  %v822_v59 = vshll.u32 %v5730_v2, 16 }
  0x62   :  { %11103 = vst [vmem:[#allocation31_spill] sm:$0xff] %v6661_v18  ;;  %v1159_v5 = vshrl.u32 %v6661_v18, 16  ;;  %v1161_v47 = vshll.u32 %v6661_v18, 16  ;;  %v1168_v8 = vrot.slane %v1166_v34, 1  ;;  %v269_v43 = vrot.slane %v267_v22, 3 }
  0x63   :  { %v588_v16 = vrot.slane %v586_v37, 7  ;;  %v5665_v35 = vcombine.low %v61_v30, %v61_v30  ;;  %v6669_v4 = vsel %vm953_vm2, %v1176_v29, %v1180_v33  ;;  %v5697_v24 = vcombine.low %v60_v50, %v61_v30  ;;  %v66_v33 = vld [vmem:[%s10744_s0 + $0xb0] sm:$0xf]  ;;  %v64_v29 = vld [vmem:[%s10744_s0 + $0xa8] sm:$0xf] }
  0x64   :  { %11104 = vst [vmem:[#allocation32_spill] sm:$0xff] %v6669_v4  ;;  %v1163_v0 = vrot.slane %v1161_v47, 1  ;;  %v5729_v14 = vcombine.low %v60_v50, %v60_v50  ;;  %1537 = vrot.lane.b32.xlu1 %v6669_v4, %s6175_s17  ;;  %v5668_v2 = vcombine.low %v67_v11, %v67_v11  ;;  %vm2011_vm6 = vcmask 31744  }
  0x65   :  { %v591_v60 = vor.u32 %v589_v53, %v588_v16  ;;  %v6678_v26 = vsel %vm6243_vm3, %v588_v16, %v822_v59  ;;  %v263_v34 = vshrl.u32 %v5665_v35, 16  ;;  %v579_v37 = vshrl.u32 %v5697_v24, 16  ;;  %v65_v59 = vld [vmem:[%s10744_s0 + $0xac] sm:$0xf] }
  0x66   :  { %11105 = vst [vmem:[#allocation33_spill] sm:$0xff] %v6678_v26  ;;  %v1164_v22 = vor.u32 %v1163_v0, %v1159_v5  ;;  %v1202_v50 = vshll.u32 %v6678_v26, 16  ;;  %v582_v30 = vshll.u32 %v5697_v24, 16  ;;  %v819_v35 = vshll.u32 %v5729_v14, 16 }
  0x67   :  { %v6689_v53 = vsel %vm6243_vm3, %v269_v43, %v591_v60  ;;  %v265_v47 = vrot.slane %v263_v34, 3  ;;  %v275_v16 = vshrl.u32 %v5668_v2, 16  ;;  %v581_v43 = vrot.slane %v579_v37, 7 }
  0x68   :  { %11106 = vst [vmem:[#allocation34_spill] sm:$0xff] %v6689_v53  ;;  %v6695_v5 = vsel %vm953_vm2, %v1164_v22, %v1168_v8  ;;  %v1195_v0 = vshrl.u32 %v6689_v53, 16  ;;  %v1197_v24 = vshll.u32 %v6689_v53, 16  ;;  %v1204_v4 = vrot.slane %v1202_v50, 1 }
  0x69   :  { %11107 = vst [vmem:[#allocation35_spill] sm:$0xff] %v6695_v5  ;;  %1535 = vrot.lane.b32.xlu0 %v6695_v5, %s6175_s17  ;;  %v277_v60 = vrot.slane %v275_v16, 3  ;;  %v5700_v34 = vcombine.low %v66_v33, %v67_v11  ;;  %v5732_v14 = vcombine.low %v66_v33, %v66_v33  ;;  %v5667_v51 = vcombine.low %v65_v59, %v65_v59 }
  0x6a   :  { %v1199_v2 = vrot.slane %v1197_v24, 1  ;;  %v5699_v18 = vcombine.low %v64_v29, %v65_v59  ;;  %v5731_v26 = vcombine.low %v64_v29, %v64_v29  ;;  %v584_v52 = vor.u32 %v582_v30, %v581_v43  ;;  %v70_v30 = vld [vmem:[%s10744_s0 + $0xc0] sm:$0xf] }
  0x6b   :  { %v6703_v8 = vsel %vm6243_vm3, %v581_v43, %v819_v35  ;;  %v600_v22 = vshrl.u32 %v5700_v34, 16  ;;  %v603_v15 = vshll.u32 %v5700_v34, 16  ;;  %v828_v40 = vshll.u32 %v5732_v14, 16 }
  0x6c   :  { %11108 = vst [vmem:[#allocation36_spill] sm:$0xff] %v6703_v8  ;;  %v1200_v53 = vor.u32 %v1199_v2, %v1195_v0  ;;  %v1190_v50 = vshll.u32 %v6703_v8, 16  ;;  %v271_v5 = vshrl.u32 %v5667_v51, 16  ;;  %v6708_v11 = vsel %vm6243_vm3, %v265_v47, %v584_v52  ;;  %v71_v52 = vld [vmem:[%s10744_s0 + $0xc4] sm:$0xf] }
  0x6d   :  { %11109 = vst [vmem:[#allocation37_spill] sm:$0xff] %v6708_v11  ;;  %v602_v33 = vrot.slane %v600_v22, 7  ;;  %v593_v37 = vshrl.u32 %v5699_v18, 16  ;;  %v596_v16 = vshll.u32 %v5699_v18, 16  ;;  %v1183_v35 = vshrl.u32 %v6708_v11, 16 }
  0x6e   :  { %v6714_v29 = vsel %vm953_vm2, %v1200_v53, %v1204_v4  ;;  %v1185_v59 = vshll.u32 %v6708_v11, 16  ;;  %v1192_v0 = vrot.slane %v1190_v50, 1  ;;  %v273_v47 = vrot.slane %v271_v5, 3 }
  0x6f   :  { %11110 = vst [vmem:[#allocation38_spill] sm:$0xff] %v6714_v29  ;;  %1541 = vrot.lane.b32.xlu1 %v6714_v29, %s6175_s17  ;;  %v605_v51 = vor.u32 %v603_v15, %v602_v33  ;;  %v6725_v18 = vsel %vm6243_vm3, %v602_v33, %v828_v40  ;;  %v595_v4 = vrot.slane %v593_v37, 7  ;;  %v825_v43 = vshll.u32 %v5731_v26, 16 }
  0x70   :  { %11111 = vst [vmem:[#allocation39_spill] sm:$0xff] %v6725_v18  ;;  %v1187_v53 = vrot.slane %v1185_v59, 1  ;;  %v1226_v24 = vshll.u32 %v6725_v18, 16  ;;  %v5670_v34 = vcombine.low %v71_v52, %v71_v52  ;;  %v5702_v22 = vcombine.low %v70_v30, %v71_v52 }
  0x71   :  { %v6730_v14 = vsel %vm6243_vm3, %v277_v60, %v605_v51  ;;  %v598_v2 = vor.u32 %v596_v16, %v595_v4  ;;  %v5734_v50 = vcombine.low %v70_v30, %v70_v30  ;;  %v6740_v26 = vsel %vm6243_vm3, %v595_v4, %v825_v43  ;;  %v68_v16 = vld [vmem:[%s10744_s0 + $0xb8] sm:$0xf]  ;;  %v69_v51 = vld [vmem:[%s10744_s0 + $0xbc] sm:$0xf] }
  0x72   :  { %11112 = vst [vmem:[#allocation40_spill] sm:$0xff] %v6730_v14  ;;  %v1188_v29 = vor.u32 %v1187_v53, %v1183_v35  ;;  %v1219_v15 = vshrl.u32 %v6730_v14, 16  ;;  %v1221_v40 = vshll.u32 %v6730_v14, 16  ;;  %v1228_v33 = vrot.slane %v1226_v24, 1  ;;  %11114 = vst [vmem:[#allocation42_spill] sm:$0xff] %v6740_v26 }
  0x73   :  { %v6736_v5 = vsel %vm6243_vm3, %v273_v47, %v598_v2  ;;  %v283_v37 = vshrl.u32 %v5670_v34, 16  ;;  %v614_v60 = vshrl.u32 %v5702_v22, 16  ;;  %v1214_v47 = vshll.u32 %v6740_v26, 16 }
  0x74   :  { %11113 = vst [vmem:[#allocation41_spill] sm:$0xff] %v6736_v5  ;;  %v6746_v30 = vsel %vm953_vm2, %v1188_v29, %v1192_v0  ;;  %v1223_v35 = vrot.slane %v1221_v40, 1  ;;  %v1207_v59 = vshrl.u32 %v6736_v5, 16  ;;  %v1209_v52 = vshll.u32 %v6736_v5, 16 }
  0x75   :  { %11115 = vst [vmem:[#allocation43_spill] sm:$0xff] %v6746_v30  ;;  %1539 = vrot.lane.b32.xlu0 %v6746_v30, %s6175_s17  ;;  %v285_v4 = vrot.slane %v283_v37, 3  ;;  %v616_v53 = vrot.slane %v614_v60, 7  ;;  %v617_v24 = vshll.u32 %v5702_v22, 16  ;;  %v834_v0 = vshll.u32 %v5734_v50, 16 }
  0x76   :  { %v1224_v43 = vor.u32 %v1223_v35, %v1219_v15  ;;  %v1211_v29 = vrot.slane %v1209_v52, 1  ;;  %v5669_v34 = vcombine.low %v69_v51, %v69_v51  ;;  %v1216_v2 = vrot.slane %v1214_v47, 1  ;;  %v74_v22 = vld [vmem:[%s10744_s0 + $0xd0] sm:$0xf]  ;;  %v75_v50 = vld [vmem:[%s10744_s0 + $0xd4] sm:$0xf] }
  0x77   :  { %v619_v40 = vor.u32 %v617_v24, %v616_v53  ;;  %v5701_v8 = vcombine.low %v68_v16, %v69_v51  ;;  %v5733_v5 = vcombine.low %v68_v16, %v68_v16  ;;  %v6761_v30 = vsel %vm6243_vm3, %v616_v53, %v834_v0  ;;  %v72_v16 = vld [vmem:[%s10744_s0 + $0xc8] sm:$0xf]  ;;  %v73_v47 = vld [vmem:[%s10744_s0 + $0xcc] sm:$0xf] }
  0x78   :  { %v6757_v11 = vsel %vm953_vm2, %v1224_v43, %v1228_v33  ;;  %v1212_v18 = vor.u32 %v1211_v29, %v1207_v59  ;;  %11117 = vst [vmem:[#allocation45_spill] sm:$0xff] %v6761_v30  ;;  %v279_v26 = vshrl.u32 %v5669_v34, 16  ;;  %v1250_v33 = vshll.u32 %v6761_v30, 16 }
  0x79   :  { %11116 = vst [vmem:[#allocation44_spill] sm:$0xff] %v6757_v11  ;;  %1545 = vrot.lane.b32.xlu1 %v6757_v11, %s6175_s17  ;;  %v6773_v15 = vsel %vm6243_vm3, %v285_v4, %v619_v40  ;;  %v607_v37 = vshrl.u32 %v5701_v8, 16  ;;  %v610_v60 = vshll.u32 %v5701_v8, 16  ;;  %v831_v53 = vshll.u32 %v5733_v5, 16  ;;  %v78_v5 = vld [vmem:[%s10744_s0 + $0xe0] sm:$0xf] }
  0x7a   :  { %11118 = vst [vmem:[#allocation46_spill] sm:$0xff] %v6773_v15  ;;  %v6780_v35 = vsel %vm953_vm2, %v1212_v18, %v1216_v2  ;;  %v1243_v59 = vshrl.u32 %v6773_v15, 16  ;;  %v1245_v52 = vshll.u32 %v6773_v15, 16  ;;  %v281_v51 = vrot.slane %v279_v26, 3 }
  0x7b   :  { %11119 = vst [vmem:[#allocation47_spill] sm:$0xff] %v6780_v35  ;;  %1543 = vrot.lane.b32.xlu0 %v6780_v35, %s6175_s17  ;;  %v1252_v8 = vrot.slane %v1250_v33, 1  ;;  %v609_v4 = vrot.slane %v607_v37, 7  ;;  %v5672_v24 = vcombine.low %v75_v50, %v75_v50  ;;  %v5704_v29 = vcombine.low %v74_v22, %v75_v50 }
  0x7c   :  { %v1247_v43 = vrot.slane %v1245_v52, 1  ;;  %v5736_v18 = vcombine.low %v74_v22, %v74_v22  ;;  %v5671_v0 = vcombine.low %v73_v47, %v73_v47  ;;  %v5703_v40 = vcombine.low %v72_v16, %v73_v47 }
  0x7d   :  { %v612_v34 = vor.u32 %v610_v60, %v609_v4  ;;  %v6791_v2 = vsel %vm6243_vm3, %v609_v4, %v831_v53  ;;  %v291_v26 = vshrl.u32 %v5672_v24, 16  ;;  %v628_v15 = vshrl.u32 %v5704_v29, 16  ;;  %v79_v60 = vld [vmem:[%s10744_s0 + $0xe4] sm:$0xf] }
  0x7e   :  { %11120 = vst [vmem:[#allocation48_spill] sm:$0xff] %v6791_v2  ;;  %v1248_v11 = vor.u32 %v1247_v43, %v1243_v59  ;;  %v1238_v30 = vshll.u32 %v6791_v2, 16  ;;  %v631_v35 = vshll.u32 %v5704_v29, 16  ;;  %v840_v33 = vshll.u32 %v5736_v18, 16 }
  0x7f   :  { %v6799_v22 = vsel %vm6243_vm3, %v281_v51, %v612_v34  ;;  %v293_v50 = vrot.slane %v291_v26, 3  ;;  %v287_v37 = vshrl.u32 %v5671_v0, 16  ;;  %v630_v51 = vrot.slane %v628_v15, 7 }
  0x80   :  { %11121 = vst [vmem:[#allocation49_spill] sm:$0xff] %v6799_v22  ;;  %v6805_v59 = vsel %vm953_vm2, %v1248_v11, %v1252_v8  ;;  %v1231_v52 = vshrl.u32 %v6799_v22, 16  ;;  %v1233_v47 = vshll.u32 %v6799_v22, 16  ;;  %v1240_v4 = vrot.slane %v1238_v30, 1 }
  0x81   :  { %11122 = vst [vmem:[#allocation50_spill] sm:$0xff] %v6805_v59  ;;  %1549 = vrot.lane.b32.xlu1 %v6805_v59, %s6175_s17  ;;  %v289_v53 = vrot.slane %v287_v37, 3  ;;  %v621_v24 = vshrl.u32 %v5703_v40, 16  ;;  %v624_v43 = vshll.u32 %v5703_v40, 16  ;;  %v5735_v18 = vcombine.low %v72_v16, %v72_v16 }
  0x82   :  { %v1235_v29 = vrot.slane %v1233_v47, 1  ;;  %v5674_v0 = vcombine.low %v79_v60, %v79_v60  ;;  %v5706_v34 = vcombine.low %v78_v5, %v79_v60  ;;  %v633_v26 = vor.u32 %v631_v35, %v630_v51  ;;  %v76_v35 = vld [vmem:[%s10744_s0 + $0xd8] sm:$0xf] }
  0x83   :  { %v6813_v11 = vsel %vm6243_vm3, %v630_v51, %v840_v33  ;;  %v623_v8 = vrot.slane %v621_v24, 7  ;;  %v5738_v2 = vcombine.low %v78_v5, %v78_v5  ;;  %v837_v14 = vshll.u32 %v5735_v18, 16 }
  0x84   :  { %11123 = vst [vmem:[#allocation51_spill] sm:$0xff] %v6813_v11  ;;  %v1236_v22 = vor.u32 %v1235_v29, %v1231_v52  ;;  %v1274_v30 = vshll.u32 %v6813_v11, 16  ;;  %v299_v59 = vshrl.u32 %v5674_v0, 16  ;;  %v6818_v15 = vsel %vm6243_vm3, %v293_v50, %v633_v26  ;;  %v77_v50 = vld [vmem:[%s10744_s0 + $0xdc] sm:$0xf] }
  0x85   :  { %11124 = vst [vmem:[#allocation52_spill] sm:$0xff] %v6818_v15  ;;  %v626_v40 = vor.u32 %v624_v43, %v623_v8  ;;  %v642_v16 = vshrl.u32 %v5706_v34, 16  ;;  %v645_v37 = vshll.u32 %v5706_v34, 16  ;;  %v1267_v5 = vshrl.u32 %v6818_v15, 16 }
  0x86   :  { %v6824_v33 = vsel %vm953_vm2, %v1236_v22, %v1240_v4  ;;  %v1269_v60 = vshll.u32 %v6818_v15, 16  ;;  %v1276_v52 = vrot.slane %v1274_v30, 1  ;;  %v6839_v22 = vsel %vm6243_vm3, %v623_v8, %v837_v14 }
  0x87   :  { %11125 = vst [vmem:[#allocation53_spill] sm:$0xff] %v6824_v33  ;;  %1547 = vrot.lane.b32.xlu0 %v6824_v33, %s6175_s17  ;;  %v6835_v47 = vsel %vm6243_vm3, %v289_v53, %v626_v40  ;;  %11127 = vst [vmem:[#allocation55_spill] sm:$0xff] %v6839_v22  ;;  %v301_v4 = vrot.slane %v299_v59, 3  ;;  %v644_v51 = vrot.slane %v642_v16, 7  ;;  %v1262_v18 = vshll.u32 %v6839_v22, 16 }
  0x88   :  { %11126 = vst [vmem:[#allocation54_spill] sm:$0xff] %v6835_v47  ;;  %v1271_v24 = vrot.slane %v1269_v60, 1  ;;  %v1255_v43 = vshrl.u32 %v6835_v47, 16  ;;  %v1257_v29 = vshll.u32 %v6835_v47, 16  ;;  %v846_v34 = vshll.u32 %v5738_v2, 16 }
  0x89   :  { %v647_v0 = vor.u32 %v645_v37, %v644_v51  ;;  %v5673_v26 = vcombine.low %v77_v50, %v77_v50  ;;  %v5705_v30 = vcombine.low %v76_v35, %v77_v50  ;;  %v1264_v40 = vrot.slane %v1262_v18, 1  ;;  %v83_v50 = vld [vmem:[%s10744_s0 + $0xf4] sm:$0xf] }
  0x8a   :  { %v1272_v33 = vor.u32 %v1271_v24, %v1267_v5  ;;  %v1259_v53 = vrot.slane %v1257_v29, 1  ;;  %v5737_v11 = vcombine.low %v76_v35, %v76_v35  ;;  %v6850_v59 = vsel %vm6243_vm3, %v644_v51, %v846_v34  ;;  %v82_v35 = vld [vmem:[%s10744_s0 + $0xf0] sm:$0xf] }
  0x8b   :  { %v6846_v14 = vsel %vm6243_vm3, %v301_v4, %v647_v0  ;;  %v295_v8 = vshrl.u32 %v5673_v26, 16  ;;  %v635_v16 = vshrl.u32 %v5705_v30, 16  ;;  %v1298_v4 = vshll.u32 %v6850_v59, 16 }
  0x8c   :  { %11128 = vst [vmem:[#allocation56_spill] sm:$0xff] %v6846_v14  ;;  %v6853_v60 = vsel %vm953_vm2, %v1272_v33, %v1276_v52  ;;  %v1260_v2 = vor.u32 %v1259_v53, %v1255_v43  ;;  %v1291_v37 = vshrl.u32 %v6846_v14, 16  ;;  %v1293_v5 = vshll.u32 %v6846_v14, 16 }
  0x8d   :  { %11129 = vst [vmem:[#allocation57_spill] sm:$0xff] %v6853_v60  ;;  %1553 = vrot.lane.b32.xlu1 %v6853_v60, %s6175_s17  ;;  %v297_v33 = vrot.slane %v295_v8, 3  ;;  %v637_v52 = vrot.slane %v635_v16, 7  ;;  %v638_v51 = vshll.u32 %v5705_v30, 16  ;;  %v843_v29 = vshll.u32 %v5737_v11, 16 }
  0x8e   :  { %v6867_v24 = vsel %vm953_vm2, %v1260_v2, %v1264_v40  ;;  %v1295_v43 = vrot.slane %v1293_v5, 1  ;;  %v5676_v18 = vcombine.low %v83_v50, %v83_v50  ;;  %v1300_v0 = vrot.slane %v1298_v4, 1  ;;  %v81_v60 = vld [vmem:[%s10744_s0 + $0xec] sm:$0xf] }
  0x8f   :  { %11130 = vst [vmem:[#allocation58_spill] sm:$0xff] %v6867_v24  ;;  %1551 = vrot.lane.b32.xlu0 %v6867_v24, %s6175_s17  ;;  %v640_v34 = vor.u32 %v638_v51, %v637_v52  ;;  %v5708_v26 = vcombine.low %v82_v35, %v83_v50  ;;  %v5740_v53 = vcombine.low %v82_v35, %v82_v35  ;;  %v80_v35 = vld [vmem:[%s10744_s0 + $0xe8] sm:$0xf]  ;;  %s6176_s0 = smov 8   ;;  %vm2076_vm7 = vcmask 64512  }
  0x90   :  { %v1296_v8 = vor.u32 %v1295_v43, %v1291_v37  ;;  %v6876_v30 = vsel %vm6243_vm3, %v637_v52, %v843_v29  ;;  %v307_v40 = vshrl.u32 %v5676_v18, 16  ;;  %v5675_v16 = vcombine.low %v81_v60, %v81_v60 }
  0x91   :  { %11131 = vst [vmem:[#allocation59_spill] sm:$0xff] %v6876_v30  ;;  %v6880_v11 = vsel %vm6243_vm3, %v297_v33, %v640_v34  ;;  %v1286_v2 = vshll.u32 %v6876_v30, 16  ;;  %v656_v5 = vshrl.u32 %v5708_v26, 16  ;;  %v659_v50 = vshll.u32 %v5708_v26, 16 }
  0x92   :  { %11132 = vst [vmem:[#allocation60_spill] sm:$0xff] %v6880_v11  ;;  %v6887_v37 = vsel %vm953_vm2, %v1296_v8, %v1300_v0  ;;  %v1279_v4 = vshrl.u32 %v6880_v11, 16  ;;  %v1281_v52 = vshll.u32 %v6880_v11, 16  ;;  %v309_v33 = vrot.slane %v307_v40, 3 }
  0x93   :  { %11133 = vst [vmem:[#allocation61_spill] sm:$0xff] %v6887_v37  ;;  %1557 = vrot.lane.b32.xlu1 %v6887_v37, %s6175_s17  ;;  %v658_v51 = vrot.slane %v656_v5, 7  ;;  %v852_v43 = vshll.u32 %v5740_v53, 16  ;;  %v1288_v18 = vrot.slane %v1286_v2, 1  ;;  %v5707_v34 = vcombine.low %v80_v35, %v81_v60 }
  0x94   :  { %v1283_v29 = vrot.slane %v1281_v52, 1  ;;  %v5739_v26 = vcombine.low %v80_v35, %v80_v35  ;;  %v303_v0 = vshrl.u32 %v5675_v16, 16  ;;  %vm2141_vm8 = vcmask 97280  }
  0x95   :  { %v661_v24 = vor.u32 %v659_v50, %v658_v51  ;;  %v6895_v30 = vsel %vm6243_vm3, %v658_v51, %v852_v43  ;;  %v649_v11 = vshrl.u32 %v5707_v34, 16  ;;  %v652_v40 = vshll.u32 %v5707_v34, 16 }
  0x96   :  { %v1284_v8 = vor.u32 %v1283_v29, %v1279_v4  ;;  %v1322_v22 = vshll.u32 %v6895_v30, 16  ;;  %v849_v53 = vshll.u32 %v5739_v26, 16  ;;  %v305_v16 = vrot.slane %v303_v0, 3 }
  0x97   :  { %v6900_v37 = vsel %vm6243_vm3, %v309_v33, %v661_v24  ;;  %v651_v50 = vrot.slane %v649_v11, 7  ;;  %v1406_v33 = vrot.slane %v6315_v28, 1  ;;  %v1407_v51 = vrot.slane %v6307_v20, 1 }
  0x98   :  { %11134 = vst [vmem:[#allocation62_spill] sm:$0xff] %v6900_v37  ;;  %v6903_v2 = vsel %vm953_vm2, %v1284_v8, %v1288_v18  ;;  %v1315_v60 = vshrl.u32 %v6900_v37, 16  ;;  %v1317_v5 = vshll.u32 %v6900_v37, 16  ;;  %v1324_v4 = vrot.slane %v1322_v22, 1 }
  0x99   :  { %11135 = vst [vmem:[#allocation63_spill] sm:$0xff] %v6903_v2  ;;  %1555 = vrot.lane.b32.xlu0 %v6903_v2, %s6175_s17  ;;  %v654_v52 = vor.u32 %v652_v40, %v651_v50  ;;  %v6911_v24 = vsel %vm6243_vm3, %v651_v50, %v849_v53  ;;  %v6928_v20 = vsel %vm1402_vm4, %v1406_v33, %v1407_v51  ;;  %v1412_v8 = vrot.slane %v6277_v57, 1 }
  0x9a   :  { %v1319_v35 = vrot.slane %v1317_v5, 1  ;;  %v1310_v29 = vshll.u32 %v6911_v24, 16  ;;  %v1413_v40 = vrot.slane %v6281_v61, 1  ;;  %v1404_v5 = vrot.slane %v6249_v31, 1 }
  0x9b   :  { %v6918_v18 = vsel %vm6243_vm3, %v305_v16, %v654_v52  ;;  %v1409_v31 = vrot.slane %v6268_v46, 1  ;;  %v1410_v52 = vrot.slane %v6254_v36, 1  ;;  %v1424_v51 = vrot.slane %v6383_v41, 1 }
  0x9c   :  { %v1320_v43 = vor.u32 %v1319_v35, %v1315_v60  ;;  %11136 = vst [vmem:[#allocation64_spill] sm:$0xff] %v6918_v18  ;;  %v1303_v22 = vshrl.u32 %v6918_v18, 16  ;;  %v1305_v34 = vshll.u32 %v6918_v18, 16  ;;  %v1312_v0 = vrot.slane %v1310_v29, 1 }
  0x9d   :  { %v1403_v60 = vrot.slane %v6258_v38, 1  ;;  %v6940_v50 = vsel %vm1402_vm4, %v1412_v8, %v1413_v40  ;;  %v1418_v35 = vrot.slane %v6334_v55, 1  ;;  %v1415_v29 = vrot.slane %v6340_v63, 1 }
  0x9e   :  { %v6921_v11 = vsel %vm953_vm2, %v1320_v43, %v1324_v4  ;;  %v1307_v26 = vrot.slane %v1305_v34, 1  ;;  %v1419_v4 = vrot.slane %v6329_v48, 1  ;;  %v1425_v48 = vrot.slane %v6368_v32, 1 }
  0x9f   :  { %11137 = vst [vmem:[#allocation65_spill] sm:$0xff] %v6921_v11  ;;  %1561 = vrot.lane.b32.xlu1 %v6921_v11, %s6175_s17  ;;  %v6947_v61 = vsel %vm1402_vm4, %v1403_v60, %v1404_v5  ;;  %v6961_v43 = vsel %vm1402_vm4, %v1409_v31, %v1410_v52  ;;  %v1416_v36 = vrot.slane %v6347_v1, 1  ;;  %v1430_v34 = vrot.slane %v6422_v42, 1  ;;  %v7009_v52 = vpop.permute.xlu1 %1503 }
  0xa0   :  { %v1308_v53 = vor.u32 %v1307_v26, %v1303_v22  ;;  %11139 = vst [vmem:[#allocation67_spill] sm:$0xff] %v6947_v61  ;;  %v6954_v33 = vsel %vm1402_vm4, %v1418_v35, %v1419_v4  ;;  %v6968_v22 = vsel %vm1402_vm4, %v1424_v51, %v1425_v48  ;;  %v1431_v32 = vrot.slane %v6417_v27, 1  ;;  %11141 = vst [vmem:[#allocation69_spill] sm:$0xff] %v7009_v52 }
  0xa1   :  { %v6975_v26 = vsel %vm1402_vm4, %v1415_v29, %v1416_v36  ;;  %v1422_v1 = vrot.slane %v6395_v54, 1  ;;  %v1436_v40 = vrot.slane %v6469_v39, 1  ;;  %v1437_v27 = vrot.slane %v6453_v19, 1 }
  0xa2   :  { %v6937_v16 = vsel %vm953_vm2, %v1308_v53, %v1312_v0  ;;  %v1421_v0 = vrot.slane %v6400_v3, 1  ;;  %v6982_v8 = vsel %vm1402_vm4, %v1430_v34, %v1431_v32  ;;  %v1427_v60 = vrot.slane %v6439_v56, 1 }
  0xa3   :  { %1565 = vrot.lane.b32.xlu1 %v6928_v20, %s6176_s0  ;;  %11138 = vst [vmem:[#allocation66_spill] sm:$0xff] %v6937_v16  ;;  %1559 = vrot.lane.b32.xlu0 %v6937_v16, %s6175_s17  ;;  %v1428_v54 = vrot.slane %v6443_v58, 1  ;;  %v6996_v5 = vsel %vm1402_vm4, %v1436_v40, %v1437_v27  ;;  %v1442_v35 = vrot.slane %v6510_v62, 1  ;;  %v1443_v19 = vrot.slane %v6505_v45, 1  ;;  %s6177_s17 = smov 12  }
  0xa4   :  { %v6989_v53 = vsel %vm1402_vm4, %v1421_v0, %v1422_v1  ;;  %11140 = vst [vmem:[#allocation68_spill] sm:$0xff] %v6996_v5  ;;  %v1433_v31 = vrot.slane %v6488_v21, 1  ;;  %v1434_v58 = vrot.slane %v6483_v9, 1  ;;  %v1448_v45 = vrot.slane %v6546_v12, 1  ;;  %v7032_v0 = vpop.permute.xlu0 %1499  ;;  %v7034_v1 = vpop.permute.xlu1 %1505 }
  0xa5   :  { %v7003_v4 = vsel %vm1402_vm4, %v1427_v60, %v1428_v54  ;;  %v7012_v51 = vsel %vm1402_vm4, %v1442_v35, %v1443_v19  ;;  %v1449_v48 = vrot.slane %v6550_v7, 1  ;;  %v1439_v9 = vrot.slane %v6532_v44, 1  ;;  %11144 = vst [vmem:[#allocation72_spill] sm:$0xff] %v7032_v0  ;;  %11145 = vst [vmem:[#allocation73_spill] sm:$0xff] %v7034_v1  ;;  %v11147_v54 = vld [vmem:[#allocation26_spill] sm:$0xff]  ;;  %v11157_v1 = vld [vmem:[#allocation29_spill] sm:$0xff] }
  0xa6   :  { %11142 = vst [vmem:[#allocation70_spill] sm:$0xff] %v7012_v51  ;;  %v7019_v29 = vsel %vm1402_vm4, %v1433_v31, %v1434_v58  ;;  %v1440_v36 = vrot.slane %v6516_v17, 1  ;;  %v1454_v32 = vrot.slane %v6598_v13, 1  ;;  %v1455_v7 = vrot.slane %v6593_v10, 1  ;;  %v11148_v31 = vld [vmem:[#allocation25_spill] sm:$0xff] }
  0xa7   :  { %1569 = vrot.lane.b32.xlu1 %v6940_v50, %s6176_s0  ;;  %1563 = vrot.lane.b32.xlu0 %v6947_v61, %s6176_s0  ;;  %v7026_v34 = vsel %vm1402_vm4, %v1448_v45, %v1449_v48  ;;  %v1445_v17 = vrot.slane %v6579_v6, 1  ;;  %v1446_v27 = vrot.slane %v6565_v49, 1  ;;  %v1460_v10 = vrot.slane %v6642_v23, 1  ;;  %v11149_v45 = vld [vmem:[#allocation24_spill] sm:$0xff] }
  0xa8   :  { %11143 = vst [vmem:[#allocation71_spill] sm:$0xff] %v7026_v34  ;;  %v7037_v40 = vsel %vm1402_vm4, %v1439_v9, %v1440_v36  ;;  %v7044_v60 = vsel %vm1402_vm4, %v1454_v32, %v1455_v7  ;;  %v1461_v35 = vrot.slane %v11147_v54, 1  ;;  %v1451_v58 = vrot.slane %v11148_v31, 1  ;;  %v7057_v48 = vpop.permute.xlu0 %1501  ;;  %v7059_v9 = vpop.permute.xlu1 %1509  ;;  %v11153_v32 = vld [vmem:[#allocation34_spill] sm:$0xff]  ;;  %v11154_v54 = vld [vmem:[#allocation33_spill] sm:$0xff] }
  0xa9   :  { %11146 = vst [vmem:[#allocation74_spill] sm:$0xff] %v7044_v60  ;;  %v7051_v19 = vsel %vm1402_vm4, %v1445_v17, %v1446_v27  ;;  %v1452_v49 = vrot.slane %v11149_v45, 1  ;;  %11150 = vst [vmem:[#allocation26_spill] sm:$0xff] %v7057_v48  ;;  %v1466_v7 = vrot.slane %v11153_v32, 1  ;;  %v1467_v25 = vrot.slane %v11154_v54, 1  ;;  %v11156_v27 = vld [vmem:[#allocation31_spill] sm:$0xff] }
  0xaa   :  { %11151 = vst [vmem:[#allocation24_spill] sm:$0xff] %v7059_v9  ;;  %v7062_v36 = vsel %vm1402_vm4, %v1460_v10, %v1461_v35  ;;  %v1457_v45 = vrot.slane %v11156_v27, 1  ;;  %v1458_v52 = vrot.slane %v11157_v1, 1  ;;  %v11159_v35 = vld [vmem:[#allocation40_spill] sm:$0xff]  ;;  %v11160_v48 = vld [vmem:[#allocation39_spill] sm:$0xff]  ;;  %v11164_v1 = vld [vmem:[#allocation37_spill] sm:$0xff] }
  0xab   :  { %1573 = vrot.lane.b32.xlu1 %v6954_v33, %s6176_s0  ;;  %1567 = vrot.lane.b32.xlu0 %v6961_v43, %s6176_s0  ;;  %11152 = vst [vmem:[#allocation75_spill] sm:$0xff] %v7062_v36  ;;  %v7069_v17 = vsel %vm1402_vm4, %v1451_v58, %v1452_v49  ;;  %v7076_v10 = vsel %vm1402_vm4, %v1466_v7, %v1467_v25  ;;  %v1472_v9 = vrot.slane %v11159_v35, 1  ;;  %v1473_v54 = vrot.slane %v11160_v48, 1  ;;  %v11167_v48 = vld [vmem:[#allocation46_spill] sm:$0xff] }
  0xac   :  { %11155 = vst [vmem:[#allocation33_spill] sm:$0xff] %v7069_v17  ;;  %11158 = vst [vmem:[#allocation31_spill] sm:$0xff] %v7076_v10  ;;  %v7082_v0 = vpop.permute.xlu0 %1507  ;;  %v7084_v58 = vpop.permute.xlu1 %1513  ;;  %v7087_v49 = vsel %vm1402_vm4, %v1457_v45, %v1458_v52  ;;  %v1478_v7 = vrot.slane %v11167_v48, 1  ;;  %v11169_v45 = vld [vmem:[#allocation41_spill] sm:$0xff]  ;;  %vm2206_vm9 = vcmask 130048   ;;  %vm2271_vm10 = vcmask 162816  }
  0xad   :  { %11161 = vst [vmem:[#allocation29_spill] sm:$0xff] %v7082_v0  ;;  %11162 = vst [vmem:[#allocation39_spill] sm:$0xff] %v7084_v58  ;;  %v7094_v25 = vsel %vm1402_vm4, %v1472_v9, %v1473_v54  ;;  %v1469_v58 = vrot.slane %v11169_v45, 1  ;;  %v11170_v0 = vld [vmem:[#allocation42_spill] sm:$0xff]  ;;  %vm2336_vm11 = vcmask 195584   ;;  %vm2401_vm12 = vcmask 228352  }
  0xae   :  { %11163 = vst [vmem:[#allocation76_spill] sm:$0xff] %v7087_v49  ;;  %vm2466_vm13 = vcmask 261120   ;;  %vm2558_vm14 = vcmask 293888   ;;  %vm5208_vm15 = vcmask 1045504   ;;  %vm4772_vm0 = vcmask 326656  }
  0xaf   :  { %1577 = vrot.lane.b32.xlu1 %v6968_v22, %s6176_s0  ;;  %1571 = vrot.lane.b32.xlu0 %v6975_v26, %s6176_s0  ;;  %vm4837_vm1 = vcmask 392192  }
  0xb0   :  { %v7109_v9 = vpop.permute.xlu1 %1517 }
  0xb1   :  { %11172 = vst [vmem:[#allocation42_spill] sm:$0xff] %v7109_v9 }
  0xb3   :  { %1581 = vrot.lane.b32.xlu1 %v6982_v8, %s6176_s0  ;;  %1575 = vrot.lane.b32.xlu0 %v6989_v53, %s6176_s0 }
  0xb7   :  { %1585 = vrot.lane.b32.xlu1 %v6996_v5, %s6176_s0  ;;  %1579 = vrot.lane.b32.xlu0 %v7003_v4, %s6176_s0 }
  0xbb   :  { %1589 = vrot.lane.b32.xlu1 %v7012_v51, %s6176_s0  ;;  %1583 = vrot.lane.b32.xlu0 %v7019_v29, %s6176_s0 }
  0xbf   :  { %1593 = vrot.lane.b32.xlu1 %v7026_v34, %s6176_s0  ;;  %1587 = vrot.lane.b32.xlu0 %v7037_v40, %s6176_s0 }
  0xc3   :  { %1597 = vrot.lane.b32.xlu1 %v7044_v60, %s6176_s0  ;;  %1591 = vrot.lane.b32.xlu0 %v7051_v19, %s6176_s0  ;;  %v1463_v60 = vrot.slane %v11164_v1, 1 }
  0xc7   :  { %1601 = vrot.lane.b32.xlu1 %v7062_v36, %s6176_s0  ;;  %1595 = vrot.lane.b32.xlu0 %v7069_v17, %s6176_s0  ;;  %v11165_v36 = vld [vmem:[#allocation36_spill] sm:$0xff]  ;;  %v11168_v17 = vld [vmem:[#allocation45_spill] sm:$0xff] }
  0xc8   :  { %v1464_v34 = vrot.slane %v11165_v36, 1  ;;  %11166 = vst [vmem:[#allocation36_spill] sm:$0xff] %v7094_v25  ;;  %v1479_v51 = vrot.slane %v11168_v17, 1  ;;  %v1470_v36 = vrot.slane %v11170_v0, 1  ;;  %v1484_v17 = vrot.slane %v6818_v15, 1  ;;  %v11176_v0 = vld [vmem:[#allocation49_spill] sm:$0xff] }
  0xca   :  { %v7101_v52 = vsel %vm1402_vm4, %v1463_v60, %v1464_v34  ;;  %v7112_v54 = vsel %vm1402_vm4, %v1478_v7, %v1479_v51  ;;  %v7119_v34 = vsel %vm1402_vm4, %v1469_v58, %v1470_v36  ;;  %v1475_v60 = vrot.slane %v11176_v0, 1  ;;  %v7134_v58 = vpop.permute.xlu1 %1521 }
  0xcb   :  { %1605 = vrot.lane.b32.xlu1 %v7076_v10, %s6176_s0  ;;  %1599 = vrot.lane.b32.xlu0 %v7087_v49, %s6176_s0  ;;  %v7107_v10 = vpop.permute.xlu0 %1511  ;;  %11173 = vst [vmem:[#allocation77_spill] sm:$0xff] %v7112_v54  ;;  %v11174_v49 = vld [vmem:[#allocation51_spill] sm:$0xff]  ;;  %v1490_v7 = vrot.slane %v6846_v14, 1  ;;  %11180 = vst [vmem:[#allocation79_spill] sm:$0xff] %v7134_v58 }
  0xcc   :  { %11171 = vst [vmem:[#allocation45_spill] sm:$0xff] %v7107_v10  ;;  %v1485_v61 = vrot.slane %v11174_v49, 1  ;;  %11175 = vst [vmem:[#allocation51_spill] sm:$0xff] %v7119_v34  ;;  %v1491_v49 = vrot.slane %v6850_v59, 1  ;;  %v11182_v10 = vld [vmem:[#allocation55_spill] sm:$0xff]  ;;  %v1496_v59 = vrot.slane %v6900_v37, 1 }
  0xce   :  { %v7126_v51 = vsel %vm1402_vm4, %v1484_v17, %v1485_v61  ;;  %v7144_v61 = vsel %vm1402_vm4, %v1490_v7, %v1491_v49  ;;  %v1497_v17 = vrot.slane %v6895_v30, 1  ;;  %v7159_v7 = vpop.permute.xlu1 %1525 }
  0xcf   :  { %1609 = vrot.lane.b32.xlu1 %v7094_v25, %s6176_s0  ;;  %1603 = vrot.lane.b32.xlu0 %v7101_v52, %s6176_s0  ;;  %v11177_v25 = vld [vmem:[#allocation48_spill] sm:$0xff]  ;;  %v7132_v9 = vpop.permute.xlu0 %1515  ;;  %11187 = vst [vmem:[#allocation81_spill] sm:$0xff] %v7159_v7 }
  0xd0   :  { %v1476_v5 = vrot.slane %v11177_v25, 1  ;;  %11178 = vst [vmem:[#allocation48_spill] sm:$0xff] %v7126_v51  ;;  %11179 = vst [vmem:[#allocation78_spill] sm:$0xff] %v7132_v9  ;;  %v1481_v25 = vrot.slane %v6835_v47, 1  ;;  %v11185_v9 = vld [vmem:[#allocation59_spill] sm:$0xff]  ;;  %v7162_v49 = vsel %vm1402_vm4, %v1496_v59, %v1497_v17 }
  0xd1   :  { %11188 = vst [vmem:[#allocation82_spill] sm:$0xff] %v7162_v49 }
  0xd2   :  { %v7137_v36 = vsel %vm1402_vm4, %v1475_v60, %v1476_v5  ;;  %v11184_v60 = vld [vmem:[#allocation60_spill] sm:$0xff]  ;;  %v7177_v59 = vpop.permute.xlu1 %1529 }
  0xd3   :  { %1613 = vrot.lane.b32.xlu1 %v7112_v54, %s6176_s0  ;;  %1607 = vrot.lane.b32.xlu0 %v7119_v34, %s6176_s0  ;;  %11181 = vst [vmem:[#allocation80_spill] sm:$0xff] %v7137_v36  ;;  %v1482_v54 = vrot.slane %v11182_v10, 1  ;;  %v1487_v58 = vrot.slane %v11184_v60, 1  ;;  %v1488_v10 = vrot.slane %v11185_v9, 1  ;;  %v1494_v9 = vrot.slane %v6911_v24, 1  ;;  %11191 = vst [vmem:[#allocation85_spill] sm:$0xff] %v7177_v59 }
  0xd5   :  { %v7151_v5 = vsel %vm1402_vm4, %v1481_v25, %v1482_v54  ;;  %v7167_v30 = vsel %vm1402_vm4, %v1487_v58, %v1488_v10  ;;  %v1493_v54 = vrot.slane %v6918_v18, 1 }
  0xd6   :  { %11183 = vst [vmem:[#allocation55_spill] sm:$0xff] %v7151_v5  ;;  %11189 = vst [vmem:[#allocation83_spill] sm:$0xff] %v7167_v30  ;;  %v7190_v58 = vpop.permute.xlu1 %1533 }
  0xd7   :  { %1617 = vrot.lane.b32.xlu1 %v7126_v51, %s6176_s0  ;;  %1611 = vrot.lane.b32.xlu0 %v7137_v36, %s6176_s0  ;;  %v7157_v51 = vpop.permute.xlu0 %1519  ;;  %v7180_v17 = vsel %vm1402_vm4, %v1493_v54, %v1494_v9  ;;  %11194 = vst [vmem:[#allocation88_spill] sm:$0xff] %v7190_v58 }
  0xd8   :  { %11186 = vst [vmem:[#allocation59_spill] sm:$0xff] %v7157_v51  ;;  %11192 = vst [vmem:[#allocation86_spill] sm:$0xff] %v7180_v17 }
  0xda   :  { %v7200_v54 = vpop.permute.xlu1 %1537 }
  0xdb   :  { %1621 = vrot.lane.b32.xlu1 %v7144_v61, %s6176_s0  ;;  %1615 = vrot.lane.b32.xlu0 %v7151_v5, %s6176_s0  ;;  %v7175_v25 = vpop.permute.xlu0 %1523  ;;  %11196 = vst [vmem:[#allocation90_spill] sm:$0xff] %v7200_v54 }
  0xdc   :  { %11190 = vst [vmem:[#allocation84_spill] sm:$0xff] %v7175_v25  ;;  %v11217_v25 = vld [vmem:[#allocation7_spill] sm:$0xff] }
  0xdf   :  { %1625 = vrot.lane.b32.xlu1 %v7162_v49, %s6176_s0  ;;  %1619 = vrot.lane.b32.xlu0 %v7167_v30, %s6176_s0  ;;  %v7188_v24 = vpop.permute.xlu0 %1527 }
  0xe0   :  { %11193 = vst [vmem:[#allocation87_spill] sm:$0xff] %v7188_v24 }
  0xe1   :  { %v7210_v58 = vpop.permute.xlu1 %1541 }
  0xe2   :  { %11198 = vst [vmem:[#allocation92_spill] sm:$0xff] %v7210_v58 }
  0xe3   :  { %1629 = vrot.lane.b32.xlu1 %v6268_v46, %s6177_s17  ;;  %1623 = vrot.lane.b32.xlu0 %v7180_v17, %s6176_s0  ;;  %v7198_v10 = vpop.permute.xlu0 %1531 }
  0xe4   :  { %11195 = vst [vmem:[#allocation89_spill] sm:$0xff] %v7198_v10 }
  0xe7   :  { %1633 = vrot.lane.b32.xlu1 %v6340_v63, %s6177_s17  ;;  %1627 = vrot.lane.b32.xlu0 %v6315_v28, %s6177_s17  ;;  %v7208_v9 = vpop.permute.xlu0 %1535 }
  0xe8   :  { %11197 = vst [vmem:[#allocation91_spill] sm:$0xff] %v7208_v9 }
  0xeb   :  { %1637 = vrot.lane.b32.xlu1 %v6400_v3, %s6177_s17  ;;  %1631 = vrot.lane.b32.xlu0 %v6277_v57, %s6177_s17  ;;  %v7218_v54 = vpop.permute.xlu0 %1539  ;;  %v7220_v59 = vpop.permute.xlu1 %1545 }
  0xec   :  { %11199 = vst [vmem:[#allocation93_spill] sm:$0xff] %v7218_v54  ;;  %11200 = vst [vmem:[#allocation94_spill] sm:$0xff] %v7220_v59 }
  0xef   :  { %1641 = vrot.lane.b32.xlu1 %v6439_v56, %s6177_s17  ;;  %1635 = vrot.lane.b32.xlu0 %v6334_v55, %s6177_s17  ;;  %v7228_v58 = vpop.permute.xlu0 %1543 }
  0xf0   :  { %11201 = vst [vmem:[#allocation95_spill] sm:$0xff] %v7228_v58 }
  0xf3   :  { %1645 = vrot.lane.b32.xlu1 %v6488_v21, %s6177_s17  ;;  %1639 = vrot.lane.b32.xlu0 %v6383_v41, %s6177_s17  ;;  %v7230_v9 = vpop.permute.xlu1 %1549 }
  0xf4   :  { %11202 = vst [vmem:[#allocation96_spill] sm:$0xff] %v7230_v9 }
  0xf7   :  { %1649 = vrot.lane.b32.xlu1 %v6532_v44, %s6177_s17  ;;  %1643 = vrot.lane.b32.xlu0 %v6422_v42, %s6177_s17 }
  0xf9   :  { %v7238_v59 = vpop.permute.xlu0 %1547 }
  0xfa   :  { %11203 = vst [vmem:[#allocation97_spill] sm:$0xff] %v7238_v59 }
  0xfb   :  { %1653 = vrot.lane.b32.xlu1 %v6579_v6, %s6177_s17  ;;  %1647 = vrot.lane.b32.xlu0 %v6469_v39, %s6177_s17 }
  0xff   :  { %1657 = vrot.lane.b32.xlu1 %v6258_v38, %s6177_s17  ;;  %1651 = vrot.lane.b32.xlu0 %v6510_v62, %s6177_s17  ;;  %v7240_v54 = vpop.permute.xlu1 %1553 }
 0x100   :  { %11204 = vst [vmem:[#allocation98_spill] sm:$0xff] %v7240_v54 }
 0x101   :  { %v7246_v9 = vpop.permute.xlu0 %1551 }
 0x102   :  { %11205 = vst [vmem:[#allocation99_spill] sm:$0xff] %v7246_v9 }
 0x103   :  { %1661 = vrot.lane.b32.xlu1 %v11156_v27, %s6177_s17  ;;  %1655 = vrot.lane.b32.xlu0 %v6546_v12, %s6177_s17 }
 0x105   :  { %v7250_v58 = vpop.permute.xlu1 %1557 }
 0x106   :  { %11206 = vst [vmem:[#allocation100_spill] sm:$0xff] %v7250_v58 }
 0x107   :  { %1665 = vrot.lane.b32.xlu1 %v11164_v1, %s6177_s17  ;;  %1659 = vrot.lane.b32.xlu0 %v6598_v13, %s6177_s17 }
 0x10b   :  { %1669 = vrot.lane.b32.xlu1 %v11169_v45, %s6177_s17  ;;  %1663 = vrot.lane.b32.xlu0 %v6642_v23, %s6177_s17  ;;  %v7258_v54 = vpop.permute.xlu0 %1555 }
 0x10c   :  { %11207 = vst [vmem:[#allocation101_spill] sm:$0xff] %v7258_v54 }
 0x10f   :  { %1673 = vrot.lane.b32.xlu1 %v11176_v0, %s6177_s17  ;;  %1667 = vrot.lane.b32.xlu0 %v11153_v32, %s6177_s17 }
 0x111   :  { %v7260_v59 = vpop.permute.xlu1 %1561 }
 0x112   :  { %11208 = vst [vmem:[#allocation102_spill] sm:$0xff] %v7260_v59 }
 0x113   :  { %1677 = vrot.lane.b32.xlu1 %v6835_v47, %s6177_s17  ;;  %1671 = vrot.lane.b32.xlu0 %v11159_v35, %s6177_s17 }
 0x115   :  { %v7266_v58 = vpop.permute.xlu1 %1565  ;;  %v7268_v9 = vpop.permute.xlu0 %1559 }
 0x116   :  { %11209 = vst [vmem:[#allocation103_spill] sm:$0xff] %v7266_v58  ;;  %11210 = vst [vmem:[#allocation104_spill] sm:$0xff] %v7268_v9  ;;  %v11229_v58 = vld [vmem:[#allocation10_spill] sm:$0xff] }
 0x117   :  { %1681 = vrot.lane.b32.xlu1 %v11184_v60, %s6177_s17  ;;  %1675 = vrot.lane.b32.xlu0 %v11167_v48, %s6177_s17  ;;  %v11245_v48 = vld [vmem:[#allocation18_spill] sm:$0xff] }
 0x119   :  { %v7274_v10 = vpop.permute.xlu1 %1569  ;;  %v7276_v54 = vpop.permute.xlu0 %1563 }
 0x11a   :  { %11211 = vst [vmem:[#allocation105_spill] sm:$0xff] %v7274_v10  ;;  %11212 = vst [vmem:[#allocation106_spill] sm:$0xff] %v7276_v54  ;;  %v11224_v10 = vld [vmem:[#allocation13_spill] sm:$0xff]  ;;  %v11237_v54 = vld [vmem:[#allocation14_spill] sm:$0xff] }
 0x11b   :  { %1685 = vrot.lane.b32.xlu1 %v6918_v18, %s6177_s17  ;;  %1679 = vrot.lane.b32.xlu0 %v6818_v15, %s6177_s17  ;;  %v11241_v15 = vld [vmem:[#allocation16_spill] sm:$0xff] }
 0x11d   :  { %v7282_v59 = vpop.permute.xlu1 %1573  ;;  %v7284_v7 = vpop.permute.xlu0 %1567 }
 0x11e   :  { %11213 = vst [vmem:[#allocation107_spill] sm:$0xff] %v7282_v59  ;;  %11214 = vst [vmem:[#allocation108_spill] sm:$0xff] %v7284_v7  ;;  %v11221_v59 = vld [vmem:[#allocation9_spill] sm:$0xff]  ;;  %v11233_v7 = vld [vmem:[#allocation12_spill] sm:$0xff] }
 0x11f   :  { %1689 = vrot.lane.b32.xlu1 %v11148_v31, %s6177_s17  ;;  %1683 = vrot.lane.b32.xlu0 %v6846_v14, %s6177_s17  ;;  %v11220_v31 = vld [vmem:[#allocation11_spill] sm:$0xff] }
 0x121   :  { %v7290_v9 = vpop.permute.xlu1 %1577  ;;  %v7292_v24 = vpop.permute.xlu0 %1571 }
 0x122   :  { %11215 = vst [vmem:[#allocation109_spill] sm:$0xff] %v7290_v9  ;;  %11216 = vst [vmem:[#allocation110_spill] sm:$0xff] %v7292_v24  ;;  %v11225_v24 = vld [vmem:[#allocation8_spill] sm:$0xff] }
 0x123   :  { %1693 = vrot.lane.b32.xlu1 %v11217_v25, %s6178_s26  ;;  %1687 = vrot.lane.b32.xlu0 %v6900_v37, %s6177_s17 }
 0x125   :  { %v7298_v51 = vpop.permute.xlu1 %1581  ;;  %v7300_v13 = vpop.permute.xlu0 %1575 }
 0x126   :  { %11218 = vst [vmem:[#allocation111_spill] sm:$0xff] %v7298_v51  ;;  %11219 = vst [vmem:[#allocation112_spill] sm:$0xff] %v7300_v13  ;;  %v11228_v13 = vld [vmem:[#allocation15_spill] sm:$0xff] }
 0x127   :  { %1697 = vrot.lane.b32.xlu1 %v11220_v31, %s6178_s26  ;;  %1691 = vrot.lane.b32.xlu0 %v11221_v59, %s6178_s26  ;;  %v11249_v59 = vld [vmem:[#allocation21_spill] sm:$0xff] }
 0x129   :  { %v7306_v9 = vpop.permute.xlu1 %1585  ;;  %v7308_v18 = vpop.permute.xlu0 %1579 }
 0x12a   :  { %11222 = vst [vmem:[#allocation113_spill] sm:$0xff] %v7306_v9  ;;  %11223 = vst [vmem:[#allocation114_spill] sm:$0xff] %v7308_v18  ;;  %v11232_v18 = vld [vmem:[#allocation17_spill] sm:$0xff] }
 0x12b   :  { %1701 = vrot.lane.b32.xlu1 %v11224_v10, %s6178_s26  ;;  %1695 = vrot.lane.b32.xlu0 %v11225_v24, %s6178_s26 }
 0x12d   :  { %v7314_v37 = vpop.permute.xlu1 %1589  ;;  %v7316_v51 = vpop.permute.xlu0 %1583 }
 0x12e   :  { %11226 = vst [vmem:[#allocation115_spill] sm:$0xff] %v7314_v37  ;;  %11227 = vst [vmem:[#allocation116_spill] sm:$0xff] %v7316_v51  ;;  %v11236_v51 = vld [vmem:[#allocation20_spill] sm:$0xff] }
 0x12f   :  { %1705 = vrot.lane.b32.xlu1 %v11228_v13, %s6178_s26  ;;  %1699 = vrot.lane.b32.xlu0 %v11229_v58, %s6178_s26 }
 0x131   :  { %v7322_v60 = vpop.permute.xlu1 %1593  ;;  %v7324_v9 = vpop.permute.xlu0 %1587 }
 0x132   :  { %11230 = vst [vmem:[#allocation117_spill] sm:$0xff] %v7322_v60  ;;  %11231 = vst [vmem:[#allocation118_spill] sm:$0xff] %v7324_v9  ;;  %v11240_v9 = vld [vmem:[#allocation23_spill] sm:$0xff] }
 0x133   :  { %1709 = vrot.lane.b32.xlu1 %v11232_v18, %s6178_s26  ;;  %1703 = vrot.lane.b32.xlu0 %v11233_v7, %s6178_s26 }
 0x135   :  { %v7330_v14 = vpop.permute.xlu1 %1597  ;;  %v7332_v37 = vpop.permute.xlu0 %1591 }
 0x136   :  { %11234 = vst [vmem:[#allocation119_spill] sm:$0xff] %v7330_v14  ;;  %11235 = vst [vmem:[#allocation120_spill] sm:$0xff] %v7332_v37  ;;  %v11244_v37 = vld [vmem:[#allocation6_spill] sm:$0xff] }
 0x137   :  { %1713 = vrot.lane.b32.xlu1 %v11236_v51, %s6178_s26  ;;  %1707 = vrot.lane.b32.xlu0 %v11237_v54, %s6178_s26 }
 0x139   :  { %v7338_v47 = vpop.permute.xlu1 %1601  ;;  %v7340_v60 = vpop.permute.xlu0 %1595 }
 0x13a   :  { %11238 = vst [vmem:[#allocation121_spill] sm:$0xff] %v7338_v47  ;;  %11239 = vst [vmem:[#allocation122_spill] sm:$0xff] %v7340_v60  ;;  %v11248_v60 = vld [vmem:[#allocation35_spill] sm:$0xff] }
 0x13b   :  { %1717 = vrot.lane.b32.xlu1 %v11240_v9, %s6178_s26  ;;  %1711 = vrot.lane.b32.xlu0 %v11241_v15, %s6178_s26 }
 0x13d   :  { %v7346_v0 = vpop.permute.xlu1 %1605  ;;  %v7348_v14 = vpop.permute.xlu0 %1599 }
 0x13e   :  { %11242 = vst [vmem:[#allocation123_spill] sm:$0xff] %v7346_v0  ;;  %11243 = vst [vmem:[#allocation124_spill] sm:$0xff] %v7348_v14  ;;  %v11252_v14 = vld [vmem:[#allocation43_spill] sm:$0xff] }
 0x13f   :  { %1721 = vrot.lane.b32.xlu1 %v11244_v37, %s6178_s26  ;;  %1715 = vrot.lane.b32.xlu0 %v11245_v48, %s6178_s26  ;;  %v11253_v37 = vld [vmem:[#allocation27_spill] sm:$0xff] }
 0x141   :  { %v7354_v35 = vpop.permute.xlu1 %1609  ;;  %v7356_v47 = vpop.permute.xlu0 %1603 }
 0x142   :  { %11246 = vst [vmem:[#allocation125_spill] sm:$0xff] %v7354_v35  ;;  %11247 = vst [vmem:[#allocation126_spill] sm:$0xff] %v7356_v47  ;;  %v11256_v47 = vld [vmem:[#allocation47_spill] sm:$0xff] }
 0x143   :  { %1725 = vrot.lane.b32.xlu1 %v11248_v60, %s6178_s26  ;;  %1719 = vrot.lane.b32.xlu0 %v11249_v59, %s6178_s26  ;;  %v11257_v60 = vld [vmem:[#allocation32_spill] sm:$0xff] }
 0x145   :  { %v7362_v9 = vpop.permute.xlu1 %1613  ;;  %v7364_v0 = vpop.permute.xlu0 %1607 }
 0x146   :  { %11250 = vst [vmem:[#allocation127_spill] sm:$0xff] %v7362_v9  ;;  %11251 = vst [vmem:[#allocation128_spill] sm:$0xff] %v7364_v0  ;;  %v11260_v0 = vld [vmem:[#allocation53_spill] sm:$0xff] }
 0x147   :  { %1729 = vrot.lane.b32.xlu1 %v11252_v14, %s6178_s26  ;;  %1723 = vrot.lane.b32.xlu0 %v11253_v37, %s6178_s26  ;;  %v11261_v14 = vld [vmem:[#allocation38_spill] sm:$0xff] }
 0x149   :  { %v7370_v48 = vpop.permute.xlu1 %1617  ;;  %v7372_v35 = vpop.permute.xlu0 %1611 }
 0x14a   :  { %11254 = vst [vmem:[#allocation129_spill] sm:$0xff] %v7370_v48  ;;  %11255 = vst [vmem:[#allocation130_spill] sm:$0xff] %v7372_v35  ;;  %v11264_v35 = vld [vmem:[#allocation58_spill] sm:$0xff] }
 0x14b   :  { %1733 = vrot.lane.b32.xlu1 %v11256_v47, %s6178_s26  ;;  %1727 = vrot.lane.b32.xlu0 %v11257_v60, %s6178_s26  ;;  %v11265_v47 = vld [vmem:[#allocation44_spill] sm:$0xff] }
 0x14d   :  { %v7378_v59 = vpop.permute.xlu1 %1621  ;;  %v7380_v9 = vpop.permute.xlu0 %1615 }
 0x14e   :  { %11258 = vst [vmem:[#allocation131_spill] sm:$0xff] %v7378_v59  ;;  %11259 = vst [vmem:[#allocation132_spill] sm:$0xff] %v7380_v9  ;;  %v11268_v9 = vld [vmem:[#allocation50_spill] sm:$0xff] }
 0x14f   :  { %1737 = vrot.lane.b32.xlu1 %v11260_v0, %s6178_s26  ;;  %1731 = vrot.lane.b32.xlu0 %v11261_v14, %s6178_s26 }
 0x151   :  { %v7386_v37 = vpop.permute.xlu1 %1625  ;;  %v7388_v48 = vpop.permute.xlu0 %1619 }
 0x152   :  { %11262 = vst [vmem:[#allocation133_spill] sm:$0xff] %v7386_v37  ;;  %11263 = vst [vmem:[#allocation134_spill] sm:$0xff] %v7388_v48  ;;  %v11271_v48 = vld [vmem:[#allocation57_spill] sm:$0xff] }
 0x153   :  { %1741 = vrot.lane.b32.xlu1 %v11264_v35, %s6178_s26  ;;  %1735 = vrot.lane.b32.xlu0 %v11265_v47, %s6178_s26 }
 0x155   :  { %v7394_v60 = vpop.permute.xlu1 %1629  ;;  %v7396_v59 = vpop.permute.xlu0 %1623 }
 0x156   :  { %11266 = vst [vmem:[#allocation135_spill] sm:$0xff] %v7394_v60  ;;  %11267 = vst [vmem:[#allocation136_spill] sm:$0xff] %v7396_v59  ;;  %v11274_v59 = vld [vmem:[#allocation30_spill] sm:$0xff] }
 0x157   :  { %1745 = vrot.lane.b32.xlu1 %v6903_v2, %s6178_s26  ;;  %1739 = vrot.lane.b32.xlu0 %v11268_v9, %s6178_s26  ;;  %v11275_v2 = vld [vmem:[#allocation61_spill] sm:$0xff] }
 0x159   :  { %v7402_v0 = vpop.permute.xlu1 %1633  ;;  %v7404_v37 = vpop.permute.xlu0 %1627 }
 0x15a   :  { %11269 = vst [vmem:[#allocation137_spill] sm:$0xff] %v7402_v0  ;;  %11270 = vst [vmem:[#allocation138_spill] sm:$0xff] %v7404_v37  ;;  %v11298_v37 = vld [vmem:[#allocation71_spill] sm:$0xff] }
 0x15b   :  { %1749 = vrot.lane.b32.xlu1 %v6937_v16, %s6178_s26  ;;  %1743 = vrot.lane.b32.xlu0 %v11271_v48, %s6178_s26 }
 0x15d   :  { %v7410_v35 = vpop.permute.xlu1 %1637  ;;  %v7412_v60 = vpop.permute.xlu0 %1631 }
 0x15e   :  { %11272 = vst [vmem:[#allocation139_spill] sm:$0xff] %v7410_v35  ;;  %11273 = vst [vmem:[#allocation140_spill] sm:$0xff] %v7412_v60  ;;  %v11294_v60 = vld [vmem:[#allocation70_spill] sm:$0xff] }
 0x15f   :  { %1753 = vrot.lane.b32.xlu1 %v11274_v59, %s6178_s26  ;;  %1747 = vrot.lane.b32.xlu0 %v11275_v2, %s6178_s26 }
 0x161   :  { %v7418_v9 = vpop.permute.xlu1 %1641  ;;  %v7420_v0 = vpop.permute.xlu0 %1635 }
 0x162   :  { %11276 = vst [vmem:[#allocation141_spill] sm:$0xff] %v7418_v9  ;;  %11277 = vst [vmem:[#allocation142_spill] sm:$0xff] %v7420_v0 }
 0x163   :  { %1757 = vrot.lane.b32.xlu1 %v6961_v43, %s6179_s27  ;;  %1751 = vrot.lane.b32.xlu0 %v6921_v11, %s6178_s26 }
 0x165   :  { %v7426_v35 = vpop.permute.xlu1 %1645  ;;  %v7428_v16 = vpop.permute.xlu0 %1639 }
 0x166   :  { %11278 = vst [vmem:[#allocation143_spill] sm:$0xff] %v7426_v35  ;;  %11279 = vst [vmem:[#allocation144_spill] sm:$0xff] %v7428_v16 }
 0x167   :  { %1761 = vrot.lane.b32.xlu1 %v6975_v26, %s6179_s27  ;;  %1755 = vrot.lane.b32.xlu0 %v6928_v20, %s6179_s27 }
 0x169   :  { %v7434_v59 = vpop.permute.xlu1 %1649  ;;  %v7436_v9 = vpop.permute.xlu0 %1643 }
 0x16a   :  { %11280 = vst [vmem:[#allocation145_spill] sm:$0xff] %v7434_v59  ;;  %11281 = vst [vmem:[#allocation146_spill] sm:$0xff] %v7436_v9 }
 0x16b   :  { %1765 = vrot.lane.b32.xlu1 %v6989_v53, %s6179_s27  ;;  %1759 = vrot.lane.b32.xlu0 %v6940_v50, %s6179_s27 }
 0x16d   :  { %v7442_v11 = vpop.permute.xlu1 %1653  ;;  %v7444_v35 = vpop.permute.xlu0 %1647 }
 0x16e   :  { %11282 = vst [vmem:[#allocation147_spill] sm:$0xff] %v7442_v11  ;;  %11283 = vst [vmem:[#allocation148_spill] sm:$0xff] %v7444_v35 }
 0x16f   :  { %1769 = vrot.lane.b32.xlu1 %v7003_v4, %s6179_s27  ;;  %1763 = vrot.lane.b32.xlu0 %v6954_v33, %s6179_s27 }
 0x171   :  { %v7450_v16 = vpop.permute.xlu1 %1657  ;;  %v7452_v59 = vpop.permute.xlu0 %1651 }
 0x172   :  { %11284 = vst [vmem:[#allocation149_spill] sm:$0xff] %v7450_v16  ;;  %11285 = vst [vmem:[#allocation150_spill] sm:$0xff] %v7452_v59  ;;  %v11290_v59 = vld [vmem:[#allocation68_spill] sm:$0xff] }
 0x173   :  { %1773 = vrot.lane.b32.xlu1 %v7019_v29, %s6179_s27  ;;  %1767 = vrot.lane.b32.xlu0 %v6968_v22, %s6179_s27 }
 0x175   :  { %v7458_v9 = vpop.permute.xlu1 %1661  ;;  %v7460_v11 = vpop.permute.xlu0 %1655 }
 0x176   :  { %11286 = vst [vmem:[#allocation151_spill] sm:$0xff] %v7458_v9  ;;  %11287 = vst [vmem:[#allocation152_spill] sm:$0xff] %v7460_v11  ;;  %v11293_v11 = vld [vmem:[#allocation67_spill] sm:$0xff] }
 0x177   :  { %1777 = vrot.lane.b32.xlu1 %v7037_v40, %s6179_s27  ;;  %1771 = vrot.lane.b32.xlu0 %v6982_v8, %s6179_s27 }
 0x179   :  { %v7466_v35 = vpop.permute.xlu1 %1665  ;;  %v7468_v16 = vpop.permute.xlu0 %1659 }
 0x17a   :  { %11288 = vst [vmem:[#allocation153_spill] sm:$0xff] %v7466_v35  ;;  %11289 = vst [vmem:[#allocation154_spill] sm:$0xff] %v7468_v16  ;;  %v11297_v16 = vld [vmem:[#allocation76_spill] sm:$0xff] }
 0x17b   :  { %1781 = vrot.lane.b32.xlu1 %v7051_v19, %s6179_s27  ;;  %1775 = vrot.lane.b32.xlu0 %v11290_v59, %s6179_s27 }
 0x17d   :  { %v7474_v0 = vpop.permute.xlu1 %1669  ;;  %v7476_v9 = vpop.permute.xlu0 %1663 }
 0x17e   :  { %11291 = vst [vmem:[#allocation68_spill] sm:$0xff] %v7474_v0  ;;  %11292 = vst [vmem:[#allocation155_spill] sm:$0xff] %v7476_v9  ;;  %v11301_v9 = vld [vmem:[#allocation74_spill] sm:$0xff] }
 0x17f   :  { %1785 = vrot.lane.b32.xlu1 %v11293_v11, %s6179_s27  ;;  %1779 = vrot.lane.b32.xlu0 %v11294_v60, %s6179_s27 }
 0x181   :  { %v7482_v2 = vpop.permute.xlu1 %1673  ;;  %v7484_v35 = vpop.permute.xlu0 %1667 }
 0x182   :  { %11295 = vst [vmem:[#allocation67_spill] sm:$0xff] %v7482_v2  ;;  %11296 = vst [vmem:[#allocation70_spill] sm:$0xff] %v7484_v35  ;;  %v11304_v35 = vld [vmem:[#allocation75_spill] sm:$0xff] }
 0x183   :  { %1789 = vrot.lane.b32.xlu1 %v11297_v16, %s6179_s27  ;;  %1783 = vrot.lane.b32.xlu0 %v11298_v37, %s6179_s27 }
 0x185   :  { %v7490_v48 = vpop.permute.xlu1 %1677  ;;  %v7492_v0 = vpop.permute.xlu0 %1671 }
 0x186   :  { %11299 = vst [vmem:[#allocation76_spill] sm:$0xff] %v7490_v48  ;;  %11300 = vst [vmem:[#allocation71_spill] sm:$0xff] %v7492_v0  ;;  %v11307_v0 = vld [vmem:[#allocation31_spill] sm:$0xff] }
 0x187   :  { %1793 = vrot.lane.b32.xlu1 %v7101_v52, %s6179_s27  ;;  %1787 = vrot.lane.b32.xlu0 %v11301_v9, %s6179_s27 }
 0x189   :  { %v7498_v47 = vpop.permute.xlu1 %1681  ;;  %v7500_v2 = vpop.permute.xlu0 %1675 }
 0x18a   :  { %11302 = vst [vmem:[#allocation156_spill] sm:$0xff] %v7498_v47  ;;  %11303 = vst [vmem:[#allocation157_spill] sm:$0xff] %v7500_v2  ;;  %v11310_v2 = vld [vmem:[#allocation36_spill] sm:$0xff] }
 0x18b   :  { %1797 = vrot.lane.b32.xlu1 %v7119_v34, %s6179_s27  ;;  %1791 = vrot.lane.b32.xlu0 %v11304_v35, %s6179_s27 }
 0x18d   :  { %v7506_v14 = vpop.permute.xlu1 %1685  ;;  %v7508_v48 = vpop.permute.xlu0 %1679 }
 0x18e   :  { %11305 = vst [vmem:[#allocation75_spill] sm:$0xff] %v7506_v14  ;;  %11306 = vst [vmem:[#allocation158_spill] sm:$0xff] %v7508_v48  ;;  %v11313_v48 = vld [vmem:[#allocation77_spill] sm:$0xff] }
 0x18f   :  { %1801 = vrot.lane.b32.xlu1 %v7137_v36, %s6179_s27  ;;  %1795 = vrot.lane.b32.xlu0 %v11307_v0, %s6179_s27 }
 0x191   :  { %v7514_v9 = vpop.permute.xlu1 %1689  ;;  %v7516_v47 = vpop.permute.xlu0 %1683 }
 0x192   :  { %11308 = vst [vmem:[#allocation31_spill] sm:$0xff] %v7514_v9  ;;  %11309 = vst [vmem:[#allocation159_spill] sm:$0xff] %v7516_v47  ;;  %v11315_v47 = vld [vmem:[#allocation48_spill] sm:$0xff] }
 0x193   :  { %1805 = vrot.lane.b32.xlu1 %v7151_v5, %s6179_s27  ;;  %1799 = vrot.lane.b32.xlu0 %v11310_v2, %s6179_s27 }
 0x195   :  { %v7522_v34 = vpop.permute.xlu1 %1693  ;;  %v7524_v14 = vpop.permute.xlu0 %1687 }
 0x196   :  { %11311 = vst [vmem:[#allocation36_spill] sm:$0xff] %v7522_v34  ;;  %11312 = vst [vmem:[#allocation160_spill] sm:$0xff] %v7524_v14  ;;  %v11317_v14 = vld [vmem:[#allocation33_spill] sm:$0xff] }
 0x197   :  { %1809 = vrot.lane.b32.xlu1 %v7167_v30, %s6179_s27  ;;  %1803 = vrot.lane.b32.xlu0 %v11313_v48, %s6179_s27 }
 0x199   :  { %v7530_v36 = vpop.permute.xlu1 %1697  ;;  %v7532_v9 = vpop.permute.xlu0 %1691 }
 0x19a   :  { %11314 = vst [vmem:[#allocation77_spill] sm:$0xff] %v7530_v36 }
 0x19b   :  { %1813 = vrot.lane.b32.xlu1 %v7180_v17, %s6179_s27  ;;  %1807 = vrot.lane.b32.xlu0 %v11315_v47, %s6179_s27 }
 0x19d   :  { %v7538_v5 = vpop.permute.xlu1 %1701  ;;  %v7540_v34 = vpop.permute.xlu0 %1695 }
 0x19e   :  { %11316 = vst [vmem:[#allocation48_spill] sm:$0xff] %v7538_v5 }
 0x19f   :  { %1817 = vrot.lane.b32.xlu1 %v11317_v14, %s6179_s27  ;;  %1811 = vrot.lane.b32.xlu0 %v7144_v61, %s6179_s27 }
 0x1a1   :  { %v7546_v30 = vpop.permute.xlu1 %1705  ;;  %v7548_v36 = vpop.permute.xlu0 %1699 }
 0x1a2   :  { %11318 = vst [vmem:[#allocation161_spill] sm:$0xff] %v7546_v30 }
 0x1a3   :  { %1821 = vrot.lane.b32.xlu1 %v6277_v57, %s6180_s28  ;;  %1815 = vrot.lane.b32.xlu0 %v7162_v49, %s6179_s27 }
 0x1a5   :  { %v7554_v17 = vpop.permute.xlu1 %1709  ;;  %v7556_v5 = vpop.permute.xlu0 %1703 }
 0x1a6   :  { %11319 = vst [vmem:[#allocation162_spill] sm:$0xff] %v7554_v17  ;;  %11320 = vst [vmem:[#allocation163_spill] sm:$0xff] %v7556_v5 }
 0x1a7   :  { %1825 = vrot.lane.b32.xlu1 %v6334_v55, %s6180_s28  ;;  %1819 = vrot.lane.b32.xlu0 %v6268_v46, %s6180_s28 }
 0x1a9   :  { %v7562_v14 = vpop.permute.xlu1 %1713  ;;  %v7564_v30 = vpop.permute.xlu0 %1707 }
 0x1aa   :  { %11321 = vst [vmem:[#allocation164_spill] sm:$0xff] %v7562_v14  ;;  %11322 = vst [vmem:[#allocation165_spill] sm:$0xff] %v7564_v30 }
 0x1ab   :  { %1829 = vrot.lane.b32.xlu1 %v6383_v41, %s6180_s28  ;;  %1823 = vrot.lane.b32.xlu0 %v6340_v63, %s6180_s28 }
 0x1ad   :  { %v7570_v49 = vpop.permute.xlu1 %1717  ;;  %v7572_v17 = vpop.permute.xlu0 %1711 }
 0x1ae   :  { %11323 = vst [vmem:[#allocation166_spill] sm:$0xff] %v7570_v49  ;;  %11324 = vst [vmem:[#allocation167_spill] sm:$0xff] %v7572_v17 }
 0x1af   :  { %1833 = vrot.lane.b32.xlu1 %v6422_v42, %s6180_s28  ;;  %1827 = vrot.lane.b32.xlu0 %v6400_v3, %s6180_s28 }
 0x1b1   :  { %v7578_v5 = vpop.permute.xlu1 %1721  ;;  %v7580_v14 = vpop.permute.xlu0 %1715 }
 0x1b2   :  { %11325 = vst [vmem:[#allocation168_spill] sm:$0xff] %v7578_v5  ;;  %11326 = vst [vmem:[#allocation169_spill] sm:$0xff] %v7580_v14 }
 0x1b3   :  { %1837 = vrot.lane.b32.xlu1 %v6469_v39, %s6180_s28  ;;  %1831 = vrot.lane.b32.xlu0 %v6439_v56, %s6180_s28 }
 0x1b5   :  { %v7586_v30 = vpop.permute.xlu1 %1725  ;;  %v7588_v49 = vpop.permute.xlu0 %1719 }
 0x1b6   :  { %11327 = vst [vmem:[#allocation170_spill] sm:$0xff] %v7586_v30  ;;  %11328 = vst [vmem:[#allocation171_spill] sm:$0xff] %v7588_v49  ;;  %v6144_v49 = vld [vmem:[%s10745_s1 + $0x10] ss:$0 sps:$4 sm:$0x33]  }
 0x1b7   :  { %1841 = vrot.lane.b32.xlu1 %v6510_v62, %s6180_s28  ;;  %1835 = vrot.lane.b32.xlu0 %v6488_v21, %s6180_s28 }
 0x1b8   :  { %6031 = vmatprep.subr.msk.bf16.mxu0 %vm2623_vm5, %v6144_v49 }
 0x1b9   :  { %v7594_v17 = vpop.permute.xlu1 %1729  ;;  %v7596_v5 = vpop.permute.xlu0 %1723 }
 0x1ba   :  { %11329 = vst [vmem:[#allocation172_spill] sm:$0xff] %v7594_v17  ;;  %11330 = vst [vmem:[#allocation173_spill] sm:$0xff] %v7596_v5  ;;  %v2625_v5 = vsel %vm2623_vm5, %v6144_v49, 0  ;;  %vm5143_vm5 = vcmask 621568  }
 0x1bb   :  { %1845 = vrot.lane.b32.xlu1 %v6546_v12, %s6180_s28  ;;  %1839 = vrot.lane.b32.xlu0 %v6532_v44, %s6180_s28 }
 0x1bc   :  { %5888 = vmatpush3.bf16.msra.mxu0 %v2625_v5  ;;  %v6146_v5 = vld [vmem:[%s10745_s1] sm:$0xff]  }
 0x1bd   :  { %v7602_v14 = vpop.permute.xlu1 %1733  ;;  %v7604_v30 = vpop.permute.xlu0 %1727 }
 0x1be   :  { %11331 = vst [vmem:[#allocation174_spill] sm:$0xff] %v7602_v14  ;;  %11332 = vst [vmem:[#allocation175_spill] sm:$0xff] %v7604_v30  ;;  %v6145_v14 = vld [vmem:[%s10745_s1 + $0x8] sm:$0xff]   ;;  %s6182_s1 = smov 32  }
 0x1bf   :  { %1849 = vrot.lane.b32.xlu1 %v6315_v28, %s6180_s28  ;;  %1843 = vrot.lane.b32.xlu0 %v6579_v6, %s6180_s28 }
 0x1c0   :  { %5889 = vmatprep.subr.bf16.mxu0 %v6145_v14 }
 0x1c1   :  { %v7613_v17 = vpop.permute.xlu1 %1737  ;;  %v7615_v12 = vpop.permute.xlu0 %1731  ;;  %5890 = vmatpush3.bf16.msra.mxu0 %v6145_v14 }
 0x1c2   :  { %11333 = vst [vmem:[#allocation176_spill] sm:$0xff] %v7613_v17  ;;  %11334 = vst [vmem:[#allocation177_spill] sm:$0xff] %v7615_v12  ;;  %5891 = vmatprep.subr.bf16.mxu0 %v6146_v5 }
 0x1c3   :  { %1853 = vrot.lane.b32.xlu1 %v6642_v23, %s6180_s28  ;;  %1847 = vrot.lane.b32.xlu0 %v6258_v38, %s6180_s28  ;;  %v11382_v23 = vld [vmem:[#allocation106_spill] sm:$0xff] }
 0x1c5   :  { %v7624_v30 = vpop.permute.xlu1 %1741  ;;  %v7626_v17 = vpop.permute.xlu0 %1735  ;;  %5892 = vmatpush3.bf16.msra.mxu0 %v6146_v5 }
 0x1c6   :  { %11335 = vst [vmem:[#allocation178_spill] sm:$0xff] %v7624_v30  ;;  %11336 = vst [vmem:[#allocation179_spill] sm:$0xff] %v7626_v17 }
 0x1c7   :  { %1857 = vrot.lane.b32.xlu1 %v11153_v32, %s6180_s28  ;;  %1851 = vrot.lane.b32.xlu0 %v11156_v27, %s6180_s28  ;;  %v11378_v32 = vld [vmem:[#allocation57_spill] sm:$0xff] }
 0x1c9   :  { %v7635_v49 = vpop.permute.xlu1 %1745  ;;  %v7637_v12 = vpop.permute.xlu0 %1739 }
 0x1ca   :  { %11337 = vst [vmem:[#allocation180_spill] sm:$0xff] %v7635_v49  ;;  %11338 = vst [vmem:[#allocation181_spill] sm:$0xff] %v7637_v12 }
 0x1cb   :  { %1883 = vrot.lane.b32.xlu1 %v11217_v25, %s6181_s10  ;;  %1855 = vrot.lane.b32.xlu0 %v11164_v1, %s6180_s28 }
 0x1cd   :  { %v7643_v14 = vpop.permute.xlu1 %1749  ;;  %v7645_v30 = vpop.permute.xlu0 %1743 }
 0x1ce   :  { %11339 = vst [vmem:[#allocation182_spill] sm:$0xff] %v7643_v14  ;;  %11340 = vst [vmem:[#allocation183_spill] sm:$0xff] %v7645_v30  ;;  %v11351_v30 = vld [vmem:[#allocation6_spill] sm:$0xff] }
 0x1cf   :  { %1947 = vrot.lane.b32.xlu1 %v6961_v43, %s6182_s1  ;;  %1859 = vrot.lane.b32.xlu0 %v11169_v45, %s6180_s28  ;;  %v11372_v45 = vld [vmem:[#allocation50_spill] sm:$0xff] }
 0x1d1   :  { %v7651_v5 = vpop.permute.xlu1 %1753  ;;  %v7653_v49 = vpop.permute.xlu0 %1747 }
 0x1d2   :  { %11341 = vst [vmem:[#allocation184_spill] sm:$0xff] %v7651_v5  ;;  %11342 = vst [vmem:[#allocation185_spill] sm:$0xff] %v7653_v49 }
 0x1d3   :  { %1887 = vrot.lane.b32.xlu1 %v11220_v31, %s6181_s10  ;;  %1885 = vrot.lane.b32.xlu0 %v11225_v24, %s6181_s10 }
 0x1d5   :  { %v7659_v25 = vpop.permute.xlu1 %1757  ;;  %v7661_v14 = vpop.permute.xlu0 %1751 }
 0x1d6   :  { %11343 = vst [vmem:[#allocation186_spill] sm:$0xff] %v7661_v14  ;;  %v11346_v14 = vld [vmem:[#allocation23_spill] sm:$0xff] }
 0x1d7   :  { %1951 = vrot.lane.b32.xlu1 %v6975_v26, %s6182_s1  ;;  %1949 = vrot.lane.b32.xlu0 %v6940_v50, %s6182_s1 }
 0x1d9   :  { %v7667_v43 = vpop.permute.xlu1 %1761  ;;  %v7669_v5 = vpop.permute.xlu0 %1755 }
 0x1db   :  { %1891 = vrot.lane.b32.xlu1 %v11224_v10, %s6181_s10  ;;  %1889 = vrot.lane.b32.xlu0 %v11229_v58, %s6181_s10 }
 0x1dd   :  { %v7675_v24 = vpop.permute.xlu1 %1765  ;;  %v7677_v31 = vpop.permute.xlu0 %1759 }
 0x1df   :  { %1955 = vrot.lane.b32.xlu1 %v6989_v53, %s6182_s1  ;;  %1953 = vrot.lane.b32.xlu0 %v6954_v33, %s6182_s1 }
 0x1e1   :  { %v7683_v50 = vpop.permute.xlu1 %1769  ;;  %v7685_v26 = vpop.permute.xlu0 %1763 }
 0x1e3   :  { %1895 = vrot.lane.b32.xlu1 %v11228_v13, %s6181_s10  ;;  %1893 = vrot.lane.b32.xlu0 %v11233_v7, %s6181_s10 }
 0x1e5   :  { %v7691_v58 = vpop.permute.xlu1 %1773  ;;  %v7693_v10 = vpop.permute.xlu0 %1767 }
 0x1e7   :  { %1959 = vrot.lane.b32.xlu1 %v7003_v4, %s6182_s1  ;;  %1957 = vrot.lane.b32.xlu0 %v6968_v22, %s6182_s1 }
 0x1e9   :  { %v7699_v33 = vpop.permute.xlu1 %1777  ;;  %v7701_v53 = vpop.permute.xlu0 %1771 }
 0x1eb   :  { %1899 = vrot.lane.b32.xlu1 %v11232_v18, %s6181_s10  ;;  %1897 = vrot.lane.b32.xlu0 %v11237_v54, %s6181_s10 }
 0x1ed   :  { %v7707_v7 = vpop.permute.xlu1 %1781  ;;  %v7709_v13 = vpop.permute.xlu0 %1775 }
 0x1ef   :  { %1963 = vrot.lane.b32.xlu1 %v7019_v29, %s6182_s1  ;;  %1961 = vrot.lane.b32.xlu0 %v6982_v8, %s6182_s1 }
 0x1f1   :  { %v7715_v22 = vpop.permute.xlu1 %1785  ;;  %v7717_v4 = vpop.permute.xlu0 %1779 }
 0x1f3   :  { %1903 = vrot.lane.b32.xlu1 %v11236_v51, %s6181_s10  ;;  %1901 = vrot.lane.b32.xlu0 %v11241_v15, %s6181_s10  ;;  %v11347_v51 = vld [vmem:[#allocation18_spill] sm:$0xff] }
 0x1f5   :  { %v7723_v54 = vpop.permute.xlu1 %1789  ;;  %v7725_v18 = vpop.permute.xlu0 %1783 }
 0x1f6   :  { %11344 = vst [vmem:[#allocation187_spill] sm:$0xff] %v7723_v54 }
 0x1f7   :  { %1967 = vrot.lane.b32.xlu1 %v7037_v40, %s6182_s1  ;;  %1965 = vrot.lane.b32.xlu0 %v11290_v59, %s6182_s1 }
 0x1f9   :  { %v7731_v8 = vpop.permute.xlu1 %1793  ;;  %v7733_v29 = vpop.permute.xlu0 %1787 }
 0x1fa   :  { %11345 = vst [vmem:[#allocation188_spill] sm:$0xff] %v7731_v8  ;;  %v11381_v8 = vld [vmem:[#allocation72_spill] sm:$0xff] }
 0x1fb   :  { %1907 = vrot.lane.b32.xlu1 %v11346_v14, %s6181_s10  ;;  %1905 = vrot.lane.b32.xlu0 %v11347_v51, %s6181_s10  ;;  %v11352_v14 = vld [vmem:[#allocation21_spill] sm:$0xff] }
 0x1fd   :  { %v7739_v15 = vpop.permute.xlu1 %1797  ;;  %v7741_v49 = vpop.permute.xlu0 %1791 }
 0x1fe   :  { %11348 = vst [vmem:[#allocation189_spill] sm:$0xff] %v7739_v15  ;;  %v11375_v15 = vld [vmem:[#allocation52_spill] sm:$0xff] }
 0x1ff   :  { %1971 = vrot.lane.b32.xlu1 %v7051_v19, %s6182_s1  ;;  %1969 = vrot.lane.b32.xlu0 %v11294_v60, %s6182_s1 }
 0x201   :  { %v7747_v40 = vpop.permute.xlu1 %1801  ;;  %v7749_v59 = vpop.permute.xlu0 %1795 }
 0x202   :  { %11349 = vst [vmem:[#allocation190_spill] sm:$0xff] %v7747_v40  ;;  %11350 = vst [vmem:[#allocation191_spill] sm:$0xff] %v7749_v59  ;;  %v11357_v40 = vld [vmem:[#allocation35_spill] sm:$0xff] }
 0x203   :  { %1911 = vrot.lane.b32.xlu1 %v11351_v30, %s6181_s10  ;;  %1909 = vrot.lane.b32.xlu0 %v11352_v14, %s6181_s10  ;;  %v11358_v30 = vld [vmem:[#allocation9_spill] sm:$0xff] }
 0x205   :  { %v7755_v51 = vpop.permute.xlu1 %1805  ;;  %v7757_v12 = vpop.permute.xlu0 %1799 }
 0x206   :  { %11353 = vst [vmem:[#allocation192_spill] sm:$0xff] %v7755_v51  ;;  %11354 = vst [vmem:[#allocation193_spill] sm:$0xff] %v7757_v12  ;;  %v11370_v12 = vld [vmem:[#allocation46_spill] sm:$0xff] }
 0x207   :  { %1975 = vrot.lane.b32.xlu1 %v11293_v11, %s6182_s1  ;;  %1973 = vrot.lane.b32.xlu0 %v11298_v37, %s6182_s1 }
 0x209   :  { %v7763_v19 = vpop.permute.xlu1 %1809  ;;  %v7765_v60 = vpop.permute.xlu0 %1803 }
 0x20a   :  { %11355 = vst [vmem:[#allocation194_spill] sm:$0xff] %v7763_v19  ;;  %11356 = vst [vmem:[#allocation195_spill] sm:$0xff] %v7765_v60  ;;  %v11363_v19 = vld [vmem:[#allocation43_spill] sm:$0xff] }
 0x20b   :  { %1915 = vrot.lane.b32.xlu1 %v11357_v40, %s6181_s10  ;;  %1913 = vrot.lane.b32.xlu0 %v11358_v30, %s6181_s10  ;;  %v11364_v40 = vld [vmem:[#allocation32_spill] sm:$0xff] }
 0x20d   :  { %v7771_v14 = vpop.permute.xlu1 %1813  ;;  %v7773_v51 = vpop.permute.xlu0 %1807 }
 0x20e   :  { %11359 = vst [vmem:[#allocation196_spill] sm:$0xff] %v7771_v14  ;;  %11360 = vst [vmem:[#allocation197_spill] sm:$0xff] %v7773_v51  ;;  %v11369_v51 = vld [vmem:[#allocation47_spill] sm:$0xff] }
 0x20f   :  { %1979 = vrot.lane.b32.xlu1 %v11297_v16, %s6182_s1  ;;  %1977 = vrot.lane.b32.xlu0 %v6928_v20, %s6182_s1 }
 0x211   :  { %v7779_v37 = vpop.permute.xlu1 %1817  ;;  %v7781_v11 = vpop.permute.xlu0 %1811 }
 0x212   :  { %11361 = vst [vmem:[#allocation198_spill] sm:$0xff] %v7779_v37  ;;  %11362 = vst [vmem:[#allocation199_spill] sm:$0xff] %v7781_v11  ;;  %v11366_v37 = vld [vmem:[#allocation40_spill] sm:$0xff] }
 0x213   :  { %1919 = vrot.lane.b32.xlu1 %v11363_v19, %s6181_s10  ;;  %1917 = vrot.lane.b32.xlu0 %v11364_v40, %s6181_s10  ;;  %v11367_v19 = vld [vmem:[#allocation38_spill] sm:$0xff] }
 0x215   :  { %v7787_v30 = vpop.permute.xlu1 %1821  ;;  %v7789_v14 = vpop.permute.xlu0 %1815 }
 0x216   :  { %11365 = vst [vmem:[#allocation200_spill] sm:$0xff] %v7789_v14  ;;  %v11368_v14 = vld [vmem:[#allocation44_spill] sm:$0xff] }
 0x217   :  { %1983 = vrot.lane.b32.xlu1 %v7101_v52, %s6182_s1  ;;  %1981 = vrot.lane.b32.xlu0 %v11304_v35, %s6182_s1 }
 0x219   :  { %v7795_v20 = vpop.permute.xlu1 %1825  ;;  %v1820_v16 = vpop.permute.xlu0 %1819 }
 0x21b   :  { %1861 = vrot.lane.b32.xlu1 %v11366_v37, %s6180_s28  ;;  %1921 = vrot.lane.b32.xlu0 %v11367_v19, %s6181_s10 }
 0x21d   :  { %v7801_v40 = vpop.permute.xlu1 %1829  ;;  %v7803_v11 = vpop.permute.xlu0 %1823 }
 0x21f   :  { %1925 = vrot.lane.b32.xlu1 %v11368_v14, %s6181_s10  ;;  %1985 = vrot.lane.b32.xlu0 %v11307_v0, %s6182_s1  ;;  %v11371_v14 = vld [vmem:[#allocation51_spill] sm:$0xff] }
 0x221   :  { %v7809_v35 = vpop.permute.xlu1 %1833  ;;  %v7811_v52 = vpop.permute.xlu0 %1827 }
 0x223   :  { %1989 = vrot.lane.b32.xlu1 %v11310_v2, %s6182_s1  ;;  %1923 = vrot.lane.b32.xlu0 %v11369_v51, %s6181_s10  ;;  %v11373_v2 = vld [vmem:[#allocation49_spill] sm:$0xff] }
 0x225   :  { %v7817_v19 = vpop.permute.xlu1 %1837  ;;  %v7819_v60 = vpop.permute.xlu0 %1831 }
 0x227   :  { %1865 = vrot.lane.b32.xlu1 %v11370_v12, %s6180_s28  ;;  %1987 = vrot.lane.b32.xlu0 %v11371_v14, %s6182_s1  ;;  %v11374_v12 = vld [vmem:[#allocation53_spill] sm:$0xff] }
 0x229   :  { %v7825_v0 = vpop.permute.xlu1 %1841  ;;  %v7827_v17 = vpop.permute.xlu0 %1835 }
 0x22b   :  { %1929 = vrot.lane.b32.xlu1 %v11372_v45, %s6181_s10  ;;  %1863 = vrot.lane.b32.xlu0 %v11373_v2, %s6180_s28  ;;  %v11376_v45 = vld [vmem:[#allocation80_spill] sm:$0xff] }
 0x22d   :  { %v7833_v51 = vpop.permute.xlu1 %1845  ;;  %v7835_v37 = vpop.permute.xlu0 %1839 }
 0x22f   :  { %1993 = vrot.lane.b32.xlu1 %v11313_v48, %s6182_s1  ;;  %1927 = vrot.lane.b32.xlu0 %v11374_v12, %s6181_s10  ;;  %v11379_v48 = vld [vmem:[#allocation54_spill] sm:$0xff] }
 0x231   :  { %v7841_v14 = vpop.permute.xlu1 %1849  ;;  %v7843_v59 = vpop.permute.xlu0 %1843 }
 0x233   :  { %1869 = vrot.lane.b32.xlu1 %v11375_v15, %s6180_s28  ;;  %1991 = vrot.lane.b32.xlu0 %v11376_v45, %s6182_s1  ;;  %v2013_v15 = vsel %vm2011_vm6, %v6258_v38, %v11381_v8 }
 0x235   :  { %v7849_v2 = vpop.permute.xlu1 %1853  ;;  %v7851_v1 = vpop.permute.xlu0 %1847 }
 0x236   :  { %11377 = vst [vmem:[#allocation51_spill] sm:$0xff] %v7849_v2  ;;  %v11383_v2 = vld [vmem:[#allocation138_spill] sm:$0xff] }
 0x237   :  { %1933 = vrot.lane.b32.xlu1 %v11378_v32, %s6181_s10  ;;  %1867 = vrot.lane.b32.xlu0 %v11379_v48, %s6180_s28  ;;  %v2078_v32 = vsel %vm2076_vm7, %v2013_v15, %v11382_v23  ;;  %v11386_v23 = vld [vmem:[#allocation56_spill] sm:$0xff] }
 0x238   :  { %v2143_v48 = vsel %vm2141_vm8, %v2078_v32, %v11383_v2  ;;  %v11387_v32 = vld [vmem:[#allocation55_spill] sm:$0xff] }
 0x239   :  { %v7857_v12 = vpop.permute.xlu1 %1857  ;;  %v7862_v45 = vpop.permute.xlu0 %1851  ;;  %v2208_v38 = vsel %vm2206_vm9, %v2143_v48, %v7532_v9 }
 0x23a   :  { %11380 = vst [vmem:[#allocation80_spill] sm:$0xff] %v7857_v12  ;;  %v11384_v12 = vld [vmem:[#allocation58_spill] sm:$0xff]  ;;  %v2273_v8 = vsel %vm2271_vm10, %v2208_v38, %v7669_v5  ;;  %v11389_v5 = vld [vmem:[#allocation61_spill] sm:$0xff] }
 0x23b   :  { %1997 = vrot.lane.b32.xlu1 %v11315_v47, %s6182_s1  ;;  %1931 = vrot.lane.b32.xlu0 %v11384_v12, %s6181_s10  ;;  %v2338_v15 = vsel %vm2336_vm11, %v2273_v8, %v1820_v16  ;;  %v11390_v38 = vld [vmem:[#allocation69_spill] sm:$0xff]  ;;  %v11391_v8 = vld [vmem:[#allocation26_spill] sm:$0xff] }
 0x23c   :  { %v2017_v16 = vsel %vm2011_vm6, %v6268_v46, %v11390_v38 }
 0x23d   :  { %v1884_v54 = vpop.permute.xlu1 %1883  ;;  %v7876_v47 = vpop.permute.xlu0 %1855 }
 0x23e   :  { %11385 = vst [vmem:[#allocation72_spill] sm:$0xff] %v7876_v47  ;;  %v2403_v2 = vsel %vm2401_vm12, %v2338_v15, %v1884_v54  ;;  %v11396_v47 = vld [vmem:[#allocation135_spill] sm:$0xff] }
 0x23f   :  { %1873 = vrot.lane.b32.xlu1 %v11386_v23, %s6180_s28  ;;  %1995 = vrot.lane.b32.xlu0 %v11387_v32, %s6182_s1  ;;  %v2015_v32 = vsel %vm2011_vm6, %v6315_v28, %v11391_v8  ;;  %v11392_v23 = vld [vmem:[#allocation108_spill] sm:$0xff] }
 0x240   :  { %v2082_v54 = vsel %vm2076_vm7, %v2017_v16, %v11392_v23  ;;  %v11397_v23 = vld [vmem:[#allocation36_spill] sm:$0xff] }
 0x241   :  { %v1948_v12 = vpop.permute.xlu1 %1947  ;;  %v7885_v48 = vpop.permute.xlu0 %1859 }
 0x242   :  { %v2468_v9 = vsel %vm2466_vm13, %v2403_v2, %v1948_v12  ;;  %11388 = vst [vmem:[#allocation106_spill] sm:$0xff] %v7885_v48  ;;  %v11393_v12 = vld [vmem:[#allocation60_spill] sm:$0xff]  ;;  %v11394_v2 = vld [vmem:[#allocation103_spill] sm:$0xff] }
 0x243   :  { %1937 = vrot.lane.b32.xlu1 %v11389_v5, %s6181_s10  ;;  %5893 = vmatprep.mubr.msk.bf16.mxu0 %vm2558_vm14, %v2468_v9  ;;  %v2080_v5 = vsel %vm2076_vm7, %v2015_v32, %v11394_v2  ;;  %v11395_v48 = vld [vmem:[#allocation140_spill] sm:$0xff] }
 0x244   :  { %1871 = vrot.lane.b32.xlu0 %v11393_v12, %s6180_s28  ;;  %v2147_v9 = vsel %vm2141_vm8, %v2082_v54, %v11395_v48  ;;  %v2145_v46 = vsel %vm2141_vm8, %v2080_v5, %v11396_v47  ;;  %v11398_v47 = vld [vmem:[#allocation63_spill] sm:$0xff] }
 0x245   :  { %v1888_v15 = vpop.permute.xlu1 %1887  ;;  %v2212_v38 = vsel %vm2206_vm9, %v2147_v9, %v7540_v34  ;;  %v1886_v28 = vpop.permute.xlu0 %1885  ;;  %v2210_v16 = vsel %vm2206_vm9, %v2145_v46, %v11397_v23  ;;  %v11399_v9 = vld [vmem:[#allocation62_spill] sm:$0xff] }
 0x246   :  { %v2277_v8 = vsel %vm2271_vm10, %v2212_v38, %v7677_v31  ;;  %v2275_v32 = vsel %vm2271_vm10, %v2210_v16, %v7659_v25  ;;  %v11400_v25 = vld [vmem:[#allocation29_spill] sm:$0xff]  ;;  %v11402_v23 = vld [vmem:[#allocation110_spill] sm:$0xff] }
 0x247   :  { %2001 = vrot.lane.b32.xlu1 %v7144_v61, %s6182_s1  ;;  %v2342_v48 = vsel %vm2336_vm11, %v2277_v8, %v7803_v11  ;;  %v2340_v5 = vsel %vm2336_vm11, %v2275_v32, %v7787_v30  ;;  %v2021_v11 = vsel %vm2011_vm6, %v6340_v63, %v11400_v25  ;;  %v11401_v38 = vld [vmem:[#allocation73_spill] sm:$0xff] }
 0x248   :  { %1935 = vrot.lane.b32.xlu0 %v11398_v47, %s6181_s10  ;;  %v2407_v61 = vsel %vm2401_vm12, %v2342_v48, %v1888_v15  ;;  %v2405_v54 = vsel %vm2401_vm12, %v2340_v5, %v1886_v28  ;;  %v2019_v30 = vsel %vm2011_vm6, %v6277_v57, %v11401_v38  ;;  %v2086_v15 = vsel %vm2076_vm7, %v2021_v11, %v11402_v23  ;;  %v11403_v28 = vld [vmem:[#allocation83_spill] sm:$0xff]  ;;  %v11404_v8 = vld [vmem:[#allocation105_spill] sm:$0xff]  ;;  %v11405_v48 = vld [vmem:[#allocation142_spill] sm:$0xff] }
 0x249   :  { %v1952_v34 = vpop.permute.xlu1 %1951  ;;  %v1950_v2 = vpop.permute.xlu0 %1949  ;;  %v2084_v32 = vsel %vm2076_vm7, %v2019_v30, %v11404_v8  ;;  %v2151_v63 = vsel %vm2141_vm8, %v2086_v15, %v11405_v48  ;;  %v11409_v38 = vld [vmem:[#allocation64_spill] sm:$0xff]  ;;  %v11410_v8 = vld [vmem:[#allocation82_spill] sm:$0xff] }
 0x24a   :  { %v2472_v31 = vsel %vm2466_vm13, %v2407_v61, %v1952_v34  ;;  %v2470_v46 = vsel %vm2466_vm13, %v2405_v54, %v1950_v2  ;;  %v11406_v34 = vld [vmem:[#allocation137_spill] sm:$0xff]  ;;  %v2216_v5 = vsel %vm2206_vm9, %v2151_v63, %v7548_v36  ;;  %v11412_v48 = vld [vmem:[#allocation24_spill] sm:$0xff] }
 0x24b   :  { %1877 = vrot.lane.b32.xlu1 %v11399_v9, %s6180_s28  ;;  %5894 = vmatmul.mubr.msk.bf16.vlgmr.msra.gmra.mxu0 %vm2558_vm14, %v2470_v46  ;;  %v2149_v57 = vsel %vm2141_vm8, %v2084_v32, %v11406_v34  ;;  %v11407_v54 = vld [vmem:[#allocation65_spill] sm:$0xff]  ;;  %v2281_v11 = vsel %vm2271_vm10, %v2216_v5, %v7685_v26  ;;  %v11413_v63 = vld [vmem:[#allocation112_spill] sm:$0xff]  ;;  %v11414_v34 = vld [vmem:[#allocation66_spill] sm:$0xff] }
 0x24c   :  { %1999 = vrot.lane.b32.xlu0 %v11403_v28, %s6182_s1  ;;  %5897 = vmatprep.mubr.msk.bf16.mxu0 %vm2558_vm14, %v2472_v31  ;;  %v11408_v2 = vld [vmem:[#allocation77_spill] sm:$0xff]  ;;  %v2346_v31 = vsel %vm2336_vm11, %v2281_v11, %v7811_v52  ;;  %v11415_v5 = vld [vmem:[#allocation107_spill] sm:$0xff] }
 0x24d   :  { %v1892_v16 = vpop.permute.xlu1 %1891  ;;  %v1890_v61 = vpop.permute.xlu0 %1889  ;;  %v2214_v25 = vsel %vm2206_vm9, %v2149_v57, %v11408_v2  ;;  %v11416_v2 = vld [vmem:[#allocation144_spill] sm:$0xff]  ;;  %v11418_v11 = vld [vmem:[#allocation163_spill] sm:$0xff] }
 0x24e   :  { %v2279_v46 = vsel %vm2271_vm10, %v2214_v25, %v7667_v43  ;;  %v2411_v23 = vsel %vm2401_vm12, %v2346_v31, %v1892_v16  ;;  %v11411_v43 = vld [vmem:[#allocation45_spill] sm:$0xff]  ;;  %v11417_v25 = vld [vmem:[#allocation139_spill] sm:$0xff] }
 0x24f   :  { %1941 = vrot.lane.b32.xlu1 %v11407_v54, %s6181_s10  ;;  %v2344_v30 = vsel %vm2336_vm11, %v2279_v46, %v7795_v20  ;;  %v2025_v52 = vsel %vm2011_vm6, %v6400_v3, %v11411_v43  ;;  %v2023_v20 = vsel %vm2011_vm6, %v6334_v55, %v11412_v48 }
 0x250   :  { %1875 = vrot.lane.b32.xlu0 %v11409_v38, %s6180_s28  ;;  %v2409_v15 = vsel %vm2401_vm12, %v2344_v30, %v1890_v61  ;;  %v2090_v16 = vsel %vm2076_vm7, %v2025_v52, %v11413_v63  ;;  %v2088_v61 = vsel %vm2076_vm7, %v2023_v20, %v11415_v5  ;;  %v11420_v30 = vld [vmem:[#allocation48_spill] sm:$0xff]  ;;  %v11422_v63 = vld [vmem:[#allocation27_spill] sm:$0xff] }
 0x251   :  { %v1956_v36 = vpop.permute.xlu1 %1955  ;;  %v1954_v28 = vpop.permute.xlu0 %1953  ;;  %v2155_v3 = vsel %vm2141_vm8, %v2090_v16, %v11416_v2  ;;  %v2153_v55 = vsel %vm2141_vm8, %v2088_v61, %v11417_v25  ;;  %v11424_v5 = vld [vmem:[#allocation39_spill] sm:$0xff]  ;;  %v11425_v61 = vld [vmem:[#allocation114_spill] sm:$0xff]  ;;  %v11426_v2 = vld [vmem:[#allocation25_spill] sm:$0xff] }
 0x252   :  { %v2476_v26 = vsel %vm2466_vm13, %v2411_v23, %v1956_v36  ;;  %v2474_v32 = vsel %vm2466_vm13, %v2409_v15, %v1954_v28  ;;  %v2220_v46 = vsel %vm2206_vm9, %v2155_v3, %v11418_v11  ;;  %v11419_v36 = vld [vmem:[#allocation22_spill] sm:$0xff]  ;;  %v2218_v23 = vsel %vm2206_vm9, %v2153_v55, %v11420_v30  ;;  %v11427_v25 = vld [vmem:[#allocation109_spill] sm:$0xff] }
 0x253   :  { %2005 = vrot.lane.b32.xlu1 %v11410_v8, %s6182_s1  ;;  %5898 = vmatmul.mubr.msk.bf16.gmra.mxu0 %vm2558_vm14, %v2474_v32  ;;  %v2285_v15 = vsel %vm2271_vm10, %v2220_v46, %v7693_v10  ;;  %v2283_v28 = vsel %vm2271_vm10, %v2218_v23, %v7675_v24  ;;  %v11421_v8 = vld [vmem:[#allocation86_spill] sm:$0xff]  ;;  %v11429_v46 = vld [vmem:[#allocation141_spill] sm:$0xff] }
 0x254   :  { %1939 = vrot.lane.b32.xlu0 %v11414_v34, %s6181_s10  ;;  %5901 = vmatprep.mubr.msk.bf16.mxu0 %vm2558_vm14, %v2476_v26  ;;  %v2350_v26 = vsel %vm2336_vm11, %v2285_v15, %v7819_v60  ;;  %v2348_v52 = vsel %vm2336_vm11, %v2283_v28, %v7801_v40  ;;  %v11423_v24 = vld [vmem:[#allocation78_spill] sm:$0xff]  ;;  %v2027_v40 = vsel %vm2011_vm6, %v6383_v41, %v11424_v5  ;;  %v11432_v28 = vld [vmem:[#allocation161_spill] sm:$0xff] }
 0x255   :  { %v1896_v57 = vpop.permute.xlu1 %1895  ;;  %v1894_v31 = vpop.permute.xlu0 %1893  ;;  %v2029_v60 = vsel %vm2011_vm6, %v6439_v56, %v11423_v24  ;;  %v2092_v55 = vsel %vm2076_vm7, %v2027_v40, %v11427_v25  ;;  %v11428_v11 = vld [vmem:[#allocation146_spill] sm:$0xff]  ;;  %v11438_v25 = vld [vmem:[#allocation111_spill] sm:$0xff] }
 0x256   :  { %v2415_v32 = vsel %vm2401_vm12, %v2350_v26, %v1896_v57  ;;  %v2413_v48 = vsel %vm2401_vm12, %v2348_v52, %v1894_v31  ;;  %v2094_v57 = vsel %vm2076_vm7, %v2029_v60, %v11425_v61  ;;  %v2157_v41 = vsel %vm2141_vm8, %v2092_v55, %v11429_v46  ;;  %v11430_v31 = vld [vmem:[#allocation165_spill] sm:$0xff]  ;;  %v11431_v15 = vld [vmem:[#allocation74_spill] sm:$0xff]  ;;  %v11436_v61 = vld [vmem:[#allocation116_spill] sm:$0xff] }
 0x257   :  { %1881 = vrot.lane.b32.xlu1 %v11419_v36, %s6180_s28  ;;  %v2159_v56 = vsel %vm2141_vm8, %v2094_v57, %v11428_v11  ;;  %v2222_v26 = vsel %vm2206_vm9, %v2157_v41, %v11432_v28  ;;  %v11435_v5 = vld [vmem:[#allocation42_spill] sm:$0xff]  ;;  %v11437_v57 = vld [vmem:[#allocation33_spill] sm:$0xff]  ;;  %v11439_v11 = vld [vmem:[#allocation148_spill] sm:$0xff] }
 0x258   :  { %2003 = vrot.lane.b32.xlu0 %v11421_v8, %s6182_s1  ;;  %v2224_v30 = vsel %vm2206_vm9, %v2159_v56, %v11430_v31  ;;  %v2031_v40 = vsel %vm2011_vm6, %v6422_v42, %v11435_v5  ;;  %v11440_v56 = vld [vmem:[#allocation143_spill] sm:$0xff]  ;;  %v11447_v5 = vld [vmem:[#allocation150_spill] sm:$0xff] }
 0x259   :  { %v1960_v43 = vpop.permute.xlu1 %1959  ;;  %v1958_v20 = vpop.permute.xlu0 %1957  ;;  %v2289_v8 = vsel %vm2271_vm10, %v2224_v30, %v7701_v53  ;;  %v2096_v55 = vsel %vm2076_vm7, %v2031_v40, %v11438_v25  ;;  %v11441_v46 = vld [vmem:[#allocation167_spill] sm:$0xff]  ;;  %v11442_v30 = vld [vmem:[#allocation162_spill] sm:$0xff] }
 0x25a   :  { %v2480_v10 = vsel %vm2466_vm13, %v2415_v32, %v1960_v43  ;;  %v2478_v16 = vsel %vm2466_vm13, %v2413_v48, %v1958_v20  ;;  %v2287_v43 = vsel %vm2271_vm10, %v2222_v26, %v7683_v50  ;;  %v2354_v52 = vsel %vm2336_vm11, %v2289_v8, %v7827_v17  ;;  %v11433_v32 = vld [vmem:[#allocation30_spill] sm:$0xff] }
 0x25b   :  { %1945 = vrot.lane.b32.xlu1 %v11422_v63, %s6181_s10  ;;  %5902 = vmatmul.mubr.msk.bf16.gmra.mxu0 %vm2558_vm14, %v2478_v16  ;;  %v2352_v20 = vsel %vm2336_vm11, %v2287_v43, %v7809_v35  ;;  %v11434_v16 = vld [vmem:[#allocation59_spill] sm:$0xff]  ;;  %v2161_v42 = vsel %vm2141_vm8, %v2096_v55, %v11440_v56 }
 0x25c   :  { %1879 = vrot.lane.b32.xlu0 %v11426_v2, %s6180_s28  ;;  %5905 = vmatprep.mubr.msk.bf16.mxu0 %vm2558_vm14, %v2480_v10  ;;  %v2033_v50 = vsel %vm2011_vm6, %v6488_v21, %v11434_v16 }
 0x25d   :  { %v1900_v3 = vpop.permute.xlu1 %1899  ;;  %v1898_v23 = vpop.permute.xlu0 %1897  ;;  %v2098_v35 = vsel %vm2076_vm7, %v2033_v50, %v11436_v61  ;;  %v11446_v50 = vld [vmem:[#allocation113_spill] sm:$0xff] }
 0x25e   :  { %v2419_v10 = vsel %vm2401_vm12, %v2354_v52, %v1900_v3  ;;  %v2417_v24 = vsel %vm2401_vm12, %v2352_v20, %v1898_v23  ;;  %v2163_v21 = vsel %vm2141_vm8, %v2098_v35, %v11439_v11  ;;  %v2226_v23 = vsel %vm2206_vm9, %v2161_v42, %v11442_v30  ;;  %v11449_v35 = vld [vmem:[#allocation169_spill] sm:$0xff] }
 0x25f   :  { %2009 = vrot.lane.b32.xlu1 %v11431_v15, %s6182_s1  ;;  %v2228_v41 = vsel %vm2206_vm9, %v2163_v21, %v11441_v46  ;;  %v2291_v28 = vsel %vm2271_vm10, %v2226_v23, %v7691_v58  ;;  %v11451_v23 = vld [vmem:[#allocation87_spill] sm:$0xff] }
 0x260   :  { %1943 = vrot.lane.b32.xlu0 %v11433_v32, %s6181_s10  ;;  %v2293_v15 = vsel %vm2271_vm10, %v2228_v41, %v7709_v13  ;;  %v2356_v43 = vsel %vm2336_vm11, %v2291_v28, %v7817_v19  ;;  %v11453_v28 = vld [vmem:[#allocation120_spill] sm:$0xff] }
 0x261   :  { %v1964_v48 = vpop.permute.xlu1 %1963  ;;  %v1962_v60 = vpop.permute.xlu0 %1961  ;;  %v2358_v26 = vsel %vm2336_vm11, %v2293_v15, %v7835_v37  ;;  %v11452_v15 = vld [vmem:[#allocation81_spill] sm:$0xff] }
 0x262   :  { %v2484_v53 = vsel %vm2466_vm13, %v2419_v10, %v1964_v48  ;;  %v2482_v17 = vsel %vm2466_vm13, %v2417_v24, %v1962_v60  ;;  %v11443_v24 = vld [vmem:[#allocation84_spill] sm:$0xff]  ;;  %v11444_v60 = vld [vmem:[#allocation79_spill] sm:$0xff] }
 0x263   :  { %5906 = vmatmul.mubr.msk.bf16.gmra.mxu0 %vm2558_vm14, %v2482_v17  ;;  %v2037_v13 = vsel %vm2011_vm6, %v6532_v44, %v11443_v24  ;;  %v2035_v37 = vsel %vm2011_vm6, %v6469_v39, %v11444_v60  ;;  %v11448_v44 = vld [vmem:[#allocation145_spill] sm:$0xff] }
 0x264   :  { %2007 = vrot.lane.b32.xlu0 %v11437_v57, %s6182_s1  ;;  %5909 = vmatprep.mubr.msk.bf16.mxu0 %vm2558_vm14, %v2484_v53  ;;  %v11445_v53 = vld [vmem:[#allocation118_spill] sm:$0xff]  ;;  %v2100_v17 = vsel %vm2076_vm7, %v2035_v37, %v11446_v50 }
 0x265   :  { %v1904_v3 = vpop.permute.xlu1 %1903  ;;  %v1902_v31 = vpop.permute.xlu0 %1901  ;;  %v2102_v19 = vsel %vm2076_vm7, %v2037_v13, %v11445_v53  ;;  %v2165_v61 = vsel %vm2141_vm8, %v2100_v17, %v11448_v44  ;;  %v11458_v13 = vld [vmem:[#allocation166_spill] sm:$0xff]  ;;  %v11459_v44 = vld [vmem:[#allocation89_spill] sm:$0xff] }
 0x266   :  { %v2423_v52 = vsel %vm2401_vm12, %v2358_v26, %v1904_v3  ;;  %v2421_v48 = vsel %vm2401_vm12, %v2356_v43, %v1902_v31  ;;  %v2167_v40 = vsel %vm2141_vm8, %v2102_v19, %v11447_v5  ;;  %v11450_v3 = vld [vmem:[#allocation164_spill] sm:$0xff] }
 0x267   :  { %v2232_v39 = vsel %vm2206_vm9, %v2167_v40, %v11449_v35  ;;  %v2230_v25 = vsel %vm2206_vm9, %v2165_v61, %v11450_v3  ;;  %v11460_v61 = vld [vmem:[#allocation85_spill] sm:$0xff]  ;;  %v11461_v35 = vld [vmem:[#allocation19_spill] sm:$0xff] }
 0x268   :  { %v2297_v55 = vsel %vm2271_vm10, %v2232_v39, %v7717_v4  ;;  %v2295_v11 = vsel %vm2271_vm10, %v2230_v25, %v7699_v33  ;;  %v2041_v4 = vsel %vm2011_vm6, %v6579_v6, %v11451_v23  ;;  %v11456_v6 = vld [vmem:[#allocation147_spill] sm:$0xff]  ;;  %v11462_v39 = vld [vmem:[#allocation122_spill] sm:$0xff]  ;;  %v11463_v3 = vld [vmem:[#allocation117_spill] sm:$0xff] }
 0x269   :  { %v1968_v8 = vpop.permute.xlu1 %1967  ;;  %v1966_v20 = vpop.permute.xlu0 %1965  ;;  %v2362_v21 = vsel %vm2336_vm11, %v2297_v55, %v7843_v59  ;;  %v2360_v42 = vsel %vm2336_vm11, %v2295_v11, %v7825_v0  ;;  %v2039_v59 = vsel %vm2011_vm6, %v6510_v62, %v11452_v15  ;;  %v2106_v0 = vsel %vm2076_vm7, %v2041_v4, %v11453_v28  ;;  %v11464_v55 = vld [vmem:[#allocation154_spill] sm:$0xff] }
 0x26a   :  { %v2488_v10 = vsel %vm2466_vm13, %v2423_v52, %v1968_v8  ;;  %v2486_v58 = vsel %vm2466_vm13, %v2421_v48, %v1966_v20  ;;  %v11454_v8 = vld [vmem:[#allocation115_spill] sm:$0xff]  ;;  %v11455_v52 = vld [vmem:[#allocation152_spill] sm:$0xff] }
 0x26b   :  { %5910 = vmatmul.mubr.msk.bf16.gmra.mxu0 %vm2558_vm14, %v2486_v58  ;;  %v2104_v43 = vsel %vm2076_vm7, %v2039_v59, %v11454_v8  ;;  %v2171_v48 = vsel %vm2141_vm8, %v2106_v0, %v11455_v52  ;;  %v11468_v8 = vld [vmem:[#allocation91_spill] sm:$0xff]  ;;  %v11470_v52 = vld [vmem:[#allocation124_spill] sm:$0xff] }
 0x26c   :  { %5913 = vmatprep.mubr.msk.bf16.mxu0 %vm2558_vm14, %v2488_v10  ;;  %v2169_v20 = vsel %vm2141_vm8, %v2104_v43, %v11456_v6  ;;  %v11457_v10 = vld [vmem:[#allocation171_spill] sm:$0xff]  ;;  %v11469_v43 = vld [vmem:[#allocation88_spill] sm:$0xff] }
 0x26d   :  { %v1908_v16 = vpop.permute.xlu1 %1907  ;;  %v1906_v57 = vpop.permute.xlu0 %1905  ;;  %v2236_v62 = vsel %vm2206_vm9, %v2171_v48, %v11457_v10  ;;  %v2234_v58 = vsel %vm2206_vm9, %v2169_v20, %v11458_v13  ;;  %v11471_v6 = vld [vmem:[#allocation119_spill] sm:$0xff] }
 0x26e   :  { %v2427_v46 = vsel %vm2401_vm12, %v2362_v21, %v1908_v16  ;;  %v2425_v41 = vsel %vm2401_vm12, %v2360_v42, %v1906_v57  ;;  %v2301_v60 = vsel %vm2271_vm10, %v2236_v62, %v7725_v18  ;;  %v2299_v37 = vsel %vm2271_vm10, %v2234_v58, %v7707_v7  ;;  %v11472_v10 = vld [vmem:[#allocation155_spill] sm:$0xff] }
 0x26f   :  { %v2366_v53 = vsel %vm2336_vm11, %v2301_v60, %v7851_v1  ;;  %v2364_v16 = vsel %vm2336_vm11, %v2299_v37, %v7833_v51  ;;  %v2045_v18 = vsel %vm2011_vm6, %v11426_v2, %v11459_v44  ;;  %v2043_v1 = vsel %vm2011_vm6, %v11461_v35, %v11460_v61  ;;  %v11465_v2 = vld [vmem:[#allocation149_spill] sm:$0xff]  ;;  %v11474_v13 = vld [vmem:[#allocation175_spill] sm:$0xff]  ;;  %v11475_v60 = vld [vmem:[#allocation170_spill] sm:$0xff] }
 0x270   :  { %v2110_v51 = vsel %vm2076_vm7, %v2045_v18, %v11462_v39  ;;  %v2108_v25 = vsel %vm2076_vm7, %v2043_v1, %v11463_v3  ;;  %v11480_v39 = vld [vmem:[#allocation28_spill] sm:$0xff]  ;;  %v11481_v3 = vld [vmem:[#allocation121_spill] sm:$0xff] }
 0x271   :  { %v1972_v56 = vpop.permute.xlu1 %1971  ;;  %v1970_v31 = vpop.permute.xlu0 %1969  ;;  %v2175_v11 = vsel %vm2141_vm8, %v2110_v51, %v11464_v55  ;;  %v2173_v21 = vsel %vm2141_vm8, %v2108_v25, %v11465_v2  ;;  %v11482_v55 = vld [vmem:[#allocation153_spill] sm:$0xff] }
 0x272   :  { %v2492_v30 = vsel %vm2466_vm13, %v2427_v46, %v1972_v56  ;;  %v2490_v33 = vsel %vm2466_vm13, %v2425_v41, %v1970_v31  ;;  %v11466_v56 = vld [vmem:[#allocation173_spill] sm:$0xff]  ;;  %v11467_v41 = vld [vmem:[#allocation168_spill] sm:$0xff] }
 0x273   :  { %5914 = vmatmul.mubr.msk.bf16.gmra.mxu0 %vm2558_vm14, %v2490_v33  ;;  %v2240_v42 = vsel %vm2206_vm9, %v2175_v11, %v11466_v56  ;;  %v2238_v31 = vsel %vm2206_vm9, %v2173_v21, %v11467_v41  ;;  %v11483_v21 = vld [vmem:[#allocation172_spill] sm:$0xff] }
 0x274   :  { %5917 = vmatprep.mubr.msk.bf16.mxu0 %vm2558_vm14, %v2492_v30  ;;  %v2305_v30 = vsel %vm2271_vm10, %v2240_v42, %v7733_v29  ;;  %v2303_v23 = vsel %vm2271_vm10, %v2238_v31, %v7715_v22  ;;  %v2049_v29 = vsel %vm2011_vm6, %v11156_v27, %v11468_v8  ;;  %v11473_v27 = vld [vmem:[#allocation151_spill] sm:$0xff]  ;;  %v11484_v42 = vld [vmem:[#allocation188_spill] sm:$0xff] }
 0x275   :  { %v1912_v26 = vpop.permute.xlu1 %1911  ;;  %v1910_v24 = vpop.permute.xlu0 %1909  ;;  %v2370_v4 = vsel %vm2336_vm11, %v2305_v30, %v7862_v45  ;;  %v2368_v15 = vsel %vm2336_vm11, %v2303_v23, %v7841_v14  ;;  %v2047_v45 = vsel %vm2011_vm6, %v11419_v36, %v11469_v43  ;;  %v2114_v14 = vsel %vm2076_vm7, %v2049_v29, %v11470_v52  ;;  %v11485_v31 = vld [vmem:[#allocation80_spill] sm:$0xff]  ;;  %v11490_v29 = vld [vmem:[#allocation123_spill] sm:$0xff] }
 0x276   :  { %v2431_v50 = vsel %vm2401_vm12, %v2366_v53, %v1912_v26  ;;  %v2429_v17 = vsel %vm2401_vm12, %v2364_v16, %v1910_v24  ;;  %v2112_v20 = vsel %vm2076_vm7, %v2047_v45, %v11471_v6  ;;  %v2179_v62 = vsel %vm2141_vm8, %v2114_v14, %v11472_v10  ;;  %v11491_v45 = vld [vmem:[#allocation126_spill] sm:$0xff]  ;;  %v11492_v14 = vld [vmem:[#allocation68_spill] sm:$0xff] }
 0x277   :  { %v2177_v24 = vsel %vm2141_vm8, %v2112_v20, %v11473_v27  ;;  %v2244_v36 = vsel %vm2206_vm9, %v2179_v62, %v11474_v13  ;;  %v11493_v6 = vld [vmem:[#allocation70_spill] sm:$0xff] }
 0x278   :  { %v2242_v37 = vsel %vm2206_vm9, %v2177_v24, %v11475_v60  ;;  %v2309_v53 = vsel %vm2271_vm10, %v2244_v36, %v7741_v49  ;;  %v11479_v49 = vld [vmem:[#allocation90_spill] sm:$0xff]  ;;  %v11495_v24 = vld [vmem:[#allocation177_spill] sm:$0xff]  ;;  %v11497_v60 = vld [vmem:[#allocation191_spill] sm:$0xff] }
 0x279   :  { %v1976_v19 = vpop.permute.xlu1 %1975  ;;  %v1974_v5 = vpop.permute.xlu0 %1973  ;;  %v2051_v51 = vsel %vm2011_vm6, %v11480_v39, %v11479_v49  ;;  %v11494_v10 = vld [vmem:[#allocation174_spill] sm:$0xff]  ;;  %v11496_v36 = vld [vmem:[#allocation189_spill] sm:$0xff]  ;;  %v11501_v39 = vld [vmem:[#allocation95_spill] sm:$0xff] }
 0x27a   :  { %v2496_v40 = vsel %vm2466_vm13, %v2431_v50, %v1976_v19  ;;  %v2494_v7 = vsel %vm2466_vm13, %v2429_v17, %v1974_v5  ;;  %v11476_v19 = vld [vmem:[#allocation187_spill] sm:$0xff]  ;;  %v11477_v50 = vld [vmem:[#allocation72_spill] sm:$0xff]  ;;  %v2116_v25 = vsel %vm2076_vm7, %v2051_v51, %v11481_v3  ;;  %v11502_v51 = vld [vmem:[#allocation41_spill] sm:$0xff] }
 0x27b   :  { %5918 = vmatmul.mubr.msk.bf16.gmra.mxu0 %vm2558_vm14, %v2494_v7  ;;  %v2307_v16 = vsel %vm2271_vm10, %v2242_v37, %v11476_v19  ;;  %v2374_v17 = vsel %vm2336_vm11, %v2309_v53, %v11477_v50  ;;  %v2181_v11 = vsel %vm2141_vm8, %v2116_v25, %v11482_v55  ;;  %v11503_v3 = vld [vmem:[#allocation125_spill] sm:$0xff] }
 0x27c   :  { %5921 = vmatprep.mubr.msk.bf16.mxu0 %vm2558_vm14, %v2496_v40  ;;  %v11478_v40 = vld [vmem:[#allocation51_spill] sm:$0xff]  ;;  %v2246_v56 = vsel %vm2206_vm9, %v2181_v11, %v11483_v21  ;;  %v11504_v11 = vld [vmem:[#allocation128_spill] sm:$0xff] }
 0x27d   :  { %v1916_v57 = vpop.permute.xlu1 %1915  ;;  %v1914_v46 = vpop.permute.xlu0 %1913  ;;  %v2372_v44 = vsel %vm2336_vm11, %v2307_v16, %v11478_v40  ;;  %v11498_v16 = vld [vmem:[#allocation106_spill] sm:$0xff]  ;;  %v11505_v21 = vld [vmem:[#allocation67_spill] sm:$0xff] }
 0x27e   :  { %v2435_v59 = vsel %vm2401_vm12, %v2370_v4, %v1916_v57  ;;  %v2433_v28 = vsel %vm2401_vm12, %v2368_v15, %v1914_v46  ;;  %v2311_v46 = vsel %vm2271_vm10, %v2246_v56, %v11484_v42  ;;  %v11487_v15 = vld [vmem:[#allocation34_spill] sm:$0xff]  ;;  %v11506_v42 = vld [vmem:[#allocation71_spill] sm:$0xff] }
 0x27f   :  { %v2376_v30 = vsel %vm2336_vm11, %v2311_v46, %v11485_v31 }
 0x281   :  { %v1980_v33 = vpop.permute.xlu1 %1979  ;;  %v1978_v0 = vpop.permute.xlu0 %1977 }
 0x282   :  { %v2500_v26 = vsel %vm2466_vm13, %v2435_v59, %v1980_v33  ;;  %v2498_v22 = vsel %vm2466_vm13, %v2433_v28, %v1978_v0  ;;  %v11486_v33 = vld [vmem:[#allocation92_spill] sm:$0xff]  ;;  %v11488_v0 = vld [vmem:[#allocation93_spill] sm:$0xff] }
 0x283   :  { %5922 = vmatmul.mubr.msk.bf16.gmra.mxu0 %vm2558_vm14, %v2498_v22  ;;  %v2055_v59 = vsel %vm2011_vm6, %v11487_v15, %v11486_v33  ;;  %v11509_v33 = vld [vmem:[#allocation190_spill] sm:$0xff] }
 0x284   :  { %5925 = vmatprep.mubr.msk.bf16.mxu0 %vm2558_vm14, %v2500_v26  ;;  %v11489_v26 = vld [vmem:[#allocation37_spill] sm:$0xff]  ;;  %v2120_v22 = vsel %vm2076_vm7, %v2055_v59, %v11490_v29 }
 0x285   :  { %v1920_v48 = vpop.permute.xlu1 %1919  ;;  %v1918_v58 = vpop.permute.xlu0 %1917  ;;  %v2053_v8 = vsel %vm2011_vm6, %v11489_v26, %v11488_v0  ;;  %v11510_v59 = vld [vmem:[#allocation193_spill] sm:$0xff] }
 0x286   :  { %v2439_v18 = vsel %vm2401_vm12, %v2374_v17, %v1920_v48  ;;  %v2437_v7 = vsel %vm2401_vm12, %v2372_v44, %v1918_v58  ;;  %v2118_v52 = vsel %vm2076_vm7, %v2053_v8, %v11491_v45  ;;  %v2185_v48 = vsel %vm2141_vm8, %v2120_v22, %v11492_v14 }
 0x287   :  { %v2183_v20 = vsel %vm2141_vm8, %v2118_v52, %v11493_v6  ;;  %v2250_v62 = vsel %vm2206_vm9, %v2185_v48, %v11494_v10  ;;  %v11511_v6 = vld [vmem:[#allocation96_spill] sm:$0xff] }
 0x288   :  { %v2248_v13 = vsel %vm2206_vm9, %v2183_v20, %v11495_v24  ;;  %v2315_v58 = vsel %vm2271_vm10, %v2250_v62, %v11496_v36  ;;  %v11512_v20 = vld [vmem:[#allocation46_spill] sm:$0xff]  ;;  %v11513_v62 = vld [vmem:[#allocation97_spill] sm:$0xff] }
 0x289   :  { %v1984_v5 = vpop.permute.xlu1 %1983  ;;  %v1982_v61 = vpop.permute.xlu0 %1981  ;;  %v2313_v37 = vsel %vm2271_vm10, %v2248_v13, %v11497_v60  ;;  %v2063_v10 = vsel %vm2011_vm6, %v11512_v20, %v11511_v6  ;;  %v11515_v13 = vld [vmem:[#allocation127_spill] sm:$0xff]  ;;  %v11516_v60 = vld [vmem:[#allocation130_spill] sm:$0xff]  ;;  %v11534_v6 = vld [vmem:[#allocation197_spill] sm:$0xff] }
 0x28a   :  { %v2504_v35 = vsel %vm2466_vm13, %v2439_v18, %v1984_v5  ;;  %v2502_v1 = vsel %vm2466_vm13, %v2437_v7, %v1982_v61  ;;  %v2378_v50 = vsel %vm2336_vm11, %v2313_v37, %v11498_v16  ;;  %v2128_v36 = vsel %vm2076_vm7, %v2063_v10, %v11515_v13  ;;  %v11518_v16 = vld [vmem:[#allocation157_spill] sm:$0xff] }
 0x28b   :  { %5926 = vmatmul.mubr.msk.bf16.gmra.mxu0 %vm2558_vm14, %v2502_v1  ;;  %v11500_v1 = vld [vmem:[#allocation40_spill] sm:$0xff] }
 0x28c   :  { %5929 = vmatprep.mubr.msk.bf16.mxu0 %vm2558_vm14, %v2504_v35  ;;  %v11499_v35 = vld [vmem:[#allocation94_spill] sm:$0xff] }
 0x28d   :  { %v1862_v57 = vpop.permute.xlu1 %1861  ;;  %v1922_v2 = vpop.permute.xlu0 %1921  ;;  %v2059_v49 = vsel %vm2011_vm6, %v11500_v1, %v11499_v35  ;;  %v11522_v35 = vld [vmem:[#allocation195_spill] sm:$0xff] }
 0x28e   :  { %v2441_v23 = vsel %vm2401_vm12, %v2376_v30, %v1922_v2  ;;  %v2380_v53 = vsel %vm2336_vm11, %v2315_v58, %v1862_v57  ;;  %v2057_v57 = vsel %vm2011_vm6, %v11502_v51, %v11501_v39  ;;  %v2124_v25 = vsel %vm2076_vm7, %v2059_v49, %v11503_v3 }
 0x28f   :  { %v2122_v2 = vsel %vm2076_vm7, %v2057_v57, %v11504_v11  ;;  %v2189_v56 = vsel %vm2141_vm8, %v2124_v25, %v11505_v21 }
 0x290   :  { %v2187_v46 = vsel %vm2141_vm8, %v2122_v2, %v11506_v42  ;;  %v11524_v42 = vld [vmem:[#allocation52_spill] sm:$0xff] }
 0x291   :  { %v1926_v41 = vpop.permute.xlu1 %1925  ;;  %v1986_v4 = vpop.permute.xlu0 %1985 }
 0x292   :  { %v2506_v28 = vsel %vm2466_vm13, %v2441_v23, %v1986_v4  ;;  %v2445_v17 = vsel %vm2401_vm12, %v2380_v53, %v1926_v41  ;;  %v11507_v41 = vld [vmem:[#allocation176_spill] sm:$0xff]  ;;  %v11508_v23 = vld [vmem:[#allocation179_spill] sm:$0xff] }
 0x293   :  { %5930 = vmatmul.mubr.msk.bf16.gmra.mxu0 %vm2558_vm14, %v2506_v28  ;;  %v2254_v31 = vsel %vm2206_vm9, %v2189_v56, %v11507_v41  ;;  %v2252_v4 = vsel %vm2206_vm9, %v2187_v46, %v11508_v23  ;;  %v11517_v53 = vld [vmem:[#allocation76_spill] sm:$0xff]  ;;  %v11523_v56 = vld [vmem:[#allocation98_spill] sm:$0xff]  ;;  %v11525_v41 = vld [vmem:[#allocation99_spill] sm:$0xff] }
 0x294   :  { %v2319_v15 = vsel %vm2271_vm10, %v2254_v31, %v11509_v33  ;;  %v2317_v28 = vsel %vm2271_vm10, %v2252_v4, %v11510_v59  ;;  %v2067_v46 = vsel %vm2011_vm6, %v11524_v42, %v11523_v56  ;;  %v11526_v31 = vld [vmem:[#allocation54_spill] sm:$0xff]  ;;  %v11527_v23 = vld [vmem:[#allocation129_spill] sm:$0xff] }
 0x295   :  { %v1990_v43 = vpop.permute.xlu1 %1989  ;;  %v1924_v27 = vpop.permute.xlu0 %1923  ;;  %v2132_v4 = vsel %vm2076_vm7, %v2067_v46, %v11527_v23 }
 0x296   :  { %v2443_v5 = vsel %vm2401_vm12, %v2378_v50, %v1924_v27  ;;  %v2510_v40 = vsel %vm2466_vm13, %v2445_v17, %v1990_v43  ;;  %v11514_v27 = vld [vmem:[#allocation49_spill] sm:$0xff]  ;;  %v11519_v17 = vld [vmem:[#allocation178_spill] sm:$0xff] }
 0x297   :  { %v2061_v24 = vsel %vm2011_vm6, %v11514_v27, %v11513_v62 }
 0x298   :  { %v2126_v37 = vsel %vm2076_vm7, %v2061_v24, %v11516_v60 }
 0x299   :  { %v1866_v19 = vpop.permute.xlu1 %1865  ;;  %v1988_v44 = vpop.permute.xlu0 %1987  ;;  %v2191_v50 = vsel %vm2141_vm8, %v2126_v37, %v11518_v16  ;;  %v11536_v16 = vld [vmem:[#allocation56_spill] sm:$0xff] }
 0x29a   :  { %v2508_v18 = vsel %vm2466_vm13, %v2443_v5, %v1988_v44  ;;  %v2384_v0 = vsel %vm2336_vm11, %v2319_v15, %v1866_v19  ;;  %v2193_v19 = vsel %vm2141_vm8, %v2128_v36, %v11517_v53  ;;  %v11520_v44 = vld [vmem:[#allocation181_spill] sm:$0xff]  ;;  %v11528_v15 = vld [vmem:[#allocation132_spill] sm:$0xff] }
 0x29b   :  { %5933 = vmatprep.mubr.msk.bf16.mxu0 %vm2558_vm14, %v2508_v18  ;;  %v2258_v5 = vsel %vm2206_vm9, %v2193_v19, %v11519_v17  ;;  %v2256_v18 = vsel %vm2206_vm9, %v2191_v50, %v11520_v44  ;;  %v11535_v19 = vld [vmem:[#allocation100_spill] sm:$0xff]  ;;  %v11537_v17 = vld [vmem:[#allocation101_spill] sm:$0xff] }
 0x29c   :  { %5934 = vmatmul.mubr.msk.bf16.gmra.mxu0 %vm2558_vm14, %v2510_v40  ;;  %v2321_v1 = vsel %vm2271_vm10, %v2256_v18, %v11522_v35  ;;  %v2071_v50 = vsel %vm2011_vm6, %v11536_v16, %v11535_v19  ;;  %v11540_v35 = vld [vmem:[#allocation75_spill] sm:$0xff] }
 0x29d   :  { %v1930_v7 = vpop.permute.xlu1 %1929  ;;  %v1864_v61 = vpop.permute.xlu0 %1863 }
 0x29e   :  { %v2382_v8 = vsel %vm2336_vm11, %v2317_v28, %v1864_v61  ;;  %v2449_v29 = vsel %vm2401_vm12, %v2384_v0, %v1930_v7  ;;  %v11521_v7 = vld [vmem:[#allocation192_spill] sm:$0xff] }
 0x29f   :  { %v2323_v61 = vsel %vm2271_vm10, %v2258_v5, %v11521_v7  ;;  %v11529_v28 = vld [vmem:[#allocation156_spill] sm:$0xff]  ;;  %v2069_v5 = vsel %vm2011_vm6, %v11393_v12, %v11537_v17  ;;  %v11539_v7 = vld [vmem:[#allocation134_spill] sm:$0xff] }
 0x2a0   :  { %v2197_v0 = vsel %vm2141_vm8, %v2132_v4, %v11529_v28 }
 0x2a1   :  { %v1994_v55 = vpop.permute.xlu1 %1993  ;;  %v1928_v30 = vpop.permute.xlu0 %1927 }
 0x2a2   :  { %v2447_v22 = vsel %vm2401_vm12, %v2382_v8, %v1928_v30  ;;  %v2514_v43 = vsel %vm2466_vm13, %v2449_v29, %v1994_v55  ;;  %v2065_v30 = vsel %vm2011_vm6, %v11526_v31, %v11525_v41  ;;  %v11531_v29 = vld [vmem:[#allocation180_spill] sm:$0xff] }
 0x2a3   :  { %v2130_v59 = vsel %vm2076_vm7, %v2065_v30, %v11528_v15 }
 0x2a5   :  { %v1870_v26 = vpop.permute.xlu1 %1869  ;;  %v1992_v45 = vpop.permute.xlu0 %1991 }
 0x2a6   :  { %v2512_v52 = vsel %vm2466_vm13, %v2447_v22, %v1992_v45  ;;  %v2388_v49 = vsel %vm2336_vm11, %v2323_v61, %v1870_v26  ;;  %v11530_v26 = vld [vmem:[#allocation158_spill] sm:$0xff]  ;;  %v2262_v22 = vsel %vm2206_vm9, %v2197_v0, %v11531_v29  ;;  %v11532_v45 = vld [vmem:[#allocation183_spill] sm:$0xff]  ;;  %v2134_v61 = vsel %vm2076_vm7, %v2069_v5, %v11539_v7  ;;  %v11547_v0 = vld [vmem:[#allocation104_spill] sm:$0xff] }
 0x2a7   :  { %5937 = vmatprep.mubr.msk.bf16.mxu0 %vm2558_vm14, %v2512_v52  ;;  %v2195_v8 = vsel %vm2141_vm8, %v2130_v59, %v11530_v26  ;;  %v11546_v59 = vld [vmem:[#allocation102_spill] sm:$0xff]  ;;  %v2073_v26 = vsel %vm2011_vm6, %v11409_v38, %v11547_v0  ;;  %v8410_v5 = vld [vmem:[%s10746_s2] ss:$0 sm:$0xff] }
 0x2a8   :  { %5938 = vmatmul.mubr.msk.bf16.gmra.mxu0 %vm2558_vm14, %v2514_v43  ;;  %v2260_v52 = vsel %vm2206_vm9, %v2195_v8, %v11532_v45  ;;  %v2075_v28 = vsel %vm2011_vm6, %v11399_v9, %v11546_v59  ;;  %v11548_v8 = vld [vmem:[#allocation133_spill] sm:$0xff]  ;;  %v11550_v45 = vld [vmem:[#allocation31_spill] sm:$0xff]  ;;  %v11554_v38 = vld [vmem:[#allocation198_spill] sm:$0xff] }
 0x2a9   :  { %v1934_v14 = vpop.permute.xlu1 %1933  ;;  %v1868_v48 = vpop.permute.xlu0 %1867  ;;  %v2325_v20 = vsel %vm2271_vm10, %v2260_v52, %v11534_v6  ;;  %v2140_v29 = vsel %vm2076_vm7, %v2075_v28, %v11548_v8  ;;  %v11552_v6 = vld [vmem:[#allocation184_spill] sm:$0xff] }
 0x2aa   :  { %v2386_v51 = vsel %vm2336_vm11, %v2321_v1, %v1868_v48  ;;  %v2453_v57 = vsel %vm2401_vm12, %v2388_v49, %v1934_v14  ;;  %v11533_v14 = vld [vmem:[#allocation194_spill] sm:$0xff]  ;;  %v11541_v49 = vld [vmem:[#allocation159_spill] sm:$0xff]  ;;  %v2205_v52 = vsel %vm2141_vm8, %v2140_v29, %v11550_v45 }
 0x2ab   :  { %v2327_v48 = vsel %vm2271_vm10, %v2262_v22, %v11533_v14  ;;  %v11549_v22 = vld [vmem:[#allocation136_spill] sm:$0xff] }
 0x2ac   :  { %v11551_v14 = vld [vmem:[#allocation160_spill] sm:$0xff] }
 0x2ad   :  { %v1998_v58 = vpop.permute.xlu1 %1997  ;;  %v1932_v40 = vpop.permute.xlu0 %1931 }
 0x2ae   :  { %v2451_v3 = vsel %vm2401_vm12, %v2386_v51, %v1932_v40  ;;  %v2518_v25 = vsel %vm2466_vm13, %v2453_v57, %v1998_v58  ;;  %v11538_v40 = vld [vmem:[#allocation131_spill] sm:$0xff]  ;;  %v11542_v51 = vld [vmem:[#allocation182_spill] sm:$0xff] }
 0x2af   :  { %v2136_v44 = vsel %vm2076_vm7, %v2071_v50, %v11538_v40 }
 0x2b0   :  { %v2201_v1 = vsel %vm2141_vm8, %v2136_v44, %v11540_v35 }
 0x2b1   :  { %v1874_v39 = vpop.permute.xlu1 %1873  ;;  %v1996_v55 = vpop.permute.xlu0 %1995  ;;  %v2266_v57 = vsel %vm2206_vm9, %v2201_v1, %v11542_v51 }
 0x2b2   :  { %v2516_v11 = vsel %vm2466_vm13, %v2451_v3, %v1996_v55  ;;  %v2392_v10 = vsel %vm2336_vm11, %v2327_v48, %v1874_v39  ;;  %v2199_v39 = vsel %vm2141_vm8, %v2134_v61, %v11541_v49  ;;  %v11544_v55 = vld [vmem:[#allocation196_spill] sm:$0xff] }
 0x2b3   :  { %5941 = vmatprep.mubr.msk.bf16.mxu0 %vm2558_vm14, %v2516_v11  ;;  %v2331_v11 = vsel %vm2271_vm10, %v2266_v57, %v11544_v55 }
 0x2b4   :  { %5942 = vmatmul.mubr.msk.bf16.gmra.mxu0 %vm2558_vm14, %v2518_v25  ;;  %v11543_v25 = vld [vmem:[#allocation185_spill] sm:$0xff] }
 0x2b5   :  { %v1938_v2 = vpop.permute.xlu1 %1937  ;;  %v2264_v12 = vsel %vm2206_vm9, %v2199_v39, %v11543_v25 }
 0x2b6   :  { %v1872_v21 = vpop.permute.xlu0 %1871  ;;  %v2457_v24 = vsel %vm2401_vm12, %v2392_v10, %v1938_v2  ;;  %v11545_v2 = vld [vmem:[#allocation199_spill] sm:$0xff]  ;;  %v11553_v10 = vld [vmem:[#allocation186_spill] sm:$0xff] }
 0x2b7   :  { %v2390_v27 = vsel %vm2336_vm11, %v2325_v20, %v1872_v21  ;;  %v2329_v21 = vsel %vm2271_vm10, %v2264_v12, %v11545_v2  ;;  %v2270_v20 = vsel %vm2206_vm9, %v2205_v52, %v11552_v6 }
 0x2b9   :  { %v2002_v33 = vpop.permute.xlu1 %2001 }
 0x2ba   :  { %v1936_v43 = vpop.permute.xlu0 %1935  ;;  %v2522_v36 = vsel %vm2466_vm13, %v2457_v24, %v2002_v33 }
 0x2bb   :  { %v2455_v13 = vsel %vm2401_vm12, %v2390_v27, %v1936_v43  ;;  %v2138_v43 = vsel %vm2076_vm7, %v2073_v26, %v11549_v22  ;;  %v2335_v27 = vsel %vm2271_vm10, %v2270_v20, %v11554_v38 }
 0x2bc   :  { %v2203_v48 = vsel %vm2141_vm8, %v2138_v43, %v11551_v14 }
 0x2bd   :  { %v1878_v62 = vpop.permute.xlu1 %1877 }
 0x2be   :  { %v2000_v58 = vpop.permute.xlu0 %1999  ;;  %v2396_v56 = vsel %vm2336_vm11, %v2331_v11, %v1878_v62  ;;  %v2268_v62 = vsel %vm2206_vm9, %v2203_v48, %v11553_v10 }
 0x2bf   :  { %v2520_v60 = vsel %vm2466_vm13, %v2455_v13, %v2000_v58  ;;  %v11555_v13 = vld [vmem:[#allocation200_spill] sm:$0xff] }
 0x2c0   :  { %5945 = vmatprep.mubr.msk.bf16.mxu0 %vm2558_vm14, %v2520_v60 }
 0x2c1   :  { %v1942_v37 = vpop.permute.xlu1 %1941  ;;  %5946 = vmatmul.mubr.msk.bf16.gmra.mxu0 %vm2558_vm14, %v2522_v36  ;;  %v2333_v36 = vsel %vm2271_vm10, %v2268_v62, %v11555_v13 }
 0x2c2   :  { %v1876_v53 = vpop.permute.xlu0 %1875  ;;  %v2461_v41 = vsel %vm2401_vm12, %v2396_v56, %v1942_v37 }
 0x2c3   :  { %v2394_v46 = vsel %vm2336_vm11, %v2329_v21, %v1876_v53 }
 0x2c5   :  { %v2006_v18 = vpop.permute.xlu1 %2005 }
 0x2c6   :  { %v1940_v3 = vpop.permute.xlu0 %1939  ;;  %v2526_v30 = vsel %vm2466_vm13, %v2461_v41, %v2006_v18 }
 0x2c7   :  { %v2459_v31 = vsel %vm2401_vm12, %v2394_v46, %v1940_v3 }
 0x2c9   :  { %v1882_v42 = vpop.permute.xlu1 %1881 }
 0x2ca   :  { %v2004_v23 = vpop.permute.xlu0 %2003  ;;  %v2400_v58 = vsel %vm2336_vm11, %v2335_v27, %v1882_v42 }
 0x2cb   :  { %v2524_v4 = vsel %vm2466_vm13, %v2459_v31, %v2004_v23 }
 0x2cc   :  { %5949 = vmatprep.mubr.msk.bf16.mxu0 %vm2558_vm14, %v2524_v4 }
 0x2cd   :  { %5950 = vmatmul.mubr.msk.bf16.gmra.mxu0 %vm2558_vm14, %v2526_v30  ;;  %v1946_v33 = vpop.permute.xlu1 %1945 }
 0x2ce   :  { %v1880_v15 = vpop.permute.xlu0 %1879  ;;  %v2465_v37 = vsel %vm2401_vm12, %v2400_v58, %v1946_v33 }
 0x2cf   :  { %v2398_v60 = vsel %vm2336_vm11, %v2333_v36, %v1880_v15 }
 0x2d1   :  { %v2010_v24 = vpop.permute.xlu1 %2009 }
 0x2d2   :  { %v1944_v9 = vpop.permute.xlu0 %1943  ;;  %v2530_v19 = vsel %vm2466_vm13, %v2465_v37, %v2010_v24 }
 0x2d3   :  { %v2463_v53 = vsel %vm2401_vm12, %v2398_v60, %v1944_v9 }
 0x2d6   :  { %v2008_v16 = vpop.permute.xlu0 %2007 }
 0x2d7   :  { %v2528_v50 = vsel %vm2466_vm13, %v2463_v53, %v2008_v16 }
 0x2d8   :  { %5953 = vmatprep.mubr.msk.bf16.mxu0 %vm2558_vm14, %v2528_v50 }
 0x2d9   :  { %5954 = vmatmul.mubr.msk.bf16.gmra.mxu0 %vm2558_vm14, %v2530_v19 }
 0x30b   :  { %v5895_v17 = vpop.f32.mrf.mxu0 }
 0x30c   :  { %v2670_v44 = vadd.f32 %v5895_v17, %v8410_v5 }
 0x30d   :  { %v2661_v40 = vpop.f32.mrf.mxu0 }
 0x30e   :  { %v2662_v7 = vadd.f32 %v8410_v5, %v2661_v40  ;;  %v2918_v1 = vmax.f32 %v2670_v44, 0.0 }
 0x30f   :  { %v5896_v18 = vpop.f32.mrf.mxu0 }
 0x310   :  { %v2673_v61 = vadd.f32 %v5896_v18, %v8410_v5  ;;  %v2916_v57 = vmax.f32 %v2662_v7, 0.0 }
 0x311   :  { %v2664_v35 = vpop.f32.mrf.mxu0 }
 0x312   :  { %v2919_v49 = vmax.f32 %v2673_v61, 0.0  ;;  %v2665_v39 = vadd.f32 %v8410_v5, %v2664_v35 }
 0x313   :  { %v5899_v51 = vpop.f32.mrf.mxu0 }
 0x314   :  { %v2981_v3 = vpack.c.bf16 %v2919_v49, %v2918_v1  ;;  %v2917_v25 = vmax.f32 %v2665_v39, 0.0  ;;  %v2686_v2 = vadd.f32 %v5899_v51, %v8410_v5 }
 0x315   :  { %v2677_v12 = vpop.f32.mrf.mxu0 }
 0x316   :  { %v3021_v55 = vshrl.u32 %v2981_v3, 16  ;;  %v2980_v11 = vpack.c.bf16 %v2917_v25, %v2916_v57  ;;  %v2678_v46 = vadd.f32 %v8410_v5, %v2677_v12  ;;  %v3178_v31 = vshll.u32 %v2981_v3, 16 }
 0x317   :  { %v5900_v21 = vpop.f32.mrf.mxu0  ;;  %v2922_v59 = vmax.f32 %v2686_v2, 0.0 }
 0x318   :  { %v3023_v56 = vrot.slane %v3021_v55, 7  ;;  %v3017_v42 = vshrl.u32 %v2980_v11, 16  ;;  %v2689_v41 = vadd.f32 %v5900_v21, %v8410_v5  ;;  %v3175_v4 = vshll.u32 %v2980_v11, 16 }
 0x319   :  { %v2680_v30 = vpop.f32.mrf.mxu0  ;;  %v2920_v8 = vmax.f32 %v2678_v46, 0.0 }
 0x31a   :  { %v3019_v23 = vrot.slane %v3017_v42, 7  ;;  %v2923_v33 = vmax.f32 %v2689_v41, 0.0  ;;  %v2681_v15 = vadd.f32 %v8410_v5, %v2680_v30  ;;  %v3180_v0 = vor.u32 %v3178_v31, %v3023_v56 }
 0x31b   :  { %v5903_v28 = vpop.f32.mrf.mxu0  ;;  %v8450_v49 = vsel %vm6243_vm3, %v3023_v56, %v3178_v31 }
 0x31c   :  { %v3177_v26 = vor.u32 %v3175_v4, %v3019_v23  ;;  %v2921_v29 = vmax.f32 %v2681_v15, 0.0  ;;  %v8420_v22 = vpack.c.bf16 %v2923_v33, %v2922_v59  ;;  %v8428_v48 = vsel %vm6243_vm3, %v3019_v23, %v3175_v4 }
 0x31d   :  { %v2693_v43 = vpop.f32.mrf.mxu0  ;;  %v8433_v9 = vsel %vm6243_vm3, %v3023_v56, %v3180_v0  ;;  %v3416_v36 = vshll.u32 %v8428_v48, 16  ;;  %v2702_v53 = vadd.f32 %v5903_v28, %v8410_v5 }
 0x31e   :  { %v8424_v52 = vsel %vm6243_vm3, %v3019_v23, %v3177_v26  ;;  %v2982_v14 = vpack.c.bf16 %v2921_v29, %v2920_v8  ;;  %v2694_v62 = vadd.f32 %v8410_v5, %v2693_v43  ;;  %v3029_v38 = vshrl.u32 %v8420_v22, 16 }
 0x31f   :  { %v5904_v6 = vpop.f32.mrf.mxu0  ;;  %v3411_v20 = vshll.u32 %v8424_v52, 16  ;;  %v3409_v24 = vshrl.u32 %v8424_v52, 16  ;;  %v3418_v17 = vrot.slane %v3416_v36, 1  ;;  %v3423_v7 = vshll.u32 %v8433_v9, 16 }
 0x320   :  { %v3025_v10 = vshrl.u32 %v2982_v14, 16  ;;  %v3181_v60 = vshll.u32 %v2982_v14, 16  ;;  %v2705_v19 = vadd.f32 %v5904_v6, %v8410_v5  ;;  %v2924_v44 = vmax.f32 %v2694_v62, 0.0 }
 0x321   :  { %v2696_v27 = vpop.f32.mrf.mxu0  ;;  %v3413_v13 = vrot.slane %v3411_v20, 1  ;;  %v8443_v61 = vrot.slane %v3029_v38, 7  ;;  %v3184_v39 = vshll.u32 %v8420_v22, 16  ;;  %v2926_v25 = vmax.f32 %v2702_v53, 0.0 }
 0x322   :  { %v3027_v58 = vrot.slane %v3025_v10, 7  ;;  %v2697_v37 = vadd.f32 %v8410_v5, %v2696_v27  ;;  %v2927_v12 = vmax.f32 %v2705_v19, 0.0  ;;  %v3425_v46 = vrot.slane %v3423_v7, 1 }
 0x323   :  { %v5907_v16 = vpop.f32.mrf.mxu0  ;;  %v3414_v50 = vor.u32 %v3413_v13, %v3409_v24  ;;  %v3186_v41 = vor.u32 %v3184_v39, %v8443_v61  ;;  %v3421_v10 = vshrl.u32 %v8433_v9, 16 }
 0x324   :  { %v3183_v40 = vor.u32 %v3181_v60, %v3027_v58  ;;  %v2925_v18 = vmax.f32 %v2697_v37, 0.0  ;;  %v8461_v3 = vsel %vm6243_vm3, %v3027_v58, %v3181_v60  ;;  %v2718_v55 = vadd.f32 %v5907_v16, %v8410_v5 }
 0x325   :  { %v2709_v35 = vpop.f32.mrf.mxu0  ;;  %v8446_v1 = vsel %vm953_vm2, %v3414_v50, %v3418_v17  ;;  %v3440_v4 = vshll.u32 %v8461_v3, 16  ;;  %v8473_v0 = vpack.c.bf16 %v2927_v12, %v2926_v25  ;;  %v8496_v60 = vsel %vm6243_vm3, %v8443_v61, %v3186_v41 }
 0x326   :  { %11557 = vst [vmem:[#allocation138_spill] sm:$0xff] %v8446_v1  ;;  %v8455_v51 = vsel %vm6243_vm3, %v3027_v58, %v3183_v40  ;;  %v2984_v57 = vpack.c.bf16 %v2925_v18, %v2924_v44  ;;  %3942 = vrot.lane.b32.xlu1 %v8446_v1, %s6176_s0  ;;  %v2710_v56 = vadd.f32 %v8410_v5, %v2709_v35  ;;  %v2930_v26 = vmax.f32 %v2718_v55, 0.0 }
 0x327   :  { %v5908_v11 = vpop.f32.mrf.mxu0  ;;  %v3435_v2 = vshll.u32 %v8455_v51, 16  ;;  %v3433_v30 = vshrl.u32 %v8455_v51, 16  ;;  %v3442_v43 = vrot.slane %v3440_v4, 1  ;;  %v8491_v58 = vor.u32 %v3425_v46, %v3421_v10 }
 0x328   :  { %v3033_v21 = vshrl.u32 %v2984_v57, 16  ;;  %v2721_v42 = vadd.f32 %v5908_v11, %v8410_v5  ;;  %v3187_v15 = vshll.u32 %v2984_v57, 16  ;;  %v2928_v6 = vmax.f32 %v2710_v56, 0.0 }
 0x329   :  { %v2712_v31 = vpop.f32.mrf.mxu0  ;;  %v3437_v23 = vrot.slane %v3435_v2, 1  ;;  %v3037_v37 = vshrl.u32 %v8473_v0, 16  ;;  %v3428_v16 = vshll.u32 %v8450_v49, 16  ;;  %v3447_v41 = vshll.u32 %v8496_v60, 16 }
 0x32a   :  { %v3035_v33 = vrot.slane %v3033_v21, 7  ;;  %v2931_v59 = vmax.f32 %v2721_v42, 0.0  ;;  %v2713_v28 = vadd.f32 %v8410_v5, %v2712_v31 }
 0x32b   :  { %v5911_v8 = vpop.f32.mrf.mxu0  ;;  %v3438_v29 = vor.u32 %v3437_v23, %v3433_v30  ;;  %v8508_v21 = vrot.slane %v3037_v37, 7 }
 0x32c   :  { %v3189_v14 = vor.u32 %v3187_v15, %v3035_v33  ;;  %v2929_v20 = vmax.f32 %v2713_v28, 0.0  ;;  %v8476_v62 = vpack.c.bf16 %v2931_v59, %v2930_v26  ;;  %v8489_v36 = vsel %vm6243_vm3, %v3035_v33, %v3187_v15 }
 0x32d   :  { %v2725_v38 = vpop.f32.mrf.mxu0  ;;  %v8479_v27 = vsel %vm953_vm2, %v3438_v29, %v3442_v43  ;;  %v2734_v17 = vadd.f32 %v5911_v8, %v8410_v5  ;;  %v3464_v25 = vshll.u32 %v8489_v36, 16  ;;  %v3430_v26 = vrot.slane %v3428_v16, 1 }
 0x32e   :  { %11558 = vst [vmem:[#allocation55_spill] sm:$0xff] %v8479_v27  ;;  %v8483_v24 = vsel %vm6243_vm3, %v3035_v33, %v3189_v14  ;;  %v2986_v13 = vpack.c.bf16 %v2929_v20, %v2928_v6  ;;  %3946 = vrot.lane.b32.xlu1 %v8479_v27, %s6176_s0  ;;  %v2726_v40 = vadd.f32 %v8410_v5, %v2725_v38  ;;  %v3045_v18 = vshrl.u32 %v8476_v62, 16 }
 0x32f   :  { %v5912_v53 = vpop.f32.mrf.mxu0  ;;  %v3459_v19 = vshll.u32 %v8483_v24, 16  ;;  %v3457_v35 = vshrl.u32 %v8483_v24, 16  ;;  %v3466_v46 = vrot.slane %v3464_v25, 1  ;;  %v2934_v30 = vmax.f32 %v2734_v17, 0.0 }
 0x330   :  { %v3041_v50 = vshrl.u32 %v2986_v13, 16  ;;  %v2737_v44 = vadd.f32 %v5912_v53, %v8410_v5  ;;  %v3193_v55 = vshll.u32 %v2986_v13, 16  ;;  %v2932_v23 = vmax.f32 %v2726_v40, 0.0 }
 0x331   :  { %v2728_v7 = vpop.f32.mrf.mxu0  ;;  %v3461_v57 = vrot.slane %v3459_v19, 1  ;;  %v3190_v33 = vshll.u32 %v8473_v0, 16  ;;  %v8512_v15 = vrot.slane %v3045_v18, 7  ;;  %v10910_v20 = vshll.u32 %v8476_v62, 16 }
 0x332   :  { %v3043_v12 = vrot.slane %v3041_v50, 7  ;;  %v2935_v11 = vmax.f32 %v2737_v44, 0.0  ;;  %v2729_v2 = vadd.f32 %v8410_v5, %v2728_v7  ;;  %v8539_v13 = vsel %vm6243_vm3, %v8443_v61, %v3184_v39 }
 0x333   :  { %v5915_v56 = vpop.f32.mrf.mxu0  ;;  %v3462_v42 = vor.u32 %v3461_v57, %v3457_v35  ;;  %v3192_v6 = vor.u32 %v3190_v33, %v8508_v21  ;;  %v3445_v19 = vshrl.u32 %v8496_v60, 16  ;;  %v3449_v16 = vrot.slane %v3447_v41, 1 }
 0x334   :  { %v3195_v31 = vor.u32 %v3193_v55, %v3043_v12  ;;  %v2933_v4 = vmax.f32 %v2729_v2, 0.0  ;;  %v8521_v29 = vpack.c.bf16 %v2935_v11, %v2934_v30  ;;  %v8527_v14 = vsel %vm6243_vm3, %v3043_v12, %v3193_v55 }
 0x335   :  { %v2741_v59 = vpop.f32.mrf.mxu0  ;;  %v8515_v28 = vsel %vm953_vm2, %v3462_v42, %v3466_v46  ;;  %v3198_v50 = vor.u32 %v10910_v20, %v8512_v15  ;;  %v3488_v22 = vshll.u32 %v8527_v14, 16  ;;  %v3452_v55 = vshll.u32 %v8539_v13, 16 }
 0x336   :  { %11559 = vst [vmem:[#allocation69_spill] sm:$0xff] %v8515_v28  ;;  %v8519_v8 = vsel %vm6243_vm3, %v3043_v12, %v3195_v31  ;;  %v2988_v43 = vpack.c.bf16 %v2933_v4, %v2932_v23  ;;  %3950 = vrot.lane.b32.xlu1 %v8515_v28, %s6176_s0  ;;  %v2742_v53 = vadd.f32 %v8410_v5, %v2741_v59  ;;  %v3053_v18 = vshrl.u32 %v8521_v29, 16 }
 0x337   :  { %v5916_v10 = vpop.f32.mrf.mxu0  ;;  %v3483_v38 = vshll.u32 %v8519_v8, 16  ;;  %v3481_v40 = vshrl.u32 %v8519_v8, 16  ;;  %v3490_v12 = vrot.slane %v3488_v22, 1  ;;  %v2750_v2 = vadd.f32 %v5915_v56, %v8410_v5 }
 0x338   :  { %v3049_v37 = vshrl.u32 %v2988_v43, 16  ;;  %v3199_v39 = vshll.u32 %v2988_v43, 16  ;;  %v2753_v35 = vadd.f32 %v5916_v10, %v8410_v5  ;;  %v2936_v42 = vmax.f32 %v2742_v53, 0.0 }
 0x339   :  { %v2744_v17 = vpop.f32.mrf.mxu0  ;;  %v3485_v44 = vrot.slane %v3483_v38, 1  ;;  %v8556_v41 = vsel %vm6243_vm3, %v8508_v21, %v3192_v6  ;;  %v8563_v23 = vsel %vm953_vm2, %v8491_v58, %v3430_v26  ;;  %v3450_v4 = vor.u32 %v3449_v16, %v3445_v19 }
 0x33a   :  { %v3051_v61 = vrot.slane %v3049_v37, 7  ;;  %v2745_v7 = vadd.f32 %v8410_v5, %v2744_v17  ;;  %11560 = vst [vmem:[#allocation26_spill] sm:$0xff] %v8556_v41  ;;  %11562 = vst [vmem:[#allocation60_spill] sm:$0xff] %v8563_v23  ;;  %v8565_v59 = vrot.slane %v3053_v18, 7  ;;  %v8580_v58 = vsel %vm6243_vm3, %v8512_v15, %v3198_v50 }
 0x33b   :  { %v5919_v57 = vpop.f32.mrf.mxu0  ;;  %v3486_v25 = vor.u32 %v3485_v44, %v3481_v40  ;;  %11564 = vst [vmem:[#allocation140_spill] sm:$0xff] %v8580_v58  ;;  %v2939_v26 = vmax.f32 %v2753_v35, 0.0  ;;  %v3454_v37 = vrot.slane %v3452_v55, 1  ;;  %v10909_v53 = vshll.u32 %v8521_v29, 16 }
 0x33c   :  { %v3201_v11 = vor.u32 %v3199_v39, %v3051_v61  ;;  %v2937_v46 = vmax.f32 %v2745_v7, 0.0  ;;  %v8575_v6 = vsel %vm6243_vm3, %v3051_v61, %v3199_v39  ;;  %v2938_v19 = vmax.f32 %v2750_v2, 0.0 }
 0x33d   :  { %v2757_v31 = vpop.f32.mrf.mxu0  ;;  %v8559_v30 = vsel %vm953_vm2, %v3486_v25, %v3490_v12  ;;  %v3512_v18 = vshll.u32 %v8575_v6, 16  ;;  %v8588_v50 = vsel %vm953_vm2, %v3450_v4, %v3454_v37 }
 0x33e   :  { %11561 = vst [vmem:[#allocation108_spill] sm:$0xff] %v8559_v30  ;;  %v8569_v56 = vsel %vm6243_vm3, %v3051_v61, %v3201_v11  ;;  %v2990_v43 = vpack.c.bf16 %v2937_v46, %v2936_v42  ;;  %3954 = vrot.lane.b32.xlu1 %v8559_v30, %s6176_s0  ;;  %v2758_v17 = vadd.f32 %v8410_v5, %v2757_v31  ;;  %11565 = vst [vmem:[#allocation135_spill] sm:$0xff] %v8588_v50 }
 0x33f   :  { %11563 = vst [vmem:[#allocation103_spill] sm:$0xff] %v8569_v56  ;;  %v5920_v10 = vpop.f32.mrf.mxu0  ;;  %v3507_v38 = vshll.u32 %v8569_v56, 16  ;;  %v3505_v44 = vshrl.u32 %v8569_v56, 16  ;;  %v3204_v61 = vor.u32 %v10909_v53, %v8565_v59  ;;  %v8594_v25 = vpack.c.bf16 %v2939_v26, %v2938_v19 }
 0x340   :  { %v3057_v16 = vshrl.u32 %v2990_v43, 16  ;;  %v3205_v7 = vshll.u32 %v2990_v43, 16  ;;  %v2769_v12 = vadd.f32 %v5920_v10, %v8410_v5  ;;  %v3514_v2 = vrot.slane %v3512_v18, 1 }
 0x341   :  { %v2760_v40 = vpop.f32.mrf.mxu0  ;;  %v3509_v22 = vrot.slane %v3507_v38, 1  ;;  %v2766_v46 = vadd.f32 %v5919_v57, %v8410_v5  ;;  %v2940_v31 = vmax.f32 %v2758_v17, 0.0  ;;  %v8607_v43 = vsel %vm6243_vm3, %v8508_v21, %v3190_v33 }
 0x342   :  { %v3059_v39 = vrot.slane %v3057_v16, 7  ;;  %v2761_v35 = vadd.f32 %v8410_v5, %v2760_v40  ;;  %11567 = vst [vmem:[#allocation62_spill] sm:$0xff] %v8607_v43  ;;  %v8613_v57 = vsel %vm6243_vm3, %v8565_v59, %v3204_v61  ;;  %v3061_v21 = vshrl.u32 %v8594_v25, 16 }
 0x343   :  { %v5923_v55 = vpop.f32.mrf.mxu0  ;;  %v3510_v11 = vor.u32 %v3509_v22, %v3505_v44  ;;  %11568 = vst [vmem:[#allocation29_spill] sm:$0xff] %v8613_v57  ;;  %v2943_v33 = vmax.f32 %v2769_v12, 0.0  ;;  %v3471_v44 = vshll.u32 %v8556_v41, 16  ;;  %v2942_v22 = vmax.f32 %v2766_v46, 0.0 }
 0x344   :  { %v3207_v42 = vor.u32 %v3205_v7, %v3059_v39  ;;  %v2941_v4 = vmax.f32 %v2761_v35, 0.0  ;;  %v2782_v38 = vadd.f32 %v5923_v55, %v8410_v5  ;;  %v8623_v0 = vsel %vm6243_vm3, %v3059_v39, %v3205_v7 }
 0x345   :  { %v2773_v37 = vpop.f32.mrf.mxu0  ;;  %v8600_v16 = vsel %vm953_vm2, %v3510_v11, %v3514_v2  ;;  %v3536_v7 = vshll.u32 %v8623_v0, 16  ;;  %v8634_v46 = vpack.c.bf16 %v2943_v33, %v2942_v22  ;;  %v8636_v34 = vrot.slane %v3061_v21, 7 }
 0x346   :  { %11566 = vst [vmem:[#allocation36_spill] sm:$0xff] %v8600_v16  ;;  %v8617_v10 = vsel %vm6243_vm3, %v3059_v39, %v3207_v42  ;;  %v2992_v19 = vpack.c.bf16 %v2941_v4, %v2940_v31  ;;  %3958 = vrot.lane.b32.xlu1 %v8600_v16, %s6176_s0  ;;  %v2774_v61 = vadd.f32 %v8410_v5, %v2773_v37  ;;  %v2946_v55 = vmax.f32 %v2782_v38, 0.0 }
 0x347   :  { %11569 = vst [vmem:[#allocation73_spill] sm:$0xff] %v8617_v10  ;;  %v5924_v17 = vpop.f32.mrf.mxu0  ;;  %v3531_v40 = vshll.u32 %v8617_v10, 16  ;;  %v3529_v2 = vshrl.u32 %v8617_v10, 16  ;;  %v3538_v26 = vrot.slane %v3536_v7, 1 }
 0x348   :  { %v3065_v18 = vshrl.u32 %v2992_v19, 16  ;;  %v2785_v35 = vadd.f32 %v5924_v17, %v8410_v5  ;;  %v3211_v12 = vshll.u32 %v2992_v19, 16  ;;  %v2944_v38 = vmax.f32 %v2774_v61, 0.0 }
 0x349   :  { %v2776_v11 = vpop.f32.mrf.mxu0  ;;  %v3533_v39 = vrot.slane %v3531_v40, 1 }
 0x34a   :  { %v3067_v42 = vrot.slane %v3065_v18, 7  ;;  %v2947_v31 = vmax.f32 %v2785_v35, 0.0  ;;  %v2777_v4 = vadd.f32 %v8410_v5, %v2776_v11  ;;  %v3473_v35 = vrot.slane %v3471_v44, 1 }
 0x34b   :  { %v5927_v20 = vpop.f32.mrf.mxu0  ;;  %v3534_v37 = vor.u32 %v3533_v39, %v3529_v2 }
 0x34c   :  { %v3213_v17 = vor.u32 %v3211_v12, %v3067_v42  ;;  %v2995_v54 = vpack.c.bf16 %v2947_v31, %v2946_v55  ;;  %v2945_v32 = vmax.f32 %v2777_v4, 0.0  ;;  %v2798_v40 = vadd.f32 %v5927_v20, %v8410_v5 }
 0x34d   :  { %v2789_v18 = vpop.f32.mrf.mxu0  ;;  %v8640_v19 = vsel %vm953_vm2, %v3534_v37, %v3538_v26  ;;  %v8650_v21 = vsel %vm6243_vm3, %v3067_v42, %v3211_v12  ;;  %v3069_v20 = vshrl.u32 %v8634_v46, 16 }
 0x34e   :  { %11570 = vst [vmem:[#allocation110_spill] sm:$0xff] %v8640_v19  ;;  %v8644_v33 = vsel %vm6243_vm3, %v3067_v42, %v3213_v17  ;;  %v3013_v22 = vshrl.u32 %v2995_v54, 16  ;;  %v2994_v11 = vpack.c.bf16 %v2945_v32, %v2944_v38  ;;  %3962 = vrot.lane.b32.xlu1 %v8640_v19, %s6176_s0  ;;  %v3172_v61 = vshll.u32 %v2995_v54, 16 }
 0x34f   :  { %11571 = vst [vmem:[#allocation83_spill] sm:$0xff] %v8644_v33  ;;  %v2790_v26 = vadd.f32 %v8410_v5, %v2789_v18  ;;  %v5928_v55 = vpop.f32.mrf.mxu0  ;;  %v3555_v44 = vshll.u32 %v8644_v33, 16  ;;  %v2950_v7 = vmax.f32 %v2798_v40, 0.0  ;;  %v3553_v37 = vshrl.u32 %v8644_v33, 16 }
 0x350   :  { %v3015_v2 = vrot.slane %v3013_v22, 7  ;;  %v3073_v39 = vshrl.u32 %v2994_v11, 16  ;;  %v2801_v32 = vadd.f32 %v5928_v55, %v8410_v5  ;;  %v3217_v31 = vshll.u32 %v2994_v11, 16 }
 0x351   :  { %v2792_v4 = vpop.f32.mrf.mxu0  ;;  %v3557_v17 = vrot.slane %v3555_v44, 1  ;;  %v3560_v42 = vshll.u32 %v8650_v21, 16  ;;  %v2948_v53 = vmax.f32 %v2790_v26, 0.0 }
 0x352   :  { %v3174_v12 = vor.u32 %v3172_v61, %v3015_v2  ;;  %v3075_v38 = vrot.slane %v3073_v39, 7  ;;  %v2951_v54 = vmax.f32 %v2801_v32, 0.0  ;;  %v2793_v18 = vadd.f32 %v8410_v5, %v2792_v4 }
 0x353   :  { %v5931_v47 = vpop.f32.mrf.mxu0  ;;  %v3558_v63 = vor.u32 %v3557_v17, %v3553_v37  ;;  %v3562_v22 = vrot.slane %v3560_v42, 1  ;;  %v8661_v40 = vsel %vm6243_vm3, %v3015_v2, %v3172_v61  ;;  %v11572_v39 = vshll.u32 %v8594_v25, 16 }
 0x354   :  { %v8665_v11 = vsel %vm6243_vm3, %v3015_v2, %v3174_v12  ;;  %v3219_v55 = vor.u32 %v3217_v31, %v3075_v38  ;;  %v8667_v44 = vpack.c.bf16 %v2951_v54, %v2950_v7  ;;  %v2949_v19 = vmax.f32 %v2793_v18, 0.0 }
 0x355   :  { %v8672_v32 = vor.u32 %v11572_v39, %v8636_v34  ;;  %v2814_v26 = vadd.f32 %v5931_v47, %v8410_v5  ;;  %v2805_v4 = vpop.f32.mrf.mxu0  ;;  %v8676_v37 = vsel %vm953_vm2, %v3558_v63, %v3562_v22  ;;  %v3399_v61 = vshll.u32 %v8665_v11, 16 }
 0x356   :  { %11573 = vst [vmem:[#allocation105_spill] sm:$0xff] %v8676_v37  ;;  %v8679_v17 = vrot.slane %v3069_v20, 7  ;;  %v2996_v2 = vpack.c.bf16 %v2949_v19, %v2948_v53  ;;  %3966 = vrot.lane.b32.xlu1 %v8676_v37, %s6176_s0  ;;  %v11574_v7 = vshrl.u32 %v8556_v41, 16  ;;  %v3476_v12 = vshll.u32 %v8607_v43, 16 }
 0x357   :  { %v5932_v54 = vpop.f32.mrf.mxu0  ;;  %v3397_v47 = vshrl.u32 %v8665_v11, 16  ;;  %v3401_v18 = vrot.slane %v3399_v61, 1  ;;  %v3404_v63 = vshll.u32 %v8661_v40, 16  ;;  %v3495_v22 = vshll.u32 %v8580_v58, 16 }
 0x358   :  { %v8685_v42 = vor.u32 %v3473_v35, %v11574_v7  ;;  %v8693_v53 = vsel %vm6243_vm3, %v3075_v38, %v3219_v55  ;;  %v3081_v19 = vshrl.u32 %v2996_v2, 16  ;;  %v2806_v20 = vadd.f32 %v8410_v5, %v2805_v4 }
 0x359   :  { %11575 = vst [vmem:[#allocation142_spill] sm:$0xff] %v8693_v53  ;;  %v2817_v35 = vadd.f32 %v5932_v54, %v8410_v5  ;;  %v2954_v39 = vmax.f32 %v2814_v26, 0.0  ;;  %v2808_v7 = vpop.f32.mrf.mxu0  ;;  %v3402_v37 = vor.u32 %v3401_v18, %v3397_v47  ;;  %v3406_v16 = vrot.slane %v3404_v63, 1 }
 0x35a   :  { %v8699_v61 = vsel %vm6243_vm3, %v3075_v38, %v3217_v31  ;;  %v3083_v30 = vrot.slane %v3081_v19, 7  ;;  %v3223_v28 = vshll.u32 %v2996_v2, 16  ;;  %v2809_v27 = vadd.f32 %v8410_v5, %v2808_v7 }
 0x35b   :  { %v2955_v1 = vmax.f32 %v2817_v35, 0.0  ;;  %v10928_v55 = vshll.u32 %v8634_v46, 16  ;;  %v8704_v43 = vsel %vm953_vm2, %v3402_v37, %v3406_v16  ;;  %v3579_v4 = vshll.u32 %v8693_v53, 16 }
 0x35c   :  { %11576 = vst [vmem:[#allocation137_spill] sm:$0xff] %v8704_v43  ;;  %v3584_v26 = vshll.u32 %v8699_v61, 16  ;;  %v3225_v54 = vor.u32 %v3223_v28, %v3083_v30  ;;  %v2952_v47 = vmax.f32 %v2806_v20, 0.0  ;;  %v2953_v31 = vmax.f32 %v2809_v27, 0.0  ;;  %3940 = vrot.lane.b32.xlu0 %v8704_v43, %s6176_s0  ;;  %v5935_v38 = vpop.f32.mrf.mxu0 }
 0x35d   :  { %v8708_v18 = vpack.c.bf16 %v2955_v1, %v2954_v39  ;;  %v3577_v2 = vshrl.u32 %v8693_v53, 16  ;;  %v3581_v63 = vrot.slane %v3579_v4, 1  ;;  %v3478_v19 = vrot.slane %v3476_v12, 1 }
 0x35e   :  { %v3497_v35 = vrot.slane %v3495_v22, 1  ;;  %v3216_v16 = vor.u32 %v10928_v55, %v8679_v17  ;;  %v8718_v37 = vsel %vm6243_vm3, %v3083_v30, %v3225_v54  ;;  %v2998_v1 = vpack.c.bf16 %v2953_v31, %v2952_v47  ;;  %v2821_v20 = vpop.f32.mrf.mxu0 }
 0x35f   :  { %11577 = vst [vmem:[#allocation77_spill] sm:$0xff] %v8718_v37  ;;  %v8722_v27 = vsel %vm6243_vm3, %v3083_v30, %v3223_v28  ;;  %v2830_v39 = vadd.f32 %v5935_v38, %v8410_v5  ;;  %v3582_v7 = vor.u32 %v3581_v63, %v3577_v2  ;;  %v3586_v4 = vrot.slane %v3584_v26, 1 }
 0x360   :  { %v3493_v12 = vshrl.u32 %v8580_v58, 16  ;;  %v3089_v22 = vshrl.u32 %v2998_v1, 16  ;;  %v2822_v43 = vadd.f32 %v8410_v5, %v2821_v20  ;;  %3944 = vrot.lane.b32.xlu0 %v8563_v23, %s6176_s0  ;;  %v5936_v54 = vpop.f32.mrf.mxu0  ;;  %v3603_v47 = vshll.u32 %v8718_v37, 16 }
 0x361   :  { %v11578_v31 = vshll.u32 %v8476_v62, 16  ;;  %v8738_v30 = vsel %vm953_vm2, %v3582_v7, %v3586_v4  ;;  %v2833_v26 = vadd.f32 %v5936_v54, %v8410_v5  ;;  %v3608_v38 = vshll.u32 %v8722_v27, 16 }
 0x362   :  { %11580 = vst [vmem:[#allocation82_spill] sm:$0xff] %v8738_v30  ;;  %v3498_v2 = vor.u32 %v3497_v35, %v3493_v12  ;;  %v3091_v63 = vrot.slane %v3089_v22, 7  ;;  %v3229_v20 = vshll.u32 %v2998_v1, 16  ;;  %3970 = vrot.lane.b32.xlu1 %v8738_v30, %s6176_s0  ;;  %v2824_v55 = vpop.f32.mrf.mxu0  ;;  %v3601_v62 = vshrl.u32 %v8718_v37, 16 }
 0x363   :  { %v8735_v28 = vsel %vm6243_vm3, %v8512_v15, %v11578_v31  ;;  %v3605_v23 = vrot.slane %v3603_v47, 1  ;;  %v2958_v58 = vmax.f32 %v2830_v39, 0.0  ;;  %v2959_v15 = vmax.f32 %v2833_v26, 0.0 }
 0x364   :  { %11579 = vst [vmem:[#allocation64_spill] sm:$0xff] %v8735_v28  ;;  %v2825_v31 = vadd.f32 %v8410_v5, %v2824_v55  ;;  %v3500_v7 = vshll.u32 %v8735_v28, 16  ;;  %v3231_v4 = vor.u32 %v3229_v20, %v3091_v63  ;;  %v2956_v54 = vmax.f32 %v2822_v43, 0.0  ;;  %3948 = vrot.lane.b32.xlu0 %v8588_v50, %s6176_s0 }
 0x365   :  { %v3606_v35 = vor.u32 %v3605_v23, %v3601_v62  ;;  %v3610_v1 = vrot.slane %v3608_v38, 1  ;;  %v8749_v12 = vpack.c.bf16 %v2959_v15, %v2958_v58  ;;  %v8753_v30 = vsel %vm6243_vm3, %v3091_v63, %v3229_v20 }
 0x366   :  { %v2957_v22 = vmax.f32 %v2825_v31, 0.0  ;;  %11581 = vst [vmem:[#allocation45_spill] sm:$0xff] %v8753_v30  ;;  %v11582_v39 = vshll.u32 %v8521_v29, 16  ;;  %v8764_v43 = vsel %vm6243_vm3, %v3091_v63, %v3231_v4  ;;  %v3632_v58 = vshll.u32 %v8753_v30, 16 }
 0x367   :  { %v8767_v23 = vsel %vm953_vm2, %v3606_v35, %v3610_v1  ;;  %v8774_v47 = vsel %vm6243_vm3, %v8636_v34, %v8672_v32  ;;  %v3502_v26 = vrot.slane %v3500_v7, 1  ;;  %v8785_v38 = vsel %vm6243_vm3, %v8679_v17, %v3216_v16 }
 0x368   :  { %v8760_v55 = vsel %vm6243_vm3, %v8565_v59, %v11582_v39  ;;  %11584 = vst [vmem:[#allocation112_spill] sm:$0xff] %v8767_v23  ;;  %11585 = vst [vmem:[#allocation107_spill] sm:$0xff] %v8774_v47  ;;  %v3000_v29 = vpack.c.bf16 %v2957_v22, %v2956_v54  ;;  %3974 = vrot.lane.b32.xlu1 %v8767_v23, %s6176_s0  ;;  %v8780_v59 = vsel %vm953_vm2, %v8685_v42, %v3478_v19  ;;  %v5939_v63 = vpop.f32.mrf.mxu0 }
 0x369   :  { %11583 = vst [vmem:[#allocation24_spill] sm:$0xff] %v8760_v55  ;;  %11586 = vst [vmem:[#allocation144_spill] sm:$0xff] %v8780_v59  ;;  %3952 = vrot.lane.b32.xlu0 %v8780_v59, %s6176_s0  ;;  %v3627_v32 = vshll.u32 %v8764_v43, 16  ;;  %v3519_v20 = vshll.u32 %v8613_v57, 16  ;;  %v3524_v62 = vshll.u32 %v8760_v55, 16  ;;  %v2846_v42 = vadd.f32 %v5939_v63, %v8410_v5 }
 0x36a   :  { %11587 = vst [vmem:[#allocation139_spill] sm:$0xff] %v8785_v38  ;;  %v3097_v15 = vshrl.u32 %v3000_v29, 16  ;;  %v8794_v19 = vsel %vm953_vm2, %v3498_v2, %v3502_v26  ;;  %v3517_v31 = vshrl.u32 %v8613_v57, 16  ;;  %v2837_v16 = vpop.f32.mrf.mxu0  ;;  %v3625_v7 = vshrl.u32 %v8764_v43, 16 }
 0x36b   :  { %11588 = vst [vmem:[#allocation163_spill] sm:$0xff] %v8794_v19  ;;  %v3629_v4 = vrot.slane %v3627_v32, 1  ;;  %v3634_v54 = vrot.slane %v3632_v58, 1  ;;  %v3521_v35 = vrot.slane %v3519_v20, 1  ;;  %v3235_v22 = vshll.u32 %v3000_v29, 16 }
 0x36c   :  { %v3099_v1 = vrot.slane %v3097_v15, 7  ;;  %v3526_v39 = vrot.slane %v3524_v62, 1  ;;  %v11589_v23 = vshll.u32 %v8594_v25, 16  ;;  %v2838_v2 = vadd.f32 %v8410_v5, %v2837_v16  ;;  %v5940_v26 = vpop.f32.mrf.mxu0 }
 0x36d   :  { %3956 = vrot.lane.b32.xlu0 %v8794_v19, %s6176_s0  ;;  %v3630_v59 = vor.u32 %v3629_v4, %v3625_v7  ;;  %v3522_v32 = vor.u32 %v3521_v35, %v3517_v31  ;;  %v3543_v58 = vshll.u32 %v8774_v47, 16  ;;  %v2962_v29 = vmax.f32 %v2846_v42, 0.0 }
 0x36e   :  { %v8803_v63 = vsel %vm6243_vm3, %v8636_v34, %v11589_v23  ;;  %v3237_v20 = vor.u32 %v3235_v22, %v3099_v1  ;;  %v2849_v62 = vadd.f32 %v5940_v26, %v8410_v5  ;;  %v3541_v25 = vshrl.u32 %v8774_v47, 16  ;;  %v2840_v34 = vpop.f32.mrf.mxu0 }
 0x36f   :  { %11590 = vst [vmem:[#allocation22_spill] sm:$0xff] %v8803_v63  ;;  %v8812_v15 = vsel %vm953_vm2, %v3630_v59, %v3634_v54  ;;  %v8815_v23 = vsel %vm953_vm2, %v3522_v32, %v3526_v39  ;;  %v3545_v16 = vrot.slane %v3543_v58, 1  ;;  %v3548_v19 = vshll.u32 %v8803_v63, 16 }
 0x370   :  { %11591 = vst [vmem:[#allocation48_spill] sm:$0xff] %v8812_v15  ;;  %11592 = vst [vmem:[#allocation86_spill] sm:$0xff] %v8815_v23  ;;  %v8820_v31 = vsel %vm6243_vm3, %v3099_v1, %v3237_v20  ;;  %v2963_v7 = vmax.f32 %v2849_v62, 0.0  ;;  %3978 = vrot.lane.b32.xlu1 %v8812_v15, %s6176_s0  ;;  %v2841_v42 = vadd.f32 %v8410_v5, %v2840_v34  ;;  %v2960_v4 = vmax.f32 %v2838_v2, 0.0 }
 0x371   :  { %11593 = vst [vmem:[#allocation78_spill] sm:$0xff] %v8820_v31  ;;  %v8827_v59 = vsel %vm6243_vm3, %v3099_v1, %v3235_v22  ;;  %3960 = vrot.lane.b32.xlu0 %v8815_v23, %s6176_s0  ;;  %v3546_v54 = vor.u32 %v3545_v16, %v3541_v25  ;;  %v3550_v35 = vrot.slane %v3548_v19, 1  ;;  %v3651_v39 = vshll.u32 %v8820_v31, 16 }
 0x372   :  { %11594 = vst [vmem:[#allocation39_spill] sm:$0xff] %v8827_v59  ;;  %v8832_v26 = vpack.c.bf16 %v2963_v7, %v2962_v29  ;;  %v2961_v32 = vmax.f32 %v2841_v42, 0.0  ;;  %v3656_v58 = vshll.u32 %v8827_v59, 16  ;;  %v11595_v20 = vshll.u32 %v8634_v46, 16 }
 0x373   :  { %v3649_v22 = vshrl.u32 %v8820_v31, 16  ;;  %v3653_v2 = vrot.slane %v3651_v39, 1  ;;  %v3567_v62 = vshll.u32 %v8785_v38, 16  ;;  %v8845_v25 = vsel %vm953_vm2, %v3546_v54, %v3550_v35 }
 0x374   :  { %v8840_v1 = vsel %vm6243_vm3, %v8679_v17, %v11595_v20  ;;  %v3002_v19 = vpack.c.bf16 %v2961_v32, %v2960_v4  ;;  %11597 = vst [vmem:[#allocation25_spill] sm:$0xff] %v8845_v25  ;;  %v3565_v29 = vshrl.u32 %v8785_v38, 16  ;;  %v8850_v46 = vpop.f32.mrf.mxu0  ;;  %v3658_v16 = vrot.slane %v3656_v58, 1 }
 0x375   :  { %11596 = vst [vmem:[#allocation114_spill] sm:$0xff] %v8840_v1  ;;  %3964 = vrot.lane.b32.xlu0 %v8845_v25, %s6176_s0  ;;  %v3654_v34 = vor.u32 %v3653_v2, %v3649_v22  ;;  %v3569_v17 = vrot.slane %v3567_v62, 1  ;;  %v3572_v7 = vshll.u32 %v8840_v1, 16 }
 0x376   :  { %v3105_v42 = vshrl.u32 %v3002_v19, 16  ;;  %v2853_v39 = vpop.f32.mrf.mxu0  ;;  %v3241_v32 = vshll.u32 %v3002_v19, 16 }
 0x377   :  { %v8854_v20 = vsel %vm953_vm2, %v3654_v34, %v3658_v16  ;;  %v3570_v4 = vor.u32 %v3569_v17, %v3565_v29  ;;  %v3574_v54 = vrot.slane %v3572_v7, 1  ;;  %v2854_v2 = vadd.f32 %v8410_v5, %v2853_v39 }
 0x378   :  { %11598 = vst [vmem:[#allocation109_spill] sm:$0xff] %v8854_v20  ;;  %v3107_v35 = vrot.slane %v3105_v42, 7  ;;  %3982 = vrot.lane.b32.xlu1 %v8854_v20, %s6176_s0  ;;  %v8861_v22 = vpop.f32.mrf.mxu0 }
 0x379   :  { %v8859_v15 = vsel %vm953_vm2, %v3570_v4, %v3574_v54  ;;  %v2964_v7 = vmax.f32 %v2854_v2, 0.0 }
 0x37a   :  { %11599 = vst [vmem:[#allocation146_spill] sm:$0xff] %v8859_v15  ;;  %v3243_v58 = vor.u32 %v3241_v32, %v3107_v35  ;;  %3968 = vrot.lane.b32.xlu0 %v8859_v15, %s6176_s0  ;;  %v2856_v62 = vpop.f32.mrf.mxu0  ;;  %v8868_v29 = vsel %vm6243_vm3, %v3107_v35, %v3241_v32 }
 0x37b   :  { %11600 = vst [vmem:[#allocation141_spill] sm:$0xff] %v8868_v29  ;;  %v2857_v34 = vadd.f32 %v8410_v5, %v2856_v62  ;;  %v3680_v17 = vshll.u32 %v8868_v29, 16 }
 0x37c   :  { %v8872_v19 = vsel %vm6243_vm3, %v3107_v35, %v3243_v58 }
 0x37d   :  { %11601 = vst [vmem:[#allocation165_spill] sm:$0xff] %v8872_v19  ;;  %v3675_v16 = vshll.u32 %v8872_v19, 16  ;;  %v2965_v42 = vmax.f32 %v2857_v34, 0.0  ;;  %v3673_v39 = vshrl.u32 %v8872_v19, 16  ;;  %v3682_v15 = vrot.slane %v3680_v17, 1 }
 0x37f   :  { %v3677_v4 = vrot.slane %v3675_v16, 1  ;;  %v3004_v54 = vpack.c.bf16 %v2965_v42, %v2964_v7 }
 0x381   :  { %v8878_v20 = vpop.f32.mrf.mxu0  ;;  %v3678_v32 = vor.u32 %v3677_v4, %v3673_v39  ;;  %v3113_v25 = vshrl.u32 %v3004_v54, 16  ;;  %v3247_v62 = vshll.u32 %v3004_v54, 16 }
 0x383   :  { %v2869_v23 = vpop.f32.mrf.mxu0  ;;  %v8881_v35 = vsel %vm953_vm2, %v3678_v32, %v3682_v15  ;;  %v3115_v58 = vrot.slane %v3113_v25, 7 }
 0x384   :  { %11602 = vst [vmem:[#allocation74_spill] sm:$0xff] %v8881_v35  ;;  %3986 = vrot.lane.b32.xlu1 %v8881_v35, %s6176_s0  ;;  %v2870_v16 = vadd.f32 %v8410_v5, %v2869_v23 }
 0x385   :  { %v8885_v2 = vpop.f32.mrf.mxu0  ;;  %v3249_v34 = vor.u32 %v3247_v62, %v3115_v58  ;;  %v8890_v42 = vsel %vm6243_vm3, %v3115_v58, %v3247_v62 }
 0x386   :  { %11603 = vst [vmem:[#allocation161_spill] sm:$0xff] %v8890_v42  ;;  %v3704_v39 = vshll.u32 %v8890_v42, 16  ;;  %v2968_v4 = vmax.f32 %v2870_v16, 0.0  ;;  %v3085_v16 = vshrl.u32 %v8667_v44, 16  ;;  %v3226_v42 = vshll.u32 %v8667_v44, 16 }
 0x387   :  { %v2872_v7 = vpop.f32.mrf.mxu0  ;;  %v8894_v17 = vsel %vm6243_vm3, %v3115_v58, %v3249_v34 }
 0x388   :  { %11604 = vst [vmem:[#allocation59_spill] sm:$0xff] %v8894_v17  ;;  %v2873_v15 = vadd.f32 %v8410_v5, %v2872_v7  ;;  %v3699_v25 = vshll.u32 %v8894_v17, 16  ;;  %v3697_v32 = vshrl.u32 %v8894_v17, 16  ;;  %v3706_v1 = vrot.slane %v3704_v39, 1 }
 0x38a   :  { %v2969_v54 = vmax.f32 %v2873_v15, 0.0  ;;  %v3701_v23 = vrot.slane %v3699_v25, 1 }
 0x38c   :  { %v3006_v35 = vpack.c.bf16 %v2969_v54, %v2968_v4  ;;  %v3702_v62 = vor.u32 %v3701_v23, %v3697_v32  ;;  %v3093_v54 = vshrl.u32 %v8708_v18, 16 }
 0x38d   :  { %v8900_v50 = vpop.f32.mrf.mxu0 }
 0x38e   :  { %v3121_v38 = vshrl.u32 %v3006_v35, 16  ;;  %v8903_v58 = vsel %vm953_vm2, %v3702_v62, %v3706_v1  ;;  %v3253_v7 = vshll.u32 %v3006_v35, 16  ;;  %v3087_v35 = vrot.slane %v3085_v16, 7 }
 0x38f   :  { %v2885_v63 = vpop.f32.mrf.mxu0  ;;  %11605 = vst [vmem:[#allocation42_spill] sm:$0xff] %v8903_v58  ;;  %3990 = vrot.lane.b32.xlu1 %v8903_v58, %s6176_s0  ;;  %v8925_v17 = vrot.slane %v3093_v54, 7 }
 0x390   :  { %v3123_v34 = vrot.slane %v3121_v38, 7  ;;  %v2886_v4 = vadd.f32 %v8410_v5, %v2885_v63  ;;  %v3101_v63 = vshrl.u32 %v8749_v12, 16 }
 0x391   :  { %v8908_v15 = vpop.f32.mrf.mxu0 }
 0x392   :  { %v3255_v25 = vor.u32 %v3253_v7, %v3123_v34  ;;  %v8914_v32 = vsel %vm6243_vm3, %v3123_v34, %v3253_v7  ;;  %v2972_v58 = vmax.f32 %v2886_v4, 0.0  ;;  %v8929_v29 = vrot.slane %v3101_v63, 7 }
 0x393   :  { %v2888_v39 = vpop.f32.mrf.mxu0  ;;  %11606 = vst [vmem:[#allocation116_spill] sm:$0xff] %v8914_v32  ;;  %v3728_v62 = vshll.u32 %v8914_v32, 16 }
 0x394   :  { %v8918_v38 = vsel %vm6243_vm3, %v3123_v34, %v3255_v25  ;;  %v2889_v1 = vadd.f32 %v8410_v5, %v2888_v39  ;;  %v3228_v25 = vor.u32 %v3226_v42, %v3087_v35  ;;  %v10971_v5 = vshll.u32 %v8708_v18, 16 }
 0x395   :  { %11607 = vst [vmem:[#allocation33_spill] sm:$0xff] %v8918_v38  ;;  %v3723_v23 = vshll.u32 %v8918_v38, 16  ;;  %v3721_v7 = vshrl.u32 %v8918_v38, 16  ;;  %v3730_v57 = vrot.slane %v3728_v62, 1 }
 0x396   :  { %v2973_v47 = vmax.f32 %v2889_v1, 0.0  ;;  %v3234_v4 = vor.u32 %v10971_v5, %v8925_v17  ;;  %v10974_v1 = vshll.u32 %v8749_v12, 16  ;;  %v8945_v62 = vsel %vm6243_vm3, %v3087_v35, %v3228_v25 }
 0x397   :  { %v3725_v55 = vrot.slane %v3723_v23, 1  ;;  %11609 = vst [vmem:[#allocation148_spill] sm:$0xff] %v8945_v62  ;;  %v3109_v5 = vshrl.u32 %v8832_v26, 16 }
 0x398   :  { %v3008_v34 = vpack.c.bf16 %v2973_v47, %v2972_v58 }
 0x399   :  { %v5955_v16 = vpop.f32.mrf.mxu0  ;;  %v3726_v39 = vor.u32 %v3725_v55, %v3721_v7  ;;  %v6152_v55 = vld [vmem:[%s10746_s2] ss:$0 sm:$0xff]  ;;  %s6183_s2 = smov 40  }
 0x39a   :  { %v3129_v32 = vshrl.u32 %v3008_v34, 16  ;;  %v3259_v58 = vshll.u32 %v3008_v34, 16  ;;  %v2910_v23 = vadd.f32 %v6152_v55, %v5955_v16  ;;  %v2865_v63 = vadd.f32 %v6152_v55, %v8861_v22 }
 0x39b   :  { %v2901_v44 = vpop.f32.mrf.mxu0  ;;  %v8935_v54 = vsel %vm953_vm2, %v3726_v39, %v3730_v57  ;;  %v8954_v16 = vsel %vm6243_vm3, %v8925_v17, %v3234_v4  ;;  %v2862_v25 = vadd.f32 %v6152_v55, %v8850_v46  ;;  %v2881_v4 = vadd.f32 %v6152_v55, %v8885_v2 }
 0x39c   :  { %11608 = vst [vmem:[#allocation111_spill] sm:$0xff] %v8935_v54  ;;  %v3131_v47 = vrot.slane %v3129_v32, 7  ;;  %3994 = vrot.lane.b32.xlu1 %v8935_v54, %s6176_s0  ;;  %v3240_v32 = vor.u32 %v10974_v1, %v8929_v29  ;;  %v2902_v34 = vadd.f32 %v6152_v55, %v2901_v44  ;;  %11610 = vst [vmem:[#allocation143_spill] sm:$0xff] %v8954_v16  ;;  %v2978_v44 = vmax.f32 %v2910_v23, 0.0 }
 0x39d   :  { %v5956_v57 = vpop.f32.mrf.mxu0  ;;  %v2967_v19 = vmax.f32 %v2865_v63, 0.0  ;;  %v2878_v23 = vadd.f32 %v6152_v55, %v8878_v20 }
 0x39e   :  { %v3261_v7 = vor.u32 %v3259_v58, %v3131_v47  ;;  %v2913_v39 = vadd.f32 %v6152_v55, %v5956_v57  ;;  %v8960_v22 = vsel %vm6243_vm3, %v3131_v47, %v3259_v58  ;;  %v8972_v46 = vsel %vm6243_vm3, %v8929_v29, %v3240_v32 }
 0x39f   :  { %v2904_v54 = vpop.f32.mrf.mxu0  ;;  %11611 = vst [vmem:[#allocation167_spill] sm:$0xff] %v8960_v22  ;;  %v3752_v59 = vshll.u32 %v8960_v22, 16  ;;  %11613 = vst [vmem:[#allocation84_spill] sm:$0xff] %v8972_v46  ;;  %v2976_v58 = vmax.f32 %v2902_v34, 0.0  ;;  %v8980_v22 = vsel %vm6243_vm3, %v3087_v35, %v3226_v42  ;;  %v2971_v32 = vmax.f32 %v2881_v4, 0.0 }
 0x3a0   :  { %v8964_v1 = vsel %vm6243_vm3, %v3131_v47, %v3261_v7  ;;  %v2979_v57 = vmax.f32 %v2913_v39, 0.0  ;;  %v2905_v38 = vadd.f32 %v6152_v55, %v2904_v54  ;;  %v2966_v47 = vmax.f32 %v2862_v25, 0.0  ;;  %11614 = vst [vmem:[#allocation79_spill] sm:$0xff] %v8980_v22 }
 0x3a1   :  { %11612 = vst [vmem:[#allocation162_spill] sm:$0xff] %v8964_v1  ;;  %v3747_v28 = vshll.u32 %v8964_v1, 16  ;;  %v3745_v54 = vshrl.u32 %v8964_v1, 16  ;;  %v8976_v7 = vrot.slane %v3109_v5, 7  ;;  %v2970_v1 = vmax.f32 %v2878_v23, 0.0 }
 0x3a2   :  { %v3011_v31 = vpack.c.bf16 %v2979_v57, %v2978_v44  ;;  %v2977_v41 = vmax.f32 %v2905_v38, 0.0  ;;  %v8982_v30 = vpack.c.bf16 %v2967_v19, %v2966_v47  ;;  %v3754_v44 = vrot.slane %v3752_v59, 1 }
 0x3a3   :  { %v3749_v63 = vrot.slane %v3747_v28, 1  ;;  %v2897_v38 = vadd.f32 %v6152_v55, %v8908_v15  ;;  %v2894_v28 = vadd.f32 %v6152_v55, %v8900_v50  ;;  %v8998_v50 = vpack.c.bf16 %v2971_v32, %v2970_v1 }
 0x3a4   :  { %v3077_v2 = vshrl.u32 %v3011_v31, 16  ;;  %v3010_v39 = vpack.c.bf16 %v2977_v41, %v2976_v58  ;;  %v3220_v20 = vshll.u32 %v3011_v31, 16  ;;  %v3615_v41 = vshll.u32 %v8945_v62, 16 }
 0x3a5   :  { %v3750_v34 = vor.u32 %v3749_v63, %v3745_v54  ;;  %v10989_v31 = vshll.u32 %v8832_v26, 16  ;;  %v3117_v15 = vshrl.u32 %v8982_v30, 16  ;;  %v3613_v55 = vshrl.u32 %v8945_v62, 16 }
 0x3a6   :  { %v3079_v25 = vrot.slane %v3077_v2, 7  ;;  %v3137_v57 = vshrl.u32 %v3010_v39, 16  ;;  %v3265_v19 = vshll.u32 %v3010_v39, 16  ;;  %v2975_v4 = vmax.f32 %v2897_v38, 0.0 }
 0x3a7   :  { %v8987_v5 = vsel %vm953_vm2, %v3750_v34, %v3754_v44  ;;  %v3246_v54 = vor.u32 %v10989_v31, %v8976_v7  ;;  %v3620_v2 = vshll.u32 %v8980_v22, 16  ;;  %v2974_v39 = vmax.f32 %v2894_v28, 0.0 }
 0x3a8   :  { %11615 = vst [vmem:[#allocation118_spill] sm:$0xff] %v8987_v5  ;;  %v3222_v42 = vor.u32 %v3220_v20, %v3079_v25  ;;  %v3139_v35 = vrot.slane %v3137_v57, 7  ;;  %3998 = vrot.lane.b32.xlu1 %v8987_v5, %s6176_s0  ;;  %v8994_v59 = vsel %vm6243_vm3, %v3079_v25, %v3220_v20  ;;  %v3617_v34 = vrot.slane %v3615_v41, 1 }
 0x3a9   :  { %v3596_v1 = vshll.u32 %v8994_v59, 16  ;;  %v3639_v44 = vshll.u32 %v8954_v16, 16  ;;  %v9024_v31 = vpack.c.bf16 %v2975_v4, %v2974_v39  ;;  %v3847_v28 = vrot.slane %v8424_v52, 1 }
 0x3aa   :  { %v9003_v58 = vsel %vm6243_vm3, %v3079_v25, %v3222_v42  ;;  %v3267_v47 = vor.u32 %v3265_v19, %v3139_v35  ;;  %v9007_v23 = vsel %vm6243_vm3, %v3139_v35, %v3265_v19  ;;  %v3119_v42 = vrot.slane %v3117_v15, 7 }
 0x3ab   :  { %11616 = vst [vmem:[#allocation113_spill] sm:$0xff] %v9003_v58  ;;  %11617 = vst [vmem:[#allocation150_spill] sm:$0xff] %v9007_v23  ;;  %v3591_v63 = vshll.u32 %v9003_v58, 16  ;;  %v3589_v38 = vshrl.u32 %v9003_v58, 16  ;;  %v3776_v57 = vshll.u32 %v9007_v23, 16  ;;  %v3125_v19 = vshrl.u32 %v8998_v50, 16 }
 0x3ac   :  { %v9017_v32 = vsel %vm6243_vm3, %v3139_v35, %v3267_v47  ;;  %v3598_v35 = vrot.slane %v3596_v1, 1  ;;  %v3250_v22 = vshll.u32 %v8982_v30, 16  ;;  %v3618_v62 = vor.u32 %v3617_v34, %v3613_v55 }
 0x3ad   :  { %11618 = vst [vmem:[#allocation145_spill] sm:$0xff] %v9017_v32  ;;  %v3593_v25 = vrot.slane %v3591_v63, 1  ;;  %v3771_v20 = vshll.u32 %v9017_v32, 16  ;;  %v3769_v41 = vshrl.u32 %v9017_v32, 16  ;;  %v11619_v63 = vshll.u32 %v8708_v18, 16 }
 0x3ae   :  { %v3641_v23 = vrot.slane %v3639_v44, 1  ;;  %v3663_v1 = vshll.u32 %v8972_v46, 16  ;;  %v9043_v30 = vsel %vm6243_vm3, %v8976_v7, %v3246_v54  ;;  %v3252_v55 = vor.u32 %v3250_v22, %v3119_v42 }
 0x3af   :  { %v3594_v5 = vor.u32 %v3593_v25, %v3589_v38  ;;  %v3773_v47 = vrot.slane %v3771_v20, 1  ;;  %v9034_v15 = vsel %vm6243_vm3, %v8925_v17, %v11619_v63  ;;  %v3778_v38 = vrot.slane %v3776_v57, 1  ;;  %11621 = vst [vmem:[#allocation164_spill] sm:$0xff] %v9043_v30 }
 0x3b0   :  { %v3127_v18 = vrot.slane %v3125_v19, 7  ;;  %v3133_v34 = vshrl.u32 %v9024_v31, 16  ;;  %v3637_v44 = vshrl.u32 %v8954_v16, 16  ;;  %v3644_v25 = vshll.u32 %v9034_v15, 16 }
 0x3b1   :  { %v9037_v4 = vsel %vm953_vm2, %v3594_v5, %v3598_v35  ;;  %v3774_v39 = vor.u32 %v3773_v47, %v3769_v41  ;;  %v3622_v5 = vrot.slane %v3620_v2, 1  ;;  %v3256_v20 = vshll.u32 %v8998_v50, 16 }
 0x3b2   :  { %11620 = vst [vmem:[#allocation169_spill] sm:$0xff] %v9037_v4  ;;  %3972 = vrot.lane.b32.xlu0 %v9037_v4, %s6176_s0  ;;  %v3848_v54 = vrot.slane %v8428_v48, 1  ;;  %v11623_v57 = vshll.u32 %v8749_v12, 16  ;;  %v3642_v35 = vor.u32 %v3641_v23, %v3637_v44  ;;  %v3665_v41 = vrot.slane %v3663_v1, 1 }
 0x3b3   :  { %v9049_v17 = vsel %vm953_vm2, %v3774_v39, %v3778_v38  ;;  %v9065_v2 = vsel %vm953_vm2, %v3618_v62, %v3622_v5  ;;  %v3687_v47 = vshll.u32 %v9043_v30, 16  ;;  %v9070_v50 = vsel %vm6243_vm3, %v3119_v42, %v3252_v55 }
 0x3b4   :  { %11622 = vst [vmem:[#allocation87_spill] sm:$0xff] %v9049_v17  ;;  %4002 = vrot.lane.b32.xlu1 %v9049_v17, %s6176_s0  ;;  %v9062_v19 = vsel %vm6243_vm3, %v8929_v29, %v11623_v57  ;;  %11624 = vst [vmem:[#allocation81_spill] sm:$0xff] %v9065_v2  ;;  %v3258_v63 = vor.u32 %v3256_v20, %v3127_v18  ;;  %v3135_v48 = vrot.slane %v3133_v34, 7  ;;  %v3646_v29 = vrot.slane %v3644_v25, 1  ;;  %v11649_v17 = vld [vmem:[#allocation29_spill] sm:$0xff] }
 0x3b5   :  { %11625 = vst [vmem:[#allocation120_spill] sm:$0xff] %v9070_v50  ;;  %v9075_v12 = vsel %vm1402_vm4, %v3847_v28, %v3848_v54  ;;  %v3853_v62 = vrot.slane %v8455_v51, 1  ;;  %v3661_v23 = vshrl.u32 %v8972_v46, 16  ;;  %v3668_v39 = vshll.u32 %v9062_v19, 16 }
 0x3b6   :  { %3976 = vrot.lane.b32.xlu0 %v9065_v2, %s6176_s0  ;;  %v3262_v38 = vshll.u32 %v9024_v31, 16  ;;  %v3854_v1 = vrot.slane %v8461_v3, 1  ;;  %v11626_v55 = vshll.u32 %v8832_v26, 16  ;;  %v9092_v34 = vsel %vm953_vm2, %v3642_v35, %v3646_v29  ;;  %v11662_v2 = vld [vmem:[#allocation162_spill] sm:$0xff] }
 0x3b7   :  { %11627 = vst [vmem:[#allocation115_spill] sm:$0xff] %v9092_v34  ;;  %v3666_v5 = vor.u32 %v3665_v41, %v3661_v23  ;;  %v3689_v44 = vrot.slane %v3687_v47, 1  ;;  %v3711_v25 = vshll.u32 %v9070_v50, 16  ;;  %v9097_v31 = vsel %vm6243_vm3, %v3127_v18, %v3258_v63 }
 0x3b8   :  { %4006 = vrot.lane.b32.xlu1 %v9075_v12, %s6178_s26  ;;  %v9089_v28 = vsel %vm6243_vm3, %v8976_v7, %v11626_v55  ;;  %11628 = vst [vmem:[#allocation152_spill] sm:$0xff] %v9097_v31  ;;  %v3264_v54 = vor.u32 %v3262_v38, %v3135_v48  ;;  %v3859_v3 = vrot.slane %v8483_v24, 1  ;;  %v9103_v26 = vsel %vm1402_vm4, %v3853_v62, %v3854_v1 }
 0x3b9   :  { %v3670_v7 = vrot.slane %v3668_v39, 1  ;;  %v3685_v57 = vshrl.u32 %v9043_v30, 16  ;;  %v3692_v35 = vshll.u32 %v9089_v28, 16  ;;  %v3860_v41 = vrot.slane %v8489_v36, 1 }
 0x3ba   :  { %3980 = vrot.lane.b32.xlu0 %v9092_v34, %s6176_s0  ;;  %v9112_v47 = vsel %vm6243_vm3, %v3119_v42, %v3250_v22  ;;  %v3713_v62 = vrot.slane %v3711_v25, 1  ;;  %v3735_v23 = vshll.u32 %v9097_v31, 16  ;;  %v9120_v39 = vsel %vm6243_vm3, %v3135_v48, %v3264_v54 }
 0x3bb   :  { %v9115_v63 = vsel %vm953_vm2, %v3666_v5, %v3670_v7  ;;  %v3690_v29 = vor.u32 %v3689_v44, %v3685_v57  ;;  %11630 = vst [vmem:[#allocation171_spill] sm:$0xff] %v9120_v39  ;;  %v9125_v36 = vsel %vm1402_vm4, %v3859_v3, %v3860_v41  ;;  %v3694_v1 = vrot.slane %v3692_v35, 1 }
 0x3bc   :  { %4010 = vrot.lane.b32.xlu1 %v9103_v26, %s6178_s26  ;;  %11629 = vst [vmem:[#allocation147_spill] sm:$0xff] %v9115_v63  ;;  %v3865_v22 = vrot.slane %v8519_v8, 1  ;;  %v3709_v42 = vshrl.u32 %v9070_v50, 16  ;;  %v3716_v55 = vshll.u32 %v9112_v47, 16  ;;  %v3866_v5 = vrot.slane %v8527_v14, 1 }
 0x3bd   :  { %v9135_v44 = vsel %vm6243_vm3, %v3127_v18, %v3256_v20  ;;  %v9138_v25 = vsel %vm953_vm2, %v3690_v29, %v3694_v1  ;;  %v3737_v3 = vrot.slane %v3735_v23, 1  ;;  %v3759_v7 = vshll.u32 %v9120_v39, 16 }
 0x3be   :  { %3984 = vrot.lane.b32.xlu0 %v9115_v63, %s6176_s0  ;;  %11631 = vst [vmem:[#allocation166_spill] sm:$0xff] %v9138_v25  ;;  %v3714_v54 = vor.u32 %v3713_v62, %v3709_v42  ;;  %v3871_v57 = vrot.slane %v8569_v56, 1  ;;  %v9145_v35 = vsel %vm1402_vm4, %v3865_v22, %v3866_v5  ;;  %v3718_v14 = vrot.slane %v3716_v55, 1 }
 0x3bf   :  { %v3733_v41 = vshrl.u32 %v9097_v31, 16  ;;  %v3740_v18 = vshll.u32 %v9135_v44, 16  ;;  %v3872_v20 = vrot.slane %v8575_v6, 1  ;;  %v9154_v29 = vsel %vm6243_vm3, %v3135_v48, %v3262_v38 }
 0x3c0   :  { %4014 = vrot.lane.b32.xlu1 %v9125_v36, %s6178_s26  ;;  %v9157_v62 = vsel %vm953_vm2, %v3714_v54, %v3718_v14  ;;  %v3761_v1 = vrot.slane %v3759_v7, 1  ;;  %v3877_v55 = vrot.slane %v8617_v10, 1  ;;  %v3757_v6 = vshrl.u32 %v9120_v39, 16 }
 0x3c1   :  { %11632 = vst [vmem:[#allocation89_spill] sm:$0xff] %v9157_v62  ;;  %v3738_v23 = vor.u32 %v3737_v3, %v3733_v41  ;;  %v9162_v22 = vsel %vm1402_vm4, %v3871_v57, %v3872_v20  ;;  %v3742_v42 = vrot.slane %v3740_v18, 1  ;;  %v3764_v45 = vshll.u32 %v9154_v29, 16 }
 0x3c2   :  { %3988 = vrot.lane.b32.xlu0 %v9138_v25, %s6176_s0  ;;  %v3878_v38 = vrot.slane %v8623_v0, 1  ;;  %v3762_v5 = vor.u32 %v3761_v1, %v3757_v6  ;;  %v3883_v7 = vrot.slane %v8644_v33, 1  ;;  %v3884_v14 = vrot.slane %v8650_v21, 1  ;;  %v11654_v25 = vld [vmem:[#allocation107_spill] sm:$0xff] }
 0x3c3   :  { %v9170_v48 = vsel %vm953_vm2, %v3738_v23, %v3742_v42  ;;  %v3766_v3 = vrot.slane %v3764_v45, 1  ;;  %v3844_v0 = vrot.slane %v8665_v11, 1  ;;  %v3845_v18 = vrot.slane %v8661_v40, 1 }
 0x3c4   :  { %4018 = vrot.lane.b32.xlu1 %v9145_v35, %s6178_s26  ;;  %11633 = vst [vmem:[#allocation85_spill] sm:$0xff] %v9170_v48  ;;  %v9176_v54 = vsel %vm1402_vm4, %v3877_v55, %v3878_v38  ;;  %v9189_v41 = vsel %vm1402_vm4, %v3883_v7, %v3884_v14  ;;  %v3889_v20 = vrot.slane %v8693_v53, 1  ;;  %v3890_v21 = vrot.slane %v8699_v61, 1  ;;  %v11638_v7 = vld [vmem:[#allocation45_spill] sm:$0xff]  ;;  %v11639_v14 = vld [vmem:[#allocation26_spill] sm:$0xff] }
 0x3c5   :  { %v9182_v57 = vsel %vm953_vm2, %v3762_v5, %v3766_v3  ;;  %v9196_v23 = vsel %vm1402_vm4, %v3844_v0, %v3845_v18  ;;  %v3850_v1 = vrot.slane %v8433_v9, 1  ;;  %v3851_v40 = vrot.slane %v8450_v49, 1 }
 0x3c6   :  { %3992 = vrot.lane.b32.xlu0 %v9157_v62, %s6176_s0  ;;  %11634 = vst [vmem:[#allocation19_spill] sm:$0xff] %v9182_v57  ;;  %11635 = vst [vmem:[#allocation122_spill] sm:$0xff] %v9196_v23  ;;  %v9203_v42 = vsel %vm1402_vm4, %v3889_v20, %v3890_v21  ;;  %v3895_v55 = vrot.slane %v8718_v37, 1  ;;  %v3896_v61 = vrot.slane %v8722_v27, 1  ;;  %v3856_v45 = vrot.slane %v8496_v60, 1  ;;  %v11641_v20 = vld [vmem:[#allocation62_spill] sm:$0xff] }
 0x3c7   :  { %11636 = vst [vmem:[#allocation117_spill] sm:$0xff] %v9203_v42  ;;  %v9210_v6 = vsel %vm1402_vm4, %v3850_v1, %v3851_v40  ;;  %v3857_v49 = vrot.slane %v8539_v13, 1  ;;  %v3901_v5 = vrot.slane %v8764_v43, 1  ;;  %v3902_v27 = vrot.slane %v11638_v7, 1  ;;  %v11642_v21 = vld [vmem:[#allocation78_spill] sm:$0xff]  ;;  %v11646_v7 = vld [vmem:[#allocation64_spill] sm:$0xff] }
 0x3c8   :  { %4022 = vrot.lane.b32.xlu1 %v9162_v22, %s6178_s26  ;;  %v9217_v38 = vsel %vm1402_vm4, %v3895_v55, %v3896_v61  ;;  %v3862_v0 = vrot.slane %v11639_v14, 1  ;;  %v3863_v13 = vrot.slane %v11641_v20, 1  ;;  %v3907_v1 = vrot.slane %v11642_v21, 1  ;;  %v11643_v55 = vld [vmem:[#allocation39_spill] sm:$0xff]  ;;  %v11647_v20 = vld [vmem:[#allocation165_spill] sm:$0xff] }
 0x3c9   :  { %11637 = vst [vmem:[#allocation154_spill] sm:$0xff] %v9217_v38  ;;  %v9224_v3 = vsel %vm1402_vm4, %v3856_v45, %v3857_v49  ;;  %v9231_v18 = vsel %vm1402_vm4, %v3901_v5, %v3902_v27  ;;  %v3908_v61 = vrot.slane %v11643_v55, 1  ;;  %v11644_v45 = vld [vmem:[#allocation140_spill] sm:$0xff]  ;;  %v3869_v27 = vrot.slane %v11646_v7, 1 }
 0x3ca   :  { %3996 = vrot.lane.b32.xlu0 %v9170_v48, %s6176_s0  ;;  %11640 = vst [vmem:[#allocation149_spill] sm:$0xff] %v9231_v18  ;;  %v9238_v40 = vsel %vm1402_vm4, %v3862_v0, %v3863_v13  ;;  %v3868_v49 = vrot.slane %v11644_v45, 1  ;;  %v3913_v4 = vrot.slane %v11647_v20, 1  ;;  %v11648_v13 = vld [vmem:[#allocation141_spill] sm:$0xff]  ;;  %v11652_v48 = vld [vmem:[#allocation59_spill] sm:$0xff]  ;;  %v3880_v63 = vrot.slane %v11654_v25, 1 }
 0x3cb   :  { %v9245_v5 = vsel %vm1402_vm4, %v3907_v1, %v3908_v61  ;;  %v3914_v55 = vrot.slane %v11648_v13, 1  ;;  %v11651_v61 = vld [vmem:[#allocation24_spill] sm:$0xff]  ;;  %v3919_v62 = vrot.slane %v11652_v48, 1  ;;  %vm4902_vm2 = vcmask 457728  }
 0x3cc   :  { %4026 = vrot.lane.b32.xlu1 %v9176_v54, %s6178_s26  ;;  %11645 = vst [vmem:[#allocation173_spill] sm:$0xff] %v9245_v5  ;;  %v9252_v0 = vsel %vm1402_vm4, %v3868_v49, %v3869_v27  ;;  %v3875_v7 = vrot.slane %v11651_v61, 1  ;;  %v11653_v27 = vld [vmem:[#allocation161_spill] sm:$0xff]  ;;  %vm4967_vm3 = vcmask 523264  }
 0x3cd   :  { %v9259_v1 = vsel %vm1402_vm4, %v3913_v4, %v3914_v55  ;;  %v3920_v13 = vrot.slane %v11653_v27, 1  ;;  %v11656_v55 = vld [vmem:[#allocation22_spill] sm:$0xff] }
 0x3ce   :  { %4000 = vrot.lane.b32.xlu0 %v9182_v57, %s6176_s0  ;;  %v3874_v57 = vrot.slane %v11649_v17, 1  ;;  %11650 = vst [vmem:[#allocation168_spill] sm:$0xff] %v9259_v1  ;;  %v3881_v61 = vrot.slane %v11656_v55, 1 }
 0x3cf   :  { %v9273_v4 = vsel %vm1402_vm4, %v3919_v62, %v3920_v13  ;;  %v11661_v13 = vld [vmem:[#allocation114_spill] sm:$0xff] }
 0x3d0   :  { %4030 = vrot.lane.b32.xlu1 %v9189_v41, %s6178_s26  ;;  %v9266_v49 = vsel %vm1402_vm4, %v3874_v57, %v3875_v7  ;;  %11655 = vst [vmem:[#allocation91_spill] sm:$0xff] %v9273_v4  ;;  %v9280_v57 = vsel %vm1402_vm4, %v3880_v63, %v3881_v61  ;;  %v11658_v7 = vld [vmem:[#allocation116_spill] sm:$0xff]  ;;  %v3887_v55 = vrot.slane %v11661_v13, 1  ;;  %v11663_v61 = vld [vmem:[#allocation167_spill] sm:$0xff]  ;;  %v3937_v13 = vrot.slane %v9017_v32, 1  ;;  %v9332_v32 = vpop.permute.xlu0 %3940 }
 0x3d1   :  { %v3926_v27 = vrot.slane %v11658_v7, 1  ;;  %v3932_v7 = vrot.slane %v11663_v61, 1 }
 0x3d2   :  { %4004 = vrot.lane.b32.xlu0 %v9196_v23, %s6178_s26  ;;  %v3931_v23 = vrot.slane %v11662_v2, 1 }
 0x3d4   :  { %4034 = vrot.lane.b32.xlu1 %v9203_v42, %s6178_s26 }
 0x3d6   :  { %4008 = vrot.lane.b32.xlu0 %v9210_v6, %s6178_s26 }
 0x3d8   :  { %4038 = vrot.lane.b32.xlu1 %v9217_v38, %s6178_s26 }
 0x3da   :  { %4012 = vrot.lane.b32.xlu0 %v9224_v3, %s6178_s26 }
 0x3dc   :  { %4042 = vrot.lane.b32.xlu1 %v9231_v18, %s6178_s26  ;;  %v9284_v18 = vpop.permute.xlu1 %3942 }
 0x3de   :  { %4016 = vrot.lane.b32.xlu0 %v9238_v40, %s6178_s26 }
 0x3e0   :  { %4046 = vrot.lane.b32.xlu1 %v9245_v5, %s6178_s26  ;;  %v11657_v5 = vld [vmem:[#allocation33_spill] sm:$0xff]  ;;  %v9300_v42 = vpop.permute.xlu1 %3946 }
 0x3e1   :  { %v3925_v38 = vrot.slane %v11657_v5, 1  ;;  %11664 = vst [vmem:[#allocation124_spill] sm:$0xff] %v9300_v42 }
 0x3e2   :  { %4020 = vrot.lane.b32.xlu0 %v9252_v0, %s6178_s26 }
 0x3e3   :  { %v9289_v62 = vsel %vm1402_vm4, %v3925_v38, %v3926_v27  ;;  %v9305_v38 = vsel %vm1402_vm4, %v3931_v23, %v3932_v7  ;;  %v3893_v27 = vrot.slane %v8994_v59, 1  ;;  %v11670_v59 = vld [vmem:[#allocation79_spill] sm:$0xff] }
 0x3e4   :  { %4050 = vrot.lane.b32.xlu1 %v9259_v1, %s6178_s26  ;;  %v11659_v1 = vld [vmem:[#allocation139_spill] sm:$0xff]  ;;  %11660 = vst [vmem:[#allocation88_spill] sm:$0xff] %v9289_v62  ;;  %11665 = vst [vmem:[#allocation119_spill] sm:$0xff] %v9305_v38  ;;  %v9316_v42 = vpop.permute.xlu1 %3950  ;;  %v3899_v7 = vrot.slane %v11670_v59, 1 }
 0x3e5   :  { %v3886_v34 = vrot.slane %v11659_v1, 1 }
 0x3e6   :  { %4024 = vrot.lane.b32.xlu0 %v9266_v49, %s6178_s26 }
 0x3e7   :  { %v9296_v63 = vsel %vm1402_vm4, %v3886_v34, %v3887_v55  ;;  %v11667_v55 = vld [vmem:[#allocation150_spill] sm:$0xff] }
 0x3e8   :  { %4054 = vrot.lane.b32.xlu1 %v9273_v4, %s6178_s26  ;;  %v3892_v4 = vrot.slane %v9003_v58, 1  ;;  %v3938_v61 = vrot.slane %v11667_v55, 1  ;;  %v11668_v58 = vld [vmem:[#allocation148_spill] sm:$0xff]  ;;  %v9330_v55 = vpop.permute.xlu1 %3954 }
 0x3ea   :  { %4028 = vrot.lane.b32.xlu0 %v9280_v57, %s6178_s26  ;;  %v9312_v34 = vsel %vm1402_vm4, %v3892_v4, %v3893_v27  ;;  %v9321_v23 = vsel %vm1402_vm4, %v3937_v13, %v3938_v61  ;;  %v3904_v27 = vrot.slane %v8954_v16, 1  ;;  %v3905_v13 = vrot.slane %v9034_v15, 1 }
 0x3eb   :  { %11666 = vst [vmem:[#allocation155_spill] sm:$0xff] %v9312_v34  ;;  %11669 = vst [vmem:[#allocation151_spill] sm:$0xff] %v9321_v23 }
 0x3ec   :  { %4058 = vrot.lane.b32.xlu1 %v9289_v62, %s6178_s26  ;;  %v3898_v62 = vrot.slane %v11668_v58, 1  ;;  %v9340_v61 = vsel %vm1402_vm4, %v3904_v27, %v3905_v13  ;;  %v9343_v59 = vpop.permute.xlu1 %3958  ;;  %v3916_v27 = vrot.slane %v9043_v30, 1 }
 0x3ed   :  { %11671 = vst [vmem:[#allocation175_spill] sm:$0xff] %v9343_v59 }
 0x3ee   :  { %4032 = vrot.lane.b32.xlu0 %v9296_v63, %s6178_s26  ;;  %v9327_v4 = vsel %vm1402_vm4, %v3898_v62, %v3899_v7  ;;  %v3910_v62 = vrot.slane %v8972_v46, 1  ;;  %v3911_v7 = vrot.slane %v9062_v19, 1 }
 0x3f0   :  { %4062 = vrot.lane.b32.xlu1 %v9305_v38, %s6178_s26  ;;  %v9353_v15 = vsel %vm1402_vm4, %v3910_v62, %v3911_v7  ;;  %v9356_v13 = vpop.permute.xlu1 %3962  ;;  %v3922_v38 = vrot.slane %v9070_v50, 1  ;;  %v3923_v7 = vrot.slane %v9112_v47, 1 }
 0x3f1   :  { %11672 = vst [vmem:[#allocation170_spill] sm:$0xff] %v9353_v15  ;;  %11673 = vst [vmem:[#allocation187_spill] sm:$0xff] %v9356_v13 }
 0x3f2   :  { %4036 = vrot.lane.b32.xlu0 %v9312_v34, %s6178_s26  ;;  %v9348_v34 = vpop.permute.xlu0 %3944 }
 0x3f4   :  { %4066 = vrot.lane.b32.xlu1 %v9321_v23, %s6178_s26  ;;  %v3917_v23 = vrot.slane %v9089_v28, 1  ;;  %v9367_v59 = vpop.permute.xlu1 %3966  ;;  %v9377_v28 = vsel %vm1402_vm4, %v3922_v38, %v3923_v7  ;;  %v3934_v38 = vrot.slane %v9120_v39, 1 }
 0x3f5   :  { %11675 = vst [vmem:[#allocation51_spill] sm:$0xff] %v9367_v59  ;;  %11676 = vst [vmem:[#allocation90_spill] sm:$0xff] %v9377_v28  ;;  %v3929_v59 = vrot.slane %v9135_v44, 1 }
 0x3f6   :  { %4040 = vrot.lane.b32.xlu0 %v9327_v4, %s6178_s26  ;;  %v9364_v19 = vsel %vm1402_vm4, %v3916_v27, %v3917_v23  ;;  %v9369_v62 = vpop.permute.xlu0 %3948  ;;  %v3928_v23 = vrot.slane %v9097_v31, 1 }
 0x3f7   :  { %11674 = vst [vmem:[#allocation72_spill] sm:$0xff] %v9364_v19 }
 0x3f8   :  { %4070 = vrot.lane.b32.xlu1 %v8433_v9, %s6180_s28  ;;  %v9380_v27 = vpop.permute.xlu1 %3970  ;;  %v9390_v47 = vsel %vm1402_vm4, %v3928_v23, %v3929_v59 }
 0x3f9   :  { %11677 = vst [vmem:[#allocation28_spill] sm:$0xff] %v9380_v27  ;;  %11678 = vst [vmem:[#allocation121_spill] sm:$0xff] %v9390_v47  ;;  %v3935_v27 = vrot.slane %v9154_v29, 1 }
 0x3fa   :  { %4044 = vrot.lane.b32.xlu0 %v9340_v61, %s6178_s26  ;;  %v9385_v13 = vpop.permute.xlu0 %3952 }
 0x3fb   :  { %v9401_v44 = vsel %vm1402_vm4, %v3934_v38, %v3935_v27  ;;  %vm5032_vm4 = vcmask 588800  }
 0x3fc   :  { %4074 = vrot.lane.b32.xlu1 %v8496_v60, %s6180_s28  ;;  %v9393_v7 = vpop.permute.xlu1 %3974  ;;  %11680 = vst [vmem:[#allocation172_spill] sm:$0xff] %v9401_v44 }
 0x3fd   :  { %11679 = vst [vmem:[#allocation153_spill] sm:$0xff] %v9393_v7 }
 0x3fe   :  { %4048 = vrot.lane.b32.xlu0 %v9353_v15, %s6178_s26 }
 0x400   :  { %4078 = vrot.lane.b32.xlu1 %v11639_v14, %s6180_s28 }
 0x402   :  { %4052 = vrot.lane.b32.xlu0 %v9364_v19, %s6178_s26  ;;  %v9405_v19 = vpop.permute.xlu1 %3978 }
 0x403   :  { %11682 = vst [vmem:[#allocation80_spill] sm:$0xff] %v9405_v19 }
 0x404   :  { %4082 = vrot.lane.b32.xlu1 %v11644_v45, %s6180_s28 }
 0x406   :  { %4056 = vrot.lane.b32.xlu0 %v9377_v28, %s6178_s26  ;;  %v9403_v28 = vpop.permute.xlu0 %3956  ;;  %v9411_v59 = vpop.permute.xlu1 %3982 }
 0x407   :  { %11681 = vst [vmem:[#allocation188_spill] sm:$0xff] %v9403_v28  ;;  %11683 = vst [vmem:[#allocation92_spill] sm:$0xff] %v9411_v59 }
 0x408   :  { %4086 = vrot.lane.b32.xlu1 %v11649_v17, %s6180_s28 }
 0x40a   :  { %4060 = vrot.lane.b32.xlu0 %v9390_v47, %s6178_s26  ;;  %v9415_v29 = vpop.permute.xlu0 %3960  ;;  %v9419_v23 = vpop.permute.xlu1 %3986 }
 0x40b   :  { %11684 = vst [vmem:[#allocation34_spill] sm:$0xff] %v9415_v29  ;;  %11685 = vst [vmem:[#allocation93_spill] sm:$0xff] %v9419_v23 }
 0x40c   :  { %4090 = vrot.lane.b32.xlu1 %v11654_v25, %s6180_s28 }
 0x40e   :  { %4064 = vrot.lane.b32.xlu0 %v9401_v44, %s6178_s26  ;;  %v9425_v27 = vpop.permute.xlu0 %3964  ;;  %v9427_v38 = vpop.permute.xlu1 %3990 }
 0x40f   :  { %11686 = vst [vmem:[#allocation37_spill] sm:$0xff] %v9425_v27  ;;  %11687 = vst [vmem:[#allocation123_spill] sm:$0xff] %v9427_v38 }
 0x410   :  { %4094 = vrot.lane.b32.xlu1 %v11659_v1, %s6180_s28 }
 0x412   :  { %4068 = vrot.lane.b32.xlu0 %v8424_v52, %s6180_s28  ;;  %v9433_v59 = vpop.permute.xlu1 %3994  ;;  %v9437_v23 = vpop.permute.xlu0 %3968 }
 0x413   :  { %11688 = vst [vmem:[#allocation126_spill] sm:$0xff] %v9433_v59  ;;  %11689 = vst [vmem:[#allocation68_spill] sm:$0xff] %v9437_v23  ;;  %v11703_v23 = vld [vmem:[#allocation55_spill] sm:$0xff] }
 0x414   :  { %4098 = vrot.lane.b32.xlu1 %v8665_v11, %s6180_s28 }
 0x416   :  { %4072 = vrot.lane.b32.xlu0 %v8455_v51, %s6180_s28 }
 0x418   :  { %4102 = vrot.lane.b32.xlu1 %v11668_v58, %s6180_s28 }
 0x41a   :  { %4076 = vrot.lane.b32.xlu0 %v8483_v24, %s6180_s28  ;;  %v9441_v19 = vpop.permute.xlu1 %3998 }
 0x41b   :  { %11690 = vst [vmem:[#allocation70_spill] sm:$0xff] %v9441_v19 }
 0x41c   :  { %4106 = vrot.lane.b32.xlu1 %v8954_v16, %s6180_s28 }
 0x41e   :  { %4080 = vrot.lane.b32.xlu0 %v8519_v8, %s6180_s28 }
 0x420   :  { %4110 = vrot.lane.b32.xlu1 %v8972_v46, %s6180_s28 }
 0x422   :  { %4084 = vrot.lane.b32.xlu0 %v8569_v56, %s6180_s28 }
 0x424   :  { %4114 = vrot.lane.b32.xlu1 %v9043_v30, %s6180_s28  ;;  %v9447_v38 = vpop.permute.xlu0 %3972 }
 0x425   :  { %11691 = vst [vmem:[#allocation174_spill] sm:$0xff] %v9447_v38 }
 0x426   :  { %4088 = vrot.lane.b32.xlu0 %v8617_v10, %s6180_s28  ;;  %v9451_v59 = vpop.permute.xlu1 %4002 }
 0x427   :  { %11692 = vst [vmem:[#allocation177_spill] sm:$0xff] %v9451_v59 }
 0x428   :  { %4118 = vrot.lane.b32.xlu1 %v9070_v50, %s6180_s28  ;;  %v9455_v7 = vpop.permute.xlu0 %3976  ;;  %v11696_v50 = vld [vmem:[#allocation60_spill] sm:$0xff] }
 0x429   :  { %11693 = vst [vmem:[#allocation189_spill] sm:$0xff] %v9455_v7 }
 0x42a   :  { %4092 = vrot.lane.b32.xlu0 %v8644_v33, %s6180_s28  ;;  %v9459_v19 = vpop.permute.xlu1 %4006 }
 0x42c   :  { %4122 = vrot.lane.b32.xlu1 %v9097_v31, %s6180_s28  ;;  %v9463_v44 = vpop.permute.xlu0 %3980 }
 0x42d   :  { %11694 = vst [vmem:[#allocation191_spill] sm:$0xff] %v9463_v44 }
 0x42e   :  { %4096 = vrot.lane.b32.xlu0 %v8693_v53, %s6180_s28  ;;  %v9467_v38 = vpop.permute.xlu1 %4010 }
 0x430   :  { %4126 = vrot.lane.b32.xlu1 %v9120_v39, %s6180_s28  ;;  %v9471_v59 = vpop.permute.xlu0 %3984 }
 0x431   :  { %11695 = vst [vmem:[#allocation106_spill] sm:$0xff] %v9471_v59 }
 0x432   :  { %4100 = vrot.lane.b32.xlu0 %v8718_v37, %s6180_s28  ;;  %v9475_v7 = vpop.permute.xlu1 %4014 }
 0x434   :  { %4134 = vrot.lane.b32.xlu1 %v11696_v50, %s6182_s1  ;;  %v9479_v31 = vpop.permute.xlu0 %3988 }
 0x435   :  { %11697 = vst [vmem:[#allocation94_spill] sm:$0xff] %v9479_v31 }
 0x436   :  { %4104 = vrot.lane.b32.xlu0 %v8764_v43, %s6180_s28  ;;  %v9483_v44 = vpop.permute.xlu1 %4018 }
 0x437   :  { %11698 = vst [vmem:[#allocation40_spill] sm:$0xff] %v9483_v44 }
 0x438   :  { %4198 = vrot.lane.b32.xlu1 %v9210_v6, %s6183_s2  ;;  %v9487_v59 = vpop.permute.xlu0 %3992 }
 0x439   :  { %11699 = vst [vmem:[#allocation95_spill] sm:$0xff] %v9487_v59 }
 0x43a   :  { %4108 = vrot.lane.b32.xlu0 %v11642_v21, %s6180_s28  ;;  %v9491_v39 = vpop.permute.xlu1 %4022 }
 0x43b   :  { %11700 = vst [vmem:[#allocation41_spill] sm:$0xff] %v9491_v39  ;;  %v11715_v39 = vld [vmem:[#allocation69_spill] sm:$0xff] }
 0x43c   :  { %4262 = vrot.lane.b32.xlu1 %v8455_v51, %s6184_s15  ;;  %v9495_v31 = vpop.permute.xlu0 %3996 }
 0x43d   :  { %11701 = vst [vmem:[#allocation125_spill] sm:$0xff] %v9495_v31  ;;  %v6147_v31 = vld [vmem:[%s10747_s3 + $0x20] sm:$0x3f]  }
 0x43e   :  { %4112 = vrot.lane.b32.xlu0 %v11647_v20, %s6180_s28  ;;  %v9499_v37 = vpop.permute.xlu1 %4026  ;;  %6032 = vmatprep.subr.msk.bf16.mxu1 %vm5208_vm15, %v6147_v31  ;;  %v5210_v27 = vsel %vm5208_vm15, %v6147_v31, 0 }
 0x43f   :  { %11702 = vst [vmem:[#allocation128_spill] sm:$0xff] %v9499_v37  ;;  %5958 = vmatpush3.bf16.msra.mxu1 %v5210_v27  ;;  %v11707_v37 = vld [vmem:[#allocation7_spill] sm:$0xff] }
 0x440   :  { %4326 = vrot.lane.b32.xlu1 %v11703_v23, %s6185_s16  ;;  %v9503_v59 = vpop.permute.xlu0 %4000  ;;  %v6149_v27 = vld [vmem:[%s10747_s3 + $0x10] sm:$0xff]  }
 0x441   :  { %11704 = vst [vmem:[#allocation67_spill] sm:$0xff] %v9503_v59 }
 0x442   :  { %4116 = vrot.lane.b32.xlu0 %v11652_v48, %s6180_s28  ;;  %v9507_v47 = vpop.permute.xlu1 %4030 }
 0x443   :  { %11705 = vst [vmem:[#allocation71_spill] sm:$0xff] %v9507_v47  ;;  %v6148_v47 = vld [vmem:[%s10747_s3 + $0x18] sm:$0xff]  }
 0x444   :  { %4390 = vrot.lane.b32.xlu1 %v9103_v26, %s6186_s20  ;;  %v9514_v30 = vpop.permute.xlu0 %4004  ;;  %5959 = vmatprep.subr.bf16.mxu1 %v6148_v47 }
 0x445   :  { %5960 = vmatpush3.bf16.msra.mxu1 %v6148_v47  ;;  %v6150_v47 = vld [vmem:[%s10747_s3 + $0x8] sm:$0xff]  }
 0x446   :  { %4120 = vrot.lane.b32.xlu0 %v11657_v5, %s6180_s28  ;;  %v9518_v59 = vpop.permute.xlu1 %4034  ;;  %5961 = vmatprep.subr.bf16.mxu1 %v6149_v27 }
 0x447   :  { %11706 = vst [vmem:[#allocation176_spill] sm:$0xff] %v9518_v59  ;;  %v11709_v59 = vld [vmem:[#allocation135_spill] sm:$0xff] }
 0x448   :  { %4454 = vrot.lane.b32.xlu1 %v11707_v37, %s6187_s23  ;;  %v9525_v46 = vpop.permute.xlu0 %4008  ;;  %v11710_v37 = vld [vmem:[#allocation138_spill] sm:$0xff] }
 0x449   :  { %5962 = vmatpush3.bf16.msra.mxu1 %v6149_v27  ;;  %v6151_v27 = vld [vmem:[%s10747_s3] sm:$0xff]  }
 0x44a   :  { %4124 = vrot.lane.b32.xlu0 %v11662_v2, %s6180_s28  ;;  %v9529_v31 = vpop.permute.xlu1 %4038  ;;  %5963 = vmatprep.subr.bf16.mxu1 %v6150_v47 }
 0x44b   :  { %11708 = vst [vmem:[#allocation179_spill] sm:$0xff] %v9529_v31 }
 0x44c   :  { %4138 = vrot.lane.b32.xlu1 %v11709_v59, %s6182_s1  ;;  %v9536_v5 = vpop.permute.xlu0 %4012 }
 0x44d   :  { %5964 = vmatpush3.bf16.msra.mxu1 %v6150_v47 }
 0x44e   :  { %4132 = vrot.lane.b32.xlu0 %v11710_v37, %s6182_s1  ;;  %v9540_v29 = vpop.permute.xlu1 %4042  ;;  %5965 = vmatprep.subr.bf16.mxu1 %v6151_v27 }
 0x44f   :  { %11711 = vst [vmem:[#allocation190_spill] sm:$0xff] %v9540_v29 }
 0x450   :  { %4202 = vrot.lane.b32.xlu1 %v9224_v3, %s6183_s2  ;;  %v9547_v31 = vpop.permute.xlu0 %4016 }
 0x451   :  { %5966 = vmatpush3.bf16.msra.mxu1 %v6151_v27  ;;  %v11720_v27 = vld [vmem:[#allocation11_spill] sm:$0xff] }
 0x452   :  { %4196 = vrot.lane.b32.xlu0 %v9075_v12, %s6183_s2  ;;  %v9551_v2 = vpop.permute.xlu1 %4046 }
 0x453   :  { %11712 = vst [vmem:[#allocation193_spill] sm:$0xff] %v9551_v2 }
 0x454   :  { %4266 = vrot.lane.b32.xlu1 %v8483_v24, %s6184_s15  ;;  %v9558_v29 = vpop.permute.xlu0 %4020 }
 0x455   :  { %11713 = vst [vmem:[#allocation96_spill] sm:$0xff] %v9558_v29 }
 0x456   :  { %v9560_v48 = vpop.permute.xlu1 %4050  ;;  %4260 = vrot.lane.b32.xlu0 %v8433_v9, %s6184_s15 }
 0x457   :  { %11714 = vst [vmem:[#allocation46_spill] sm:$0xff] %v9560_v48 }
 0x458   :  { %4330 = vrot.lane.b32.xlu1 %v11715_v39, %s6185_s16  ;;  %v9566_v47 = vpop.permute.xlu0 %4024 }
 0x459   :  { %11716 = vst [vmem:[#allocation97_spill] sm:$0xff] %v9566_v47 }
 0x45a   :  { %v9568_v2 = vpop.permute.xlu1 %4054  ;;  %4324 = vrot.lane.b32.xlu0 %v11696_v50, %s6185_s16  ;;  %v11724_v50 = vld [vmem:[#allocation144_spill] sm:$0xff] }
 0x45b   :  { %11717 = vst [vmem:[#allocation49_spill] sm:$0xff] %v9568_v2  ;;  %v11723_v2 = vld [vmem:[#allocation9_spill] sm:$0xff] }
 0x45c   :  { %4394 = vrot.lane.b32.xlu1 %v9125_v36, %s6186_s20  ;;  %v9574_v16 = vpop.permute.xlu0 %4028 }
 0x45d   :  { %11718 = vst [vmem:[#allocation127_spill] sm:$0xff] %v9574_v16 }
 0x45e   :  { %v9576_v48 = vpop.permute.xlu1 %4058  ;;  %4388 = vrot.lane.b32.xlu0 %v9210_v6, %s6186_s20 }
 0x45f   :  { %11719 = vst [vmem:[#allocation130_spill] sm:$0xff] %v9576_v48 }
 0x460   :  { %4458 = vrot.lane.b32.xlu1 %v11720_v27, %s6187_s23  ;;  %v9582_v29 = vpop.permute.xlu0 %4032 }
 0x461   :  { %11721 = vst [vmem:[#allocation76_spill] sm:$0xff] %v9582_v29  ;;  %v11736_v29 = vld [vmem:[#allocation8_spill] sm:$0xff] }
 0x462   :  { %v9584_v47 = vpop.permute.xlu1 %4062  ;;  %4452 = vrot.lane.b32.xlu0 %v11723_v2, %s6187_s23 }
 0x463   :  { %11722 = vst [vmem:[#allocation157_spill] sm:$0xff] %v9584_v47 }
 0x464   :  { %4142 = vrot.lane.b32.xlu1 %v11724_v50, %s6182_s1  ;;  %v9590_v28 = vpop.permute.xlu0 %4036 }
 0x465   :  { %11725 = vst [vmem:[#allocation178_spill] sm:$0xff] %v9590_v28 }
 0x466   :  { %v9592_v16 = vpop.permute.xlu1 %4066  ;;  %4136 = vrot.lane.b32.xlu0 %v11703_v23, %s6182_s1  ;;  %v11729_v23 = vld [vmem:[#allocation108_spill] sm:$0xff] }
 0x467   :  { %11726 = vst [vmem:[#allocation181_spill] sm:$0xff] %v9592_v16 }
 0x468   :  { %4206 = vrot.lane.b32.xlu1 %v9238_v40, %s6183_s2  ;;  %v9598_v6 = vpop.permute.xlu0 %4040 }
 0x469   :  { %11727 = vst [vmem:[#allocation192_spill] sm:$0xff] %v9598_v6  ;;  %v11733_v6 = vld [vmem:[#allocation13_spill] sm:$0xff] }
 0x46a   :  { %v9600_v27 = vpop.permute.xlu1 %4070  ;;  %4200 = vrot.lane.b32.xlu0 %v9103_v26, %s6183_s2 }
 0x46c   :  { %4270 = vrot.lane.b32.xlu1 %v8519_v8, %s6184_s15  ;;  %v9606_v2 = vpop.permute.xlu0 %4044 }
 0x46d   :  { %11728 = vst [vmem:[#allocation195_spill] sm:$0xff] %v9606_v2 }
 0x46e   :  { %v9608_v47 = vpop.permute.xlu1 %4074  ;;  %4264 = vrot.lane.b32.xlu0 %v8496_v60, %s6184_s15 }
 0x470   :  { %4334 = vrot.lane.b32.xlu1 %v11729_v23, %s6185_s16  ;;  %v9614_v16 = vpop.permute.xlu0 %4048 }
 0x471   :  { %11730 = vst [vmem:[#allocation98_spill] sm:$0xff] %v9614_v16 }
 0x472   :  { %v9616_v48 = vpop.permute.xlu1 %4078  ;;  %4328 = vrot.lane.b32.xlu0 %v11709_v59, %s6185_s16  ;;  %v11737_v59 = vld [vmem:[#allocation163_spill] sm:$0xff] }
 0x474   :  { %4398 = vrot.lane.b32.xlu1 %v9145_v35, %s6186_s20  ;;  %v9622_v26 = vpop.permute.xlu0 %4052 }
 0x475   :  { %11731 = vst [vmem:[#allocation52_spill] sm:$0xff] %v9622_v26 }
 0x476   :  { %v9624_v2 = vpop.permute.xlu1 %4082  ;;  %4392 = vrot.lane.b32.xlu0 %v9224_v3, %s6186_s20 }
 0x477   :  { %11732 = vst [vmem:[#allocation99_spill] sm:$0xff] %v9624_v2 }
 0x478   :  { %4462 = vrot.lane.b32.xlu1 %v11733_v6, %s6187_s23  ;;  %v9630_v28 = vpop.permute.xlu0 %4056 }
 0x479   :  { %11734 = vst [vmem:[#allocation54_spill] sm:$0xff] %v9630_v28 }
 0x47a   :  { %v9632_v16 = vpop.permute.xlu1 %4086  ;;  %4456 = vrot.lane.b32.xlu0 %v11736_v29, %s6187_s23 }
 0x47b   :  { %11735 = vst [vmem:[#allocation129_spill] sm:$0xff] %v9632_v16 }
 0x47c   :  { %4146 = vrot.lane.b32.xlu1 %v11737_v59, %s6182_s1  ;;  %v9638_v20 = vpop.permute.xlu0 %4060 }
 0x47d   :  { %11738 = vst [vmem:[#allocation132_spill] sm:$0xff] %v9638_v20 }
 0x47e   :  { %v9640_v26 = vpop.permute.xlu1 %4090  ;;  %4140 = vrot.lane.b32.xlu0 %v11715_v39, %s6182_s1  ;;  %v11743_v39 = vld [vmem:[#allocation36_spill] sm:$0xff] }
 0x47f   :  { %11739 = vst [vmem:[#allocation156_spill] sm:$0xff] %v9640_v26 }
 0x480   :  { %4210 = vrot.lane.b32.xlu1 %v9252_v0, %s6183_s2  ;;  %v9646_v3 = vpop.permute.xlu0 %4064 }
 0x481   :  { %11740 = vst [vmem:[#allocation158_spill] sm:$0xff] %v9646_v3 }
 0x482   :  { %v9648_v6 = vpop.permute.xlu1 %4094  ;;  %4204 = vrot.lane.b32.xlu0 %v9125_v36, %s6183_s2 }
 0x483   :  { %11741 = vst [vmem:[#allocation180_spill] sm:$0xff] %v9648_v6 }
 0x484   :  { %4274 = vrot.lane.b32.xlu1 %v8569_v56, %s6184_s15  ;;  %v9654_v29 = vpop.permute.xlu0 %4068 }
 0x486   :  { %v9656_v20 = vpop.permute.xlu1 %4098  ;;  %4268 = vrot.lane.b32.xlu0 %v11639_v14, %s6184_s15 }
 0x487   :  { %11742 = vst [vmem:[#allocation183_spill] sm:$0xff] %v9656_v20  ;;  %v11746_v20 = vld [vmem:[#allocation15_spill] sm:$0xff] }
 0x488   :  { %4338 = vrot.lane.b32.xlu1 %v11743_v39, %s6185_s16  ;;  %v9662_v28 = vpop.permute.xlu0 %4072 }
 0x48a   :  { %v9664_v3 = vpop.permute.xlu1 %4102  ;;  %4332 = vrot.lane.b32.xlu0 %v11724_v50, %s6185_s16  ;;  %v11750_v50 = vld [vmem:[#allocation86_spill] sm:$0xff] }
 0x48b   :  { %11744 = vst [vmem:[#allocation194_spill] sm:$0xff] %v9664_v3  ;;  %v11749_v3 = vld [vmem:[#allocation10_spill] sm:$0xff] }
 0x48c   :  { %4402 = vrot.lane.b32.xlu1 %v9162_v22, %s6186_s20  ;;  %v9670_v36 = vpop.permute.xlu0 %4076 }
 0x48e   :  { %v9672_v6 = vpop.permute.xlu1 %4106  ;;  %4396 = vrot.lane.b32.xlu0 %v9238_v40, %s6186_s20 }
 0x48f   :  { %11745 = vst [vmem:[#allocation197_spill] sm:$0xff] %v9672_v6 }
 0x490   :  { %4466 = vrot.lane.b32.xlu1 %v11746_v20, %s6187_s23  ;;  %v9678_v26 = vpop.permute.xlu0 %4080 }
 0x491   :  { %11747 = vst [vmem:[#allocation100_spill] sm:$0xff] %v9678_v26 }
 0x492   :  { %v9680_v16 = vpop.permute.xlu1 %4110  ;;  %4460 = vrot.lane.b32.xlu0 %v11749_v3, %s6187_s23 }
 0x493   :  { %11748 = vst [vmem:[#allocation56_spill] sm:$0xff] %v9680_v16 }
 0x494   :  { %4150 = vrot.lane.b32.xlu1 %v11750_v50, %s6182_s1  ;;  %v9686_v56 = vpop.permute.xlu0 %4084 }
 0x495   :  { %11751 = vst [vmem:[#allocation101_spill] sm:$0xff] %v9686_v56 }
 0x496   :  { %v9688_v15 = vpop.permute.xlu1 %4114  ;;  %4144 = vrot.lane.b32.xlu0 %v11729_v23, %s6182_s1  ;;  %v11757_v23 = vld [vmem:[#allocation110_spill] sm:$0xff] }
 0x497   :  { %11752 = vst [vmem:[#allocation131_spill] sm:$0xff] %v9688_v15 }
 0x498   :  { %4214 = vrot.lane.b32.xlu1 %v9266_v49, %s6183_s2  ;;  %v9694_v40 = vpop.permute.xlu0 %4088 }
 0x499   :  { %11753 = vst [vmem:[#allocation134_spill] sm:$0xff] %v9694_v40 }
 0x49a   :  { %v9696_v20 = vpop.permute.xlu1 %4118  ;;  %4208 = vrot.lane.b32.xlu0 %v9145_v35, %s6183_s2 }
 0x49b   :  { %11754 = vst [vmem:[#allocation75_spill] sm:$0xff] %v9696_v20 }
 0x49c   :  { %4278 = vrot.lane.b32.xlu1 %v8617_v10, %s6184_s15  ;;  %v9702_v3 = vpop.permute.xlu0 %4092 }
 0x49d   :  { %11755 = vst [vmem:[#allocation159_spill] sm:$0xff] %v9702_v3 }
 0x49e   :  { %v9704_v16 = vpop.permute.xlu1 %4122  ;;  %4272 = vrot.lane.b32.xlu0 %v11644_v45, %s6184_s15 }
 0x49f   :  { %11756 = vst [vmem:[#allocation182_spill] sm:$0xff] %v9704_v16  ;;  %v11761_v16 = vld [vmem:[#allocation17_spill] sm:$0xff] }
 0x4a0   :  { %4342 = vrot.lane.b32.xlu1 %v11757_v23, %s6185_s16  ;;  %v9710_v15 = vpop.permute.xlu0 %4096 }
 0x4a1   :  { %11758 = vst [vmem:[#allocation185_spill] sm:$0xff] %v9710_v15 }
 0x4a2   :  { %v9712_v6 = vpop.permute.xlu1 %4126  ;;  %4336 = vrot.lane.b32.xlu0 %v11737_v59, %s6185_s16  ;;  %v11764_v59 = vld [vmem:[#allocation25_spill] sm:$0xff] }
 0x4a3   :  { %11759 = vst [vmem:[#allocation196_spill] sm:$0xff] %v9712_v6  ;;  %v11763_v6 = vld [vmem:[#allocation12_spill] sm:$0xff] }
 0x4a4   :  { %4406 = vrot.lane.b32.xlu1 %v9176_v54, %s6186_s20  ;;  %v9718_v35 = vpop.permute.xlu0 %4100 }
 0x4a5   :  { %11760 = vst [vmem:[#allocation199_spill] sm:$0xff] %v9718_v35 }
 0x4a6   :  { %v4135_v20 = vpop.permute.xlu1 %4134  ;;  %4400 = vrot.lane.b32.xlu0 %v9252_v0, %s6186_s20 }
 0x4a8   :  { %4470 = vrot.lane.b32.xlu1 %v11761_v16, %s6187_s23  ;;  %v9724_v3 = vpop.permute.xlu0 %4104 }
 0x4a9   :  { %11762 = vst [vmem:[#allocation102_spill] sm:$0xff] %v9724_v3 }
 0x4aa   :  { %v4199_v15 = vpop.permute.xlu1 %4198  ;;  %4464 = vrot.lane.b32.xlu0 %v11763_v6, %s6187_s23 }
 0x4ac   :  { %4154 = vrot.lane.b32.xlu1 %v11764_v59, %s6182_s1  ;;  %v9730_v40 = vpop.permute.xlu0 %4108 }
 0x4ad   :  { %11765 = vst [vmem:[#allocation104_spill] sm:$0xff] %v9730_v40 }
 0x4ae   :  { %v4263_v10 = vpop.permute.xlu1 %4262  ;;  %4148 = vrot.lane.b32.xlu0 %v11743_v39, %s6182_s1  ;;  %v11768_v39 = vld [vmem:[#allocation105_spill] sm:$0xff] }
 0x4b0   :  { %4218 = vrot.lane.b32.xlu1 %v9280_v57, %s6183_s2  ;;  %v9736_v0 = vpop.permute.xlu0 %4112 }
 0x4b1   :  { %11766 = vst [vmem:[#allocation133_spill] sm:$0xff] %v9736_v0 }
 0x4b2   :  { %v4327_v16 = vpop.permute.xlu1 %4326  ;;  %4212 = vrot.lane.b32.xlu0 %v9162_v22, %s6183_s2 }
 0x4b4   :  { %4282 = vrot.lane.b32.xlu1 %v8644_v33, %s6184_s15  ;;  %v9742_v6 = vpop.permute.xlu0 %4116 }
 0x4b5   :  { %11767 = vst [vmem:[#allocation136_spill] sm:$0xff] %v9742_v6  ;;  %v11771_v6 = vld [vmem:[#allocation20_spill] sm:$0xff] }
 0x4b6   :  { %v4391_v3 = vpop.permute.xlu1 %4390  ;;  %4276 = vrot.lane.b32.xlu0 %v11649_v17, %s6184_s15 }
 0x4b8   :  { %4346 = vrot.lane.b32.xlu1 %v11768_v39, %s6185_s16  ;;  %v9748_v40 = vpop.permute.xlu0 %4120 }
 0x4b9   :  { %11769 = vst [vmem:[#allocation31_spill] sm:$0xff] %v9748_v40  ;;  %v11772_v40 = vld [vmem:[#allocation14_spill] sm:$0xff] }
 0x4ba   :  { %v4455_v35 = vpop.permute.xlu1 %4454  ;;  %4340 = vrot.lane.b32.xlu0 %v11750_v50, %s6185_s16  ;;  %v11773_v50 = vld [vmem:[#allocation146_spill] sm:$0xff] }
 0x4bc   :  { %4410 = vrot.lane.b32.xlu1 %v9189_v41, %s6186_s20  ;;  %v9754_v22 = vpop.permute.xlu0 %4124 }
 0x4bd   :  { %11770 = vst [vmem:[#allocation160_spill] sm:$0xff] %v9754_v22  ;;  %v4517_v22 = vsel %vm2076_vm7, %v8665_v11, %v9332_v32 }
 0x4be   :  { %v9756_v0 = vpop.permute.xlu1 %4138  ;;  %4404 = vrot.lane.b32.xlu0 %v9266_v49, %s6186_s20  ;;  %v4581_v2 = vsel %vm2206_vm9, %v4517_v22, %v9514_v30  ;;  %v11774_v30 = vld [vmem:[#allocation82_spill] sm:$0xff] }
 0x4c0   :  { %4474 = vrot.lane.b32.xlu1 %v11771_v6, %s6187_s23  ;;  %v4133_v33 = vpop.permute.xlu0 %4132 }
 0x4c2   :  { %v9762_v17 = vpop.permute.xlu1 %4202  ;;  %4468 = vrot.lane.b32.xlu0 %v11772_v40, %s6187_s23 }
 0x4c4   :  { %4158 = vrot.lane.b32.xlu1 %v11773_v50, %s6182_s1  ;;  %v4197_v56 = vpop.permute.xlu0 %4196 }
 0x4c6   :  { %v9768_v45 = vpop.permute.xlu1 %4266  ;;  %4152 = vrot.lane.b32.xlu0 %v11757_v23, %s6182_s1  ;;  %v4519_v23 = vsel %vm2076_vm7, %v8424_v52, %v9284_v18 }
 0x4c8   :  { %4222 = vrot.lane.b32.xlu1 %v9296_v63, %s6183_s2  ;;  %v4261_v49 = vpop.permute.xlu0 %4260 }
 0x4ca   :  { %v9774_v6 = vpop.permute.xlu1 %4330  ;;  %4216 = vrot.lane.b32.xlu0 %v9176_v54, %s6183_s2  ;;  %v4583_v54 = vsel %vm2206_vm9, %v4519_v23, %v9459_v19 }
 0x4cb   :  { %v4647_v32 = vsel %vm2336_vm11, %v4583_v54, %v9600_v27 }
 0x4cc   :  { %4286 = vrot.lane.b32.xlu1 %v8693_v53, %s6184_s15  ;;  %v4325_v40 = vpop.permute.xlu0 %4324  ;;  %v4645_v53 = vsel %vm2336_vm11, %v4581_v2, %v9654_v29  ;;  %v4711_v44 = vsel %vm2466_vm13, %v4647_v32, %v4135_v20 }
 0x4cd   :  { %v4709_v18 = vsel %vm2466_vm13, %v4645_v53, %v4133_v33  ;;  %v4776_v19 = vsel %vm4772_vm0, %v4711_v44, %v4199_v15 }
 0x4ce   :  { %v9788_v26 = vpop.permute.xlu1 %4394  ;;  %4280 = vrot.lane.b32.xlu0 %v11654_v25, %s6184_s15  ;;  %v4774_v25 = vsel %vm4772_vm0, %v4709_v18, %v4197_v56  ;;  %v4841_v33 = vsel %vm4837_vm1, %v4776_v19, %v4263_v10  ;;  %v11775_v56 = vld [vmem:[#allocation117_spill] sm:$0xff]  ;;  %v11776_v10 = vld [vmem:[#allocation23_spill] sm:$0xff]  ;;  %v4521_v19 = vsel %vm2076_vm7, %v8433_v9, %v9348_v34 }
 0x4cf   :  { %v4839_v2 = vsel %vm4837_vm1, %v4774_v25, %v4261_v49  ;;  %v4906_v27 = vsel %vm4902_vm2, %v4841_v33, %v4327_v16  ;;  %v4585_v33 = vsel %vm2206_vm9, %v4521_v19, %v9525_v46 }
 0x4d0   :  { %4350 = vrot.lane.b32.xlu1 %v11774_v30, %s6185_s16  ;;  %v4389_v22 = vpop.permute.xlu0 %4388  ;;  %v4904_v53 = vsel %vm4902_vm2, %v4839_v2, %v4325_v40  ;;  %v4971_v25 = vsel %vm4967_vm3, %v4906_v27, %v4391_v3  ;;  %v11777_v3 = vld [vmem:[#allocation16_spill] sm:$0xff] }
 0x4d1   :  { %v4969_v20 = vsel %vm4967_vm3, %v4904_v53, %v4389_v22  ;;  %v11780_v2 = vld [vmem:[#allocation124_spill] sm:$0xff] }
 0x4d2   :  { %v4459_v29 = vpop.permute.xlu1 %4458  ;;  %4344 = vrot.lane.b32.xlu0 %v11764_v59, %s6185_s16  ;;  %v5036_v59 = vsel %vm5032_vm4, %v4971_v25, %v4455_v35  ;;  %v11778_v35 = vld [vmem:[#allocation137_spill] sm:$0xff] }
 0x4d4   :  { %4414 = vrot.lane.b32.xlu1 %v11775_v56, %s6186_s20  ;;  %v4453_v15 = vpop.permute.xlu0 %4452 }
 0x4d5   :  { %v5034_v44 = vsel %vm5032_vm4, %v4969_v20, %v4453_v15 }
 0x4d6   :  { %v9816_v49 = vpop.permute.xlu1 %4142  ;;  %4408 = vrot.lane.b32.xlu0 %v9280_v57, %s6186_s20  ;;  %5967 = vmatprep.mubr.msk.bf16.mxu1 %vm5143_vm5, %v5034_v44  ;;  %v11779_v57 = vld [vmem:[#allocation122_spill] sm:$0xff] }
 0x4d7   :  { %5968 = vmatmul.mubr.msk.bf16.vlgmr.msra.gmra.mxu1 %vm5143_vm5, %v5036_v59 }
 0x4d8   :  { %4478 = vrot.lane.b32.xlu1 %v11776_v10, %s6187_s23  ;;  %v4137_v16 = vpop.permute.xlu0 %4136 }
 0x4da   :  { %v9824_v40 = vpop.permute.xlu1 %4206  ;;  %4472 = vrot.lane.b32.xlu0 %v11777_v3, %s6187_s23 }
 0x4dc   :  { %4162 = vrot.lane.b32.xlu1 %v11778_v35, %s6182_s1  ;;  %v4201_v23 = vpop.permute.xlu0 %4200 }
 0x4de   :  { %v9830_v54 = vpop.permute.xlu1 %4270  ;;  %4156 = vrot.lane.b32.xlu0 %v11768_v39, %s6182_s1  ;;  %v4523_v39 = vsel %vm2076_vm7, %v8455_v51, %v11780_v2 }
 0x4e0   :  { %4226 = vrot.lane.b32.xlu1 %v11779_v57, %s6183_s2  ;;  %v4265_v32 = vpop.permute.xlu0 %4264 }
 0x4e2   :  { %v9836_v18 = vpop.permute.xlu1 %4334  ;;  %4220 = vrot.lane.b32.xlu0 %v9189_v41, %s6183_s2  ;;  %v4649_v41 = vsel %vm2336_vm11, %v4585_v33, %v9662_v28 }
 0x4e3   :  { %v4713_v34 = vsel %vm2466_vm13, %v4649_v41, %v4137_v16  ;;  %v11785_v41 = vld [vmem:[#allocation149_spill] sm:$0xff] }
 0x4e4   :  { %4290 = vrot.lane.b32.xlu1 %v8424_v52, %s6184_s15  ;;  %v4329_v22 = vpop.permute.xlu0 %4328  ;;  %v4587_v52 = vsel %vm2206_vm9, %v4523_v39, %v9467_v38  ;;  %v4778_v27 = vsel %vm4772_vm0, %v4713_v34, %v4201_v23 }
 0x4e5   :  { %v4651_v9 = vsel %vm2336_vm11, %v4587_v52, %v9608_v47  ;;  %v4843_v20 = vsel %vm4837_vm1, %v4778_v27, %v4265_v32  ;;  %v4525_v32 = vsel %vm2076_vm7, %v8496_v60, %v9369_v62  ;;  %v11788_v27 = vld [vmem:[#allocation115_spill] sm:$0xff] }
 0x4e6   :  { %v9850_v53 = vpop.permute.xlu1 %4398  ;;  %4284 = vrot.lane.b32.xlu0 %v11659_v1, %s6184_s15  ;;  %v4715_v46 = vsel %vm2466_vm13, %v4651_v9, %v9756_v0 }
 0x4e7   :  { %v4780_v38 = vsel %vm4772_vm0, %v4715_v46, %v9762_v17 }
 0x4e8   :  { %4354 = vrot.lane.b32.xlu1 %v11710_v37, %s6185_s16  ;;  %v4393_v51 = vpop.permute.xlu0 %4392  ;;  %v4845_v47 = vsel %vm4837_vm1, %v4780_v38, %v9768_v45  ;;  %v4908_v37 = vsel %vm4902_vm2, %v4843_v20, %v4329_v22  ;;  %v11781_v45 = vld [vmem:[#allocation6_spill] sm:$0xff]  ;;  %v4589_v22 = vsel %vm2206_vm9, %v4525_v32, %v9536_v5 }
 0x4e9   :  { %v4910_v15 = vsel %vm4902_vm2, %v4845_v47, %v9774_v6  ;;  %v4973_v0 = vsel %vm4967_vm3, %v4908_v37, %v4393_v51  ;;  %v4653_v2 = vsel %vm2336_vm11, %v4589_v22, %v9670_v36  ;;  %v11790_v37 = vld [vmem:[#allocation154_spill] sm:$0xff] }
 0x4ea   :  { %v4463_v28 = vpop.permute.xlu1 %4462  ;;  %4348 = vrot.lane.b32.xlu0 %v11773_v50, %s6185_s16  ;;  %v4975_v25 = vsel %vm4967_vm3, %v4910_v15, %v9788_v26  ;;  %v11782_v26 = vld [vmem:[#allocation18_spill] sm:$0xff] }
 0x4eb   :  { %v5040_v50 = vsel %vm5032_vm4, %v4975_v25, %v4459_v29  ;;  %v11783_v29 = vld [vmem:[#allocation81_spill] sm:$0xff] }
 0x4ec   :  { %4418 = vrot.lane.b32.xlu1 %v9075_v12, %s6186_s20  ;;  %v4457_v17 = vpop.permute.xlu0 %4456 }
 0x4ed   :  { %v5038_v44 = vsel %vm5032_vm4, %v4973_v0, %v4457_v17  ;;  %v4529_v0 = vsel %vm2076_vm7, %v11639_v14, %v9385_v13  ;;  %v4531_v17 = vsel %vm2076_vm7, %v8519_v8, %v9330_v55  ;;  %v11794_v8 = vld [vmem:[#allocation109_spill] sm:$0xff] }
 0x4ee   :  { %v9883_v59 = vpop.permute.xlu1 %4146  ;;  %4412 = vrot.lane.b32.xlu0 %v9296_v63, %s6186_s20  ;;  %5971 = vmatprep.mubr.msk.bf16.mxu1 %vm5143_vm5, %v5038_v44  ;;  %v4593_v25 = vsel %vm2206_vm9, %v4529_v0, %v9547_v31  ;;  %v11808_v0 = vld [vmem:[#allocation101_spill] sm:$0xff] }
 0x4ef   :  { %5972 = vmatmul.mubr.msk.bf16.gmra.mxu1 %vm5143_vm5, %v5040_v50  ;;  %v11791_v50 = vld [vmem:[#allocation40_spill] sm:$0xff] }
 0x4f0   :  { %4482 = vrot.lane.b32.xlu1 %v11781_v45, %s6187_s23  ;;  %v4141_v12 = vpop.permute.xlu0 %4140  ;;  %v4595_v45 = vsel %vm2206_vm9, %v4531_v17, %v11791_v50 }
 0x4f1   :  { %v4717_v62 = vsel %vm2466_vm13, %v4653_v2, %v4141_v12  ;;  %v11792_v12 = vld [vmem:[#allocation100_spill] sm:$0xff] }
 0x4f2   :  { %v9891_v6 = vpop.permute.xlu1 %4210  ;;  %4476 = vrot.lane.b32.xlu0 %v11782_v26, %s6187_s23  ;;  %v4657_v26 = vsel %vm2336_vm11, %v4593_v25, %v11792_v12  ;;  %v11809_v25 = vld [vmem:[#allocation129_spill] sm:$0xff]  ;;  %v11810_v12 = vld [vmem:[#allocation74_spill] sm:$0xff] }
 0x4f4   :  { %4166 = vrot.lane.b32.xlu1 %v11783_v29, %s6182_s1  ;;  %v4205_v10 = vpop.permute.xlu0 %4204 }
 0x4f6   :  { %v9897_v16 = vpop.permute.xlu1 %4274  ;;  %4160 = vrot.lane.b32.xlu0 %v11774_v30, %s6182_s1  ;;  %v4527_v30 = vsel %vm2076_vm7, %v8483_v24, %v9316_v42  ;;  %v11784_v24 = vld [vmem:[#allocation48_spill] sm:$0xff] }
 0x4f8   :  { %4230 = vrot.lane.b32.xlu1 %v9327_v4, %s6183_s2  ;;  %v4269_v63 = vpop.permute.xlu0 %4268 }
 0x4fa   :  { %v9903_v3 = vpop.permute.xlu1 %4338  ;;  %4224 = vrot.lane.b32.xlu0 %v11775_v56, %s6183_s2  ;;  %v4591_v56 = vsel %vm2206_vm9, %v4527_v30, %v9475_v7 }
 0x4fb   :  { %v4655_v60 = vsel %vm2336_vm11, %v4591_v56, %v9616_v48 }
 0x4fc   :  { %4294 = vrot.lane.b32.xlu1 %v8764_v43, %s6184_s15  ;;  %v4333_v23 = vpop.permute.xlu0 %4332  ;;  %v4719_v5 = vsel %vm2466_vm13, %v4655_v60, %v9816_v49  ;;  %v11795_v60 = vld [vmem:[#allocation173_spill] sm:$0xff] }
 0x4fd   :  { %v4784_v7 = vsel %vm4772_vm0, %v4719_v5, %v9824_v40 }
 0x4fe   :  { %v9917_v19 = vpop.permute.xlu1 %4402  ;;  %4288 = vrot.lane.b32.xlu0 %v8665_v11, %s6184_s15  ;;  %v4782_v11 = vsel %vm4772_vm0, %v4717_v62, %v4205_v10  ;;  %v4849_v48 = vsel %vm4837_vm1, %v4784_v7, %v9830_v54  ;;  %v11786_v54 = vld [vmem:[#allocation35_spill] sm:$0xff] }
 0x4ff   :  { %v4847_v39 = vsel %vm4837_vm1, %v4782_v11, %v4269_v63  ;;  %v4914_v52 = vsel %vm4902_vm2, %v4849_v48, %v9836_v18  ;;  %v11793_v10 = vld [vmem:[#allocation99_spill] sm:$0xff] }
 0x500   :  { %4358 = vrot.lane.b32.xlu1 %v11784_v24, %s6185_s16  ;;  %v4397_v42 = vpop.permute.xlu0 %4396  ;;  %v4912_v33 = vsel %vm4902_vm2, %v4847_v39, %v4333_v23  ;;  %v4979_v9 = vsel %vm4967_vm3, %v4914_v52, %v9850_v53  ;;  %v11787_v53 = vld [vmem:[#allocation21_spill] sm:$0xff]  ;;  %v4659_v14 = vsel %vm2336_vm11, %v4595_v45, %v11793_v10  ;;  %v11798_v7 = vld [vmem:[#allocation147_spill] sm:$0xff] }
 0x501   :  { %v4977_v49 = vsel %vm4967_vm3, %v4912_v33, %v4397_v42  ;;  %v4723_v31 = vsel %vm2466_vm13, %v4659_v14, %v9883_v59  ;;  %v11800_v52 = vld [vmem:[#allocation165_spill] sm:$0xff] }
 0x502   :  { %v4467_v36 = vpop.permute.xlu1 %4466  ;;  %4352 = vrot.lane.b32.xlu0 %v11778_v35, %s6185_s16  ;;  %v5044_v35 = vsel %vm5032_vm4, %v4979_v9, %v4463_v28  ;;  %v4788_v23 = vsel %vm4772_vm0, %v4723_v31, %v9891_v6  ;;  %v11802_v9 = vld [vmem:[#allocation140_spill] sm:$0xff] }
 0x503   :  { %v4853_v22 = vsel %vm4837_vm1, %v4788_v23, %v9897_v16  ;;  %v11796_v16 = vld [vmem:[#allocation43_spill] sm:$0xff] }
 0x504   :  { %4422 = vrot.lane.b32.xlu1 %v11785_v41, %s6186_s20  ;;  %v4461_v40 = vpop.permute.xlu0 %4460  ;;  %v4918_v2 = vsel %vm4902_vm2, %v4853_v22, %v9903_v3  ;;  %v11811_v22 = vld [vmem:[#allocation168_spill] sm:$0xff] }
 0x505   :  { %v5042_v34 = vsel %vm5032_vm4, %v4977_v49, %v4461_v40  ;;  %v4983_v62 = vsel %vm4967_vm3, %v4918_v2, %v9917_v19  ;;  %v11797_v19 = vld [vmem:[#allocation27_spill] sm:$0xff]  ;;  %v11801_v40 = vld [vmem:[#allocation188_spill] sm:$0xff] }
 0x506   :  { %v9950_v51 = vpop.permute.xlu1 %4150  ;;  %4416 = vrot.lane.b32.xlu0 %v11779_v57, %s6186_s20  ;;  %5975 = vmatprep.mubr.msk.bf16.mxu1 %vm5143_vm5, %v5042_v34  ;;  %v11789_v57 = vld [vmem:[#allocation112_spill] sm:$0xff]  ;;  %v4533_v34 = vsel %vm2076_vm7, %v11802_v9, %v11801_v40  ;;  %v11819_v40 = vld [vmem:[#allocation187_spill] sm:$0xff]  ;;  %v11820_v9 = vld [vmem:[#allocation73_spill] sm:$0xff] }
 0x507   :  { %5976 = vmatmul.mubr.msk.bf16.gmra.mxu1 %vm5143_vm5, %v5044_v35  ;;  %v11803_v35 = vld [vmem:[#allocation175_spill] sm:$0xff] }
 0x508   :  { %4486 = vrot.lane.b32.xlu1 %v11786_v54, %s6187_s23  ;;  %v4145_v18 = vpop.permute.xlu0 %4144  ;;  %v11804_v54 = vld [vmem:[#allocation103_spill] sm:$0xff] }
 0x509   :  { %v4721_v13 = vsel %vm2466_vm13, %v4657_v26, %v4145_v18  ;;  %v11805_v18 = vld [vmem:[#allocation96_spill] sm:$0xff] }
 0x50a   :  { %v9958_v46 = vpop.permute.xlu1 %4214  ;;  %4480 = vrot.lane.b32.xlu0 %v11787_v53, %s6187_s23  ;;  %v4597_v53 = vsel %vm2206_vm9, %v4533_v34, %v11805_v18  ;;  %v11821_v34 = vld [vmem:[#allocation97_spill] sm:$0xff] }
 0x50b   :  { %v4661_v17 = vsel %vm2336_vm11, %v4597_v53, %v11808_v0  ;;  %v11824_v53 = vld [vmem:[#allocation134_spill] sm:$0xff] }
 0x50c   :  { %4170 = vrot.lane.b32.xlu1 %v11788_v27, %s6182_s1  ;;  %v4209_v38 = vpop.permute.xlu0 %4208 }
 0x50d   :  { %v4786_v63 = vsel %vm4772_vm0, %v4721_v13, %v4209_v38 }
 0x50e   :  { %v9964_v20 = vpop.permute.xlu1 %4278  ;;  %4164 = vrot.lane.b32.xlu0 %v11789_v57, %s6182_s1 }
 0x510   :  { %4234 = vrot.lane.b32.xlu1 %v9340_v61, %s6183_s2  ;;  %v4273_v28 = vpop.permute.xlu0 %4272 }
 0x511   :  { %v4851_v32 = vsel %vm4837_vm1, %v4786_v63, %v4273_v28  ;;  %v11806_v28 = vld [vmem:[#allocation143_spill] sm:$0xff] }
 0x512   :  { %v9970_v47 = vpop.permute.xlu1 %4342  ;;  %4228 = vrot.lane.b32.xlu0 %v11790_v37, %s6183_s2 }
 0x514   :  { %4298 = vrot.lane.b32.xlu1 %v11642_v21, %s6184_s15  ;;  %v4337_v15 = vpop.permute.xlu0 %4336 }
 0x515   :  { %v4916_v56 = vsel %vm4902_vm2, %v4851_v32, %v4337_v15 }
 0x516   :  { %v9984_v44 = vpop.permute.xlu1 %4406  ;;  %4292 = vrot.lane.b32.xlu0 %v11668_v58, %s6184_s15 }
 0x518   :  { %4362 = vrot.lane.b32.xlu1 %v11794_v8, %s6185_s16  ;;  %v4401_v55 = vpop.permute.xlu0 %4400 }
 0x519   :  { %v4981_v59 = vsel %vm4967_vm3, %v4916_v56, %v4401_v55 }
 0x51a   :  { %v4471_v30 = vpop.permute.xlu1 %4470  ;;  %4356 = vrot.lane.b32.xlu0 %v11783_v29, %s6185_s16  ;;  %v5048_v29 = vsel %vm5032_vm4, %v4983_v62, %v4467_v36 }
 0x51c   :  { %4426 = vrot.lane.b32.xlu1 %v11795_v60, %s6186_s20  ;;  %v4465_v6 = vpop.permute.xlu0 %4464 }
 0x51d   :  { %v5046_v42 = vsel %vm5032_vm4, %v4981_v59, %v4465_v6 }
 0x51e   :  { %v10017_v5 = vpop.permute.xlu1 %4154  ;;  %4420 = vrot.lane.b32.xlu0 %v9327_v4, %s6186_s20  ;;  %5979 = vmatprep.mubr.msk.bf16.mxu1 %vm5143_vm5, %v5046_v42  ;;  %v11799_v4 = vld [vmem:[#allocation170_spill] sm:$0xff] }
 0x51f   :  { %5980 = vmatmul.mubr.msk.bf16.gmra.mxu1 %vm5143_vm5, %v5048_v29 }
 0x520   :  { %4490 = vrot.lane.b32.xlu1 %v11796_v16, %s6187_s23  ;;  %v4149_v3 = vpop.permute.xlu0 %4148 }
 0x521   :  { %v4725_v45 = vsel %vm2466_vm13, %v4661_v17, %v4149_v3  ;;  %v11816_v3 = vld [vmem:[#allocation59_spill] sm:$0xff] }
 0x522   :  { %v10025_v11 = vpop.permute.xlu1 %4218  ;;  %4484 = vrot.lane.b32.xlu0 %v11797_v19, %s6187_s23 }
 0x524   :  { %4174 = vrot.lane.b32.xlu1 %v11798_v7, %s6182_s1  ;;  %v4213_v39 = vpop.permute.xlu0 %4212 }
 0x525   :  { %v4790_v14 = vsel %vm4772_vm0, %v4725_v45, %v4213_v39  ;;  %v11817_v39 = vld [vmem:[#allocation34_spill] sm:$0xff] }
 0x526   :  { %v10031_v36 = vpop.permute.xlu1 %4282  ;;  %4168 = vrot.lane.b32.xlu0 %v11784_v24, %s6182_s1  ;;  %v4535_v24 = vsel %vm2076_vm7, %v11804_v54, %v11803_v35 }
 0x528   :  { %4238 = vrot.lane.b32.xlu1 %v11799_v4, %s6183_s2  ;;  %v4277_v48 = vpop.permute.xlu0 %4276 }
 0x529   :  { %v4855_v55 = vsel %vm4837_vm1, %v4790_v14, %v4277_v48  ;;  %v11818_v48 = vld [vmem:[#allocation29_spill] sm:$0xff] }
 0x52a   :  { %v10037_v33 = vpop.permute.xlu1 %4346  ;;  %4232 = vrot.lane.b32.xlu0 %v11785_v41, %s6183_s2  ;;  %v11807_v41 = vld [vmem:[#allocation41_spill] sm:$0xff] }
 0x52b   :  { %v4599_v15 = vsel %vm2206_vm9, %v4535_v24, %v11807_v41  ;;  %v11822_v24 = vld [vmem:[#allocation84_spill] sm:$0xff] }
 0x52c   :  { %4302 = vrot.lane.b32.xlu1 %v11800_v52, %s6184_s15  ;;  %v4341_v49 = vpop.permute.xlu0 %4340  ;;  %v4663_v50 = vsel %vm2336_vm11, %v4599_v15, %v11809_v25  ;;  %v11825_v15 = vld [vmem:[#allocation156_spill] sm:$0xff]  ;;  %v11826_v25 = vld [vmem:[#allocation42_spill] sm:$0xff] }
 0x52d   :  { %v4727_v10 = vsel %vm2466_vm13, %v4663_v50, %v9950_v51  ;;  %v4920_v23 = vsel %vm4902_vm2, %v4855_v55, %v4341_v49  ;;  %v4537_v49 = vsel %vm2076_vm7, %v11818_v48, %v11817_v39  ;;  %v11834_v39 = vld [vmem:[#allocation107_spill] sm:$0xff] }
 0x52e   :  { %v10051_v38 = vpop.permute.xlu1 %4410  ;;  %4296 = vrot.lane.b32.xlu0 %v11806_v28, %s6184_s15  ;;  %v4792_v13 = vsel %vm4772_vm0, %v4727_v10, %v9958_v46  ;;  %v4601_v35 = vsel %vm2206_vm9, %v4537_v49, %v11821_v34  ;;  %v11835_v49 = vld [vmem:[#allocation51_spill] sm:$0xff] }
 0x52f   :  { %v4857_v63 = vsel %vm4837_vm1, %v4792_v13, %v9964_v20  ;;  %v11812_v20 = vld [vmem:[#allocation47_spill] sm:$0xff]  ;;  %v4665_v41 = vsel %vm2336_vm11, %v4601_v35, %v11824_v53  ;;  %v11838_v35 = vld [vmem:[#allocation164_spill] sm:$0xff] }
 0x530   :  { %4366 = vrot.lane.b32.xlu1 %v11810_v12, %s6185_s16  ;;  %v4405_v26 = vpop.permute.xlu0 %4404  ;;  %v4922_v32 = vsel %vm4902_vm2, %v4857_v63, %v9970_v47 }
 0x531   :  { %v4985_v51 = vsel %vm4967_vm3, %v4920_v23, %v4405_v26  ;;  %v4987_v56 = vsel %vm4967_vm3, %v4922_v32, %v9984_v44  ;;  %v11813_v44 = vld [vmem:[#allocation32_spill] sm:$0xff]  ;;  %v11827_v32 = vld [vmem:[#allocation91_spill] sm:$0xff] }
 0x532   :  { %v4475_v31 = vpop.permute.xlu1 %4474  ;;  %4360 = vrot.lane.b32.xlu0 %v11788_v27, %s6185_s16  ;;  %v5052_v27 = vsel %vm5032_vm4, %v4987_v56, %v4471_v30  ;;  %v11814_v30 = vld [vmem:[#allocation166_spill] sm:$0xff] }
 0x534   :  { %4430 = vrot.lane.b32.xlu1 %v11811_v22, %s6186_s20  ;;  %v4469_v46 = vpop.permute.xlu0 %4468 }
 0x535   :  { %v5050_v2 = vsel %vm5032_vm4, %v4985_v51, %v4469_v46 }
 0x536   :  { %v10084_v59 = vpop.permute.xlu1 %4158  ;;  %4424 = vrot.lane.b32.xlu0 %v9340_v61, %s6186_s20  ;;  %5983 = vmatprep.mubr.msk.bf16.mxu1 %vm5143_vm5, %v5050_v2  ;;  %v11815_v61 = vld [vmem:[#allocation72_spill] sm:$0xff] }
 0x537   :  { %5984 = vmatmul.mubr.msk.bf16.gmra.mxu1 %vm5143_vm5, %v5052_v27 }
 0x538   :  { %4494 = vrot.lane.b32.xlu1 %v11812_v20, %s6187_s23  ;;  %v4153_v47 = vpop.permute.xlu0 %4152 }
 0x539   :  { %v4729_v17 = vsel %vm2466_vm13, %v4665_v41, %v4153_v47  ;;  %v11841_v41 = vld [vmem:[#allocation180_spill] sm:$0xff] }
 0x53a   :  { %v10092_v6 = vpop.permute.xlu1 %4222  ;;  %4488 = vrot.lane.b32.xlu0 %v11813_v44, %s6187_s23 }
 0x53c   :  { %4178 = vrot.lane.b32.xlu1 %v11814_v30, %s6182_s1  ;;  %v4217_v62 = vpop.permute.xlu0 %4216 }
 0x53d   :  { %v4794_v26 = vsel %vm4772_vm0, %v4729_v17, %v4217_v62  ;;  %v11832_v62 = vld [vmem:[#allocation33_spill] sm:$0xff]  ;;  %v11842_v17 = vld [vmem:[#allocation111_spill] sm:$0xff] }
 0x53e   :  { %v10098_v42 = vpop.permute.xlu1 %4286  ;;  %4172 = vrot.lane.b32.xlu0 %v11794_v8, %s6182_s1  ;;  %v4539_v8 = vsel %vm2076_vm7, %v11820_v9, %v11819_v40  ;;  %v11836_v40 = vld [vmem:[#allocation83_spill] sm:$0xff] }
 0x53f   :  { %v11837_v9 = vld [vmem:[#allocation127_spill] sm:$0xff] }
 0x540   :  { %4242 = vrot.lane.b32.xlu1 %v11815_v61, %s6183_s2  ;;  %v4281_v29 = vpop.permute.xlu0 %4280 }
 0x541   :  { %v4859_v14 = vsel %vm4837_vm1, %v4794_v26, %v4281_v29 }
 0x542   :  { %v10104_v16 = vpop.permute.xlu1 %4350  ;;  %4236 = vrot.lane.b32.xlu0 %v11795_v60, %s6183_s2  ;;  %v11823_v60 = vld [vmem:[#allocation128_spill] sm:$0xff] }
 0x543   :  { %v4603_v18 = vsel %vm2206_vm9, %v4539_v8, %v11823_v60 }
 0x544   :  { %4306 = vrot.lane.b32.xlu1 %v11816_v3, %s6184_s15  ;;  %v4345_v19 = vpop.permute.xlu0 %4344  ;;  %v4667_v0 = vsel %vm2336_vm11, %v4603_v18, %v11825_v15  ;;  %v11840_v18 = vld [vmem:[#allocation159_spill] sm:$0xff] }
 0x545   :  { %v4731_v45 = vsel %vm2466_vm13, %v4667_v0, %v10017_v5  ;;  %v4924_v63 = vsel %vm4902_vm2, %v4859_v14, %v4345_v19  ;;  %v11833_v19 = vld [vmem:[#allocation37_spill] sm:$0xff] }
 0x546   :  { %v10118_v54 = vpop.permute.xlu1 %4414  ;;  %4300 = vrot.lane.b32.xlu0 %v11822_v24, %s6184_s15  ;;  %v4796_v10 = vsel %vm4772_vm0, %v4731_v45, %v10025_v11  ;;  %v4541_v48 = vsel %vm2076_vm7, %v11834_v39, %v11833_v19  ;;  %v11849_v39 = vld [vmem:[#allocation68_spill] sm:$0xff] }
 0x547   :  { %v4861_v55 = vsel %vm4837_vm1, %v4796_v10, %v10031_v36  ;;  %v11828_v36 = vld [vmem:[#allocation53_spill] sm:$0xff]  ;;  %v4605_v8 = vsel %vm2206_vm9, %v4541_v48, %v11837_v9  ;;  %v4545_v48 = vsel %vm2076_vm7, %v11659_v1, %v11849_v39 }
 0x548   :  { %4370 = vrot.lane.b32.xlu1 %v11826_v25, %s6185_s16  ;;  %v4409_v50 = vpop.permute.xlu0 %4408  ;;  %v4926_v23 = vsel %vm4902_vm2, %v4861_v55, %v10037_v33  ;;  %v4669_v53 = vsel %vm2336_vm11, %v4605_v8, %v11840_v18  ;;  %v11855_v18 = vld [vmem:[#allocation185_spill] sm:$0xff] }
 0x549   :  { %v4989_v5 = vsel %vm4967_vm3, %v4924_v63, %v4409_v50  ;;  %v4991_v51 = vsel %vm4967_vm3, %v4926_v23, %v10051_v38  ;;  %v11829_v38 = vld [vmem:[#allocation38_spill] sm:$0xff] }
 0x54a   :  { %v4479_v13 = vpop.permute.xlu1 %4478  ;;  %4364 = vrot.lane.b32.xlu0 %v11798_v7, %s6185_s16  ;;  %v5056_v7 = vsel %vm5032_vm4, %v4991_v51, %v4475_v31  ;;  %v11830_v31 = vld [vmem:[#allocation89_spill] sm:$0xff] }
 0x54c   :  { %4434 = vrot.lane.b32.xlu1 %v11827_v32, %s6186_s20  ;;  %v4473_v11 = vpop.permute.xlu0 %4472 }
 0x54d   :  { %v5054_v46 = vsel %vm5032_vm4, %v4989_v5, %v4473_v11  ;;  %v11843_v11 = vld [vmem:[#allocation88_spill] sm:$0xff] }
 0x54e   :  { %v10151_v56 = vpop.permute.xlu1 %4162  ;;  %4428 = vrot.lane.b32.xlu0 %v11799_v4, %s6186_s20  ;;  %5987 = vmatprep.mubr.msk.bf16.mxu1 %vm5143_vm5, %v5054_v46  ;;  %v11831_v4 = vld [vmem:[#allocation90_spill] sm:$0xff] }
 0x54f   :  { %5988 = vmatmul.mubr.msk.bf16.gmra.mxu1 %vm5143_vm5, %v5056_v7 }
 0x550   :  { %4498 = vrot.lane.b32.xlu1 %v11828_v36, %s6187_s23  ;;  %v4157_v33 = vpop.permute.xlu0 %4156 }
 0x551   :  { %v4733_v0 = vsel %vm2466_vm13, %v4669_v53, %v4157_v33 }
 0x552   :  { %v10159_v2 = vpop.permute.xlu1 %4226  ;;  %4492 = vrot.lane.b32.xlu0 %v11829_v38, %s6187_s23 }
 0x554   :  { %4182 = vrot.lane.b32.xlu1 %v11830_v31, %s6182_s1  ;;  %v4221_v27 = vpop.permute.xlu0 %4220 }
 0x555   :  { %v4798_v26 = vsel %vm4772_vm0, %v4733_v0, %v4221_v27  ;;  %v11857_v0 = vld [vmem:[#allocation118_spill] sm:$0xff] }
 0x556   :  { %v10165_v20 = vpop.permute.xlu1 %4290  ;;  %4176 = vrot.lane.b32.xlu0 %v11810_v12, %s6182_s1  ;;  %v4543_v12 = vsel %vm2076_vm7, %v11836_v40, %v11835_v49  ;;  %v11850_v49 = vld [vmem:[#allocation28_spill] sm:$0xff]  ;;  %v11851_v40 = vld [vmem:[#allocation142_spill] sm:$0xff] }
 0x558   :  { %4246 = vrot.lane.b32.xlu1 %v11831_v4, %s6183_s2  ;;  %v4285_v47 = vpop.permute.xlu0 %4284 }
 0x559   :  { %v4863_v14 = vsel %vm4837_vm1, %v4798_v26, %v4285_v47 }
 0x55a   :  { %v10171_v44 = vpop.permute.xlu1 %4354  ;;  %4240 = vrot.lane.b32.xlu0 %v11811_v22, %s6183_s2  ;;  %v11839_v22 = vld [vmem:[#allocation71_spill] sm:$0xff] }
 0x55b   :  { %v4607_v60 = vsel %vm2206_vm9, %v4543_v12, %v11839_v22  ;;  %v11852_v12 = vld [vmem:[#allocation76_spill] sm:$0xff] }
 0x55c   :  { %4310 = vrot.lane.b32.xlu1 %v11832_v62, %s6184_s15  ;;  %v4349_v29 = vpop.permute.xlu0 %4348  ;;  %v4671_v15 = vsel %vm2336_vm11, %v4607_v60, %v11841_v41  ;;  %v4609_v9 = vsel %vm2206_vm9, %v4545_v48, %v11852_v12  ;;  %v11853_v22 = vld [vmem:[#allocation120_spill] sm:$0xff]  ;;  %v11856_v41 = vld [vmem:[#allocation183_spill] sm:$0xff]  ;;  %v11864_v48 = vld [vmem:[#allocation174_spill] sm:$0xff] }
 0x55d   :  { %v4735_v45 = vsel %vm2466_vm13, %v4671_v15, %v10084_v59  ;;  %v4928_v23 = vsel %vm4902_vm2, %v4863_v14, %v4349_v29  ;;  %v11848_v29 = vld [vmem:[#allocation162_spill] sm:$0xff]  ;;  %v4673_v53 = vsel %vm2336_vm11, %v4609_v9, %v11855_v18  ;;  %v11867_v12 = vld [vmem:[#allocation77_spill] sm:$0xff]  ;;  %v11869_v18 = vld [vmem:[#allocation152_spill] sm:$0xff] }
 0x55e   :  { %v10185_v34 = vpop.permute.xlu1 %4418  ;;  %4304 = vrot.lane.b32.xlu0 %v11838_v35, %s6184_s15  ;;  %v4800_v10 = vsel %vm4772_vm0, %v4735_v45, %v10092_v6  ;;  %v11868_v9 = vld [vmem:[#allocation178_spill] sm:$0xff] }
 0x55f   :  { %v4865_v63 = vsel %vm4837_vm1, %v4800_v10, %v10098_v42  ;;  %v11844_v42 = vld [vmem:[#allocation58_spill] sm:$0xff] }
 0x560   :  { %4374 = vrot.lane.b32.xlu1 %v11842_v17, %s6185_s16  ;;  %v4413_v50 = vpop.permute.xlu0 %4412  ;;  %v4930_v5 = vsel %vm4902_vm2, %v4865_v63, %v10104_v16 }
 0x561   :  { %v4993_v59 = vsel %vm4967_vm3, %v4928_v23, %v4413_v50  ;;  %v4995_v51 = vsel %vm4967_vm3, %v4930_v5, %v10118_v54  ;;  %v11845_v54 = vld [vmem:[#allocation44_spill] sm:$0xff] }
 0x562   :  { %v4483_v55 = vpop.permute.xlu1 %4482  ;;  %4368 = vrot.lane.b32.xlu0 %v11814_v30, %s6185_s16  ;;  %v5060_v30 = vsel %vm5032_vm4, %v4995_v51, %v4479_v13  ;;  %v11846_v13 = vld [vmem:[#allocation85_spill] sm:$0xff] }
 0x564   :  { %4438 = vrot.lane.b32.xlu1 %v11843_v11, %s6186_s20  ;;  %v4477_v6 = vpop.permute.xlu0 %4476 }
 0x565   :  { %v5058_v46 = vsel %vm5032_vm4, %v4993_v59, %v4477_v6  ;;  %v11858_v6 = vld [vmem:[#allocation119_spill] sm:$0xff] }
 0x566   :  { %v10218_v7 = vpop.permute.xlu1 %4166  ;;  %4432 = vrot.lane.b32.xlu0 %v11815_v61, %s6186_s20  ;;  %5991 = vmatprep.mubr.msk.bf16.mxu1 %vm5143_vm5, %v5058_v46  ;;  %v11847_v61 = vld [vmem:[#allocation121_spill] sm:$0xff] }
 0x567   :  { %5992 = vmatmul.mubr.msk.bf16.gmra.mxu1 %vm5143_vm5, %v5060_v30 }
 0x568   :  { %4502 = vrot.lane.b32.xlu1 %v11844_v42, %s6187_s23  ;;  %v4161_v16 = vpop.permute.xlu0 %4160 }
 0x569   :  { %v4737_v15 = vsel %vm2466_vm13, %v4673_v53, %v4161_v16 }
 0x56a   :  { %v10226_v36 = vpop.permute.xlu1 %4230  ;;  %4496 = vrot.lane.b32.xlu0 %v11845_v54, %s6187_s23 }
 0x56c   :  { %4186 = vrot.lane.b32.xlu1 %v11846_v13, %s6182_s1  ;;  %v4225_v33 = vpop.permute.xlu0 %4224 }
 0x56d   :  { %v4802_v26 = vsel %vm4772_vm0, %v4737_v15, %v4225_v33  ;;  %v11872_v15 = vld [vmem:[#allocation194_spill] sm:$0xff] }
 0x56e   :  { %v10232_v38 = vpop.permute.xlu1 %4294  ;;  %4180 = vrot.lane.b32.xlu0 %v11826_v25, %s6182_s1  ;;  %v4547_v25 = vsel %vm2076_vm7, %v11851_v40, %v11850_v49  ;;  %v11865_v49 = vld [vmem:[#allocation113_spill] sm:$0xff] }
 0x56f   :  { %v4549_v40 = vsel %vm2076_vm7, %v11865_v49, %v11864_v48 }
 0x570   :  { %4250 = vrot.lane.b32.xlu1 %v11847_v61, %s6183_s2  ;;  %v4289_v27 = vpop.permute.xlu0 %4288 }
 0x571   :  { %v4867_v14 = vsel %vm4837_vm1, %v4802_v26, %v4289_v27  ;;  %v11873_v26 = vld [vmem:[#allocation87_spill] sm:$0xff] }
 0x572   :  { %v10238_v47 = vpop.permute.xlu1 %4358  ;;  %4244 = vrot.lane.b32.xlu0 %v11827_v32, %s6183_s2  ;;  %v11854_v32 = vld [vmem:[#allocation176_spill] sm:$0xff] }
 0x573   :  { %v4611_v60 = vsel %vm2206_vm9, %v4547_v25, %v11854_v32  ;;  %v11866_v25 = vld [vmem:[#allocation153_spill] sm:$0xff]  ;;  %v4613_v32 = vsel %vm2206_vm9, %v4549_v40, %v11868_v9 }
 0x574   :  { %4314 = vrot.lane.b32.xlu1 %v11848_v29, %s6184_s15  ;;  %v4353_v19 = vpop.permute.xlu0 %4352  ;;  %v4675_v1 = vsel %vm2336_vm11, %v4611_v60, %v11856_v41  ;;  %v11871_v41 = vld [vmem:[#allocation199_spill] sm:$0xff] }
 0x575   :  { %v4739_v45 = vsel %vm2466_vm13, %v4675_v1, %v10151_v56  ;;  %v4932_v5 = vsel %vm4902_vm2, %v4867_v14, %v4353_v19  ;;  %v11863_v19 = vld [vmem:[#allocation145_spill] sm:$0xff]  ;;  %v4677_v1 = vsel %vm2336_vm11, %v4613_v32, %v11871_v41 }
 0x576   :  { %v10252_v8 = vpop.permute.xlu1 %4422  ;;  %4308 = vrot.lane.b32.xlu0 %v11853_v22, %s6184_s15  ;;  %v4804_v10 = vsel %vm4772_vm0, %v4739_v45, %v10159_v2 }
 0x577   :  { %v4869_v23 = vsel %vm4837_vm1, %v4804_v10, %v10165_v20  ;;  %v11859_v20 = vld [vmem:[#allocation63_spill] sm:$0xff] }
 0x578   :  { %4378 = vrot.lane.b32.xlu1 %v11857_v0, %s6185_s16  ;;  %v4417_v50 = vpop.permute.xlu0 %4416  ;;  %v4934_v59 = vsel %vm4902_vm2, %v4869_v23, %v10171_v44 }
 0x579   :  { %v4997_v56 = vsel %vm4967_vm3, %v4932_v5, %v4417_v50  ;;  %v4999_v51 = vsel %vm4967_vm3, %v4934_v59, %v10185_v34  ;;  %v11860_v34 = vld [vmem:[#allocation50_spill] sm:$0xff] }
 0x57a   :  { %v4487_v63 = vpop.permute.xlu1 %4486  ;;  %4372 = vrot.lane.b32.xlu0 %v11830_v31, %s6185_s16  ;;  %v5064_v31 = vsel %vm5032_vm4, %v4999_v51, %v4483_v55  ;;  %v11861_v55 = vld [vmem:[#allocation19_spill] sm:$0xff] }
 0x57c   :  { %4442 = vrot.lane.b32.xlu1 %v11858_v6, %s6186_s20  ;;  %v4481_v2 = vpop.permute.xlu0 %4480 }
 0x57d   :  { %v5062_v46 = vsel %vm5032_vm4, %v4997_v56, %v4481_v2 }
 0x57e   :  { %v10285_v30 = vpop.permute.xlu1 %4170  ;;  %4436 = vrot.lane.b32.xlu0 %v11831_v4, %s6186_s20  ;;  %5995 = vmatprep.mubr.msk.bf16.mxu1 %vm5143_vm5, %v5062_v46  ;;  %v11862_v4 = vld [vmem:[#allocation172_spill] sm:$0xff] }
 0x57f   :  { %5996 = vmatmul.mubr.msk.bf16.gmra.mxu1 %vm5143_vm5, %v5064_v31  ;;  %v11874_v31 = vld [vmem:[#allocation151_spill] sm:$0xff] }
 0x580   :  { %4506 = vrot.lane.b32.xlu1 %v11859_v20, %s6187_s23  ;;  %v4165_v44 = vpop.permute.xlu0 %4164 }
 0x581   :  { %v4741_v45 = vsel %vm2466_vm13, %v4677_v1, %v4165_v44 }
 0x582   :  { %v10293_v42 = vpop.permute.xlu1 %4234  ;;  %4500 = vrot.lane.b32.xlu0 %v11860_v34, %s6187_s23 }
 0x584   :  { %4190 = vrot.lane.b32.xlu1 %v11861_v55, %s6182_s1  ;;  %v4229_v16 = vpop.permute.xlu0 %4228 }
 0x585   :  { %v4806_v23 = vsel %vm4772_vm0, %v4741_v45, %v4229_v16  ;;  %v11875_v16 = vld [vmem:[#allocation66_spill] sm:$0xff] }
 0x586   :  { %v10299_v54 = vpop.permute.xlu1 %4298  ;;  %4184 = vrot.lane.b32.xlu0 %v11842_v17, %s6182_s1  ;;  %v4551_v17 = vsel %vm2076_vm7, %v11867_v12, %v11866_v25  ;;  %v11876_v25 = vld [vmem:[#allocation57_spill] sm:$0xff] }
 0x588   :  { %4254 = vrot.lane.b32.xlu1 %v11862_v4, %s6183_s2  ;;  %v4293_v33 = vpop.permute.xlu0 %4292 }
 0x589   :  { %v4871_v59 = vsel %vm4837_vm1, %v4806_v23, %v4293_v33 }
 0x58a   :  { %v10305_v27 = vpop.permute.xlu1 %4362  ;;  %4248 = vrot.lane.b32.xlu0 %v11843_v11, %s6183_s2  ;;  %v11870_v11 = vld [vmem:[#allocation179_spill] sm:$0xff] }
 0x58b   :  { %v4615_v53 = vsel %vm2206_vm9, %v4551_v17, %v11870_v11 }
 0x58c   :  { %4318 = vrot.lane.b32.xlu1 %v11863_v19, %s6184_s15  ;;  %v4357_v39 = vpop.permute.xlu0 %4356  ;;  %v4679_v50 = vsel %vm2336_vm11, %v4615_v53, %v11872_v15 }
 0x58d   :  { %v4743_v14 = vsel %vm2466_vm13, %v4679_v50, %v10218_v7  ;;  %v4936_v51 = vsel %vm4902_vm2, %v4871_v59, %v4357_v39  ;;  %v11877_v50 = vld [vmem:[#allocation169_spill] sm:$0xff]  ;;  %v11880_v59 = vld [vmem:[#allocation80_spill] sm:$0xff] }
 0x58e   :  { %v10319_v60 = vpop.permute.xlu1 %4426  ;;  %4312 = vrot.lane.b32.xlu0 %v11869_v18, %s6184_s15  ;;  %v4808_v5 = vsel %vm4772_vm0, %v4743_v14, %v10226_v36  ;;  %v11878_v14 = vld [vmem:[#allocation155_spill] sm:$0xff] }
 0x58f   :  { %v4873_v2 = vsel %vm4837_vm1, %v4808_v5, %v10232_v38  ;;  %v11879_v5 = vld [vmem:[#allocation189_spill] sm:$0xff] }
 0x590   :  { %4382 = vrot.lane.b32.xlu1 %v11873_v26, %s6185_s16  ;;  %v4421_v10 = vpop.permute.xlu0 %4420  ;;  %v4938_v7 = vsel %vm4902_vm2, %v4873_v2, %v10238_v47  ;;  %v4555_v2 = vsel %vm2076_vm7, %v8764_v43, %v11880_v59 }
 0x591   :  { %v5001_v46 = vsel %vm4967_vm3, %v4936_v51, %v4421_v10  ;;  %v5003_v20 = vsel %vm4967_vm3, %v4938_v7, %v10252_v8  ;;  %v11881_v51 = vld [vmem:[#allocation192_spill] sm:$0xff] }
 0x592   :  { %v10338_v56 = vpop.permute.xlu1 %4490  ;;  %4376 = vrot.lane.b32.xlu0 %v11846_v13, %s6185_s16  ;;  %v10356_v13 = vld [vmem:[%s10748_s4] ss:$0 sm:$0xff]  ;;  %v5068_v38 = vsel %vm5032_vm4, %v5003_v20, %v4487_v63  ;;  %s6188_s4 = smov [#allocation2]  }
 0x594   :  { %4446 = vrot.lane.b32.xlu1 %v11874_v31, %s6186_s20  ;;  %v4485_v36 = vpop.permute.xlu0 %4484 }
 0x595   :  { %v5066_v44 = vsel %vm5032_vm4, %v5001_v46, %v4485_v36  ;;  %v11882_v36 = vld [vmem:[#allocation171_spill] sm:$0xff] }
 0x596   :  { %v10359_v34 = vpop.permute.xlu1 %4174  ;;  %4440 = vrot.lane.b32.xlu0 %v11847_v61, %s6186_s20  ;;  %5999 = vmatprep.mubr.msk.bf16.mxu1 %vm5143_vm5, %v5066_v44  ;;  %v11884_v44 = vld [vmem:[#allocation102_spill] sm:$0xff] }
 0x597   :  { %v5969_v47 = vpop.f32.mrf.mxu1  ;;  %6000 = vmatmul.mubr.msk.bf16.gmra.mxu1 %vm5143_vm5, %v5068_v38 }
 0x598   :  { %v5255_v8 = vadd.f32 %v5969_v47, %v10356_v13  ;;  %4510 = vrot.lane.b32.xlu1 %v11875_v16, %s6187_s23  ;;  %v4169_v33 = vpop.permute.xlu0 %4168  ;;  %v11885_v47 = vld [vmem:[#allocation197_spill] sm:$0xff] }
 0x599   :  { %v5246_v39 = vpop.f32.mrf.mxu1 }
 0x59a   :  { %v5503_v48 = vmax.f32 %v5255_v8, 0.0  ;;  %v5247_v63 = vadd.f32 %v10356_v13, %v5246_v39  ;;  %v10369_v40 = vpop.permute.xlu1 %4238  ;;  %4504 = vrot.lane.b32.xlu0 %v11876_v25, %s6187_s23 }
 0x59b   :  { %v5970_v61 = vpop.f32.mrf.mxu1 }
 0x59c   :  { %5567 = vst [vmem:[#allocation2 + $0x10] sm:$0xff] %v5503_v48  ;;  %v5501_v17 = vmax.f32 %v5247_v63, 0.0  ;;  %v5258_v9 = vadd.f32 %v5970_v61, %v10356_v13  ;;  %4130 = vrot.lane.b32.xlu1 %v11865_v49, %s6180_s28  ;;  %v4233_v32 = vpop.permute.xlu0 %4232 }
 0x59d   :  { %v5249_v11 = vpop.f32.mrf.mxu1 }
 0x59e   :  { %5565 = vst [vmem:[#allocation2] sm:$0xff] %v5501_v17  ;;  %v5504_v53 = vmax.f32 %v5258_v9, 0.0  ;;  %v5250_v41 = vadd.f32 %v10356_v13, %v5249_v11  ;;  %v10377_v1 = vpop.permute.xlu1 %4302  ;;  %4188 = vrot.lane.b32.xlu0 %v11857_v0, %s6182_s1  ;;  %v4553_v0 = vsel %vm2076_vm7, %v11668_v58, %v11879_v5 }
 0x59f   :  { %v4617_v7 = vsel %vm2206_vm9, %v4553_v0, %v11881_v51 }
 0x5a0   :  { %5568 = vst [vmem:[#allocation2 + $0x18] sm:$0xff] %v5504_v53  ;;  %v5502_v15 = vmax.f32 %v5250_v41, 0.0  ;;  %4194 = vrot.lane.b32.xlu1 %v11877_v50, %s6182_s1  ;;  %v4297_v45 = vpop.permute.xlu0 %4296  ;;  %v4681_v38 = vsel %vm2336_vm11, %v4617_v7, %v11884_v44  ;;  %v11886_v41 = vld [vmem:[#allocation61_spill] sm:$0xff]  ;;  %v11888_v44 = vld [vmem:[#allocation191_spill] sm:$0xff] }
 0x5a1   :  { %v4745_v8 = vsel %vm2466_vm13, %v4681_v38, %v4169_v33  ;;  %v4557_v38 = vsel %vm2076_vm7, %v11806_v28, %v11888_v44  ;;  %v11895_v44 = vld [vmem:[#allocation106_spill] sm:$0xff] }
 0x5a2   :  { %5566 = vst [vmem:[#allocation2 + $0x8] sm:$0xff] %v5502_v15  ;;  %v10383_v10 = vpop.permute.xlu1 %4366  ;;  %4252 = vrot.lane.b32.xlu0 %v11858_v6, %s6183_s2  ;;  %v11883_v6 = vld [vmem:[#allocation190_spill] sm:$0xff]  ;;  %v4810_v39 = vsel %vm4772_vm0, %v4745_v8, %v4233_v32  ;;  %v11890_v8 = vld [vmem:[#allocation195_spill] sm:$0xff] }
 0x5a3   :  { %v4619_v20 = vsel %vm2206_vm9, %v4555_v2, %v11883_v6  ;;  %v4875_v63 = vsel %vm4837_vm1, %v4810_v39, %v4297_v45  ;;  %v11891_v39 = vld [vmem:[#allocation193_spill] sm:$0xff] }
 0x5a4   :  { %4258 = vrot.lane.b32.xlu1 %v11878_v14, %s6183_s2  ;;  %v4361_v23 = vpop.permute.xlu0 %4360  ;;  %v4683_v58 = vsel %vm2336_vm11, %v4619_v20, %v11885_v47  ;;  %v11889_v47 = vld [vmem:[#allocation92_spill] sm:$0xff] }
 0x5a5   :  { %v4747_v16 = vsel %vm2466_vm13, %v4683_v58, %v10285_v30  ;;  %v4559_v58 = vsel %vm2076_vm7, %v11642_v21, %v11889_v47  ;;  %v11896_v47 = vld [vmem:[#allocation93_spill] sm:$0xff] }
 0x5a6   :  { %v10397_v46 = vpop.permute.xlu1 %4430  ;;  %4316 = vrot.lane.b32.xlu0 %v11882_v36, %s6184_s15  ;;  %v4812_v48 = vsel %vm4772_vm0, %v4747_v16, %v10293_v42 }
 0x5a7   :  { %v4877_v33 = vsel %vm4837_vm1, %v4812_v48, %v10299_v54  ;;  %v11892_v48 = vld [vmem:[#allocation104_spill] sm:$0xff] }
 0x5a8   :  { %4322 = vrot.lane.b32.xlu1 %v11867_v12, %s6184_s15  ;;  %v4425_v43 = vpop.permute.xlu0 %4424  ;;  %v4940_v12 = vsel %vm4902_vm2, %v4875_v63, %v4361_v23  ;;  %v4942_v30 = vsel %vm4902_vm2, %v4877_v33, %v10305_v27  ;;  %v11887_v23 = vld [vmem:[#allocation30_spill] sm:$0xff]  ;;  %v11893_v33 = vld [vmem:[#allocation56_spill] sm:$0xff] }
 0x5a9   :  { %v5005_v61 = vsel %vm4967_vm3, %v4940_v12, %v4425_v43  ;;  %v5007_v17 = vsel %vm4967_vm3, %v4942_v30, %v10319_v60  ;;  %v4621_v43 = vsel %vm2206_vm9, %v4557_v38, %v11890_v8  ;;  %v4561_v38 = vsel %vm2076_vm7, %v11822_v24, %v11895_v44  ;;  %v11897_v8 = vld [vmem:[#allocation98_spill] sm:$0xff] }
 0x5aa   :  { %v10416_v25 = vpop.permute.xlu1 %4494  ;;  %4380 = vrot.lane.b32.xlu0 %v11861_v55, %s6185_s16  ;;  %v5072_v55 = vsel %vm5032_vm4, %v5007_v17, %v10338_v56  ;;  %v4685_v63 = vsel %vm2336_vm11, %v4621_v43, %v11892_v48  ;;  %v4625_v43 = vsel %vm2206_vm9, %v4561_v38, %v11897_v8  ;;  %v11903_v38 = vld [vmem:[#allocation52_spill] sm:$0xff]  ;;  %v11904_v8 = vld [vmem:[#allocation49_spill] sm:$0xff] }
 0x5ac   :  { %4386 = vrot.lane.b32.xlu1 %v11789_v57, %s6185_s16  ;;  %v4489_v42 = vpop.permute.xlu0 %4488 }
 0x5ad   :  { %v5070_v9 = vsel %vm5032_vm4, %v5005_v61, %v4489_v42 }
 0x5ae   :  { %v10433_v54 = vpop.permute.xlu1 %4178  ;;  %4444 = vrot.lane.b32.xlu0 %v11862_v4, %s6186_s20  ;;  %6003 = vmatprep.mubr.msk.bf16.mxu1 %vm5143_vm5, %v5070_v9 }
 0x5af   :  { %v5973_v27 = vpop.f32.mrf.mxu1  ;;  %6004 = vmatmul.mubr.msk.bf16.gmra.mxu1 %vm5143_vm5, %v5072_v55 }
 0x5b0   :  { %v5271_v57 = vadd.f32 %v5973_v27, %v10356_v13  ;;  %4450 = vrot.lane.b32.xlu1 %v11790_v37, %s6186_s20  ;;  %v4173_v60 = vpop.permute.xlu0 %4172 }
 0x5b1   :  { %v5262_v32 = vpop.f32.mrf.mxu1  ;;  %v4749_v12 = vsel %vm2466_vm13, %v4685_v63, %v4173_v60  ;;  %v11899_v63 = vld [vmem:[#allocation133_spill] sm:$0xff] }
 0x5b2   :  { %v5507_v11 = vmax.f32 %v5271_v57, 0.0  ;;  %v5263_v56 = vadd.f32 %v10356_v13, %v5262_v32  ;;  %v10443_v53 = vpop.permute.xlu1 %4242  ;;  %4508 = vrot.lane.b32.xlu0 %v11886_v41, %s6187_s23 }
 0x5b3   :  { %v5974_v4 = vpop.f32.mrf.mxu1 }
 0x5b4   :  { %5571 = vst [vmem:[#allocation2 + $0x30] sm:$0xff] %v5507_v11  ;;  %v5505_v15 = vmax.f32 %v5263_v56, 0.0  ;;  %v5274_v45 = vadd.f32 %v5974_v4, %v10356_v13  ;;  %4514 = vrot.lane.b32.xlu1 %v11887_v23, %s6187_s23  ;;  %v4237_v5 = vpop.permute.xlu0 %4236 }
 0x5b5   :  { %v5265_v37 = vpop.f32.mrf.mxu1  ;;  %v4814_v61 = vsel %vm4772_vm0, %v4749_v12, %v4237_v5 }
 0x5b6   :  { %5569 = vst [vmem:[#allocation2 + $0x20] sm:$0xff] %v5505_v15  ;;  %v5508_v0 = vmax.f32 %v5274_v45, 0.0  ;;  %v5266_v59 = vadd.f32 %v10356_v13, %v5265_v37  ;;  %v10451_v2 = vpop.permute.xlu1 %4306  ;;  %4128 = vrot.lane.b32.xlu0 %v11863_v19, %s6180_s28  ;;  %s5634_s28 = sshll.u32 %s6188_s4, 4  ;;  %s5635_s28 = int_to_ptr.vmem [resolvable:$true] %s5634_s28 }
 0x5b7   :  { %s6153_s6 = scalar_lea.vmem %s5635_s28, 8192  ;;  %p6158_p1 = scmp.lt.s32.totalorder %s5635_s28, %s5635_s28 }
 0x5b8   :  { %5572 = vst [vmem:[#allocation2 + $0x38] sm:$0xff] %v5508_v0  ;;  %v5506_v51 = vmax.f32 %v5266_v59, 0.0  ;;  %v4301_v7 = vpop.permute.xlu0 %4300  ;;  %v11894_v59 = vld [vmem:[#allocation65_spill] sm:$0xff]  ;;  %p6154_p0 = scmp.ne.s32.totalorder %s5635_s28, %s6153_s6  ;;  %p6159_p2 = scmp.lt.s32.totalorder %s6153_s6, %s6153_s6 }
 0x5b9   :  { %v4879_v42 = vsel %vm4837_vm1, %v4814_v61, %v4301_v7 }
 0x5ba   :  { %5570 = vst [vmem:[#allocation2 + $0x28] sm:$0xff] %v5506_v51  ;;  %v10455_v6 = vpop.permute.xlu1 %4370  ;;  %4192 = vrot.lane.b32.xlu0 %v11873_v26, %s6182_s1  ;;  %v4623_v26 = vsel %vm2206_vm9, %v4559_v58, %v11891_v39  ;;  %v4563_v58 = vsel %vm2076_vm7, %v11800_v52, %v11896_v47  ;;  %p6160_p3 = por %p6159_p2, %p6158_p1 }
 0x5bb   :  { %v4687_v28 = vsel %vm2336_vm11, %v4623_v26, %v11893_v33  ;;  %v11898_v26 = vld [vmem:[#allocation46_spill] sm:$0xff]  ;;  %v4689_v33 = vsel %vm2336_vm11, %v4625_v43, %v11899_v63  ;;  %v11906_v63 = vld [vmem:[#allocation75_spill] sm:$0xff] }
 0x5bc   :  { %v4365_v20 = vpop.permute.xlu0 %4364  ;;  %v4751_v30 = vsel %vm2466_vm13, %v4687_v28, %v10359_v34  ;;  %v4627_v48 = vsel %vm2206_vm9, %v4563_v58, %v11898_v26  ;;  %v11900_v28 = vld [vmem:[#allocation131_spill] sm:$0xff]  ;;  %v11905_v26 = vld [vmem:[#allocation136_spill] sm:$0xff]  ;;  %p6161_p4 = pnand %p6160_p3, %p6154_p0 }
 0x5bd   :  { %v4944_v55 = vsel %vm4902_vm2, %v4879_v42, %v4365_v20  ;;  %v4691_v12 = vsel %vm2336_vm11, %v4627_v48, %v11900_v28 }
 0x5be   :  { %v10467_v16 = vpop.permute.xlu1 %4434  ;;  %4256 = vrot.lane.b32.xlu0 %v11874_v31, %s6183_s2  ;;  %v4816_v31 = vsel %vm4772_vm0, %v4751_v30, %v10369_v40  ;;  %v4755_v52 = vsel %vm2466_vm13, %v4691_v12, %v10433_v54 }
 0x5bf   :  { %v4881_v9 = vsel %vm4837_vm1, %v4816_v31, %v10377_v1  ;;  %v4820_v61 = vsel %vm4772_vm0, %v4755_v52, %v10443_v53 }
 0x5c0   :  { %v4429_v21 = vpop.permute.xlu0 %4428  ;;  %v4946_v27 = vsel %vm4902_vm2, %v4881_v9, %v10383_v10  ;;  %v4885_v9 = vsel %vm4837_vm1, %v4820_v61, %v10451_v2 }
 0x5c1   :  { %v5009_v34 = vsel %vm4967_vm3, %v4944_v55, %v4429_v21  ;;  %v5011_v40 = vsel %vm4967_vm3, %v4946_v27, %v10397_v46  ;;  %v4950_v27 = vsel %vm4902_vm2, %v4885_v9, %v10455_v6 }
 0x5c2   :  { %v4499_v17 = vpop.permute.xlu1 %4498  ;;  %4320 = vrot.lane.b32.xlu0 %v11865_v49, %s6184_s15  ;;  %v5076_v32 = vsel %vm5032_vm4, %v5011_v40, %v10416_v25  ;;  %v5015_v54 = vsel %vm4967_vm3, %v4950_v27, %v10467_v16 }
 0x5c3   :  { %v5080_v53 = vsel %vm5032_vm4, %v5015_v54, %v4499_v17 }
 0x5c4   :  { %v4493_v57 = vpop.permute.xlu0 %4492 }
 0x5c5   :  { %v5074_v60 = vsel %vm5032_vm4, %v5009_v34, %v4493_v57 }
 0x5c6   :  { %v10497_v49 = vpop.permute.xlu1 %4182  ;;  %4384 = vrot.lane.b32.xlu0 %v11877_v50, %s6185_s16  ;;  %6007 = vmatprep.mubr.msk.bf16.mxu1 %vm5143_vm5, %v5074_v60 }
 0x5c7   :  { %v5977_v1 = vpop.f32.mrf.mxu1  ;;  %6008 = vmatmul.mubr.msk.bf16.gmra.mxu1 %vm5143_vm5, %v5076_v32 }
 0x5c8   :  { %v5287_v10 = vadd.f32 %v5977_v1, %v10356_v13  ;;  %v4177_v11 = vpop.permute.xlu0 %4176 }
 0x5c9   :  { %v5278_v56 = vpop.f32.mrf.mxu1  ;;  %v4753_v24 = vsel %vm2466_vm13, %v4689_v33, %v4177_v11 }
 0x5ca   :  { %v5511_v46 = vmax.f32 %v5287_v10, 0.0  ;;  %v5279_v41 = vadd.f32 %v10356_v13, %v5278_v56  ;;  %v10505_v4 = vpop.permute.xlu1 %4246  ;;  %4448 = vrot.lane.b32.xlu0 %v11878_v14, %s6186_s20 }
 0x5cb   :  { %v5978_v25 = vpop.f32.mrf.mxu1 }
 0x5cc   :  { %5575 = vst [vmem:[#allocation2 + $0x50] sm:$0xff] %v5511_v46  ;;  %v5509_v50 = vmax.f32 %v5279_v41, 0.0  ;;  %v5290_v15 = vadd.f32 %v5978_v25, %v10356_v13  ;;  %v4241_v45 = vpop.permute.xlu0 %4240 }
 0x5cd   :  { %v5281_v23 = vpop.f32.mrf.mxu1  ;;  %v4818_v30 = vsel %vm4772_vm0, %v4753_v24, %v4241_v45 }
 0x5ce   :  { %5573 = vst [vmem:[#allocation2 + $0x40] sm:$0xff] %v5509_v50  ;;  %v5512_v5 = vmax.f32 %v5290_v15, 0.0  ;;  %v5282_v37 = vadd.f32 %v10356_v13, %v5281_v23  ;;  %v10511_v0 = vpop.permute.xlu1 %4310  ;;  %4512 = vrot.lane.b32.xlu0 %v11894_v59, %s6187_s23 }
 0x5d0   :  { %5576 = vst [vmem:[#allocation2 + $0x58] sm:$0xff] %v5512_v5  ;;  %v5510_v51 = vmax.f32 %v5282_v37, 0.0  ;;  %v4305_v7 = vpop.permute.xlu0 %4304 }
 0x5d1   :  { %v4883_v31 = vsel %vm4837_vm1, %v4818_v30, %v4305_v7 }
 0x5d2   :  { %5574 = vst [vmem:[#allocation2 + $0x48] sm:$0xff] %v5510_v51  ;;  %v10515_v14 = vpop.permute.xlu1 %4374  ;;  %v11901_v51 = vld [vmem:[#allocation94_spill] sm:$0xff] }
 0x5d3   :  { %v4565_v7 = vsel %vm2076_vm7, %v11838_v35, %v11901_v51  ;;  %v11910_v51 = vld [vmem:[#allocation130_spill] sm:$0xff] }
 0x5d4   :  { %v4369_v20 = vpop.permute.xlu0 %4368  ;;  %v4629_v47 = vsel %vm2206_vm9, %v4565_v7, %v11903_v38  ;;  %v11912_v38 = vld [vmem:[#allocation182_spill] sm:$0xff] }
 0x5d5   :  { %v4948_v55 = vsel %vm4902_vm2, %v4883_v31, %v4369_v20  ;;  %v11902_v20 = vld [vmem:[#allocation123_spill] sm:$0xff]  ;;  %v4693_v48 = vsel %vm2336_vm11, %v4629_v47, %v11905_v26 }
 0x5d6   :  { %v10525_v39 = vpop.permute.xlu1 %4438  ;;  %v4567_v44 = vsel %vm2076_vm7, %v11816_v3, %v11902_v20  ;;  %v11911_v20 = vld [vmem:[#allocation31_spill] sm:$0xff] }
 0x5d7   :  { %v4631_v43 = vsel %vm2206_vm9, %v4567_v44, %v11904_v8 }
 0x5d8   :  { %v4433_v21 = vpop.permute.xlu0 %4432  ;;  %v4695_v33 = vsel %vm2336_vm11, %v4631_v43, %v11906_v63 }
 0x5d9   :  { %v5013_v34 = vsel %vm4967_vm3, %v4948_v55, %v4433_v21  ;;  %v4759_v3 = vsel %vm2466_vm13, %v4695_v33, %v10497_v49 }
 0x5da   :  { %v4503_v42 = vpop.permute.xlu1 %4502  ;;  %v4824_v24 = vsel %vm4772_vm0, %v4759_v3, %v10505_v4 }
 0x5db   :  { %v4889_v30 = vsel %vm4837_vm1, %v4824_v24, %v10511_v0 }
 0x5dc   :  { %v4497_v57 = vpop.permute.xlu0 %4496  ;;  %v4954_v31 = vsel %vm4902_vm2, %v4889_v30, %v10515_v14 }
 0x5dd   :  { %v5078_v40 = vsel %vm5032_vm4, %v5013_v34, %v4497_v57  ;;  %v5019_v49 = vsel %vm4967_vm3, %v4954_v31, %v10525_v39 }
 0x5de   :  { %v10550_v60 = vpop.permute.xlu1 %4186  ;;  %6011 = vmatprep.mubr.msk.bf16.mxu1 %vm5143_vm5, %v5078_v40  ;;  %v5084_v4 = vsel %vm5032_vm4, %v5019_v49, %v4503_v42 }
 0x5df   :  { %v5981_v2 = vpop.f32.mrf.mxu1  ;;  %6012 = vmatmul.mubr.msk.bf16.gmra.mxu1 %vm5143_vm5, %v5080_v53 }
 0x5e0   :  { %v5303_v32 = vadd.f32 %v5981_v2, %v10356_v13  ;;  %v4181_v6 = vpop.permute.xlu0 %4180 }
 0x5e1   :  { %v5294_v1 = vpop.f32.mrf.mxu1  ;;  %v4757_v35 = vsel %vm2466_vm13, %v4693_v48, %v4181_v6 }
 0x5e2   :  { %v5515_v10 = vmax.f32 %v5303_v32, 0.0  ;;  %v5295_v11 = vadd.f32 %v10356_v13, %v5294_v1  ;;  %v10556_v56 = vpop.permute.xlu1 %4250 }
 0x5e3   :  { %v5982_v16 = vpop.f32.mrf.mxu1 }
 0x5e4   :  { %5579 = vst [vmem:[#allocation2 + $0x70] sm:$0xff] %v5515_v10  ;;  %v5513_v46 = vmax.f32 %v5295_v11, 0.0  ;;  %v5306_v17 = vadd.f32 %v5982_v16, %v10356_v13  ;;  %v4245_v41 = vpop.permute.xlu0 %4244 }
 0x5e5   :  { %v5297_v25 = vpop.f32.mrf.mxu1  ;;  %v4822_v12 = vsel %vm4772_vm0, %v4757_v35, %v4245_v41 }
 0x5e6   :  { %5577 = vst [vmem:[#allocation2 + $0x60] sm:$0xff] %v5513_v46  ;;  %v5516_v50 = vmax.f32 %v5306_v17, 0.0  ;;  %v5298_v15 = vadd.f32 %v10356_v13, %v5297_v25  ;;  %v10560_v45 = vpop.permute.xlu1 %4314  ;;  %v11907_v25 = vld [vmem:[#allocation95_spill] sm:$0xff] }
 0x5e8   :  { %5580 = vst [vmem:[#allocation2 + $0x78] sm:$0xff] %v5516_v50  ;;  %v5514_v23 = vmax.f32 %v5298_v15, 0.0  ;;  %v4309_v5 = vpop.permute.xlu0 %4308  ;;  %v4569_v50 = vsel %vm2076_vm7, %v11853_v22, %v11907_v25  ;;  %v11908_v15 = vld [vmem:[#allocation126_spill] sm:$0xff]  ;;  %v11918_v25 = vld [vmem:[#allocation196_spill] sm:$0xff] }
 0x5e9   :  { %v4887_v21 = vsel %vm4837_vm1, %v4822_v12, %v4309_v5  ;;  %v11909_v5 = vld [vmem:[#allocation54_spill] sm:$0xff] }
 0x5ea   :  { %5578 = vst [vmem:[#allocation2 + $0x68] sm:$0xff] %v5514_v23  ;;  %v10562_v37 = vpop.permute.xlu1 %4378  ;;  %v4571_v23 = vsel %vm2076_vm7, %v11832_v62, %v11908_v15 }
 0x5eb   :  { %v4635_v7 = vsel %vm2206_vm9, %v4571_v23, %v11910_v51 }
 0x5ec   :  { %v4373_v59 = vpop.permute.xlu0 %4372  ;;  %v4699_v47 = vsel %vm2336_vm11, %v4635_v7, %v11912_v38 }
 0x5ed   :  { %v4952_v61 = vsel %vm4902_vm2, %v4887_v21, %v4373_v59  ;;  %v4633_v59 = vsel %vm2206_vm9, %v4569_v50, %v11909_v5  ;;  %v4763_v22 = vsel %vm2466_vm13, %v4699_v47, %v10550_v60 }
 0x5ee   :  { %v10572_v58 = vpop.permute.xlu1 %4442  ;;  %v4697_v44 = vsel %vm2336_vm11, %v4633_v59, %v11911_v20  ;;  %v4828_v48 = vsel %vm4772_vm0, %v4763_v22, %v10556_v56 }
 0x5ef   :  { %v4893_v33 = vsel %vm4837_vm1, %v4828_v48, %v10560_v45 }
 0x5f0   :  { %v4437_v28 = vpop.permute.xlu0 %4436 }
 0x5f1   :  { %v5017_v9 = vsel %vm4967_vm3, %v4952_v61, %v4437_v28  ;;  %v4958_v28 = vsel %vm4902_vm2, %v4893_v33, %v10562_v37 }
 0x5f2   :  { %v4507_v52 = vpop.permute.xlu1 %4506  ;;  %v5023_v60 = vsel %vm4967_vm3, %v4958_v28, %v10572_v58 }
 0x5f3   :  { %v5088_v56 = vsel %vm5032_vm4, %v5023_v60, %v4507_v52 }
 0x5f4   :  { %v4501_v55 = vpop.permute.xlu0 %4500 }
 0x5f5   :  { %v5082_v27 = vsel %vm5032_vm4, %v5017_v9, %v4501_v55 }
 0x5f6   :  { %6015 = vmatprep.mubr.msk.bf16.mxu1 %vm5143_vm5, %v5082_v27  ;;  %v10598_v34 = vpop.permute.xlu1 %4190 }
 0x5f7   :  { %v5985_v0 = vpop.f32.mrf.mxu1  ;;  %6016 = vmatmul.mubr.msk.bf16.gmra.mxu1 %vm5143_vm5, %v5084_v4 }
 0x5f8   :  { %v5319_v57 = vadd.f32 %v5985_v0, %v10356_v13  ;;  %v4185_v14 = vpop.permute.xlu0 %4184 }
 0x5f9   :  { %v5310_v54 = vpop.f32.mrf.mxu1  ;;  %v4761_v8 = vsel %vm2466_vm13, %v4697_v44, %v4185_v14 }
 0x5fa   :  { %v5519_v40 = vmax.f32 %v5319_v57, 0.0  ;;  %v5311_v53 = vadd.f32 %v10356_v13, %v5310_v54  ;;  %v10604_v6 = vpop.permute.xlu1 %4254 }
 0x5fb   :  { %v5986_v2 = vpop.f32.mrf.mxu1 }
 0x5fc   :  { %5583 = vst [vmem:[#allocation2 + $0x90] sm:$0xff] %v5519_v40  ;;  %v5517_v39 = vmax.f32 %v5311_v53, 0.0  ;;  %v5322_v32 = vadd.f32 %v5986_v2, %v10356_v13  ;;  %v4249_v42 = vpop.permute.xlu0 %4248  ;;  %v11913_v2 = vld [vmem:[#allocation125_spill] sm:$0xff] }
 0x5fd   :  { %v5313_v1 = vpop.f32.mrf.mxu1  ;;  %v4826_v62 = vsel %vm4772_vm0, %v4761_v8, %v4249_v42 }
 0x5fe   :  { %5581 = vst [vmem:[#allocation2 + $0x80] sm:$0xff] %v5517_v39  ;;  %v5520_v10 = vmax.f32 %v5322_v32, 0.0  ;;  %v5314_v11 = vadd.f32 %v10356_v13, %v5313_v1  ;;  %v4319_v17 = vpop.permute.xlu1 %4318  ;;  %v4573_v39 = vsel %vm2076_vm7, %v11869_v18, %v11913_v2  ;;  %v11914_v32 = vld [vmem:[#allocation70_spill] sm:$0xff]  ;;  %v11915_v1 = vld [vmem:[#allocation132_spill] sm:$0xff] }
 0x5ff   :  { %v4575_v42 = vsel %vm2076_vm7, %v11848_v29, %v11914_v32 }
 0x600   :  { %5584 = vst [vmem:[#allocation2 + $0x98] sm:$0xff] %v5520_v10  ;;  %v5518_v16 = vmax.f32 %v5314_v11, 0.0  ;;  %v4313_v46 = vpop.permute.xlu0 %4312  ;;  %v4637_v10 = vsel %vm2206_vm9, %v4573_v39, %v11915_v1  ;;  %v11916_v11 = vld [vmem:[#allocation157_spill] sm:$0xff] }
 0x601   :  { %v4891_v63 = vsel %vm4837_vm1, %v4826_v62, %v4313_v46  ;;  %v11917_v46 = vld [vmem:[#allocation160_spill] sm:$0xff] }
 0x602   :  { %5582 = vst [vmem:[#allocation2 + $0x88] sm:$0xff] %v5518_v16  ;;  %v4383_v26 = vpop.permute.xlu1 %4382  ;;  %v4639_v16 = vsel %vm2206_vm9, %v4575_v42, %v11916_v11 }
 0x603   :  { %v4703_v50 = vsel %vm2336_vm11, %v4639_v16, %v11918_v25 }
 0x604   :  { %v4377_v41 = vpop.permute.xlu0 %4376  ;;  %v4767_v18 = vsel %vm2466_vm13, %v4703_v50, %v10598_v34 }
 0x605   :  { %v4956_v35 = vsel %vm4902_vm2, %v4891_v63, %v4377_v41  ;;  %v4701_v41 = vsel %vm2336_vm11, %v4637_v10, %v11917_v46  ;;  %v4832_v59 = vsel %vm4772_vm0, %v4767_v18, %v10604_v6 }
 0x606   :  { %v4447_v21 = vpop.permute.xlu1 %4446  ;;  %v4897_v7 = vsel %vm4837_vm1, %v4832_v59, %v4319_v17 }
 0x607   :  { %v4962_v44 = vsel %vm4902_vm2, %v4897_v7, %v4383_v26 }
 0x608   :  { %v4441_v43 = vpop.permute.xlu0 %4440  ;;  %v5027_v8 = vsel %vm4967_vm3, %v4962_v44, %v4447_v21 }
 0x609   :  { %v5021_v3 = vsel %vm4967_vm3, %v4956_v35, %v4441_v43 }
 0x60a   :  { %v4511_v52 = vpop.permute.xlu1 %4510 }
 0x60b   :  { %v5092_v43 = vsel %vm5032_vm4, %v5027_v8, %v4511_v52 }
 0x60c   :  { %v4505_v12 = vpop.permute.xlu0 %4504 }
 0x60d   :  { %v5086_v24 = vsel %vm5032_vm4, %v5021_v3, %v4505_v12 }
 0x60e   :  { %6019 = vmatprep.mubr.msk.bf16.mxu1 %vm5143_vm5, %v5086_v24  ;;  %v4131_v40 = vpop.permute.xlu1 %4130 }
 0x60f   :  { %v5989_v30 = vpop.f32.mrf.mxu1  ;;  %6020 = vmatmul.mubr.msk.bf16.gmra.mxu1 %vm5143_vm5, %v5088_v56 }
 0x610   :  { %v5335_v45 = vadd.f32 %v5989_v30, %v10356_v13  ;;  %v4189_v61 = vpop.permute.xlu0 %4188 }
 0x611   :  { %v5326_v37 = vpop.f32.mrf.mxu1  ;;  %v4765_v15 = vsel %vm2466_vm13, %v4701_v41, %v4189_v61 }
 0x612   :  { %v5523_v31 = vmax.f32 %v5335_v45, 0.0  ;;  %v5327_v9 = vadd.f32 %v10356_v13, %v5326_v37  ;;  %v4195_v5 = vpop.permute.xlu1 %4194 }
 0x613   :  { %v5990_v55 = vpop.f32.mrf.mxu1 }
 0x614   :  { %5587 = vst [vmem:[#allocation2 + $0xb0] sm:$0xff] %v5523_v31  ;;  %v5521_v58 = vmax.f32 %v5327_v9, 0.0  ;;  %v5338_v49 = vadd.f32 %v5990_v55, %v10356_v13  ;;  %v4253_v27 = vpop.permute.xlu0 %4252  ;;  %v11919_v31 = vld [vmem:[#allocation67_spill] sm:$0xff] }
 0x615   :  { %v5329_v4 = vpop.f32.mrf.mxu1  ;;  %v4830_v29 = vsel %vm4772_vm0, %v4765_v15, %v4253_v27  ;;  %v4577_v9 = vsel %vm2076_vm7, %v11882_v36, %v11919_v31  ;;  %v11921_v27 = vld [vmem:[#allocation158_spill] sm:$0xff] }
 0x616   :  { %5585 = vst [vmem:[#allocation2 + $0xa0] sm:$0xff] %v5521_v58  ;;  %v5524_v0 = vmax.f32 %v5338_v49, 0.0  ;;  %v5330_v57 = vadd.f32 %v10356_v13, %v5329_v4  ;;  %v4259_v6 = vpop.permute.xlu1 %4258  ;;  %v11920_v58 = vld [vmem:[#allocation177_spill] sm:$0xff]  ;;  %v4641_v52 = vsel %vm2206_vm9, %v4577_v9, %v11921_v27 }
 0x617   :  { %v4579_v49 = vsel %vm2076_vm7, %v11863_v19, %v11920_v58  ;;  %v11922_v4 = vld [vmem:[#allocation181_spill] sm:$0xff] }
 0x618   :  { %5588 = vst [vmem:[#allocation2 + $0xb8] sm:$0xff] %v5524_v0  ;;  %v5522_v14 = vmax.f32 %v5330_v57, 0.0  ;;  %v4317_v54 = vpop.permute.xlu0 %4316  ;;  %v4643_v0 = vsel %vm2206_vm9, %v4579_v49, %v11922_v4 }
 0x619   :  { %v4895_v51 = vsel %vm4837_vm1, %v4830_v29, %v4317_v54 }
 0x61a   :  { %5586 = vst [vmem:[#allocation2 + $0xa8] sm:$0xff] %v5522_v14  ;;  %v4323_v12 = vpop.permute.xlu1 %4322  ;;  %v4707_v14 = vsel %vm2336_vm11, %v4643_v0, %v4131_v40 }
 0x61b   :  { %v4771_v36 = vsel %vm2466_vm13, %v4707_v14, %v4195_v5 }
 0x61c   :  { %v4381_v53 = vpop.permute.xlu0 %4380  ;;  %v4836_v39 = vsel %vm4772_vm0, %v4771_v36, %v4259_v6 }
 0x61d   :  { %v4960_v20 = vsel %vm4902_vm2, %v4895_v51, %v4381_v53  ;;  %v4901_v32 = vsel %vm4837_vm1, %v4836_v39, %v4323_v12 }
 0x61e   :  { %v4387_v45 = vpop.permute.xlu1 %4386 }
 0x61f   :  { %v4966_v11 = vsel %vm4902_vm2, %v4901_v32, %v4387_v45 }
 0x620   :  { %v4445_v23 = vpop.permute.xlu0 %4444 }
 0x621   :  { %v5025_v38 = vsel %vm4967_vm3, %v4960_v20, %v4445_v23 }
 0x622   :  { %v4451_v55 = vpop.permute.xlu1 %4450 }
 0x623   :  { %v5031_v41 = vsel %vm4967_vm3, %v4966_v11, %v4451_v55 }
 0x624   :  { %v4509_v47 = vpop.permute.xlu0 %4508 }
 0x625   :  { %v5090_v34 = vsel %vm5032_vm4, %v5025_v38, %v4509_v47 }
 0x626   :  { %6023 = vmatprep.mubr.msk.bf16.mxu1 %vm5143_vm5, %v5090_v34  ;;  %v4515_v42 = vpop.permute.xlu1 %4514 }
 0x627   :  { %v5993_v22 = vpop.f32.mrf.mxu1  ;;  %6024 = vmatmul.mubr.msk.bf16.gmra.mxu1 %vm5143_vm5, %v5092_v43  ;;  %v5096_v15 = vsel %vm5032_vm4, %v5031_v41, %v4515_v42 }
 0x628   :  { %v5351_v17 = vadd.f32 %v5993_v22, %v10356_v13  ;;  %v4129_v62 = vpop.permute.xlu0 %4128 }
 0x629   :  { %v5342_v48 = vpop.f32.mrf.mxu1  ;;  %v4705_v57 = vsel %vm2336_vm11, %v4641_v52, %v4129_v62 }
 0x62a   :  { %v5527_v26 = vmax.f32 %v5351_v17, 0.0  ;;  %v5343_v63 = vadd.f32 %v10356_v13, %v5342_v48 }
 0x62b   :  { %v5994_v33 = vpop.f32.mrf.mxu1 }
 0x62c   :  { %5591 = vst [vmem:[#allocation2 + $0xd0] sm:$0xff] %v5527_v26  ;;  %v5525_v35 = vmax.f32 %v5343_v63, 0.0  ;;  %v5354_v28 = vadd.f32 %v5994_v33, %v10356_v13  ;;  %v4193_v3 = vpop.permute.xlu0 %4192 }
 0x62d   :  { %v5345_v60 = vpop.f32.mrf.mxu1  ;;  %v4769_v54 = vsel %vm2466_vm13, %v4705_v57, %v4193_v3 }
 0x62e   :  { %5589 = vst [vmem:[#allocation2 + $0xc0] sm:$0xff] %v5525_v35  ;;  %v5528_v24 = vmax.f32 %v5354_v28, 0.0  ;;  %v5346_v56 = vadd.f32 %v10356_v13, %v5345_v60 }
 0x630   :  { %5592 = vst [vmem:[#allocation2 + $0xd8] sm:$0xff] %v5528_v24  ;;  %v5526_v21 = vmax.f32 %v5346_v56, 0.0  ;;  %v4257_v30 = vpop.permute.xlu0 %4256 }
 0x631   :  { %v4834_v2 = vsel %vm4772_vm0, %v4769_v54, %v4257_v30 }
 0x632   :  { %5590 = vst [vmem:[#allocation2 + $0xc8] sm:$0xff] %v5526_v21 }
 0x634   :  { %v4321_v61 = vpop.permute.xlu0 %4320 }
 0x635   :  { %v4899_v19 = vsel %vm4837_vm1, %v4834_v2, %v4321_v61 }
 0x638   :  { %v4385_v37 = vpop.permute.xlu0 %4384 }
 0x639   :  { %v4964_v1 = vsel %vm4902_vm2, %v4899_v19, %v4385_v37 }
 0x63c   :  { %v4449_v53 = vpop.permute.xlu0 %4448 }
 0x63d   :  { %v5029_v40 = vsel %vm4967_vm3, %v4964_v1, %v4449_v53 }
 0x63f   :  { %v5997_v10 = vpop.f32.mrf.mxu1 }
 0x640   :  { %v5367_v16 = vadd.f32 %v5997_v10, %v10356_v13  ;;  %v4513_v46 = vpop.permute.xlu0 %4512 }
 0x641   :  { %v5094_v25 = vsel %vm5032_vm4, %v5029_v40, %v4513_v46  ;;  %v5358_v50 = vpop.f32.mrf.mxu1 }
 0x642   :  { %v5531_v23 = vmax.f32 %v5367_v16, 0.0  ;;  %v5359_v18 = vadd.f32 %v10356_v13, %v5358_v50  ;;  %6027 = vmatprep.mubr.msk.bf16.mxu1 %vm5143_vm5, %v5094_v25 }
 0x643   :  { %v5998_v5 = vpop.f32.mrf.mxu1  ;;  %6028 = vmatmul.mubr.msk.bf16.gmra.mxu1 %vm5143_vm5, %v5096_v15 }
 0x644   :  { %5595 = vst [vmem:[#allocation2 + $0xf0] sm:$0xff] %v5531_v23  ;;  %v5529_v29 = vmax.f32 %v5359_v18, 0.0  ;;  %v5370_v59 = vadd.f32 %v5998_v5, %v10356_v13 }
 0x645   :  { %v5361_v51 = vpop.f32.mrf.mxu1 }
 0x646   :  { %5593 = vst [vmem:[#allocation2 + $0xe0] sm:$0xff] %v5529_v29  ;;  %v5532_v7 = vmax.f32 %v5370_v59, 0.0  ;;  %v5362_v20 = vadd.f32 %v10356_v13, %v5361_v51 }
 0x648   :  { %5596 = vst [vmem:[#allocation2 + $0xf8] sm:$0xff] %v5532_v7  ;;  %v5530_v44 = vmax.f32 %v5362_v20, 0.0 }
 0x64a   :  { %5594 = vst [vmem:[#allocation2 + $0xe8] sm:$0xff] %v5530_v44 }
 0x657   :  { %v6001_v38 = vpop.f32.mrf.mxu1 }
 0x658   :  { %v5383_v47 = vadd.f32 %v6001_v38, %v10356_v13 }
 0x659   :  { %v5374_v8 = vpop.f32.mrf.mxu1 }
 0x65a   :  { %v5535_v34 = vmax.f32 %v5383_v47, 0.0  ;;  %v5375_v43 = vadd.f32 %v10356_v13, %v5374_v8 }
 0x65b   :  { %v6002_v6 = vpop.f32.mrf.mxu1 }
 0x65c   :  { %5599 = vst [vmem:[#allocation2 + $0x110] sm:$0xff] %v5535_v34  ;;  %v5533_v22 = vmax.f32 %v5375_v43, 0.0  ;;  %v5386_v17 = vadd.f32 %v6002_v6, %v10356_v13 }
 0x65d   :  { %v5377_v62 = vpop.f32.mrf.mxu1 }
 0x65e   :  { %5597 = vst [vmem:[#allocation2 + $0x100] sm:$0xff] %v5533_v22  ;;  %v5536_v48 = vmax.f32 %v5386_v17, 0.0  ;;  %v5378_v26 = vadd.f32 %v10356_v13, %v5377_v62 }
 0x660   :  { %5600 = vst [vmem:[#allocation2 + $0x118] sm:$0xff] %v5536_v48  ;;  %v5534_v63 = vmax.f32 %v5378_v26, 0.0 }
 0x662   :  { %5598 = vst [vmem:[#allocation2 + $0x108] sm:$0xff] %v5534_v63 }
 0x66f   :  { %v6005_v33 = vpop.f32.mrf.mxu1 }
 0x670   :  { %v5399_v35 = vadd.f32 %v6005_v33, %v10356_v13 }
 0x671   :  { %v5390_v28 = vpop.f32.mrf.mxu1 }
 0x672   :  { %v5539_v3 = vmax.f32 %v5399_v35, 0.0  ;;  %v5391_v12 = vadd.f32 %v10356_v13, %v5390_v28 }
 0x673   :  { %v6006_v60 = vpop.f32.mrf.mxu1 }
 0x674   :  { %5603 = vst [vmem:[#allocation2 + $0x130] sm:$0xff] %v5539_v3  ;;  %v5537_v24 = vmax.f32 %v5391_v12, 0.0  ;;  %v5402_v56 = vadd.f32 %v6006_v60, %v10356_v13 }
 0x675   :  { %v5393_v21 = vpop.f32.mrf.mxu1 }
 0x676   :  { %5601 = vst [vmem:[#allocation2 + $0x120] sm:$0xff] %v5537_v24  ;;  %v5540_v30 = vmax.f32 %v5402_v56, 0.0  ;;  %v5394_v45 = vadd.f32 %v10356_v13, %v5393_v21 }
 0x678   :  { %5604 = vst [vmem:[#allocation2 + $0x138] sm:$0xff] %v5540_v30  ;;  %v5538_v61 = vmax.f32 %v5394_v45, 0.0 }
 0x67a   :  { %5602 = vst [vmem:[#allocation2 + $0x128] sm:$0xff] %v5538_v61 }
 0x687   :  { %v6009_v37 = vpop.f32.mrf.mxu1 }
 0x688   :  { %v5415_v31 = vadd.f32 %v6009_v37, %v10356_v13 }
 0x689   :  { %v5406_v9 = vpop.f32.mrf.mxu1 }
 0x68a   :  { %v5543_v55 = vmax.f32 %v5415_v31, 0.0  ;;  %v5407_v58 = vadd.f32 %v10356_v13, %v5406_v9 }
 0x68b   :  { %v6010_v49 = vpop.f32.mrf.mxu1 }
 0x68c   :  { %5607 = vst [vmem:[#allocation2 + $0x150] sm:$0xff] %v5543_v55  ;;  %v5541_v27 = vmax.f32 %v5407_v58, 0.0  ;;  %v5418_v52 = vadd.f32 %v6010_v49, %v10356_v13 }
 0x68d   :  { %v5409_v4 = vpop.f32.mrf.mxu1 }
 0x68e   :  { %5605 = vst [vmem:[#allocation2 + $0x140] sm:$0xff] %v5541_v27  ;;  %v5544_v0 = vmax.f32 %v5418_v52, 0.0  ;;  %v5410_v57 = vadd.f32 %v10356_v13, %v5409_v4 }
 0x690   :  { %5608 = vst [vmem:[#allocation2 + $0x158] sm:$0xff] %v5544_v0  ;;  %v5542_v14 = vmax.f32 %v5410_v57, 0.0 }
 0x692   :  { %5606 = vst [vmem:[#allocation2 + $0x148] sm:$0xff] %v5542_v14 }
 0x69f   :  { %v6013_v54 = vpop.f32.mrf.mxu1 }
 0x6a0   :  { %v5431_v53 = vadd.f32 %v6013_v54, %v10356_v13 }
 0x6a1   :  { %v5422_v36 = vpop.f32.mrf.mxu1 }
 0x6a2   :  { %v5547_v2 = vmax.f32 %v5431_v53, 0.0  ;;  %v5423_v39 = vadd.f32 %v10356_v13, %v5422_v36 }
 0x6a3   :  { %v6014_v19 = vpop.f32.mrf.mxu1 }
 0x6a4   :  { %5611 = vst [vmem:[#allocation2 + $0x170] sm:$0xff] %v5547_v2  ;;  %v5545_v32 = vmax.f32 %v5423_v39, 0.0  ;;  %v5434_v42 = vadd.f32 %v6014_v19, %v10356_v13 }
 0x6a5   :  { %v5425_v1 = vpop.f32.mrf.mxu1 }
 0x6a6   :  { %5609 = vst [vmem:[#allocation2 + $0x160] sm:$0xff] %v5545_v32  ;;  %v5548_v10 = vmax.f32 %v5434_v42, 0.0  ;;  %v5426_v11 = vadd.f32 %v10356_v13, %v5425_v1 }
 0x6a8   :  { %5612 = vst [vmem:[#allocation2 + $0x178] sm:$0xff] %v5548_v10  ;;  %v5546_v40 = vmax.f32 %v5426_v11, 0.0 }
 0x6aa   :  { %5610 = vst [vmem:[#allocation2 + $0x168] sm:$0xff] %v5546_v40 }
 0x6b7   :  { %v6017_v16 = vpop.f32.mrf.mxu1 }
 0x6b8   :  { %v5447_v46 = vadd.f32 %v6017_v16, %v10356_v13 }
 0x6b9   :  { %v5438_v41 = vpop.f32.mrf.mxu1 }
 0x6ba   :  { %v5551_v25 = vmax.f32 %v5447_v46, 0.0  ;;  %v5439_v50 = vadd.f32 %v10356_v13, %v5438_v41 }
 0x6bb   :  { %v6018_v15 = vpop.f32.mrf.mxu1 }
 0x6bc   :  { %5615 = vst [vmem:[#allocation2 + $0x190] sm:$0xff] %v5551_v25  ;;  %v5549_v23 = vmax.f32 %v5439_v50, 0.0  ;;  %v5450_v18 = vadd.f32 %v6018_v15, %v10356_v13 }
 0x6bd   :  { %v5441_v5 = vpop.f32.mrf.mxu1 }
 0x6be   :  { %5613 = vst [vmem:[#allocation2 + $0x180] sm:$0xff] %v5549_v23  ;;  %v5552_v29 = vmax.f32 %v5450_v18, 0.0  ;;  %v5442_v59 = vadd.f32 %v10356_v13, %v5441_v5 }
 0x6c0   :  { %5616 = vst [vmem:[#allocation2 + $0x198] sm:$0xff] %v5552_v29  ;;  %v5550_v51 = vmax.f32 %v5442_v59, 0.0 }
 0x6c2   :  { %5614 = vst [vmem:[#allocation2 + $0x188] sm:$0xff] %v5550_v51 }
 0x6cf   :  { %v6021_v7 = vpop.f32.mrf.mxu1 }
 0x6d0   :  { %v5463_v20 = vadd.f32 %v6021_v7, %v10356_v13 }
 0x6d1   :  { %v5454_v44 = vpop.f32.mrf.mxu1 }
 0x6d2   :  { %v5555_v38 = vmax.f32 %v5463_v20, 0.0  ;;  %v5455_v47 = vadd.f32 %v10356_v13, %v5454_v44 }
 0x6d3   :  { %v6022_v8 = vpop.f32.mrf.mxu1 }
 0x6d4   :  { %5619 = vst [vmem:[#allocation2 + $0x1b0] sm:$0xff] %v5555_v38  ;;  %v5553_v34 = vmax.f32 %v5455_v47, 0.0  ;;  %v5466_v43 = vadd.f32 %v6022_v8, %v10356_v13 }
 0x6d5   :  { %v5457_v6 = vpop.f32.mrf.mxu1 }
 0x6d6   :  { %5617 = vst [vmem:[#allocation2 + $0x1a0] sm:$0xff] %v5553_v34  ;;  %v5556_v22 = vmax.f32 %v5466_v43, 0.0  ;;  %v5458_v17 = vadd.f32 %v10356_v13, %v5457_v6 }
 0x6d8   :  { %5620 = vst [vmem:[#allocation2 + $0x1b8] sm:$0xff] %v5556_v22  ;;  %v5554_v62 = vmax.f32 %v5458_v17, 0.0 }
 0x6da   :  { %5618 = vst [vmem:[#allocation2 + $0x1a8] sm:$0xff] %v5554_v62 }
 0x6e7   :  { %v6025_v48 = vpop.f32.mrf.mxu1 }
 0x6e8   :  { %v5479_v26 = vadd.f32 %v6025_v48, %v10356_v13 }
 0x6e9   :  { %v5470_v63 = vpop.f32.mrf.mxu1 }
 0x6ea   :  { %v5559_v33 = vmax.f32 %v5479_v26, 0.0  ;;  %v5471_v35 = vadd.f32 %v10356_v13, %v5470_v63 }
 0x6eb   :  { %v6026_v28 = vpop.f32.mrf.mxu1 }
 0x6ec   :  { %5623 = vst [vmem:[#allocation2 + $0x1d0] sm:$0xff] %v5559_v33  ;;  %v5557_v3 = vmax.f32 %v5471_v35, 0.0  ;;  %v5482_v12 = vadd.f32 %v6026_v28, %v10356_v13 }
 0x6ed   :  { %v5473_v60 = vpop.f32.mrf.mxu1 }
 0x6ee   :  { %5621 = vst [vmem:[#allocation2 + $0x1c0] sm:$0xff] %v5557_v3  ;;  %v5560_v24 = vmax.f32 %v5482_v12, 0.0  ;;  %v5474_v56 = vadd.f32 %v10356_v13, %v5473_v60 }
 0x6f0   :  { %5624 = vst [vmem:[#allocation2 + $0x1d8] sm:$0xff] %v5560_v24  ;;  %v5558_v21 = vmax.f32 %v5474_v56, 0.0 }
 0x6f2   :  { %5622 = vst [vmem:[#allocation2 + $0x1c8] sm:$0xff] %v5558_v21 }
 0x703   :  { %v6029_v30 = vpop.f32.mrf.mxu1 }
 0x704   :  { %v5495_v45 = vadd.f32 %v6029_v30, %v10356_v13 }
 0x705   :  { %v5486_v61 = vpop.f32.mrf.mxu1 }
 0x706   :  { %v5563_v37 = vmax.f32 %v5495_v45, 0.0  ;;  %v5487_v31 = vadd.f32 %v10356_v13, %v5486_v61 }
 0x707   :  { %v6030_v9 = vpop.f32.mrf.mxu1 }
 0x708   :  { %5627 = vst [vmem:[#allocation2 + $0x1f0] sm:$0xff] %v5563_v37  ;;  %v5561_v55 = vmax.f32 %v5487_v31, 0.0  ;;  %v5498_v58 = vadd.f32 %v6030_v9, %v10356_v13 }
 0x709   :  { %v5489_v49 = vpop.f32.mrf.mxu1 }
 0x70a   :  { %5625 = vst [vmem:[#allocation2 + $0x1e0] sm:$0xff] %v5561_v55  ;;  %v5564_v27 = vmax.f32 %v5498_v58, 0.0  ;;  %v5490_v52 = vadd.f32 %v10356_v13, %v5489_v49 }
 0x70c   :  { %5628 = vst [vmem:[#allocation2 + $0x1f8] sm:$0xff] %v5564_v27  ;;  %v5562_v4 = vmax.f32 %v5490_v52, 0.0 }
 0x70e   :  { %5626 = vst [vmem:[#allocation2 + $0x1e8] sm:$0xff] %v5562_v4 }
 0x70f   :  { %6164 = shalt.err (!%p6161_p4)
}
 0x710   :  { %s6189_s7 = smov 128  }
 0x711   :  { %5640 = dma.vmem_to_hbm [thread:$0]  %s5635_s28, 8192, %s10749_s5, [#allocation3], %s6189_s7, %s6189_s7, %s6176_s0  }
 0x712   :  { %6173 = dma.done.wait [#allocation3], 8192  }
 0x713   :  { %6174 = vsyncadd [#allocation3], 4294959104 }
 0x714   :  { %5644 = vsyncpa [#allocation3], 1 }

</bundles_post_ra>
